<compile_context>
chip_gen: v6e
topology: v6e:2x2x1
jax: 0.10.0
libtpu: 0.0.40
codegen_flags: <defaults>
</compile_context>

<pallas_src>
import numpy as np
import jax
import jax.numpy as jnp
from jax.experimental import pallas as pl
from jax.experimental.pallas import tpu as pltpu

EPS = 1e-5
BF16 = jnp.bfloat16


# --------------------- static (trace-time) helpers -------------------------

def _conv_out(size, k, stride, pad):
    return (size + 2 * pad - k) // stride + 1


def _selection_matrices(n, h, w, k, stride, pad):
    """0/1 gather matrices S (k*k, M_out, M_in) implementing im2col row
    selection with stride + zero padding baked in:  gathered_t = S[t] @ x_rows."""
    ho, wo = _conv_out(h, k, stride, pad), _conv_out(w, k, stride, pad)
    s = np.zeros((k * k, n * ho * wo, n * h * w), dtype=np.float32)
    for kh in range(k):
        for kw in range(k):
            t = kh * k + kw
            for b in range(n):
                for oh in range(ho):
                    ih = oh * stride + kh - pad
                    if not 0 <= ih < h:
                        continue
                    for ow in range(wo):
                        iw = ow * stride + kw - pad
                        if not 0 <= iw < w:
                            continue
                        s[t, (b * ho + oh) * wo + ow, (b * h + ih) * w + iw] = 1.0
    return s, ho, wo


def _pool_matrix(n, spatial):
    """(N, N*spatial) matrix averaging each sample's spatial rows."""
    p = np.zeros((n, n * spatial), dtype=np.float32)
    for b in range(n):
        p[b, b * spatial:(b + 1) * spatial] = 1.0 / spatial
    return p


def _im2col(x, k, stride, pad):
    """XLA-side im2col for the stem conv only (acts on the raw network input)."""
    n, h, w, cin = x.shape
    ho, wo = _conv_out(h, k, stride, pad), _conv_out(w, k, stride, pad)
    xp = jnp.pad(x, ((0, 0), (pad, pad), (pad, pad), (0, 0)))
    cols = []
    for i in range(k):
        for j in range(k):
            cols.append(xp[:, i:i + stride * (ho - 1) + 1:stride,
                              j:j + stride * (wo - 1) + 1:stride, :])
    patches = jnp.concatenate(cols, axis=-1).reshape(n * ho * wo, k * k * cin)
    return patches, ho, wo


# ------------------------- fused forward kernel ----------------------------

def _full_spec(shape):
    nd = len(shape)
    return pl.BlockSpec(shape, lambda i, _nd=nd: (0,) * _nd)


def _fused_forward(leaves, treedef, n_batch):
    def kernel(*refs):
        o_ref = refs[-1]
        t = jax.tree_util.tree_unflatten(treedef, refs[:-1])

        def bn(x, g_ref, b_ref, relu):
            # Training-mode BatchNorm over rows (N*H*W), per channel, f32 math.
            mean = jnp.mean(x, axis=0, keepdims=True)
            var = jnp.mean((x - mean) ** 2, axis=0, keepdims=True)  # biased
            y = (x - mean) * jax.lax.rsqrt(var + EPS) * g_ref[...] + b_ref[...]
            return jnp.maximum(y, 0.0) if relu else y

        def mm(a, b):
            # bf16 MXU matmul with f32 accumulation.
            return jnp.dot(a.astype(BF16), b.astype(BF16),
                           preferred_element_type=jnp.float32)

        # stem: 7x7/s2 conv (matmul on prebuilt patches) + BN (no ReLU)
        x = bn(mm(t['p0'][...], t['w0'][...]), t['bn0_g'], t['bn0_b'], relu=False)

        # residual blocks, fully unrolled; x is (N*H*W, C) f32 throughout
        for blk in t['blocks']:
            h = bn(x, blk['bn1_g'], blk['bn1_b'], relu=True).astype(BF16)
            # k x k conv = sum over taps of (in-kernel gather matmul) @ tap weights
            acc = None
            for tap in range(blk['S'].shape[0]):
                g = jnp.dot(blk['S'][tap], h, preferred_element_type=jnp.float32)
                v = jnp.dot(g.astype(BF16), blk['w1'][tap],
                            preferred_element_type=jnp.float32)
                acc = v if acc is None else acc + v
            h2 = bn(acc, blk['bn2_g'], blk['bn2_b'], relu=True)
            op = bn(mm(h2, blk['w2'][...]), blk['bn3_g'], blk['bn3_b'], relu=False)
            if 'wd' in blk:   # projection shortcut: strided 1x1 conv + BN
                xd = jnp.dot(blk['D'][...], x, preferred_element_type=jnp.float32)
                d = bn(mm(xd, blk['wd'][...]), blk['bnd_g'], blk['bnd_b'],
                       relu=False)
            else:             # identity shortcut
                d = x
            x = d + op

        # head: BN + ReLU + per-sample avg-pool (as matmul) + 1x1 conv + sigmoid
        hf = bn(x, t['bnf_g'], t['bnf_b'], relu=True)
        pooled = jnp.dot(t['P'][...], hf, preferred_element_type=jnp.float32)
        y = mm(pooled, t['wf'][...]) + t['bf'][...]
        o_ref[...] = jax.nn.sigmoid(y)

    out_shape = jax.ShapeDtypeStruct((n_batch, 1), jnp.float32)
    return pl.pallas_call(
        kernel,
        grid=(1,),
        in_specs=[_full_spec(l.shape) for l in leaves],
        out_specs=_full_spec(out_shape.shape),
        out_shape=out_shape,
        compiler_params=pltpu.CompilerParams(
            dimension_semantics=("arbitrary",)),
    )(*leaves)


# ------------------------------- model glue ---------------------------------

def discriminator_forward(x_nchw, params):
    n = x_nchw.shape[0]
    x = jnp.transpose(x_nchw, (0, 2, 3, 1)).astype(jnp.float32)  # NCHW -> NHWC

    # stem conv patches: the only XLA work in front of the single fused kernel
    p0, h, w = _im2col(x, 7, 2, 3)

    inputs = {
        'p0': p0.astype(BF16),
        'w0': params['conv0_w'].reshape(-1, params['conv0_w'].shape[-1]).astype(BF16),
        'bn0_g': params['bn0_g'].reshape(1, -1),
        'bn0_b': params['bn0_b'].reshape(1, -1),
        'blocks': [],
    }

    strides = (2, 2, 2, 1, 1, 1)
    for i, stride in enumerate(strides, start=1):
        p = params[f'rb{i}']
        k = p['conv1_w'].shape[0]
        cin, cout = p['conv1_w'].shape[2], p['conv1_w'].shape[3]
        s_np, ho, wo = _selection_matrices(n, h, w, k, stride, k // 2)
        blk = {
            'S': jnp.asarray(s_np, BF16),
            'w1': p['conv1_w'].reshape(k * k, cin, cout).astype(BF16),
            'w2': p['conv2_w'].reshape(cout, cout).astype(BF16),
            'bn1_g': p['bn1_g'].reshape(1, -1), 'bn1_b': p['bn1_b'].reshape(1, -1),
            'bn2_g': p['bn2_g'].reshape(1, -1), 'bn2_b': p['bn2_b'].reshape(1, -1),
            'bn3_g': p['bn3_g'].reshape(1, -1), 'bn3_b': p['bn3_b'].reshape(1, -1),
        }
        if 'down_w' in p:
            d_np, _, _ = _selection_matrices(n, h, w, 1, stride, 0)
            blk['D'] = jnp.asarray(d_np[0], jnp.float32)   # exact row gather
            blk['wd'] = p['down_w'].reshape(cin, cout).astype(BF16)
            blk['bnd_g'] = p['down_bn_g'].reshape(1, -1)
            blk['bnd_b'] = p['down_bn_b'].reshape(1, -1)
        inputs['blocks'].append(blk)
        h, w = ho, wo

    inputs['bnf_g'] = params['bn_f_g'].reshape(1, -1)
    inputs['bnf_b'] = params['bn_f_b'].reshape(1, -1)
    inputs['P'] = jnp.asarray(_pool_matrix(n, h * w), jnp.float32)
    inputs['wf'] = params['conv_f_w'].reshape(-1, params['conv_f_w'].shape[-1]).astype(BF16)
    inputs['bf'] = params['conv_f_b'].reshape(1, -1)

    leaves, treedef = jax.tree_util.tree_flatten(inputs)
    out = _fused_forward(leaves, treedef, n)
    return out.reshape(-1)   # matches .view(-1)


# ------------------------------ parameter init ------------------------------

def init_params(key, channels):
    c2, c4, c8, c16 = channels * 2, channels * 4, channels * 8, channels * 16
    keys = iter(jax.random.split(key, 64))

    def conv_w(kh, kw, cin, cout):
        return 0.1 * jax.random.normal(next(keys), (kh, kw, cin, cout), jnp.float32)

    def bn(c):
        return jnp.ones((c,), jnp.float32), jnp.zeros((c,), jnp.float32)

    def rb(cin, cout, k, stride):
        p = {}
        p['bn1_g'], p['bn1_b'] = bn(cin)
        p['conv1_w'] = conv_w(k, k, cin, cout)
        p['bn2_g'], p['bn2_b'] = bn(cout)
        p['conv2_w'] = conv_w(1, 1, cout, cout)
        p['bn3_g'], p['bn3_b'] = bn(cout)
        if cin != cout or stride != 1:
            p['down_w'] = conv_w(1, 1, cin, cout)
            p['down_bn_g'], p['down_bn_b'] = bn(cout)
        return p

    params = {'conv0_w': conv_w(7, 7, 1, c2)}
    params['bn0_g'], params['bn0_b'] = bn(c2)
    params['rb1'] = rb(c2, c4, 3, 2)
    params['rb2'] = rb(c4, c8, 3, 2)
    params['rb3'] = rb(c8, c16, 3, 2)
    params['rb4'] = rb(c16, c16, 3, 1)
    params['rb5'] = rb(c16, c16, 3, 1)
    params['rb6'] = rb(c16, c16, 3, 1)
    params['bn_f_g'], params['bn_f_b'] = bn(c16)
    params['conv_f_w'] = conv_w(1, 1, c16, 1)
    params['conv_f_b'] = 0.01 * jax.random.normal(next(keys), (1,), jnp.float32)
    return params


# ---------------------------------- main ------------------------------------

if __name__ == "__main__":
    channels = 4
    key = jax.random.PRNGKey(0)
    kp, kx = jax.random.split(key)
    params = init_params(kp, channels)
    x = jax.random.normal(kx, (2, 1, 16, 16), jnp.float32)  # NCHW, like PyTorch

    fwd = jax.jit(discriminator_forward)
    out = fwd(x, params)
    jax.block_until_ready(out)

    assert out.shape == (2,), out.shape
    assert bool(jnp.all(jnp.isfinite(out)))
    assert bool(jnp.all((out >= 0.0) & (out <= 1.0)))  # sigmoid range
    print("KERNEL_OK")
</pallas_src>

<mosaic_0001>
module attributes {stable_mosaic.version = 11 : i64} {
  func.func @kernel(%arg0: i32, %arg1: memref<2x2xf32, #tpu.memory_space<vmem>>, %arg2: memref<1x1xf32, #tpu.memory_space<vmem>>, %arg3: memref<32x128xf32, #tpu.memory_space<vmem>>, %arg4: memref<9x32x128xbf16, #tpu.memory_space<vmem>>, %arg5: memref<1x8xf32, #tpu.memory_space<vmem>>, %arg6: memref<1x8xf32, #tpu.memory_space<vmem>>, %arg7: memref<1x16xf32, #tpu.memory_space<vmem>>, %arg8: memref<1x16xf32, #tpu.memory_space<vmem>>, %arg9: memref<1x16xf32, #tpu.memory_space<vmem>>, %arg10: memref<1x16xf32, #tpu.memory_space<vmem>>, %arg11: memref<1x16xf32, #tpu.memory_space<vmem>>, %arg12: memref<1x16xf32, #tpu.memory_space<vmem>>, %arg13: memref<9x8x16xbf16, #tpu.memory_space<vmem>>, %arg14: memref<16x16xbf16, #tpu.memory_space<vmem>>, %arg15: memref<8x16xbf16, #tpu.memory_space<vmem>>, %arg16: memref<8x32xf32, #tpu.memory_space<vmem>>, %arg17: memref<9x8x32xbf16, #tpu.memory_space<vmem>>, %arg18: memref<1x16xf32, #tpu.memory_space<vmem>>, %arg19: memref<1x16xf32, #tpu.memory_space<vmem>>, %arg20: memref<1x32xf32, #tpu.memory_space<vmem>>, %arg21: memref<1x32xf32, #tpu.memory_space<vmem>>, %arg22: memref<1x32xf32, #tpu.memory_space<vmem>>, %arg23: memref<1x32xf32, #tpu.memory_space<vmem>>, %arg24: memref<1x32xf32, #tpu.memory_space<vmem>>, %arg25: memref<1x32xf32, #tpu.memory_space<vmem>>, %arg26: memref<9x16x32xbf16, #tpu.memory_space<vmem>>, %arg27: memref<32x32xbf16, #tpu.memory_space<vmem>>, %arg28: memref<16x32xbf16, #tpu.memory_space<vmem>>, %arg29: memref<2x8xf32, #tpu.memory_space<vmem>>, %arg30: memref<9x2x8xbf16, #tpu.memory_space<vmem>>, %arg31: memref<1x32xf32, #tpu.memory_space<vmem>>, %arg32: memref<1x32xf32, #tpu.memory_space<vmem>>, %arg33: memref<1x64xf32, #tpu.memory_space<vmem>>, %arg34: memref<1x64xf32, #tpu.memory_space<vmem>>, %arg35: memref<1x64xf32, #tpu.memory_space<vmem>>, %arg36: memref<1x64xf32, #tpu.memory_space<vmem>>, %arg37: memref<1x64xf32, #tpu.memory_space<vmem>>, %arg38: memref<1x64xf32, #tpu.memory_space<vmem>>, %arg39: memref<9x32x64xbf16, #tpu.memory_space<vmem>>, %arg40: memref<64x64xbf16, #tpu.memory_space<vmem>>, %arg41: memref<32x64xbf16, #tpu.memory_space<vmem>>, %arg42: memref<9x2x2xbf16, #tpu.memory_space<vmem>>, %arg43: memref<1x64xf32, #tpu.memory_space<vmem>>, %arg44: memref<1x64xf32, #tpu.memory_space<vmem>>, %arg45: memref<1x64xf32, #tpu.memory_space<vmem>>, %arg46: memref<1x64xf32, #tpu.memory_space<vmem>>, %arg47: memref<1x64xf32, #tpu.memory_space<vmem>>, %arg48: memref<1x64xf32, #tpu.memory_space<vmem>>, %arg49: memref<9x64x64xbf16, #tpu.memory_space<vmem>>, %arg50: memref<64x64xbf16, #tpu.memory_space<vmem>>, %arg51: memref<9x2x2xbf16, #tpu.memory_space<vmem>>, %arg52: memref<1x64xf32, #tpu.memory_space<vmem>>, %arg53: memref<1x64xf32, #tpu.memory_space<vmem>>, %arg54: memref<1x64xf32, #tpu.memory_space<vmem>>, %arg55: memref<1x64xf32, #tpu.memory_space<vmem>>, %arg56: memref<1x64xf32, #tpu.memory_space<vmem>>, %arg57: memref<1x64xf32, #tpu.memory_space<vmem>>, %arg58: memref<9x64x64xbf16, #tpu.memory_space<vmem>>, %arg59: memref<64x64xbf16, #tpu.memory_space<vmem>>, %arg60: memref<9x2x2xbf16, #tpu.memory_space<vmem>>, %arg61: memref<1x64xf32, #tpu.memory_space<vmem>>, %arg62: memref<1x64xf32, #tpu.memory_space<vmem>>, %arg63: memref<1x64xf32, #tpu.memory_space<vmem>>, %arg64: memref<1x64xf32, #tpu.memory_space<vmem>>, %arg65: memref<1x64xf32, #tpu.memory_space<vmem>>, %arg66: memref<1x64xf32, #tpu.memory_space<vmem>>, %arg67: memref<9x64x64xbf16, #tpu.memory_space<vmem>>, %arg68: memref<64x64xbf16, #tpu.memory_space<vmem>>, %arg69: memref<1x8xf32, #tpu.memory_space<vmem>>, %arg70: memref<1x8xf32, #tpu.memory_space<vmem>>, %arg71: memref<1x64xf32, #tpu.memory_space<vmem>>, %arg72: memref<1x64xf32, #tpu.memory_space<vmem>>, %arg73: memref<128x49xbf16, #tpu.memory_space<vmem>>, %arg74: memref<49x8xbf16, #tpu.memory_space<vmem>>, %arg75: memref<64x1xbf16, #tpu.memory_space<vmem>>, %arg76: memref<2x1xf32, #tpu.memory_space<vmem>>) attributes {dimension_semantics = [#tpu.dimension_semantics<arbitrary>], iteration_bounds = array<i64: 1>, scalar_prefetch = 0 : i64, scratch_operands = 0 : i64, tpu.core_type = #tpu.core_type<tc>, window_params = [{pipeline_mode = #tpu.pipeline_mode<synchronous>, transform_indices = @transform_0, window_bounds = array<i64: 2, 2>}, {pipeline_mode = #tpu.pipeline_mode<synchronous>, transform_indices = @transform_1, window_bounds = array<i64: 1, 1>}, {pipeline_mode = #tpu.pipeline_mode<synchronous>, transform_indices = @transform_2, window_bounds = array<i64: 32, 128>}, {pipeline_mode = #tpu.pipeline_mode<synchronous>, transform_indices = @transform_3, window_bounds = array<i64: 9, 32, 128>}, {pipeline_mode = #tpu.pipeline_mode<synchronous>, transform_indices = @transform_4, window_bounds = array<i64: 1, 8>}, {pipeline_mode = #tpu.pipeline_mode<synchronous>, transform_indices = @transform_5, window_bounds = array<i64: 1, 8>}, {pipeline_mode = #tpu.pipeline_mode<synchronous>, transform_indices = @transform_6, window_bounds = array<i64: 1, 16>}, {pipeline_mode = #tpu.pipeline_mode<synchronous>, transform_indices = @transform_7, window_bounds = array<i64: 1, 16>}, {pipeline_mode = #tpu.pipeline_mode<synchronous>, transform_indices = @transform_8, window_bounds = array<i64: 1, 16>}, {pipeline_mode = #tpu.pipeline_mode<synchronous>, transform_indices = @transform_9, window_bounds = array<i64: 1, 16>}, {pipeline_mode = #tpu.pipeline_mode<synchronous>, transform_indices = @transform_10, window_bounds = array<i64: 1, 16>}, {pipeline_mode = #tpu.pipeline_mode<synchronous>, transform_indices = @transform_11, window_bounds = array<i64: 1, 16>}, {pipeline_mode = #tpu.pipeline_mode<synchronous>, transform_indices = @transform_12, window_bounds = array<i64: 9, 8, 16>}, {pipeline_mode = #tpu.pipeline_mode<synchronous>, transform_indices = @transform_13, window_bounds = array<i64: 16, 16>}, {pipeline_mode = #tpu.pipeline_mode<synchronous>, transform_indices = @transform_14, window_bounds = array<i64: 8, 16>}, {pipeline_mode = #tpu.pipeline_mode<synchronous>, transform_indices = @transform_15, window_bounds = array<i64: 8, 32>}, {pipeline_mode = #tpu.pipeline_mode<synchronous>, transform_indices = @transform_16, window_bounds = array<i64: 9, 8, 32>}, {pipeline_mode = #tpu.pipeline_mode<synchronous>, transform_indices = @transform_17, window_bounds = array<i64: 1, 16>}, {pipeline_mode = #tpu.pipeline_mode<synchronous>, transform_indices = @transform_18, window_bounds = array<i64: 1, 16>}, {pipeline_mode = #tpu.pipeline_mode<synchronous>, transform_indices = @transform_19, window_bounds = array<i64: 1, 32>}, {pipeline_mode = #tpu.pipeline_mode<synchronous>, transform_indices = @transform_20, window_bounds = array<i64: 1, 32>}, {pipeline_mode = #tpu.pipeline_mode<synchronous>, transform_indices = @transform_21, window_bounds = array<i64: 1, 32>}, {pipeline_mode = #tpu.pipeline_mode<synchronous>, transform_indices = @transform_22, window_bounds = array<i64: 1, 32>}, {pipeline_mode = #tpu.pipeline_mode<synchronous>, transform_indices = @transform_23, window_bounds = array<i64: 1, 32>}, {pipeline_mode = #tpu.pipeline_mode<synchronous>, transform_indices = @transform_24, window_bounds = array<i64: 1, 32>}, {pipeline_mode = #tpu.pipeline_mode<synchronous>, transform_indices = @transform_25, window_bounds = array<i64: 9, 16, 32>}, {pipeline_mode = #tpu.pipeline_mode<synchronous>, transform_indices = @transform_26, window_bounds = array<i64: 32, 32>}, {pipeline_mode = #tpu.pipeline_mode<synchronous>, transform_indices = @transform_27, window_bounds = array<i64: 16, 32>}, {pipeline_mode = #tpu.pipeline_mode<synchronous>, transform_indices = @transform_28, window_bounds = array<i64: 2, 8>}, {pipeline_mode = #tpu.pipeline_mode<synchronous>, transform_indices = @transform_29, window_bounds = array<i64: 9, 2, 8>}, {pipeline_mode = #tpu.pipeline_mode<synchronous>, transform_indices = @transform_30, window_bounds = array<i64: 1, 32>}, {pipeline_mode = #tpu.pipeline_mode<synchronous>, transform_indices = @transform_31, window_bounds = array<i64: 1, 32>}, {pipeline_mode = #tpu.pipeline_mode<synchronous>, transform_indices = @transform_32, window_bounds = array<i64: 1, 64>}, {pipeline_mode = #tpu.pipeline_mode<synchronous>, transform_indices = @transform_33, window_bounds = array<i64: 1, 64>}, {pipeline_mode = #tpu.pipeline_mode<synchronous>, transform_indices = @transform_34, window_bounds = array<i64: 1, 64>}, {pipeline_mode = #tpu.pipeline_mode<synchronous>, transform_indices = @transform_35, window_bounds = array<i64: 1, 64>}, {pipeline_mode = #tpu.pipeline_mode<synchronous>, transform_indices = @transform_36, window_bounds = array<i64: 1, 64>}, {pipeline_mode = #tpu.pipeline_mode<synchronous>, transform_indices = @transform_37, window_bounds = array<i64: 1, 64>}, {pipeline_mode = #tpu.pipeline_mode<synchronous>, transform_indices = @transform_38, window_bounds = array<i64: 9, 32, 64>}, {pipeline_mode = #tpu.pipeline_mode<synchronous>, transform_indices = @transform_39, window_bounds = array<i64: 64, 64>}, {pipeline_mode = #tpu.pipeline_mode<synchronous>, transform_indices = @transform_40, window_bounds = array<i64: 32, 64>}, {pipeline_mode = #tpu.pipeline_mode<synchronous>, transform_indices = @transform_41, window_bounds = array<i64: 9, 2, 2>}, {pipeline_mode = #tpu.pipeline_mode<synchronous>, transform_indices = @transform_42, window_bounds = array<i64: 1, 64>}, {pipeline_mode = #tpu.pipeline_mode<synchronous>, transform_indices = @transform_43, window_bounds = array<i64: 1, 64>}, {pipeline_mode = #tpu.pipeline_mode<synchronous>, transform_indices = @transform_44, window_bounds = array<i64: 1, 64>}, {pipeline_mode = #tpu.pipeline_mode<synchronous>, transform_indices = @transform_45, window_bounds = array<i64: 1, 64>}, {pipeline_mode = #tpu.pipeline_mode<synchronous>, transform_indices = @transform_46, window_bounds = array<i64: 1, 64>}, {pipeline_mode = #tpu.pipeline_mode<synchronous>, transform_indices = @transform_47, window_bounds = array<i64: 1, 64>}, {pipeline_mode = #tpu.pipeline_mode<synchronous>, transform_indices = @transform_48, window_bounds = array<i64: 9, 64, 64>}, {pipeline_mode = #tpu.pipeline_mode<synchronous>, transform_indices = @transform_49, window_bounds = array<i64: 64, 64>}, {pipeline_mode = #tpu.pipeline_mode<synchronous>, transform_indices = @transform_50, window_bounds = array<i64: 9, 2, 2>}, {pipeline_mode = #tpu.pipeline_mode<synchronous>, transform_indices = @transform_51, window_bounds = array<i64: 1, 64>}, {pipeline_mode = #tpu.pipeline_mode<synchronous>, transform_indices = @transform_52, window_bounds = array<i64: 1, 64>}, {pipeline_mode = #tpu.pipeline_mode<synchronous>, transform_indices = @transform_53, window_bounds = array<i64: 1, 64>}, {pipeline_mode = #tpu.pipeline_mode<synchronous>, transform_indices = @transform_54, window_bounds = array<i64: 1, 64>}, {pipeline_mode = #tpu.pipeline_mode<synchronous>, transform_indices = @transform_55, window_bounds = array<i64: 1, 64>}, {pipeline_mode = #tpu.pipeline_mode<synchronous>, transform_indices = @transform_56, window_bounds = array<i64: 1, 64>}, {pipeline_mode = #tpu.pipeline_mode<synchronous>, transform_indices = @transform_57, window_bounds = array<i64: 9, 64, 64>}, {pipeline_mode = #tpu.pipeline_mode<synchronous>, transform_indices = @transform_58, window_bounds = array<i64: 64, 64>}, {pipeline_mode = #tpu.pipeline_mode<synchronous>, transform_indices = @transform_59, window_bounds = array<i64: 9, 2, 2>}, {pipeline_mode = #tpu.pipeline_mode<synchronous>, transform_indices = @transform_60, window_bounds = array<i64: 1, 64>}, {pipeline_mode = #tpu.pipeline_mode<synchronous>, transform_indices = @transform_61, window_bounds = array<i64: 1, 64>}, {pipeline_mode = #tpu.pipeline_mode<synchronous>, transform_indices = @transform_62, window_bounds = array<i64: 1, 64>}, {pipeline_mode = #tpu.pipeline_mode<synchronous>, transform_indices = @transform_63, window_bounds = array<i64: 1, 64>}, {pipeline_mode = #tpu.pipeline_mode<synchronous>, transform_indices = @transform_64, window_bounds = array<i64: 1, 64>}, {pipeline_mode = #tpu.pipeline_mode<synchronous>, transform_indices = @transform_65, window_bounds = array<i64: 1, 64>}, {pipeline_mode = #tpu.pipeline_mode<synchronous>, transform_indices = @transform_66, window_bounds = array<i64: 9, 64, 64>}, {pipeline_mode = #tpu.pipeline_mode<synchronous>, transform_indices = @transform_67, window_bounds = array<i64: 64, 64>}, {pipeline_mode = #tpu.pipeline_mode<synchronous>, transform_indices = @transform_68, window_bounds = array<i64: 1, 8>}, {pipeline_mode = #tpu.pipeline_mode<synchronous>, transform_indices = @transform_69, window_bounds = array<i64: 1, 8>}, {pipeline_mode = #tpu.pipeline_mode<synchronous>, transform_indices = @transform_70, window_bounds = array<i64: 1, 64>}, {pipeline_mode = #tpu.pipeline_mode<synchronous>, transform_indices = @transform_71, window_bounds = array<i64: 1, 64>}, {pipeline_mode = #tpu.pipeline_mode<synchronous>, transform_indices = @transform_72, window_bounds = array<i64: 128, 49>}, {pipeline_mode = #tpu.pipeline_mode<synchronous>, transform_indices = @transform_73, window_bounds = array<i64: 49, 8>}, {pipeline_mode = #tpu.pipeline_mode<synchronous>, transform_indices = @transform_74, window_bounds = array<i64: 64, 1>}, {pipeline_mode = #tpu.pipeline_mode<synchronous>, transform_indices = @transform_75, window_bounds = array<i64: 2, 1>}]} {
    %c0 = arith.constant 0 : index
    %c0_0 = arith.constant 0 : index
    %0 = vector.load %arg73[%c0, %c0_0] : memref<128x49xbf16, #tpu.memory_space<vmem>>, vector<128x49xbf16>
    %c0_1 = arith.constant 0 : index
    %c0_2 = arith.constant 0 : index
    %1 = vector.load %arg74[%c0_1, %c0_2] : memref<49x8xbf16, #tpu.memory_space<vmem>>, vector<49x8xbf16>
    %cst = arith.constant dense<0.000000e+00> : vector<128x8xf32>
    %2 = tpu.matmul %0, %1, %cst {dimension_numbers = #tpu.dot_dimension_numbers<[1], [0], [0], [1], [0, 0, 1, 1], [], []>} : vector<128x49xbf16>, vector<49x8xbf16>, vector<128x8xf32> -> vector<128x8xf32>
    %cst_3 = arith.constant dense<0.000000e+00> : vector<8xf32>
    %3 = vector.multi_reduction <add>, %2, %cst_3 [0] : vector<128x8xf32> to vector<8xf32>
    %4 = vector.shape_cast %3 : vector<8xf32> to vector<1x8xf32>
    %cst_4 = arith.constant 1.280000e+02 : f32
    %5 = vector.broadcast %cst_4 : f32 to vector<1x8xf32>
    %6 = arith.divf %4, %5 : vector<1x8xf32>
    %7 = vector.broadcast %6 : vector<1x8xf32> to vector<128x8xf32>
    %8 = arith.subf %2, %7 : vector<128x8xf32>
    %9 = arith.mulf %8, %8 : vector<128x8xf32>
    %cst_5 = arith.constant dense<0.000000e+00> : vector<8xf32>
    %10 = vector.multi_reduction <add>, %9, %cst_5 [0] : vector<128x8xf32> to vector<8xf32>
    %11 = vector.shape_cast %10 : vector<8xf32> to vector<1x8xf32>
    %cst_6 = arith.constant 1.280000e+02 : f32
    %12 = vector.broadcast %cst_6 : f32 to vector<1x8xf32>
    %13 = arith.divf %11, %12 : vector<1x8xf32>
    %14 = vector.broadcast %6 : vector<1x8xf32> to vector<128x8xf32>
    %15 = arith.subf %2, %14 : vector<128x8xf32>
    %cst_7 = arith.constant 9.99999974E-6 : f32
    %16 = vector.broadcast %cst_7 : f32 to vector<1x8xf32>
    %17 = arith.addf %13, %16 : vector<1x8xf32>
    %18 = math.rsqrt %17 : vector<1x8xf32>
    %19 = vector.broadcast %18 : vector<1x8xf32> to vector<128x8xf32>
    %20 = arith.mulf %15, %19 : vector<128x8xf32>
    %c0_8 = arith.constant 0 : index
    %c0_9 = arith.constant 0 : index
    %21 = vector.load %arg70[%c0_8, %c0_9] : memref<1x8xf32, #tpu.memory_space<vmem>>, vector<1x8xf32>
    %22 = vector.broadcast %21 : vector<1x8xf32> to vector<128x8xf32>
    %23 = arith.mulf %20, %22 : vector<128x8xf32>
    %c0_10 = arith.constant 0 : index
    %c0_11 = arith.constant 0 : index
    %24 = vector.load %arg69[%c0_10, %c0_11] : memref<1x8xf32, #tpu.memory_space<vmem>>, vector<1x8xf32>
    %25 = vector.broadcast %24 : vector<1x8xf32> to vector<128x8xf32>
    %26 = arith.addf %23, %25 : vector<128x8xf32>
    %cst_12 = arith.constant dense<0.000000e+00> : vector<8xf32>
    %27 = vector.multi_reduction <add>, %26, %cst_12 [0] : vector<128x8xf32> to vector<8xf32>
    %28 = vector.shape_cast %27 : vector<8xf32> to vector<1x8xf32>
    %cst_13 = arith.constant 1.280000e+02 : f32
    %29 = vector.broadcast %cst_13 : f32 to vector<1x8xf32>
    %30 = arith.divf %28, %29 : vector<1x8xf32>
    %31 = vector.broadcast %30 : vector<1x8xf32> to vector<128x8xf32>
    %32 = arith.subf %26, %31 : vector<128x8xf32>
    %33 = arith.mulf %32, %32 : vector<128x8xf32>
    %cst_14 = arith.constant dense<0.000000e+00> : vector<8xf32>
    %34 = vector.multi_reduction <add>, %33, %cst_14 [0] : vector<128x8xf32> to vector<8xf32>
    %35 = vector.shape_cast %34 : vector<8xf32> to vector<1x8xf32>
    %cst_15 = arith.constant 1.280000e+02 : f32
    %36 = vector.broadcast %cst_15 : f32 to vector<1x8xf32>
    %37 = arith.divf %35, %36 : vector<1x8xf32>
    %38 = vector.broadcast %30 : vector<1x8xf32> to vector<128x8xf32>
    %39 = arith.subf %26, %38 : vector<128x8xf32>
    %cst_16 = arith.constant 9.99999974E-6 : f32
    %40 = vector.broadcast %cst_16 : f32 to vector<1x8xf32>
    %41 = arith.addf %37, %40 : vector<1x8xf32>
    %42 = math.rsqrt %41 : vector<1x8xf32>
    %43 = vector.broadcast %42 : vector<1x8xf32> to vector<128x8xf32>
    %44 = arith.mulf %39, %43 : vector<128x8xf32>
    %c0_17 = arith.constant 0 : index
    %c0_18 = arith.constant 0 : index
    %45 = vector.load %arg6[%c0_17, %c0_18] : memref<1x8xf32, #tpu.memory_space<vmem>>, vector<1x8xf32>
    %46 = vector.broadcast %45 : vector<1x8xf32> to vector<128x8xf32>
    %47 = arith.mulf %44, %46 : vector<128x8xf32>
    %c0_19 = arith.constant 0 : index
    %c0_20 = arith.constant 0 : index
    %48 = vector.load %arg5[%c0_19, %c0_20] : memref<1x8xf32, #tpu.memory_space<vmem>>, vector<1x8xf32>
    %49 = vector.broadcast %48 : vector<1x8xf32> to vector<128x8xf32>
    %50 = arith.addf %47, %49 : vector<128x8xf32>
    %cst_21 = arith.constant 0.000000e+00 : f32
    %51 = vector.broadcast %cst_21 : f32 to vector<128x8xf32>
    %52 = arith.maximumf %50, %51 : vector<128x8xf32>
    %53 = arith.truncf %52 : vector<128x8xf32> to vector<128x8xbf16>
    %c0_22 = arith.constant 0 : index
    %c0_23 = arith.constant 0 : index
    %c0_24 = arith.constant 0 : index
    %54 = vector.load %arg4[%c0_22, %c0_23, %c0_24] : memref<9x32x128xbf16, #tpu.memory_space<vmem>>, vector<1x32x128xbf16>
    %55 = vector.shape_cast %54 : vector<1x32x128xbf16> to vector<32x128xbf16>
    %cst_25 = arith.constant dense<0.000000e+00> : vector<32x8xf32>
    %56 = tpu.matmul %55, %53, %cst_25 {dimension_numbers = #tpu.dot_dimension_numbers<[1], [0], [0], [1], [0, 0, 1, 1], [], []>} : vector<32x128xbf16>, vector<128x8xbf16>, vector<32x8xf32> -> vector<32x8xf32>
    %57 = arith.truncf %56 : vector<32x8xf32> to vector<32x8xbf16>
    %c0_26 = arith.constant 0 : index
    %c0_27 = arith.constant 0 : index
    %c0_28 = arith.constant 0 : index
    %58 = vector.load %arg13[%c0_26, %c0_27, %c0_28] : memref<9x8x16xbf16, #tpu.memory_space<vmem>>, vector<1x8x16xbf16>
    %59 = vector.shape_cast %58 : vector<1x8x16xbf16> to vector<8x16xbf16>
    %cst_29 = arith.constant dense<0.000000e+00> : vector<32x16xf32>
    %60 = tpu.matmul %57, %59, %cst_29 {dimension_numbers = #tpu.dot_dimension_numbers<[1], [0], [0], [1], [0, 0, 1, 1], [], []>} : vector<32x8xbf16>, vector<8x16xbf16>, vector<32x16xf32> -> vector<32x16xf32>
    %c1 = arith.constant 1 : index
    %c0_30 = arith.constant 0 : index
    %c0_31 = arith.constant 0 : index
    %61 = vector.load %arg4[%c1, %c0_30, %c0_31] : memref<9x32x128xbf16, #tpu.memory_space<vmem>>, vector<1x32x128xbf16>
    %62 = vector.shape_cast %61 : vector<1x32x128xbf16> to vector<32x128xbf16>
    %cst_32 = arith.constant dense<0.000000e+00> : vector<32x8xf32>
    %63 = tpu.matmul %62, %53, %cst_32 {dimension_numbers = #tpu.dot_dimension_numbers<[1], [0], [0], [1], [0, 0, 1, 1], [], []>} : vector<32x128xbf16>, vector<128x8xbf16>, vector<32x8xf32> -> vector<32x8xf32>
    %64 = arith.truncf %63 : vector<32x8xf32> to vector<32x8xbf16>
    %c1_33 = arith.constant 1 : index
    %c0_34 = arith.constant 0 : index
    %c0_35 = arith.constant 0 : index
    %65 = vector.load %arg13[%c1_33, %c0_34, %c0_35] : memref<9x8x16xbf16, #tpu.memory_space<vmem>>, vector<1x8x16xbf16>
    %66 = vector.shape_cast %65 : vector<1x8x16xbf16> to vector<8x16xbf16>
    %cst_36 = arith.constant dense<0.000000e+00> : vector<32x16xf32>
    %67 = tpu.matmul %64, %66, %cst_36 {dimension_numbers = #tpu.dot_dimension_numbers<[1], [0], [0], [1], [0, 0, 1, 1], [], []>} : vector<32x8xbf16>, vector<8x16xbf16>, vector<32x16xf32> -> vector<32x16xf32>
    %68 = arith.addf %60, %67 : vector<32x16xf32>
    %c2 = arith.constant 2 : index
    %c0_37 = arith.constant 0 : index
    %c0_38 = arith.constant 0 : index
    %69 = vector.load %arg4[%c2, %c0_37, %c0_38] : memref<9x32x128xbf16, #tpu.memory_space<vmem>>, vector<1x32x128xbf16>
    %70 = vector.shape_cast %69 : vector<1x32x128xbf16> to vector<32x128xbf16>
    %cst_39 = arith.constant dense<0.000000e+00> : vector<32x8xf32>
    %71 = tpu.matmul %70, %53, %cst_39 {dimension_numbers = #tpu.dot_dimension_numbers<[1], [0], [0], [1], [0, 0, 1, 1], [], []>} : vector<32x128xbf16>, vector<128x8xbf16>, vector<32x8xf32> -> vector<32x8xf32>
    %72 = arith.truncf %71 : vector<32x8xf32> to vector<32x8xbf16>
    %c2_40 = arith.constant 2 : index
    %c0_41 = arith.constant 0 : index
    %c0_42 = arith.constant 0 : index
    %73 = vector.load %arg13[%c2_40, %c0_41, %c0_42] : memref<9x8x16xbf16, #tpu.memory_space<vmem>>, vector<1x8x16xbf16>
    %74 = vector.shape_cast %73 : vector<1x8x16xbf16> to vector<8x16xbf16>
    %cst_43 = arith.constant dense<0.000000e+00> : vector<32x16xf32>
    %75 = tpu.matmul %72, %74, %cst_43 {dimension_numbers = #tpu.dot_dimension_numbers<[1], [0], [0], [1], [0, 0, 1, 1], [], []>} : vector<32x8xbf16>, vector<8x16xbf16>, vector<32x16xf32> -> vector<32x16xf32>
    %76 = arith.addf %68, %75 : vector<32x16xf32>
    %c3 = arith.constant 3 : index
    %c0_44 = arith.constant 0 : index
    %c0_45 = arith.constant 0 : index
    %77 = vector.load %arg4[%c3, %c0_44, %c0_45] : memref<9x32x128xbf16, #tpu.memory_space<vmem>>, vector<1x32x128xbf16>
    %78 = vector.shape_cast %77 : vector<1x32x128xbf16> to vector<32x128xbf16>
    %cst_46 = arith.constant dense<0.000000e+00> : vector<32x8xf32>
    %79 = tpu.matmul %78, %53, %cst_46 {dimension_numbers = #tpu.dot_dimension_numbers<[1], [0], [0], [1], [0, 0, 1, 1], [], []>} : vector<32x128xbf16>, vector<128x8xbf16>, vector<32x8xf32> -> vector<32x8xf32>
    %80 = arith.truncf %79 : vector<32x8xf32> to vector<32x8xbf16>
    %c3_47 = arith.constant 3 : index
    %c0_48 = arith.constant 0 : index
    %c0_49 = arith.constant 0 : index
    %81 = vector.load %arg13[%c3_47, %c0_48, %c0_49] : memref<9x8x16xbf16, #tpu.memory_space<vmem>>, vector<1x8x16xbf16>
    %82 = vector.shape_cast %81 : vector<1x8x16xbf16> to vector<8x16xbf16>
    %cst_50 = arith.constant dense<0.000000e+00> : vector<32x16xf32>
    %83 = tpu.matmul %80, %82, %cst_50 {dimension_numbers = #tpu.dot_dimension_numbers<[1], [0], [0], [1], [0, 0, 1, 1], [], []>} : vector<32x8xbf16>, vector<8x16xbf16>, vector<32x16xf32> -> vector<32x16xf32>
    %84 = arith.addf %76, %83 : vector<32x16xf32>
    %c4 = arith.constant 4 : index
    %c0_51 = arith.constant 0 : index
    %c0_52 = arith.constant 0 : index
    %85 = vector.load %arg4[%c4, %c0_51, %c0_52] : memref<9x32x128xbf16, #tpu.memory_space<vmem>>, vector<1x32x128xbf16>
    %86 = vector.shape_cast %85 : vector<1x32x128xbf16> to vector<32x128xbf16>
    %cst_53 = arith.constant dense<0.000000e+00> : vector<32x8xf32>
    %87 = tpu.matmul %86, %53, %cst_53 {dimension_numbers = #tpu.dot_dimension_numbers<[1], [0], [0], [1], [0, 0, 1, 1], [], []>} : vector<32x128xbf16>, vector<128x8xbf16>, vector<32x8xf32> -> vector<32x8xf32>
    %88 = arith.truncf %87 : vector<32x8xf32> to vector<32x8xbf16>
    %c4_54 = arith.constant 4 : index
    %c0_55 = arith.constant 0 : index
    %c0_56 = arith.constant 0 : index
    %89 = vector.load %arg13[%c4_54, %c0_55, %c0_56] : memref<9x8x16xbf16, #tpu.memory_space<vmem>>, vector<1x8x16xbf16>
    %90 = vector.shape_cast %89 : vector<1x8x16xbf16> to vector<8x16xbf16>
    %cst_57 = arith.constant dense<0.000000e+00> : vector<32x16xf32>
    %91 = tpu.matmul %88, %90, %cst_57 {dimension_numbers = #tpu.dot_dimension_numbers<[1], [0], [0], [1], [0, 0, 1, 1], [], []>} : vector<32x8xbf16>, vector<8x16xbf16>, vector<32x16xf32> -> vector<32x16xf32>
    %92 = arith.addf %84, %91 : vector<32x16xf32>
    %c5 = arith.constant 5 : index
    %c0_58 = arith.constant 0 : index
    %c0_59 = arith.constant 0 : index
    %93 = vector.load %arg4[%c5, %c0_58, %c0_59] : memref<9x32x128xbf16, #tpu.memory_space<vmem>>, vector<1x32x128xbf16>
    %94 = vector.shape_cast %93 : vector<1x32x128xbf16> to vector<32x128xbf16>
    %cst_60 = arith.constant dense<0.000000e+00> : vector<32x8xf32>
    %95 = tpu.matmul %94, %53, %cst_60 {dimension_numbers = #tpu.dot_dimension_numbers<[1], [0], [0], [1], [0, 0, 1, 1], [], []>} : vector<32x128xbf16>, vector<128x8xbf16>, vector<32x8xf32> -> vector<32x8xf32>
    %96 = arith.truncf %95 : vector<32x8xf32> to vector<32x8xbf16>
    %c5_61 = arith.constant 5 : index
    %c0_62 = arith.constant 0 : index
    %c0_63 = arith.constant 0 : index
    %97 = vector.load %arg13[%c5_61, %c0_62, %c0_63] : memref<9x8x16xbf16, #tpu.memory_space<vmem>>, vector<1x8x16xbf16>
    %98 = vector.shape_cast %97 : vector<1x8x16xbf16> to vector<8x16xbf16>
    %cst_64 = arith.constant dense<0.000000e+00> : vector<32x16xf32>
    %99 = tpu.matmul %96, %98, %cst_64 {dimension_numbers = #tpu.dot_dimension_numbers<[1], [0], [0], [1], [0, 0, 1, 1], [], []>} : vector<32x8xbf16>, vector<8x16xbf16>, vector<32x16xf32> -> vector<32x16xf32>
    %100 = arith.addf %92, %99 : vector<32x16xf32>
    %c6 = arith.constant 6 : index
    %c0_65 = arith.constant 0 : index
    %c0_66 = arith.constant 0 : index
    %101 = vector.load %arg4[%c6, %c0_65, %c0_66] : memref<9x32x128xbf16, #tpu.memory_space<vmem>>, vector<1x32x128xbf16>
    %102 = vector.shape_cast %101 : vector<1x32x128xbf16> to vector<32x128xbf16>
    %cst_67 = arith.constant dense<0.000000e+00> : vector<32x8xf32>
    %103 = tpu.matmul %102, %53, %cst_67 {dimension_numbers = #tpu.dot_dimension_numbers<[1], [0], [0], [1], [0, 0, 1, 1], [], []>} : vector<32x128xbf16>, vector<128x8xbf16>, vector<32x8xf32> -> vector<32x8xf32>
    %104 = arith.truncf %103 : vector<32x8xf32> to vector<32x8xbf16>
    %c6_68 = arith.constant 6 : index
    %c0_69 = arith.constant 0 : index
    %c0_70 = arith.constant 0 : index
    %105 = vector.load %arg13[%c6_68, %c0_69, %c0_70] : memref<9x8x16xbf16, #tpu.memory_space<vmem>>, vector<1x8x16xbf16>
    %106 = vector.shape_cast %105 : vector<1x8x16xbf16> to vector<8x16xbf16>
    %cst_71 = arith.constant dense<0.000000e+00> : vector<32x16xf32>
    %107 = tpu.matmul %104, %106, %cst_71 {dimension_numbers = #tpu.dot_dimension_numbers<[1], [0], [0], [1], [0, 0, 1, 1], [], []>} : vector<32x8xbf16>, vector<8x16xbf16>, vector<32x16xf32> -> vector<32x16xf32>
    %108 = arith.addf %100, %107 : vector<32x16xf32>
    %c7 = arith.constant 7 : index
    %c0_72 = arith.constant 0 : index
    %c0_73 = arith.constant 0 : index
    %109 = vector.load %arg4[%c7, %c0_72, %c0_73] : memref<9x32x128xbf16, #tpu.memory_space<vmem>>, vector<1x32x128xbf16>
    %110 = vector.shape_cast %109 : vector<1x32x128xbf16> to vector<32x128xbf16>
    %cst_74 = arith.constant dense<0.000000e+00> : vector<32x8xf32>
    %111 = tpu.matmul %110, %53, %cst_74 {dimension_numbers = #tpu.dot_dimension_numbers<[1], [0], [0], [1], [0, 0, 1, 1], [], []>} : vector<32x128xbf16>, vector<128x8xbf16>, vector<32x8xf32> -> vector<32x8xf32>
    %112 = arith.truncf %111 : vector<32x8xf32> to vector<32x8xbf16>
    %c7_75 = arith.constant 7 : index
    %c0_76 = arith.constant 0 : index
    %c0_77 = arith.constant 0 : index
    %113 = vector.load %arg13[%c7_75, %c0_76, %c0_77] : memref<9x8x16xbf16, #tpu.memory_space<vmem>>, vector<1x8x16xbf16>
    %114 = vector.shape_cast %113 : vector<1x8x16xbf16> to vector<8x16xbf16>
    %cst_78 = arith.constant dense<0.000000e+00> : vector<32x16xf32>
    %115 = tpu.matmul %112, %114, %cst_78 {dimension_numbers = #tpu.dot_dimension_numbers<[1], [0], [0], [1], [0, 0, 1, 1], [], []>} : vector<32x8xbf16>, vector<8x16xbf16>, vector<32x16xf32> -> vector<32x16xf32>
    %116 = arith.addf %108, %115 : vector<32x16xf32>
    %c8 = arith.constant 8 : index
    %c0_79 = arith.constant 0 : index
    %c0_80 = arith.constant 0 : index
    %117 = vector.load %arg4[%c8, %c0_79, %c0_80] : memref<9x32x128xbf16, #tpu.memory_space<vmem>>, vector<1x32x128xbf16>
    %118 = vector.shape_cast %117 : vector<1x32x128xbf16> to vector<32x128xbf16>
    %cst_81 = arith.constant dense<0.000000e+00> : vector<32x8xf32>
    %119 = tpu.matmul %118, %53, %cst_81 {dimension_numbers = #tpu.dot_dimension_numbers<[1], [0], [0], [1], [0, 0, 1, 1], [], []>} : vector<32x128xbf16>, vector<128x8xbf16>, vector<32x8xf32> -> vector<32x8xf32>
    %120 = arith.truncf %119 : vector<32x8xf32> to vector<32x8xbf16>
    %c8_82 = arith.constant 8 : index
    %c0_83 = arith.constant 0 : index
    %c0_84 = arith.constant 0 : index
    %121 = vector.load %arg13[%c8_82, %c0_83, %c0_84] : memref<9x8x16xbf16, #tpu.memory_space<vmem>>, vector<1x8x16xbf16>
    %122 = vector.shape_cast %121 : vector<1x8x16xbf16> to vector<8x16xbf16>
    %cst_85 = arith.constant dense<0.000000e+00> : vector<32x16xf32>
    %123 = tpu.matmul %120, %122, %cst_85 {dimension_numbers = #tpu.dot_dimension_numbers<[1], [0], [0], [1], [0, 0, 1, 1], [], []>} : vector<32x8xbf16>, vector<8x16xbf16>, vector<32x16xf32> -> vector<32x16xf32>
    %124 = arith.addf %116, %123 : vector<32x16xf32>
    %cst_86 = arith.constant dense<0.000000e+00> : vector<16xf32>
    %125 = vector.multi_reduction <add>, %124, %cst_86 [0] : vector<32x16xf32> to vector<16xf32>
    %126 = vector.shape_cast %125 : vector<16xf32> to vector<1x16xf32>
    %cst_87 = arith.constant 3.200000e+01 : f32
    %127 = vector.broadcast %cst_87 : f32 to vector<1x16xf32>
    %128 = arith.divf %126, %127 : vector<1x16xf32>
    %129 = vector.broadcast %128 : vector<1x16xf32> to vector<32x16xf32>
    %130 = arith.subf %124, %129 : vector<32x16xf32>
    %131 = arith.mulf %130, %130 : vector<32x16xf32>
    %cst_88 = arith.constant dense<0.000000e+00> : vector<16xf32>
    %132 = vector.multi_reduction <add>, %131, %cst_88 [0] : vector<32x16xf32> to vector<16xf32>
    %133 = vector.shape_cast %132 : vector<16xf32> to vector<1x16xf32>
    %cst_89 = arith.constant 3.200000e+01 : f32
    %134 = vector.broadcast %cst_89 : f32 to vector<1x16xf32>
    %135 = arith.divf %133, %134 : vector<1x16xf32>
    %136 = vector.broadcast %128 : vector<1x16xf32> to vector<32x16xf32>
    %137 = arith.subf %124, %136 : vector<32x16xf32>
    %cst_90 = arith.constant 9.99999974E-6 : f32
    %138 = vector.broadcast %cst_90 : f32 to vector<1x16xf32>
    %139 = arith.addf %135, %138 : vector<1x16xf32>
    %140 = math.rsqrt %139 : vector<1x16xf32>
    %141 = vector.broadcast %140 : vector<1x16xf32> to vector<32x16xf32>
    %142 = arith.mulf %137, %141 : vector<32x16xf32>
    %c0_91 = arith.constant 0 : index
    %c0_92 = arith.constant 0 : index
    %143 = vector.load %arg8[%c0_91, %c0_92] : memref<1x16xf32, #tpu.memory_space<vmem>>, vector<1x16xf32>
    %144 = vector.broadcast %143 : vector<1x16xf32> to vector<32x16xf32>
    %145 = arith.mulf %142, %144 : vector<32x16xf32>
    %c0_93 = arith.constant 0 : index
    %c0_94 = arith.constant 0 : index
    %146 = vector.load %arg7[%c0_93, %c0_94] : memref<1x16xf32, #tpu.memory_space<vmem>>, vector<1x16xf32>
    %147 = vector.broadcast %146 : vector<1x16xf32> to vector<32x16xf32>
    %148 = arith.addf %145, %147 : vector<32x16xf32>
    %cst_95 = arith.constant 0.000000e+00 : f32
    %149 = vector.broadcast %cst_95 : f32 to vector<32x16xf32>
    %150 = arith.maximumf %148, %149 : vector<32x16xf32>
    %c0_96 = arith.constant 0 : index
    %c0_97 = arith.constant 0 : index
    %151 = vector.load %arg14[%c0_96, %c0_97] : memref<16x16xbf16, #tpu.memory_space<vmem>>, vector<16x16xbf16>
    %152 = arith.truncf %150 : vector<32x16xf32> to vector<32x16xbf16>
    %cst_98 = arith.constant dense<0.000000e+00> : vector<32x16xf32>
    %153 = tpu.matmul %152, %151, %cst_98 {dimension_numbers = #tpu.dot_dimension_numbers<[1], [0], [0], [1], [0, 0, 1, 1], [], []>} : vector<32x16xbf16>, vector<16x16xbf16>, vector<32x16xf32> -> vector<32x16xf32>
    %cst_99 = arith.constant dense<0.000000e+00> : vector<16xf32>
    %154 = vector.multi_reduction <add>, %153, %cst_99 [0] : vector<32x16xf32> to vector<16xf32>
    %155 = vector.shape_cast %154 : vector<16xf32> to vector<1x16xf32>
    %cst_100 = arith.constant 3.200000e+01 : f32
    %156 = vector.broadcast %cst_100 : f32 to vector<1x16xf32>
    %157 = arith.divf %155, %156 : vector<1x16xf32>
    %158 = vector.broadcast %157 : vector<1x16xf32> to vector<32x16xf32>
    %159 = arith.subf %153, %158 : vector<32x16xf32>
    %160 = arith.mulf %159, %159 : vector<32x16xf32>
    %cst_101 = arith.constant dense<0.000000e+00> : vector<16xf32>
    %161 = vector.multi_reduction <add>, %160, %cst_101 [0] : vector<32x16xf32> to vector<16xf32>
    %162 = vector.shape_cast %161 : vector<16xf32> to vector<1x16xf32>
    %cst_102 = arith.constant 3.200000e+01 : f32
    %163 = vector.broadcast %cst_102 : f32 to vector<1x16xf32>
    %164 = arith.divf %162, %163 : vector<1x16xf32>
    %165 = vector.broadcast %157 : vector<1x16xf32> to vector<32x16xf32>
    %166 = arith.subf %153, %165 : vector<32x16xf32>
    %cst_103 = arith.constant 9.99999974E-6 : f32
    %167 = vector.broadcast %cst_103 : f32 to vector<1x16xf32>
    %168 = arith.addf %164, %167 : vector<1x16xf32>
    %169 = math.rsqrt %168 : vector<1x16xf32>
    %170 = vector.broadcast %169 : vector<1x16xf32> to vector<32x16xf32>
    %171 = arith.mulf %166, %170 : vector<32x16xf32>
    %c0_104 = arith.constant 0 : index
    %c0_105 = arith.constant 0 : index
    %172 = vector.load %arg10[%c0_104, %c0_105] : memref<1x16xf32, #tpu.memory_space<vmem>>, vector<1x16xf32>
    %173 = vector.broadcast %172 : vector<1x16xf32> to vector<32x16xf32>
    %174 = arith.mulf %171, %173 : vector<32x16xf32>
    %c0_106 = arith.constant 0 : index
    %c0_107 = arith.constant 0 : index
    %175 = vector.load %arg9[%c0_106, %c0_107] : memref<1x16xf32, #tpu.memory_space<vmem>>, vector<1x16xf32>
    %176 = vector.broadcast %175 : vector<1x16xf32> to vector<32x16xf32>
    %177 = arith.addf %174, %176 : vector<32x16xf32>
    %c0_108 = arith.constant 0 : index
    %c0_109 = arith.constant 0 : index
    %178 = vector.load %arg3[%c0_108, %c0_109] : memref<32x128xf32, #tpu.memory_space<vmem>>, vector<32x128xf32>
    %cst_110 = arith.constant dense<0.000000e+00> : vector<32x8xf32>
    %179 = tpu.matmul %178, %26, %cst_110 {dimension_numbers = #tpu.dot_dimension_numbers<[1], [0], [0], [1], [0, 0, 1, 1], [], []>} : vector<32x128xf32>, vector<128x8xf32>, vector<32x8xf32> -> vector<32x8xf32>
    %c0_111 = arith.constant 0 : index
    %c0_112 = arith.constant 0 : index
    %180 = vector.load %arg15[%c0_111, %c0_112] : memref<8x16xbf16, #tpu.memory_space<vmem>>, vector<8x16xbf16>
    %181 = arith.truncf %179 : vector<32x8xf32> to vector<32x8xbf16>
    %cst_113 = arith.constant dense<0.000000e+00> : vector<32x16xf32>
    %182 = tpu.matmul %181, %180, %cst_113 {dimension_numbers = #tpu.dot_dimension_numbers<[1], [0], [0], [1], [0, 0, 1, 1], [], []>} : vector<32x8xbf16>, vector<8x16xbf16>, vector<32x16xf32> -> vector<32x16xf32>
    %cst_114 = arith.constant dense<0.000000e+00> : vector<16xf32>
    %183 = vector.multi_reduction <add>, %182, %cst_114 [0] : vector<32x16xf32> to vector<16xf32>
    %184 = vector.shape_cast %183 : vector<16xf32> to vector<1x16xf32>
    %cst_115 = arith.constant 3.200000e+01 : f32
    %185 = vector.broadcast %cst_115 : f32 to vector<1x16xf32>
    %186 = arith.divf %184, %185 : vector<1x16xf32>
    %187 = vector.broadcast %186 : vector<1x16xf32> to vector<32x16xf32>
    %188 = arith.subf %182, %187 : vector<32x16xf32>
    %189 = arith.mulf %188, %188 : vector<32x16xf32>
    %cst_116 = arith.constant dense<0.000000e+00> : vector<16xf32>
    %190 = vector.multi_reduction <add>, %189, %cst_116 [0] : vector<32x16xf32> to vector<16xf32>
    %191 = vector.shape_cast %190 : vector<16xf32> to vector<1x16xf32>
    %cst_117 = arith.constant 3.200000e+01 : f32
    %192 = vector.broadcast %cst_117 : f32 to vector<1x16xf32>
    %193 = arith.divf %191, %192 : vector<1x16xf32>
    %194 = vector.broadcast %186 : vector<1x16xf32> to vector<32x16xf32>
    %195 = arith.subf %182, %194 : vector<32x16xf32>
    %cst_118 = arith.constant 9.99999974E-6 : f32
    %196 = vector.broadcast %cst_118 : f32 to vector<1x16xf32>
    %197 = arith.addf %193, %196 : vector<1x16xf32>
    %198 = math.rsqrt %197 : vector<1x16xf32>
    %199 = vector.broadcast %198 : vector<1x16xf32> to vector<32x16xf32>
    %200 = arith.mulf %195, %199 : vector<32x16xf32>
    %c0_119 = arith.constant 0 : index
    %c0_120 = arith.constant 0 : index
    %201 = vector.load %arg12[%c0_119, %c0_120] : memref<1x16xf32, #tpu.memory_space<vmem>>, vector<1x16xf32>
    %202 = vector.broadcast %201 : vector<1x16xf32> to vector<32x16xf32>
    %203 = arith.mulf %200, %202 : vector<32x16xf32>
    %c0_121 = arith.constant 0 : index
    %c0_122 = arith.constant 0 : index
    %204 = vector.load %arg11[%c0_121, %c0_122] : memref<1x16xf32, #tpu.memory_space<vmem>>, vector<1x16xf32>
    %205 = vector.broadcast %204 : vector<1x16xf32> to vector<32x16xf32>
    %206 = arith.addf %203, %205 : vector<32x16xf32>
    %207 = arith.addf %206, %177 : vector<32x16xf32>
    %cst_123 = arith.constant dense<0.000000e+00> : vector<16xf32>
    %208 = vector.multi_reduction <add>, %207, %cst_123 [0] : vector<32x16xf32> to vector<16xf32>
    %209 = vector.shape_cast %208 : vector<16xf32> to vector<1x16xf32>
    %cst_124 = arith.constant 3.200000e+01 : f32
    %210 = vector.broadcast %cst_124 : f32 to vector<1x16xf32>
    %211 = arith.divf %209, %210 : vector<1x16xf32>
    %212 = vector.broadcast %211 : vector<1x16xf32> to vector<32x16xf32>
    %213 = arith.subf %207, %212 : vector<32x16xf32>
    %214 = arith.mulf %213, %213 : vector<32x16xf32>
    %cst_125 = arith.constant dense<0.000000e+00> : vector<16xf32>
    %215 = vector.multi_reduction <add>, %214, %cst_125 [0] : vector<32x16xf32> to vector<16xf32>
    %216 = vector.shape_cast %215 : vector<16xf32> to vector<1x16xf32>
    %cst_126 = arith.constant 3.200000e+01 : f32
    %217 = vector.broadcast %cst_126 : f32 to vector<1x16xf32>
    %218 = arith.divf %216, %217 : vector<1x16xf32>
    %219 = vector.broadcast %211 : vector<1x16xf32> to vector<32x16xf32>
    %220 = arith.subf %207, %219 : vector<32x16xf32>
    %cst_127 = arith.constant 9.99999974E-6 : f32
    %221 = vector.broadcast %cst_127 : f32 to vector<1x16xf32>
    %222 = arith.addf %218, %221 : vector<1x16xf32>
    %223 = math.rsqrt %222 : vector<1x16xf32>
    %224 = vector.broadcast %223 : vector<1x16xf32> to vector<32x16xf32>
    %225 = arith.mulf %220, %224 : vector<32x16xf32>
    %c0_128 = arith.constant 0 : index
    %c0_129 = arith.constant 0 : index
    %226 = vector.load %arg19[%c0_128, %c0_129] : memref<1x16xf32, #tpu.memory_space<vmem>>, vector<1x16xf32>
    %227 = vector.broadcast %226 : vector<1x16xf32> to vector<32x16xf32>
    %228 = arith.mulf %225, %227 : vector<32x16xf32>
    %c0_130 = arith.constant 0 : index
    %c0_131 = arith.constant 0 : index
    %229 = vector.load %arg18[%c0_130, %c0_131] : memref<1x16xf32, #tpu.memory_space<vmem>>, vector<1x16xf32>
    %230 = vector.broadcast %229 : vector<1x16xf32> to vector<32x16xf32>
    %231 = arith.addf %228, %230 : vector<32x16xf32>
    %cst_132 = arith.constant 0.000000e+00 : f32
    %232 = vector.broadcast %cst_132 : f32 to vector<32x16xf32>
    %233 = arith.maximumf %231, %232 : vector<32x16xf32>
    %234 = arith.truncf %233 : vector<32x16xf32> to vector<32x16xbf16>
    %c0_133 = arith.constant 0 : index
    %c0_134 = arith.constant 0 : index
    %c0_135 = arith.constant 0 : index
    %235 = vector.load %arg17[%c0_133, %c0_134, %c0_135] : memref<9x8x32xbf16, #tpu.memory_space<vmem>>, vector<1x8x32xbf16>
    %236 = vector.shape_cast %235 : vector<1x8x32xbf16> to vector<8x32xbf16>
    %cst_136 = arith.constant dense<0.000000e+00> : vector<8x16xf32>
    %237 = tpu.matmul %236, %234, %cst_136 {dimension_numbers = #tpu.dot_dimension_numbers<[1], [0], [0], [1], [0, 0, 1, 1], [], []>} : vector<8x32xbf16>, vector<32x16xbf16>, vector<8x16xf32> -> vector<8x16xf32>
    %238 = arith.truncf %237 : vector<8x16xf32> to vector<8x16xbf16>
    %c0_137 = arith.constant 0 : index
    %c0_138 = arith.constant 0 : index
    %c0_139 = arith.constant 0 : index
    %239 = vector.load %arg26[%c0_137, %c0_138, %c0_139] : memref<9x16x32xbf16, #tpu.memory_space<vmem>>, vector<1x16x32xbf16>
    %240 = vector.shape_cast %239 : vector<1x16x32xbf16> to vector<16x32xbf16>
    %cst_140 = arith.constant dense<0.000000e+00> : vector<8x32xf32>
    %241 = tpu.matmul %238, %240, %cst_140 {dimension_numbers = #tpu.dot_dimension_numbers<[1], [0], [0], [1], [0, 0, 1, 1], [], []>} : vector<8x16xbf16>, vector<16x32xbf16>, vector<8x32xf32> -> vector<8x32xf32>
    %c1_141 = arith.constant 1 : index
    %c0_142 = arith.constant 0 : index
    %c0_143 = arith.constant 0 : index
    %242 = vector.load %arg17[%c1_141, %c0_142, %c0_143] : memref<9x8x32xbf16, #tpu.memory_space<vmem>>, vector<1x8x32xbf16>
    %243 = vector.shape_cast %242 : vector<1x8x32xbf16> to vector<8x32xbf16>
    %cst_144 = arith.constant dense<0.000000e+00> : vector<8x16xf32>
    %244 = tpu.matmul %243, %234, %cst_144 {dimension_numbers = #tpu.dot_dimension_numbers<[1], [0], [0], [1], [0, 0, 1, 1], [], []>} : vector<8x32xbf16>, vector<32x16xbf16>, vector<8x16xf32> -> vector<8x16xf32>
    %245 = arith.truncf %244 : vector<8x16xf32> to vector<8x16xbf16>
    %c1_145 = arith.constant 1 : index
    %c0_146 = arith.constant 0 : index
    %c0_147 = arith.constant 0 : index
    %246 = vector.load %arg26[%c1_145, %c0_146, %c0_147] : memref<9x16x32xbf16, #tpu.memory_space<vmem>>, vector<1x16x32xbf16>
    %247 = vector.shape_cast %246 : vector<1x16x32xbf16> to vector<16x32xbf16>
    %cst_148 = arith.constant dense<0.000000e+00> : vector<8x32xf32>
    %248 = tpu.matmul %245, %247, %cst_148 {dimension_numbers = #tpu.dot_dimension_numbers<[1], [0], [0], [1], [0, 0, 1, 1], [], []>} : vector<8x16xbf16>, vector<16x32xbf16>, vector<8x32xf32> -> vector<8x32xf32>
    %249 = arith.addf %241, %248 : vector<8x32xf32>
    %c2_149 = arith.constant 2 : index
    %c0_150 = arith.constant 0 : index
    %c0_151 = arith.constant 0 : index
    %250 = vector.load %arg17[%c2_149, %c0_150, %c0_151] : memref<9x8x32xbf16, #tpu.memory_space<vmem>>, vector<1x8x32xbf16>
    %251 = vector.shape_cast %250 : vector<1x8x32xbf16> to vector<8x32xbf16>
    %cst_152 = arith.constant dense<0.000000e+00> : vector<8x16xf32>
    %252 = tpu.matmul %251, %234, %cst_152 {dimension_numbers = #tpu.dot_dimension_numbers<[1], [0], [0], [1], [0, 0, 1, 1], [], []>} : vector<8x32xbf16>, vector<32x16xbf16>, vector<8x16xf32> -> vector<8x16xf32>
    %253 = arith.truncf %252 : vector<8x16xf32> to vector<8x16xbf16>
    %c2_153 = arith.constant 2 : index
    %c0_154 = arith.constant 0 : index
    %c0_155 = arith.constant 0 : index
    %254 = vector.load %arg26[%c2_153, %c0_154, %c0_155] : memref<9x16x32xbf16, #tpu.memory_space<vmem>>, vector<1x16x32xbf16>
    %255 = vector.shape_cast %254 : vector<1x16x32xbf16> to vector<16x32xbf16>
    %cst_156 = arith.constant dense<0.000000e+00> : vector<8x32xf32>
    %256 = tpu.matmul %253, %255, %cst_156 {dimension_numbers = #tpu.dot_dimension_numbers<[1], [0], [0], [1], [0, 0, 1, 1], [], []>} : vector<8x16xbf16>, vector<16x32xbf16>, vector<8x32xf32> -> vector<8x32xf32>
    %257 = arith.addf %249, %256 : vector<8x32xf32>
    %c3_157 = arith.constant 3 : index
    %c0_158 = arith.constant 0 : index
    %c0_159 = arith.constant 0 : index
    %258 = vector.load %arg17[%c3_157, %c0_158, %c0_159] : memref<9x8x32xbf16, #tpu.memory_space<vmem>>, vector<1x8x32xbf16>
    %259 = vector.shape_cast %258 : vector<1x8x32xbf16> to vector<8x32xbf16>
    %cst_160 = arith.constant dense<0.000000e+00> : vector<8x16xf32>
    %260 = tpu.matmul %259, %234, %cst_160 {dimension_numbers = #tpu.dot_dimension_numbers<[1], [0], [0], [1], [0, 0, 1, 1], [], []>} : vector<8x32xbf16>, vector<32x16xbf16>, vector<8x16xf32> -> vector<8x16xf32>
    %261 = arith.truncf %260 : vector<8x16xf32> to vector<8x16xbf16>
    %c3_161 = arith.constant 3 : index
    %c0_162 = arith.constant 0 : index
    %c0_163 = arith.constant 0 : index
    %262 = vector.load %arg26[%c3_161, %c0_162, %c0_163] : memref<9x16x32xbf16, #tpu.memory_space<vmem>>, vector<1x16x32xbf16>
    %263 = vector.shape_cast %262 : vector<1x16x32xbf16> to vector<16x32xbf16>
    %cst_164 = arith.constant dense<0.000000e+00> : vector<8x32xf32>
    %264 = tpu.matmul %261, %263, %cst_164 {dimension_numbers = #tpu.dot_dimension_numbers<[1], [0], [0], [1], [0, 0, 1, 1], [], []>} : vector<8x16xbf16>, vector<16x32xbf16>, vector<8x32xf32> -> vector<8x32xf32>
    %265 = arith.addf %257, %264 : vector<8x32xf32>
    %c4_165 = arith.constant 4 : index
    %c0_166 = arith.constant 0 : index
    %c0_167 = arith.constant 0 : index
    %266 = vector.load %arg17[%c4_165, %c0_166, %c0_167] : memref<9x8x32xbf16, #tpu.memory_space<vmem>>, vector<1x8x32xbf16>
    %267 = vector.shape_cast %266 : vector<1x8x32xbf16> to vector<8x32xbf16>
    %cst_168 = arith.constant dense<0.000000e+00> : vector<8x16xf32>
    %268 = tpu.matmul %267, %234, %cst_168 {dimension_numbers = #tpu.dot_dimension_numbers<[1], [0], [0], [1], [0, 0, 1, 1], [], []>} : vector<8x32xbf16>, vector<32x16xbf16>, vector<8x16xf32> -> vector<8x16xf32>
    %269 = arith.truncf %268 : vector<8x16xf32> to vector<8x16xbf16>
    %c4_169 = arith.constant 4 : index
    %c0_170 = arith.constant 0 : index
    %c0_171 = arith.constant 0 : index
    %270 = vector.load %arg26[%c4_169, %c0_170, %c0_171] : memref<9x16x32xbf16, #tpu.memory_space<vmem>>, vector<1x16x32xbf16>
    %271 = vector.shape_cast %270 : vector<1x16x32xbf16> to vector<16x32xbf16>
    %cst_172 = arith.constant dense<0.000000e+00> : vector<8x32xf32>
    %272 = tpu.matmul %269, %271, %cst_172 {dimension_numbers = #tpu.dot_dimension_numbers<[1], [0], [0], [1], [0, 0, 1, 1], [], []>} : vector<8x16xbf16>, vector<16x32xbf16>, vector<8x32xf32> -> vector<8x32xf32>
    %273 = arith.addf %265, %272 : vector<8x32xf32>
    %c5_173 = arith.constant 5 : index
    %c0_174 = arith.constant 0 : index
    %c0_175 = arith.constant 0 : index
    %274 = vector.load %arg17[%c5_173, %c0_174, %c0_175] : memref<9x8x32xbf16, #tpu.memory_space<vmem>>, vector<1x8x32xbf16>
    %275 = vector.shape_cast %274 : vector<1x8x32xbf16> to vector<8x32xbf16>
    %cst_176 = arith.constant dense<0.000000e+00> : vector<8x16xf32>
    %276 = tpu.matmul %275, %234, %cst_176 {dimension_numbers = #tpu.dot_dimension_numbers<[1], [0], [0], [1], [0, 0, 1, 1], [], []>} : vector<8x32xbf16>, vector<32x16xbf16>, vector<8x16xf32> -> vector<8x16xf32>
    %277 = arith.truncf %276 : vector<8x16xf32> to vector<8x16xbf16>
    %c5_177 = arith.constant 5 : index
    %c0_178 = arith.constant 0 : index
    %c0_179 = arith.constant 0 : index
    %278 = vector.load %arg26[%c5_177, %c0_178, %c0_179] : memref<9x16x32xbf16, #tpu.memory_space<vmem>>, vector<1x16x32xbf16>
    %279 = vector.shape_cast %278 : vector<1x16x32xbf16> to vector<16x32xbf16>
    %cst_180 = arith.constant dense<0.000000e+00> : vector<8x32xf32>
    %280 = tpu.matmul %277, %279, %cst_180 {dimension_numbers = #tpu.dot_dimension_numbers<[1], [0], [0], [1], [0, 0, 1, 1], [], []>} : vector<8x16xbf16>, vector<16x32xbf16>, vector<8x32xf32> -> vector<8x32xf32>
    %281 = arith.addf %273, %280 : vector<8x32xf32>
    %c6_181 = arith.constant 6 : index
    %c0_182 = arith.constant 0 : index
    %c0_183 = arith.constant 0 : index
    %282 = vector.load %arg17[%c6_181, %c0_182, %c0_183] : memref<9x8x32xbf16, #tpu.memory_space<vmem>>, vector<1x8x32xbf16>
    %283 = vector.shape_cast %282 : vector<1x8x32xbf16> to vector<8x32xbf16>
    %cst_184 = arith.constant dense<0.000000e+00> : vector<8x16xf32>
    %284 = tpu.matmul %283, %234, %cst_184 {dimension_numbers = #tpu.dot_dimension_numbers<[1], [0], [0], [1], [0, 0, 1, 1], [], []>} : vector<8x32xbf16>, vector<32x16xbf16>, vector<8x16xf32> -> vector<8x16xf32>
    %285 = arith.truncf %284 : vector<8x16xf32> to vector<8x16xbf16>
    %c6_185 = arith.constant 6 : index
    %c0_186 = arith.constant 0 : index
    %c0_187 = arith.constant 0 : index
    %286 = vector.load %arg26[%c6_185, %c0_186, %c0_187] : memref<9x16x32xbf16, #tpu.memory_space<vmem>>, vector<1x16x32xbf16>
    %287 = vector.shape_cast %286 : vector<1x16x32xbf16> to vector<16x32xbf16>
    %cst_188 = arith.constant dense<0.000000e+00> : vector<8x32xf32>
    %288 = tpu.matmul %285, %287, %cst_188 {dimension_numbers = #tpu.dot_dimension_numbers<[1], [0], [0], [1], [0, 0, 1, 1], [], []>} : vector<8x16xbf16>, vector<16x32xbf16>, vector<8x32xf32> -> vector<8x32xf32>
    %289 = arith.addf %281, %288 : vector<8x32xf32>
    %c7_189 = arith.constant 7 : index
    %c0_190 = arith.constant 0 : index
    %c0_191 = arith.constant 0 : index
    %290 = vector.load %arg17[%c7_189, %c0_190, %c0_191] : memref<9x8x32xbf16, #tpu.memory_space<vmem>>, vector<1x8x32xbf16>
    %291 = vector.shape_cast %290 : vector<1x8x32xbf16> to vector<8x32xbf16>
    %cst_192 = arith.constant dense<0.000000e+00> : vector<8x16xf32>
    %292 = tpu.matmul %291, %234, %cst_192 {dimension_numbers = #tpu.dot_dimension_numbers<[1], [0], [0], [1], [0, 0, 1, 1], [], []>} : vector<8x32xbf16>, vector<32x16xbf16>, vector<8x16xf32> -> vector<8x16xf32>
    %293 = arith.truncf %292 : vector<8x16xf32> to vector<8x16xbf16>
    %c7_193 = arith.constant 7 : index
    %c0_194 = arith.constant 0 : index
    %c0_195 = arith.constant 0 : index
    %294 = vector.load %arg26[%c7_193, %c0_194, %c0_195] : memref<9x16x32xbf16, #tpu.memory_space<vmem>>, vector<1x16x32xbf16>
    %295 = vector.shape_cast %294 : vector<1x16x32xbf16> to vector<16x32xbf16>
    %cst_196 = arith.constant dense<0.000000e+00> : vector<8x32xf32>
    %296 = tpu.matmul %293, %295, %cst_196 {dimension_numbers = #tpu.dot_dimension_numbers<[1], [0], [0], [1], [0, 0, 1, 1], [], []>} : vector<8x16xbf16>, vector<16x32xbf16>, vector<8x32xf32> -> vector<8x32xf32>
    %297 = arith.addf %289, %296 : vector<8x32xf32>
    %c8_197 = arith.constant 8 : index
    %c0_198 = arith.constant 0 : index
    %c0_199 = arith.constant 0 : index
    %298 = vector.load %arg17[%c8_197, %c0_198, %c0_199] : memref<9x8x32xbf16, #tpu.memory_space<vmem>>, vector<1x8x32xbf16>
    %299 = vector.shape_cast %298 : vector<1x8x32xbf16> to vector<8x32xbf16>
    %cst_200 = arith.constant dense<0.000000e+00> : vector<8x16xf32>
    %300 = tpu.matmul %299, %234, %cst_200 {dimension_numbers = #tpu.dot_dimension_numbers<[1], [0], [0], [1], [0, 0, 1, 1], [], []>} : vector<8x32xbf16>, vector<32x16xbf16>, vector<8x16xf32> -> vector<8x16xf32>
    %301 = arith.truncf %300 : vector<8x16xf32> to vector<8x16xbf16>
    %c8_201 = arith.constant 8 : index
    %c0_202 = arith.constant 0 : index
    %c0_203 = arith.constant 0 : index
    %302 = vector.load %arg26[%c8_201, %c0_202, %c0_203] : memref<9x16x32xbf16, #tpu.memory_space<vmem>>, vector<1x16x32xbf16>
    %303 = vector.shape_cast %302 : vector<1x16x32xbf16> to vector<16x32xbf16>
    %cst_204 = arith.constant dense<0.000000e+00> : vector<8x32xf32>
    %304 = tpu.matmul %301, %303, %cst_204 {dimension_numbers = #tpu.dot_dimension_numbers<[1], [0], [0], [1], [0, 0, 1, 1], [], []>} : vector<8x16xbf16>, vector<16x32xbf16>, vector<8x32xf32> -> vector<8x32xf32>
    %305 = arith.addf %297, %304 : vector<8x32xf32>
    %cst_205 = arith.constant dense<0.000000e+00> : vector<32xf32>
    %306 = vector.multi_reduction <add>, %305, %cst_205 [0] : vector<8x32xf32> to vector<32xf32>
    %307 = vector.shape_cast %306 : vector<32xf32> to vector<1x32xf32>
    %cst_206 = arith.constant 8.000000e+00 : f32
    %308 = vector.broadcast %cst_206 : f32 to vector<1x32xf32>
    %309 = arith.divf %307, %308 : vector<1x32xf32>
    %310 = vector.broadcast %309 : vector<1x32xf32> to vector<8x32xf32>
    %311 = arith.subf %305, %310 : vector<8x32xf32>
    %312 = arith.mulf %311, %311 : vector<8x32xf32>
    %cst_207 = arith.constant dense<0.000000e+00> : vector<32xf32>
    %313 = vector.multi_reduction <add>, %312, %cst_207 [0] : vector<8x32xf32> to vector<32xf32>
    %314 = vector.shape_cast %313 : vector<32xf32> to vector<1x32xf32>
    %cst_208 = arith.constant 8.000000e+00 : f32
    %315 = vector.broadcast %cst_208 : f32 to vector<1x32xf32>
    %316 = arith.divf %314, %315 : vector<1x32xf32>
    %317 = vector.broadcast %309 : vector<1x32xf32> to vector<8x32xf32>
    %318 = arith.subf %305, %317 : vector<8x32xf32>
    %cst_209 = arith.constant 9.99999974E-6 : f32
    %319 = vector.broadcast %cst_209 : f32 to vector<1x32xf32>
    %320 = arith.addf %316, %319 : vector<1x32xf32>
    %321 = math.rsqrt %320 : vector<1x32xf32>
    %322 = vector.broadcast %321 : vector<1x32xf32> to vector<8x32xf32>
    %323 = arith.mulf %318, %322 : vector<8x32xf32>
    %c0_210 = arith.constant 0 : index
    %c0_211 = arith.constant 0 : index
    %324 = vector.load %arg21[%c0_210, %c0_211] : memref<1x32xf32, #tpu.memory_space<vmem>>, vector<1x32xf32>
    %325 = vector.broadcast %324 : vector<1x32xf32> to vector<8x32xf32>
    %326 = arith.mulf %323, %325 : vector<8x32xf32>
    %c0_212 = arith.constant 0 : index
    %c0_213 = arith.constant 0 : index
    %327 = vector.load %arg20[%c0_212, %c0_213] : memref<1x32xf32, #tpu.memory_space<vmem>>, vector<1x32xf32>
    %328 = vector.broadcast %327 : vector<1x32xf32> to vector<8x32xf32>
    %329 = arith.addf %326, %328 : vector<8x32xf32>
    %cst_214 = arith.constant 0.000000e+00 : f32
    %330 = vector.broadcast %cst_214 : f32 to vector<8x32xf32>
    %331 = arith.maximumf %329, %330 : vector<8x32xf32>
    %c0_215 = arith.constant 0 : index
    %c0_216 = arith.constant 0 : index
    %332 = vector.load %arg27[%c0_215, %c0_216] : memref<32x32xbf16, #tpu.memory_space<vmem>>, vector<32x32xbf16>
    %333 = arith.truncf %331 : vector<8x32xf32> to vector<8x32xbf16>
    %cst_217 = arith.constant dense<0.000000e+00> : vector<8x32xf32>
    %334 = tpu.matmul %333, %332, %cst_217 {dimension_numbers = #tpu.dot_dimension_numbers<[1], [0], [0], [1], [0, 0, 1, 1], [], []>} : vector<8x32xbf16>, vector<32x32xbf16>, vector<8x32xf32> -> vector<8x32xf32>
    %cst_218 = arith.constant dense<0.000000e+00> : vector<32xf32>
    %335 = vector.multi_reduction <add>, %334, %cst_218 [0] : vector<8x32xf32> to vector<32xf32>
    %336 = vector.shape_cast %335 : vector<32xf32> to vector<1x32xf32>
    %cst_219 = arith.constant 8.000000e+00 : f32
    %337 = vector.broadcast %cst_219 : f32 to vector<1x32xf32>
    %338 = arith.divf %336, %337 : vector<1x32xf32>
    %339 = vector.broadcast %338 : vector<1x32xf32> to vector<8x32xf32>
    %340 = arith.subf %334, %339 : vector<8x32xf32>
    %341 = arith.mulf %340, %340 : vector<8x32xf32>
    %cst_220 = arith.constant dense<0.000000e+00> : vector<32xf32>
    %342 = vector.multi_reduction <add>, %341, %cst_220 [0] : vector<8x32xf32> to vector<32xf32>
    %343 = vector.shape_cast %342 : vector<32xf32> to vector<1x32xf32>
    %cst_221 = arith.constant 8.000000e+00 : f32
    %344 = vector.broadcast %cst_221 : f32 to vector<1x32xf32>
    %345 = arith.divf %343, %344 : vector<1x32xf32>
    %346 = vector.broadcast %338 : vector<1x32xf32> to vector<8x32xf32>
    %347 = arith.subf %334, %346 : vector<8x32xf32>
    %cst_222 = arith.constant 9.99999974E-6 : f32
    %348 = vector.broadcast %cst_222 : f32 to vector<1x32xf32>
    %349 = arith.addf %345, %348 : vector<1x32xf32>
    %350 = math.rsqrt %349 : vector<1x32xf32>
    %351 = vector.broadcast %350 : vector<1x32xf32> to vector<8x32xf32>
    %352 = arith.mulf %347, %351 : vector<8x32xf32>
    %c0_223 = arith.constant 0 : index
    %c0_224 = arith.constant 0 : index
    %353 = vector.load %arg23[%c0_223, %c0_224] : memref<1x32xf32, #tpu.memory_space<vmem>>, vector<1x32xf32>
    %354 = vector.broadcast %353 : vector<1x32xf32> to vector<8x32xf32>
    %355 = arith.mulf %352, %354 : vector<8x32xf32>
    %c0_225 = arith.constant 0 : index
    %c0_226 = arith.constant 0 : index
    %356 = vector.load %arg22[%c0_225, %c0_226] : memref<1x32xf32, #tpu.memory_space<vmem>>, vector<1x32xf32>
    %357 = vector.broadcast %356 : vector<1x32xf32> to vector<8x32xf32>
    %358 = arith.addf %355, %357 : vector<8x32xf32>
    %c0_227 = arith.constant 0 : index
    %c0_228 = arith.constant 0 : index
    %359 = vector.load %arg16[%c0_227, %c0_228] : memref<8x32xf32, #tpu.memory_space<vmem>>, vector<8x32xf32>
    %cst_229 = arith.constant dense<0.000000e+00> : vector<8x16xf32>
    %360 = tpu.matmul %359, %207, %cst_229 {dimension_numbers = #tpu.dot_dimension_numbers<[1], [0], [0], [1], [0, 0, 1, 1], [], []>} : vector<8x32xf32>, vector<32x16xf32>, vector<8x16xf32> -> vector<8x16xf32>
    %c0_230 = arith.constant 0 : index
    %c0_231 = arith.constant 0 : index
    %361 = vector.load %arg28[%c0_230, %c0_231] : memref<16x32xbf16, #tpu.memory_space<vmem>>, vector<16x32xbf16>
    %362 = arith.truncf %360 : vector<8x16xf32> to vector<8x16xbf16>
    %cst_232 = arith.constant dense<0.000000e+00> : vector<8x32xf32>
    %363 = tpu.matmul %362, %361, %cst_232 {dimension_numbers = #tpu.dot_dimension_numbers<[1], [0], [0], [1], [0, 0, 1, 1], [], []>} : vector<8x16xbf16>, vector<16x32xbf16>, vector<8x32xf32> -> vector<8x32xf32>
    %cst_233 = arith.constant dense<0.000000e+00> : vector<32xf32>
    %364 = vector.multi_reduction <add>, %363, %cst_233 [0] : vector<8x32xf32> to vector<32xf32>
    %365 = vector.shape_cast %364 : vector<32xf32> to vector<1x32xf32>
    %cst_234 = arith.constant 8.000000e+00 : f32
    %366 = vector.broadcast %cst_234 : f32 to vector<1x32xf32>
    %367 = arith.divf %365, %366 : vector<1x32xf32>
    %368 = vector.broadcast %367 : vector<1x32xf32> to vector<8x32xf32>
    %369 = arith.subf %363, %368 : vector<8x32xf32>
    %370 = arith.mulf %369, %369 : vector<8x32xf32>
    %cst_235 = arith.constant dense<0.000000e+00> : vector<32xf32>
    %371 = vector.multi_reduction <add>, %370, %cst_235 [0] : vector<8x32xf32> to vector<32xf32>
    %372 = vector.shape_cast %371 : vector<32xf32> to vector<1x32xf32>
    %cst_236 = arith.constant 8.000000e+00 : f32
    %373 = vector.broadcast %cst_236 : f32 to vector<1x32xf32>
    %374 = arith.divf %372, %373 : vector<1x32xf32>
    %375 = vector.broadcast %367 : vector<1x32xf32> to vector<8x32xf32>
    %376 = arith.subf %363, %375 : vector<8x32xf32>
    %cst_237 = arith.constant 9.99999974E-6 : f32
    %377 = vector.broadcast %cst_237 : f32 to vector<1x32xf32>
    %378 = arith.addf %374, %377 : vector<1x32xf32>
    %379 = math.rsqrt %378 : vector<1x32xf32>
    %380 = vector.broadcast %379 : vector<1x32xf32> to vector<8x32xf32>
    %381 = arith.mulf %376, %380 : vector<8x32xf32>
    %c0_238 = arith.constant 0 : index
    %c0_239 = arith.constant 0 : index
    %382 = vector.load %arg25[%c0_238, %c0_239] : memref<1x32xf32, #tpu.memory_space<vmem>>, vector<1x32xf32>
    %383 = vector.broadcast %382 : vector<1x32xf32> to vector<8x32xf32>
    %384 = arith.mulf %381, %383 : vector<8x32xf32>
    %c0_240 = arith.constant 0 : index
    %c0_241 = arith.constant 0 : index
    %385 = vector.load %arg24[%c0_240, %c0_241] : memref<1x32xf32, #tpu.memory_space<vmem>>, vector<1x32xf32>
    %386 = vector.broadcast %385 : vector<1x32xf32> to vector<8x32xf32>
    %387 = arith.addf %384, %386 : vector<8x32xf32>
    %388 = arith.addf %387, %358 : vector<8x32xf32>
    %cst_242 = arith.constant dense<0.000000e+00> : vector<32xf32>
    %389 = vector.multi_reduction <add>, %388, %cst_242 [0] : vector<8x32xf32> to vector<32xf32>
    %390 = vector.shape_cast %389 : vector<32xf32> to vector<1x32xf32>
    %cst_243 = arith.constant 8.000000e+00 : f32
    %391 = vector.broadcast %cst_243 : f32 to vector<1x32xf32>
    %392 = arith.divf %390, %391 : vector<1x32xf32>
    %393 = vector.broadcast %392 : vector<1x32xf32> to vector<8x32xf32>
    %394 = arith.subf %388, %393 : vector<8x32xf32>
    %395 = arith.mulf %394, %394 : vector<8x32xf32>
    %cst_244 = arith.constant dense<0.000000e+00> : vector<32xf32>
    %396 = vector.multi_reduction <add>, %395, %cst_244 [0] : vector<8x32xf32> to vector<32xf32>
    %397 = vector.shape_cast %396 : vector<32xf32> to vector<1x32xf32>
    %cst_245 = arith.constant 8.000000e+00 : f32
    %398 = vector.broadcast %cst_245 : f32 to vector<1x32xf32>
    %399 = arith.divf %397, %398 : vector<1x32xf32>
    %400 = vector.broadcast %392 : vector<1x32xf32> to vector<8x32xf32>
    %401 = arith.subf %388, %400 : vector<8x32xf32>
    %cst_246 = arith.constant 9.99999974E-6 : f32
    %402 = vector.broadcast %cst_246 : f32 to vector<1x32xf32>
    %403 = arith.addf %399, %402 : vector<1x32xf32>
    %404 = math.rsqrt %403 : vector<1x32xf32>
    %405 = vector.broadcast %404 : vector<1x32xf32> to vector<8x32xf32>
    %406 = arith.mulf %401, %405 : vector<8x32xf32>
    %c0_247 = arith.constant 0 : index
    %c0_248 = arith.constant 0 : index
    %407 = vector.load %arg32[%c0_247, %c0_248] : memref<1x32xf32, #tpu.memory_space<vmem>>, vector<1x32xf32>
    %408 = vector.broadcast %407 : vector<1x32xf32> to vector<8x32xf32>
    %409 = arith.mulf %406, %408 : vector<8x32xf32>
    %c0_249 = arith.constant 0 : index
    %c0_250 = arith.constant 0 : index
    %410 = vector.load %arg31[%c0_249, %c0_250] : memref<1x32xf32, #tpu.memory_space<vmem>>, vector<1x32xf32>
    %411 = vector.broadcast %410 : vector<1x32xf32> to vector<8x32xf32>
    %412 = arith.addf %409, %411 : vector<8x32xf32>
    %cst_251 = arith.constant 0.000000e+00 : f32
    %413 = vector.broadcast %cst_251 : f32 to vector<8x32xf32>
    %414 = arith.maximumf %412, %413 : vector<8x32xf32>
    %415 = arith.truncf %414 : vector<8x32xf32> to vector<8x32xbf16>
    %c0_252 = arith.constant 0 : index
    %c0_253 = arith.constant 0 : index
    %c0_254 = arith.constant 0 : index
    %416 = vector.load %arg30[%c0_252, %c0_253, %c0_254] : memref<9x2x8xbf16, #tpu.memory_space<vmem>>, vector<1x2x8xbf16>
    %417 = vector.shape_cast %416 : vector<1x2x8xbf16> to vector<2x8xbf16>
    %cst_255 = arith.constant dense<0.000000e+00> : vector<2x32xf32>
    %418 = tpu.matmul %417, %415, %cst_255 {dimension_numbers = #tpu.dot_dimension_numbers<[1], [0], [0], [1], [0, 0, 1, 1], [], []>} : vector<2x8xbf16>, vector<8x32xbf16>, vector<2x32xf32> -> vector<2x32xf32>
    %419 = arith.truncf %418 : vector<2x32xf32> to vector<2x32xbf16>
    %c0_256 = arith.constant 0 : index
    %c0_257 = arith.constant 0 : index
    %c0_258 = arith.constant 0 : index
    %420 = vector.load %arg39[%c0_256, %c0_257, %c0_258] : memref<9x32x64xbf16, #tpu.memory_space<vmem>>, vector<1x32x64xbf16>
    %421 = vector.shape_cast %420 : vector<1x32x64xbf16> to vector<32x64xbf16>
    %cst_259 = arith.constant dense<0.000000e+00> : vector<2x64xf32>
    %422 = tpu.matmul %419, %421, %cst_259 {dimension_numbers = #tpu.dot_dimension_numbers<[1], [0], [0], [1], [0, 0, 1, 1], [], []>} : vector<2x32xbf16>, vector<32x64xbf16>, vector<2x64xf32> -> vector<2x64xf32>
    %c1_260 = arith.constant 1 : index
    %c0_261 = arith.constant 0 : index
    %c0_262 = arith.constant 0 : index
    %423 = vector.load %arg30[%c1_260, %c0_261, %c0_262] : memref<9x2x8xbf16, #tpu.memory_space<vmem>>, vector<1x2x8xbf16>
    %424 = vector.shape_cast %423 : vector<1x2x8xbf16> to vector<2x8xbf16>
    %cst_263 = arith.constant dense<0.000000e+00> : vector<2x32xf32>
    %425 = tpu.matmul %424, %415, %cst_263 {dimension_numbers = #tpu.dot_dimension_numbers<[1], [0], [0], [1], [0, 0, 1, 1], [], []>} : vector<2x8xbf16>, vector<8x32xbf16>, vector<2x32xf32> -> vector<2x32xf32>
    %426 = arith.truncf %425 : vector<2x32xf32> to vector<2x32xbf16>
    %c1_264 = arith.constant 1 : index
    %c0_265 = arith.constant 0 : index
    %c0_266 = arith.constant 0 : index
    %427 = vector.load %arg39[%c1_264, %c0_265, %c0_266] : memref<9x32x64xbf16, #tpu.memory_space<vmem>>, vector<1x32x64xbf16>
    %428 = vector.shape_cast %427 : vector<1x32x64xbf16> to vector<32x64xbf16>
    %cst_267 = arith.constant dense<0.000000e+00> : vector<2x64xf32>
    %429 = tpu.matmul %426, %428, %cst_267 {dimension_numbers = #tpu.dot_dimension_numbers<[1], [0], [0], [1], [0, 0, 1, 1], [], []>} : vector<2x32xbf16>, vector<32x64xbf16>, vector<2x64xf32> -> vector<2x64xf32>
    %430 = arith.addf %422, %429 : vector<2x64xf32>
    %c2_268 = arith.constant 2 : index
    %c0_269 = arith.constant 0 : index
    %c0_270 = arith.constant 0 : index
    %431 = vector.load %arg30[%c2_268, %c0_269, %c0_270] : memref<9x2x8xbf16, #tpu.memory_space<vmem>>, vector<1x2x8xbf16>
    %432 = vector.shape_cast %431 : vector<1x2x8xbf16> to vector<2x8xbf16>
    %cst_271 = arith.constant dense<0.000000e+00> : vector<2x32xf32>
    %433 = tpu.matmul %432, %415, %cst_271 {dimension_numbers = #tpu.dot_dimension_numbers<[1], [0], [0], [1], [0, 0, 1, 1], [], []>} : vector<2x8xbf16>, vector<8x32xbf16>, vector<2x32xf32> -> vector<2x32xf32>
    %434 = arith.truncf %433 : vector<2x32xf32> to vector<2x32xbf16>
    %c2_272 = arith.constant 2 : index
    %c0_273 = arith.constant 0 : index
    %c0_274 = arith.constant 0 : index
    %435 = vector.load %arg39[%c2_272, %c0_273, %c0_274] : memref<9x32x64xbf16, #tpu.memory_space<vmem>>, vector<1x32x64xbf16>
    %436 = vector.shape_cast %435 : vector<1x32x64xbf16> to vector<32x64xbf16>
    %cst_275 = arith.constant dense<0.000000e+00> : vector<2x64xf32>
    %437 = tpu.matmul %434, %436, %cst_275 {dimension_numbers = #tpu.dot_dimension_numbers<[1], [0], [0], [1], [0, 0, 1, 1], [], []>} : vector<2x32xbf16>, vector<32x64xbf16>, vector<2x64xf32> -> vector<2x64xf32>
    %438 = arith.addf %430, %437 : vector<2x64xf32>
    %c3_276 = arith.constant 3 : index
    %c0_277 = arith.constant 0 : index
    %c0_278 = arith.constant 0 : index
    %439 = vector.load %arg30[%c3_276, %c0_277, %c0_278] : memref<9x2x8xbf16, #tpu.memory_space<vmem>>, vector<1x2x8xbf16>
    %440 = vector.shape_cast %439 : vector<1x2x8xbf16> to vector<2x8xbf16>
    %cst_279 = arith.constant dense<0.000000e+00> : vector<2x32xf32>
    %441 = tpu.matmul %440, %415, %cst_279 {dimension_numbers = #tpu.dot_dimension_numbers<[1], [0], [0], [1], [0, 0, 1, 1], [], []>} : vector<2x8xbf16>, vector<8x32xbf16>, vector<2x32xf32> -> vector<2x32xf32>
    %442 = arith.truncf %441 : vector<2x32xf32> to vector<2x32xbf16>
    %c3_280 = arith.constant 3 : index
    %c0_281 = arith.constant 0 : index
    %c0_282 = arith.constant 0 : index
    %443 = vector.load %arg39[%c3_280, %c0_281, %c0_282] : memref<9x32x64xbf16, #tpu.memory_space<vmem>>, vector<1x32x64xbf16>
    %444 = vector.shape_cast %443 : vector<1x32x64xbf16> to vector<32x64xbf16>
    %cst_283 = arith.constant dense<0.000000e+00> : vector<2x64xf32>
    %445 = tpu.matmul %442, %444, %cst_283 {dimension_numbers = #tpu.dot_dimension_numbers<[1], [0], [0], [1], [0, 0, 1, 1], [], []>} : vector<2x32xbf16>, vector<32x64xbf16>, vector<2x64xf32> -> vector<2x64xf32>
    %446 = arith.addf %438, %445 : vector<2x64xf32>
    %c4_284 = arith.constant 4 : index
    %c0_285 = arith.constant 0 : index
    %c0_286 = arith.constant 0 : index
    %447 = vector.load %arg30[%c4_284, %c0_285, %c0_286] : memref<9x2x8xbf16, #tpu.memory_space<vmem>>, vector<1x2x8xbf16>
    %448 = vector.shape_cast %447 : vector<1x2x8xbf16> to vector<2x8xbf16>
    %cst_287 = arith.constant dense<0.000000e+00> : vector<2x32xf32>
    %449 = tpu.matmul %448, %415, %cst_287 {dimension_numbers = #tpu.dot_dimension_numbers<[1], [0], [0], [1], [0, 0, 1, 1], [], []>} : vector<2x8xbf16>, vector<8x32xbf16>, vector<2x32xf32> -> vector<2x32xf32>
    %450 = arith.truncf %449 : vector<2x32xf32> to vector<2x32xbf16>
    %c4_288 = arith.constant 4 : index
    %c0_289 = arith.constant 0 : index
    %c0_290 = arith.constant 0 : index
    %451 = vector.load %arg39[%c4_288, %c0_289, %c0_290] : memref<9x32x64xbf16, #tpu.memory_space<vmem>>, vector<1x32x64xbf16>
    %452 = vector.shape_cast %451 : vector<1x32x64xbf16> to vector<32x64xbf16>
    %cst_291 = arith.constant dense<0.000000e+00> : vector<2x64xf32>
    %453 = tpu.matmul %450, %452, %cst_291 {dimension_numbers = #tpu.dot_dimension_numbers<[1], [0], [0], [1], [0, 0, 1, 1], [], []>} : vector<2x32xbf16>, vector<32x64xbf16>, vector<2x64xf32> -> vector<2x64xf32>
    %454 = arith.addf %446, %453 : vector<2x64xf32>
    %c5_292 = arith.constant 5 : index
    %c0_293 = arith.constant 0 : index
    %c0_294 = arith.constant 0 : index
    %455 = vector.load %arg30[%c5_292, %c0_293, %c0_294] : memref<9x2x8xbf16, #tpu.memory_space<vmem>>, vector<1x2x8xbf16>
    %456 = vector.shape_cast %455 : vector<1x2x8xbf16> to vector<2x8xbf16>
    %cst_295 = arith.constant dense<0.000000e+00> : vector<2x32xf32>
    %457 = tpu.matmul %456, %415, %cst_295 {dimension_numbers = #tpu.dot_dimension_numbers<[1], [0], [0], [1], [0, 0, 1, 1], [], []>} : vector<2x8xbf16>, vector<8x32xbf16>, vector<2x32xf32> -> vector<2x32xf32>
    %458 = arith.truncf %457 : vector<2x32xf32> to vector<2x32xbf16>
    %c5_296 = arith.constant 5 : index
    %c0_297 = arith.constant 0 : index
    %c0_298 = arith.constant 0 : index
    %459 = vector.load %arg39[%c5_296, %c0_297, %c0_298] : memref<9x32x64xbf16, #tpu.memory_space<vmem>>, vector<1x32x64xbf16>
    %460 = vector.shape_cast %459 : vector<1x32x64xbf16> to vector<32x64xbf16>
    %cst_299 = arith.constant dense<0.000000e+00> : vector<2x64xf32>
    %461 = tpu.matmul %458, %460, %cst_299 {dimension_numbers = #tpu.dot_dimension_numbers<[1], [0], [0], [1], [0, 0, 1, 1], [], []>} : vector<2x32xbf16>, vector<32x64xbf16>, vector<2x64xf32> -> vector<2x64xf32>
    %462 = arith.addf %454, %461 : vector<2x64xf32>
    %c6_300 = arith.constant 6 : index
    %c0_301 = arith.constant 0 : index
    %c0_302 = arith.constant 0 : index
    %463 = vector.load %arg30[%c6_300, %c0_301, %c0_302] : memref<9x2x8xbf16, #tpu.memory_space<vmem>>, vector<1x2x8xbf16>
    %464 = vector.shape_cast %463 : vector<1x2x8xbf16> to vector<2x8xbf16>
    %cst_303 = arith.constant dense<0.000000e+00> : vector<2x32xf32>
    %465 = tpu.matmul %464, %415, %cst_303 {dimension_numbers = #tpu.dot_dimension_numbers<[1], [0], [0], [1], [0, 0, 1, 1], [], []>} : vector<2x8xbf16>, vector<8x32xbf16>, vector<2x32xf32> -> vector<2x32xf32>
    %466 = arith.truncf %465 : vector<2x32xf32> to vector<2x32xbf16>
    %c6_304 = arith.constant 6 : index
    %c0_305 = arith.constant 0 : index
    %c0_306 = arith.constant 0 : index
    %467 = vector.load %arg39[%c6_304, %c0_305, %c0_306] : memref<9x32x64xbf16, #tpu.memory_space<vmem>>, vector<1x32x64xbf16>
    %468 = vector.shape_cast %467 : vector<1x32x64xbf16> to vector<32x64xbf16>
    %cst_307 = arith.constant dense<0.000000e+00> : vector<2x64xf32>
    %469 = tpu.matmul %466, %468, %cst_307 {dimension_numbers = #tpu.dot_dimension_numbers<[1], [0], [0], [1], [0, 0, 1, 1], [], []>} : vector<2x32xbf16>, vector<32x64xbf16>, vector<2x64xf32> -> vector<2x64xf32>
    %470 = arith.addf %462, %469 : vector<2x64xf32>
    %c7_308 = arith.constant 7 : index
    %c0_309 = arith.constant 0 : index
    %c0_310 = arith.constant 0 : index
    %471 = vector.load %arg30[%c7_308, %c0_309, %c0_310] : memref<9x2x8xbf16, #tpu.memory_space<vmem>>, vector<1x2x8xbf16>
    %472 = vector.shape_cast %471 : vector<1x2x8xbf16> to vector<2x8xbf16>
    %cst_311 = arith.constant dense<0.000000e+00> : vector<2x32xf32>
    %473 = tpu.matmul %472, %415, %cst_311 {dimension_numbers = #tpu.dot_dimension_numbers<[1], [0], [0], [1], [0, 0, 1, 1], [], []>} : vector<2x8xbf16>, vector<8x32xbf16>, vector<2x32xf32> -> vector<2x32xf32>
    %474 = arith.truncf %473 : vector<2x32xf32> to vector<2x32xbf16>
    %c7_312 = arith.constant 7 : index
    %c0_313 = arith.constant 0 : index
    %c0_314 = arith.constant 0 : index
    %475 = vector.load %arg39[%c7_312, %c0_313, %c0_314] : memref<9x32x64xbf16, #tpu.memory_space<vmem>>, vector<1x32x64xbf16>
    %476 = vector.shape_cast %475 : vector<1x32x64xbf16> to vector<32x64xbf16>
    %cst_315 = arith.constant dense<0.000000e+00> : vector<2x64xf32>
    %477 = tpu.matmul %474, %476, %cst_315 {dimension_numbers = #tpu.dot_dimension_numbers<[1], [0], [0], [1], [0, 0, 1, 1], [], []>} : vector<2x32xbf16>, vector<32x64xbf16>, vector<2x64xf32> -> vector<2x64xf32>
    %478 = arith.addf %470, %477 : vector<2x64xf32>
    %c8_316 = arith.constant 8 : index
    %c0_317 = arith.constant 0 : index
    %c0_318 = arith.constant 0 : index
    %479 = vector.load %arg30[%c8_316, %c0_317, %c0_318] : memref<9x2x8xbf16, #tpu.memory_space<vmem>>, vector<1x2x8xbf16>
    %480 = vector.shape_cast %479 : vector<1x2x8xbf16> to vector<2x8xbf16>
    %cst_319 = arith.constant dense<0.000000e+00> : vector<2x32xf32>
    %481 = tpu.matmul %480, %415, %cst_319 {dimension_numbers = #tpu.dot_dimension_numbers<[1], [0], [0], [1], [0, 0, 1, 1], [], []>} : vector<2x8xbf16>, vector<8x32xbf16>, vector<2x32xf32> -> vector<2x32xf32>
    %482 = arith.truncf %481 : vector<2x32xf32> to vector<2x32xbf16>
    %c8_320 = arith.constant 8 : index
    %c0_321 = arith.constant 0 : index
    %c0_322 = arith.constant 0 : index
    %483 = vector.load %arg39[%c8_320, %c0_321, %c0_322] : memref<9x32x64xbf16, #tpu.memory_space<vmem>>, vector<1x32x64xbf16>
    %484 = vector.shape_cast %483 : vector<1x32x64xbf16> to vector<32x64xbf16>
    %cst_323 = arith.constant dense<0.000000e+00> : vector<2x64xf32>
    %485 = tpu.matmul %482, %484, %cst_323 {dimension_numbers = #tpu.dot_dimension_numbers<[1], [0], [0], [1], [0, 0, 1, 1], [], []>} : vector<2x32xbf16>, vector<32x64xbf16>, vector<2x64xf32> -> vector<2x64xf32>
    %486 = arith.addf %478, %485 : vector<2x64xf32>
    %cst_324 = arith.constant dense<0.000000e+00> : vector<64xf32>
    %487 = vector.multi_reduction <add>, %486, %cst_324 [0] : vector<2x64xf32> to vector<64xf32>
    %488 = vector.shape_cast %487 : vector<64xf32> to vector<1x64xf32>
    %cst_325 = arith.constant 2.000000e+00 : f32
    %489 = vector.broadcast %cst_325 : f32 to vector<1x64xf32>
    %490 = arith.divf %488, %489 : vector<1x64xf32>
    %491 = vector.broadcast %490 : vector<1x64xf32> to vector<2x64xf32>
    %492 = arith.subf %486, %491 : vector<2x64xf32>
    %493 = arith.mulf %492, %492 : vector<2x64xf32>
    %cst_326 = arith.constant dense<0.000000e+00> : vector<64xf32>
    %494 = vector.multi_reduction <add>, %493, %cst_326 [0] : vector<2x64xf32> to vector<64xf32>
    %495 = vector.shape_cast %494 : vector<64xf32> to vector<1x64xf32>
    %cst_327 = arith.constant 2.000000e+00 : f32
    %496 = vector.broadcast %cst_327 : f32 to vector<1x64xf32>
    %497 = arith.divf %495, %496 : vector<1x64xf32>
    %498 = vector.broadcast %490 : vector<1x64xf32> to vector<2x64xf32>
    %499 = arith.subf %486, %498 : vector<2x64xf32>
    %cst_328 = arith.constant 9.99999974E-6 : f32
    %500 = vector.broadcast %cst_328 : f32 to vector<1x64xf32>
    %501 = arith.addf %497, %500 : vector<1x64xf32>
    %502 = math.rsqrt %501 : vector<1x64xf32>
    %503 = vector.broadcast %502 : vector<1x64xf32> to vector<2x64xf32>
    %504 = arith.mulf %499, %503 : vector<2x64xf32>
    %c0_329 = arith.constant 0 : index
    %c0_330 = arith.constant 0 : index
    %505 = vector.load %arg34[%c0_329, %c0_330] : memref<1x64xf32, #tpu.memory_space<vmem>>, vector<1x64xf32>
    %506 = vector.broadcast %505 : vector<1x64xf32> to vector<2x64xf32>
    %507 = arith.mulf %504, %506 : vector<2x64xf32>
    %c0_331 = arith.constant 0 : index
    %c0_332 = arith.constant 0 : index
    %508 = vector.load %arg33[%c0_331, %c0_332] : memref<1x64xf32, #tpu.memory_space<vmem>>, vector<1x64xf32>
    %509 = vector.broadcast %508 : vector<1x64xf32> to vector<2x64xf32>
    %510 = arith.addf %507, %509 : vector<2x64xf32>
    %cst_333 = arith.constant 0.000000e+00 : f32
    %511 = vector.broadcast %cst_333 : f32 to vector<2x64xf32>
    %512 = arith.maximumf %510, %511 : vector<2x64xf32>
    %c0_334 = arith.constant 0 : index
    %c0_335 = arith.constant 0 : index
    %513 = vector.load %arg40[%c0_334, %c0_335] : memref<64x64xbf16, #tpu.memory_space<vmem>>, vector<64x64xbf16>
    %514 = arith.truncf %512 : vector<2x64xf32> to vector<2x64xbf16>
    %cst_336 = arith.constant dense<0.000000e+00> : vector<2x64xf32>
    %515 = tpu.matmul %514, %513, %cst_336 {dimension_numbers = #tpu.dot_dimension_numbers<[1], [0], [0], [1], [0, 0, 1, 1], [], []>} : vector<2x64xbf16>, vector<64x64xbf16>, vector<2x64xf32> -> vector<2x64xf32>
    %cst_337 = arith.constant dense<0.000000e+00> : vector<64xf32>
    %516 = vector.multi_reduction <add>, %515, %cst_337 [0] : vector<2x64xf32> to vector<64xf32>
    %517 = vector.shape_cast %516 : vector<64xf32> to vector<1x64xf32>
    %cst_338 = arith.constant 2.000000e+00 : f32
    %518 = vector.broadcast %cst_338 : f32 to vector<1x64xf32>
    %519 = arith.divf %517, %518 : vector<1x64xf32>
    %520 = vector.broadcast %519 : vector<1x64xf32> to vector<2x64xf32>
    %521 = arith.subf %515, %520 : vector<2x64xf32>
    %522 = arith.mulf %521, %521 : vector<2x64xf32>
    %cst_339 = arith.constant dense<0.000000e+00> : vector<64xf32>
    %523 = vector.multi_reduction <add>, %522, %cst_339 [0] : vector<2x64xf32> to vector<64xf32>
    %524 = vector.shape_cast %523 : vector<64xf32> to vector<1x64xf32>
    %cst_340 = arith.constant 2.000000e+00 : f32
    %525 = vector.broadcast %cst_340 : f32 to vector<1x64xf32>
    %526 = arith.divf %524, %525 : vector<1x64xf32>
    %527 = vector.broadcast %519 : vector<1x64xf32> to vector<2x64xf32>
    %528 = arith.subf %515, %527 : vector<2x64xf32>
    %cst_341 = arith.constant 9.99999974E-6 : f32
    %529 = vector.broadcast %cst_341 : f32 to vector<1x64xf32>
    %530 = arith.addf %526, %529 : vector<1x64xf32>
    %531 = math.rsqrt %530 : vector<1x64xf32>
    %532 = vector.broadcast %531 : vector<1x64xf32> to vector<2x64xf32>
    %533 = arith.mulf %528, %532 : vector<2x64xf32>
    %c0_342 = arith.constant 0 : index
    %c0_343 = arith.constant 0 : index
    %534 = vector.load %arg36[%c0_342, %c0_343] : memref<1x64xf32, #tpu.memory_space<vmem>>, vector<1x64xf32>
    %535 = vector.broadcast %534 : vector<1x64xf32> to vector<2x64xf32>
    %536 = arith.mulf %533, %535 : vector<2x64xf32>
    %c0_344 = arith.constant 0 : index
    %c0_345 = arith.constant 0 : index
    %537 = vector.load %arg35[%c0_344, %c0_345] : memref<1x64xf32, #tpu.memory_space<vmem>>, vector<1x64xf32>
    %538 = vector.broadcast %537 : vector<1x64xf32> to vector<2x64xf32>
    %539 = arith.addf %536, %538 : vector<2x64xf32>
    %c0_346 = arith.constant 0 : index
    %c0_347 = arith.constant 0 : index
    %540 = vector.load %arg29[%c0_346, %c0_347] : memref<2x8xf32, #tpu.memory_space<vmem>>, vector<2x8xf32>
    %cst_348 = arith.constant dense<0.000000e+00> : vector<2x32xf32>
    %541 = tpu.matmul %540, %388, %cst_348 {dimension_numbers = #tpu.dot_dimension_numbers<[1], [0], [0], [1], [0, 0, 1, 1], [], []>} : vector<2x8xf32>, vector<8x32xf32>, vector<2x32xf32> -> vector<2x32xf32>
    %c0_349 = arith.constant 0 : index
    %c0_350 = arith.constant 0 : index
    %542 = vector.load %arg41[%c0_349, %c0_350] : memref<32x64xbf16, #tpu.memory_space<vmem>>, vector<32x64xbf16>
    %543 = arith.truncf %541 : vector<2x32xf32> to vector<2x32xbf16>
    %cst_351 = arith.constant dense<0.000000e+00> : vector<2x64xf32>
    %544 = tpu.matmul %543, %542, %cst_351 {dimension_numbers = #tpu.dot_dimension_numbers<[1], [0], [0], [1], [0, 0, 1, 1], [], []>} : vector<2x32xbf16>, vector<32x64xbf16>, vector<2x64xf32> -> vector<2x64xf32>
    %cst_352 = arith.constant dense<0.000000e+00> : vector<64xf32>
    %545 = vector.multi_reduction <add>, %544, %cst_352 [0] : vector<2x64xf32> to vector<64xf32>
    %546 = vector.shape_cast %545 : vector<64xf32> to vector<1x64xf32>
    %cst_353 = arith.constant 2.000000e+00 : f32
    %547 = vector.broadcast %cst_353 : f32 to vector<1x64xf32>
    %548 = arith.divf %546, %547 : vector<1x64xf32>
    %549 = vector.broadcast %548 : vector<1x64xf32> to vector<2x64xf32>
    %550 = arith.subf %544, %549 : vector<2x64xf32>
    %551 = arith.mulf %550, %550 : vector<2x64xf32>
    %cst_354 = arith.constant dense<0.000000e+00> : vector<64xf32>
    %552 = vector.multi_reduction <add>, %551, %cst_354 [0] : vector<2x64xf32> to vector<64xf32>
    %553 = vector.shape_cast %552 : vector<64xf32> to vector<1x64xf32>
    %cst_355 = arith.constant 2.000000e+00 : f32
    %554 = vector.broadcast %cst_355 : f32 to vector<1x64xf32>
    %555 = arith.divf %553, %554 : vector<1x64xf32>
    %556 = vector.broadcast %548 : vector<1x64xf32> to vector<2x64xf32>
    %557 = arith.subf %544, %556 : vector<2x64xf32>
    %cst_356 = arith.constant 9.99999974E-6 : f32
    %558 = vector.broadcast %cst_356 : f32 to vector<1x64xf32>
    %559 = arith.addf %555, %558 : vector<1x64xf32>
    %560 = math.rsqrt %559 : vector<1x64xf32>
    %561 = vector.broadcast %560 : vector<1x64xf32> to vector<2x64xf32>
    %562 = arith.mulf %557, %561 : vector<2x64xf32>
    %c0_357 = arith.constant 0 : index
    %c0_358 = arith.constant 0 : index
    %563 = vector.load %arg38[%c0_357, %c0_358] : memref<1x64xf32, #tpu.memory_space<vmem>>, vector<1x64xf32>
    %564 = vector.broadcast %563 : vector<1x64xf32> to vector<2x64xf32>
    %565 = arith.mulf %562, %564 : vector<2x64xf32>
    %c0_359 = arith.constant 0 : index
    %c0_360 = arith.constant 0 : index
    %566 = vector.load %arg37[%c0_359, %c0_360] : memref<1x64xf32, #tpu.memory_space<vmem>>, vector<1x64xf32>
    %567 = vector.broadcast %566 : vector<1x64xf32> to vector<2x64xf32>
    %568 = arith.addf %565, %567 : vector<2x64xf32>
    %569 = arith.addf %568, %539 : vector<2x64xf32>
    %cst_361 = arith.constant dense<0.000000e+00> : vector<64xf32>
    %570 = vector.multi_reduction <add>, %569, %cst_361 [0] : vector<2x64xf32> to vector<64xf32>
    %571 = vector.shape_cast %570 : vector<64xf32> to vector<1x64xf32>
    %cst_362 = arith.constant 2.000000e+00 : f32
    %572 = vector.broadcast %cst_362 : f32 to vector<1x64xf32>
    %573 = arith.divf %571, %572 : vector<1x64xf32>
    %574 = vector.broadcast %573 : vector<1x64xf32> to vector<2x64xf32>
    %575 = arith.subf %569, %574 : vector<2x64xf32>
    %576 = arith.mulf %575, %575 : vector<2x64xf32>
    %cst_363 = arith.constant dense<0.000000e+00> : vector<64xf32>
    %577 = vector.multi_reduction <add>, %576, %cst_363 [0] : vector<2x64xf32> to vector<64xf32>
    %578 = vector.shape_cast %577 : vector<64xf32> to vector<1x64xf32>
    %cst_364 = arith.constant 2.000000e+00 : f32
    %579 = vector.broadcast %cst_364 : f32 to vector<1x64xf32>
    %580 = arith.divf %578, %579 : vector<1x64xf32>
    %581 = vector.broadcast %573 : vector<1x64xf32> to vector<2x64xf32>
    %582 = arith.subf %569, %581 : vector<2x64xf32>
    %cst_365 = arith.constant 9.99999974E-6 : f32
    %583 = vector.broadcast %cst_365 : f32 to vector<1x64xf32>
    %584 = arith.addf %580, %583 : vector<1x64xf32>
    %585 = math.rsqrt %584 : vector<1x64xf32>
    %586 = vector.broadcast %585 : vector<1x64xf32> to vector<2x64xf32>
    %587 = arith.mulf %582, %586 : vector<2x64xf32>
    %c0_366 = arith.constant 0 : index
    %c0_367 = arith.constant 0 : index
    %588 = vector.load %arg44[%c0_366, %c0_367] : memref<1x64xf32, #tpu.memory_space<vmem>>, vector<1x64xf32>
    %589 = vector.broadcast %588 : vector<1x64xf32> to vector<2x64xf32>
    %590 = arith.mulf %587, %589 : vector<2x64xf32>
    %c0_368 = arith.constant 0 : index
    %c0_369 = arith.constant 0 : index
    %591 = vector.load %arg43[%c0_368, %c0_369] : memref<1x64xf32, #tpu.memory_space<vmem>>, vector<1x64xf32>
    %592 = vector.broadcast %591 : vector<1x64xf32> to vector<2x64xf32>
    %593 = arith.addf %590, %592 : vector<2x64xf32>
    %cst_370 = arith.constant 0.000000e+00 : f32
    %594 = vector.broadcast %cst_370 : f32 to vector<2x64xf32>
    %595 = arith.maximumf %593, %594 : vector<2x64xf32>
    %596 = arith.truncf %595 : vector<2x64xf32> to vector<2x64xbf16>
    %c0_371 = arith.constant 0 : index
    %c0_372 = arith.constant 0 : index
    %c0_373 = arith.constant 0 : index
    %597 = vector.load %arg42[%c0_371, %c0_372, %c0_373] : memref<9x2x2xbf16, #tpu.memory_space<vmem>>, vector<1x2x2xbf16>
    %598 = vector.shape_cast %597 : vector<1x2x2xbf16> to vector<2x2xbf16>
    %cst_374 = arith.constant dense<0.000000e+00> : vector<2x64xf32>
    %599 = tpu.matmul %598, %596, %cst_374 {dimension_numbers = #tpu.dot_dimension_numbers<[1], [0], [0], [1], [0, 0, 1, 1], [], []>} : vector<2x2xbf16>, vector<2x64xbf16>, vector<2x64xf32> -> vector<2x64xf32>
    %600 = arith.truncf %599 : vector<2x64xf32> to vector<2x64xbf16>
    %c0_375 = arith.constant 0 : index
    %c0_376 = arith.constant 0 : index
    %c0_377 = arith.constant 0 : index
    %601 = vector.load %arg49[%c0_375, %c0_376, %c0_377] : memref<9x64x64xbf16, #tpu.memory_space<vmem>>, vector<1x64x64xbf16>
    %602 = vector.shape_cast %601 : vector<1x64x64xbf16> to vector<64x64xbf16>
    %cst_378 = arith.constant dense<0.000000e+00> : vector<2x64xf32>
    %603 = tpu.matmul %600, %602, %cst_378 {dimension_numbers = #tpu.dot_dimension_numbers<[1], [0], [0], [1], [0, 0, 1, 1], [], []>} : vector<2x64xbf16>, vector<64x64xbf16>, vector<2x64xf32> -> vector<2x64xf32>
    %c1_379 = arith.constant 1 : index
    %c0_380 = arith.constant 0 : index
    %c0_381 = arith.constant 0 : index
    %604 = vector.load %arg42[%c1_379, %c0_380, %c0_381] : memref<9x2x2xbf16, #tpu.memory_space<vmem>>, vector<1x2x2xbf16>
    %605 = vector.shape_cast %604 : vector<1x2x2xbf16> to vector<2x2xbf16>
    %cst_382 = arith.constant dense<0.000000e+00> : vector<2x64xf32>
    %606 = tpu.matmul %605, %596, %cst_382 {dimension_numbers = #tpu.dot_dimension_numbers<[1], [0], [0], [1], [0, 0, 1, 1], [], []>} : vector<2x2xbf16>, vector<2x64xbf16>, vector<2x64xf32> -> vector<2x64xf32>
    %607 = arith.truncf %606 : vector<2x64xf32> to vector<2x64xbf16>
    %c1_383 = arith.constant 1 : index
    %c0_384 = arith.constant 0 : index
    %c0_385 = arith.constant 0 : index
    %608 = vector.load %arg49[%c1_383, %c0_384, %c0_385] : memref<9x64x64xbf16, #tpu.memory_space<vmem>>, vector<1x64x64xbf16>
    %609 = vector.shape_cast %608 : vector<1x64x64xbf16> to vector<64x64xbf16>
    %cst_386 = arith.constant dense<0.000000e+00> : vector<2x64xf32>
    %610 = tpu.matmul %607, %609, %cst_386 {dimension_numbers = #tpu.dot_dimension_numbers<[1], [0], [0], [1], [0, 0, 1, 1], [], []>} : vector<2x64xbf16>, vector<64x64xbf16>, vector<2x64xf32> -> vector<2x64xf32>
    %611 = arith.addf %603, %610 : vector<2x64xf32>
    %c2_387 = arith.constant 2 : index
    %c0_388 = arith.constant 0 : index
    %c0_389 = arith.constant 0 : index
    %612 = vector.load %arg42[%c2_387, %c0_388, %c0_389] : memref<9x2x2xbf16, #tpu.memory_space<vmem>>, vector<1x2x2xbf16>
    %613 = vector.shape_cast %612 : vector<1x2x2xbf16> to vector<2x2xbf16>
    %cst_390 = arith.constant dense<0.000000e+00> : vector<2x64xf32>
    %614 = tpu.matmul %613, %596, %cst_390 {dimension_numbers = #tpu.dot_dimension_numbers<[1], [0], [0], [1], [0, 0, 1, 1], [], []>} : vector<2x2xbf16>, vector<2x64xbf16>, vector<2x64xf32> -> vector<2x64xf32>
    %615 = arith.truncf %614 : vector<2x64xf32> to vector<2x64xbf16>
    %c2_391 = arith.constant 2 : index
    %c0_392 = arith.constant 0 : index
    %c0_393 = arith.constant 0 : index
    %616 = vector.load %arg49[%c2_391, %c0_392, %c0_393] : memref<9x64x64xbf16, #tpu.memory_space<vmem>>, vector<1x64x64xbf16>
    %617 = vector.shape_cast %616 : vector<1x64x64xbf16> to vector<64x64xbf16>
    %cst_394 = arith.constant dense<0.000000e+00> : vector<2x64xf32>
    %618 = tpu.matmul %615, %617, %cst_394 {dimension_numbers = #tpu.dot_dimension_numbers<[1], [0], [0], [1], [0, 0, 1, 1], [], []>} : vector<2x64xbf16>, vector<64x64xbf16>, vector<2x64xf32> -> vector<2x64xf32>
    %619 = arith.addf %611, %618 : vector<2x64xf32>
    %c3_395 = arith.constant 3 : index
    %c0_396 = arith.constant 0 : index
    %c0_397 = arith.constant 0 : index
    %620 = vector.load %arg42[%c3_395, %c0_396, %c0_397] : memref<9x2x2xbf16, #tpu.memory_space<vmem>>, vector<1x2x2xbf16>
    %621 = vector.shape_cast %620 : vector<1x2x2xbf16> to vector<2x2xbf16>
    %cst_398 = arith.constant dense<0.000000e+00> : vector<2x64xf32>
    %622 = tpu.matmul %621, %596, %cst_398 {dimension_numbers = #tpu.dot_dimension_numbers<[1], [0], [0], [1], [0, 0, 1, 1], [], []>} : vector<2x2xbf16>, vector<2x64xbf16>, vector<2x64xf32> -> vector<2x64xf32>
    %623 = arith.truncf %622 : vector<2x64xf32> to vector<2x64xbf16>
    %c3_399 = arith.constant 3 : index
    %c0_400 = arith.constant 0 : index
    %c0_401 = arith.constant 0 : index
    %624 = vector.load %arg49[%c3_399, %c0_400, %c0_401] : memref<9x64x64xbf16, #tpu.memory_space<vmem>>, vector<1x64x64xbf16>
    %625 = vector.shape_cast %624 : vector<1x64x64xbf16> to vector<64x64xbf16>
    %cst_402 = arith.constant dense<0.000000e+00> : vector<2x64xf32>
    %626 = tpu.matmul %623, %625, %cst_402 {dimension_numbers = #tpu.dot_dimension_numbers<[1], [0], [0], [1], [0, 0, 1, 1], [], []>} : vector<2x64xbf16>, vector<64x64xbf16>, vector<2x64xf32> -> vector<2x64xf32>
    %627 = arith.addf %619, %626 : vector<2x64xf32>
    %c4_403 = arith.constant 4 : index
    %c0_404 = arith.constant 0 : index
    %c0_405 = arith.constant 0 : index
    %628 = vector.load %arg42[%c4_403, %c0_404, %c0_405] : memref<9x2x2xbf16, #tpu.memory_space<vmem>>, vector<1x2x2xbf16>
    %629 = vector.shape_cast %628 : vector<1x2x2xbf16> to vector<2x2xbf16>
    %cst_406 = arith.constant dense<0.000000e+00> : vector<2x64xf32>
    %630 = tpu.matmul %629, %596, %cst_406 {dimension_numbers = #tpu.dot_dimension_numbers<[1], [0], [0], [1], [0, 0, 1, 1], [], []>} : vector<2x2xbf16>, vector<2x64xbf16>, vector<2x64xf32> -> vector<2x64xf32>
    %631 = arith.truncf %630 : vector<2x64xf32> to vector<2x64xbf16>
    %c4_407 = arith.constant 4 : index
    %c0_408 = arith.constant 0 : index
    %c0_409 = arith.constant 0 : index
    %632 = vector.load %arg49[%c4_407, %c0_408, %c0_409] : memref<9x64x64xbf16, #tpu.memory_space<vmem>>, vector<1x64x64xbf16>
    %633 = vector.shape_cast %632 : vector<1x64x64xbf16> to vector<64x64xbf16>
    %cst_410 = arith.constant dense<0.000000e+00> : vector<2x64xf32>
    %634 = tpu.matmul %631, %633, %cst_410 {dimension_numbers = #tpu.dot_dimension_numbers<[1], [0], [0], [1], [0, 0, 1, 1], [], []>} : vector<2x64xbf16>, vector<64x64xbf16>, vector<2x64xf32> -> vector<2x64xf32>
    %635 = arith.addf %627, %634 : vector<2x64xf32>
    %c5_411 = arith.constant 5 : index
    %c0_412 = arith.constant 0 : index
    %c0_413 = arith.constant 0 : index
    %636 = vector.load %arg42[%c5_411, %c0_412, %c0_413] : memref<9x2x2xbf16, #tpu.memory_space<vmem>>, vector<1x2x2xbf16>
    %637 = vector.shape_cast %636 : vector<1x2x2xbf16> to vector<2x2xbf16>
    %cst_414 = arith.constant dense<0.000000e+00> : vector<2x64xf32>
    %638 = tpu.matmul %637, %596, %cst_414 {dimension_numbers = #tpu.dot_dimension_numbers<[1], [0], [0], [1], [0, 0, 1, 1], [], []>} : vector<2x2xbf16>, vector<2x64xbf16>, vector<2x64xf32> -> vector<2x64xf32>
    %639 = arith.truncf %638 : vector<2x64xf32> to vector<2x64xbf16>
    %c5_415 = arith.constant 5 : index
    %c0_416 = arith.constant 0 : index
    %c0_417 = arith.constant 0 : index
    %640 = vector.load %arg49[%c5_415, %c0_416, %c0_417] : memref<9x64x64xbf16, #tpu.memory_space<vmem>>, vector<1x64x64xbf16>
    %641 = vector.shape_cast %640 : vector<1x64x64xbf16> to vector<64x64xbf16>
    %cst_418 = arith.constant dense<0.000000e+00> : vector<2x64xf32>
    %642 = tpu.matmul %639, %641, %cst_418 {dimension_numbers = #tpu.dot_dimension_numbers<[1], [0], [0], [1], [0, 0, 1, 1], [], []>} : vector<2x64xbf16>, vector<64x64xbf16>, vector<2x64xf32> -> vector<2x64xf32>
    %643 = arith.addf %635, %642 : vector<2x64xf32>
    %c6_419 = arith.constant 6 : index
    %c0_420 = arith.constant 0 : index
    %c0_421 = arith.constant 0 : index
    %644 = vector.load %arg42[%c6_419, %c0_420, %c0_421] : memref<9x2x2xbf16, #tpu.memory_space<vmem>>, vector<1x2x2xbf16>
    %645 = vector.shape_cast %644 : vector<1x2x2xbf16> to vector<2x2xbf16>
    %cst_422 = arith.constant dense<0.000000e+00> : vector<2x64xf32>
    %646 = tpu.matmul %645, %596, %cst_422 {dimension_numbers = #tpu.dot_dimension_numbers<[1], [0], [0], [1], [0, 0, 1, 1], [], []>} : vector<2x2xbf16>, vector<2x64xbf16>, vector<2x64xf32> -> vector<2x64xf32>
    %647 = arith.truncf %646 : vector<2x64xf32> to vector<2x64xbf16>
    %c6_423 = arith.constant 6 : index
    %c0_424 = arith.constant 0 : index
    %c0_425 = arith.constant 0 : index
    %648 = vector.load %arg49[%c6_423, %c0_424, %c0_425] : memref<9x64x64xbf16, #tpu.memory_space<vmem>>, vector<1x64x64xbf16>
    %649 = vector.shape_cast %648 : vector<1x64x64xbf16> to vector<64x64xbf16>
    %cst_426 = arith.constant dense<0.000000e+00> : vector<2x64xf32>
    %650 = tpu.matmul %647, %649, %cst_426 {dimension_numbers = #tpu.dot_dimension_numbers<[1], [0], [0], [1], [0, 0, 1, 1], [], []>} : vector<2x64xbf16>, vector<64x64xbf16>, vector<2x64xf32> -> vector<2x64xf32>
    %651 = arith.addf %643, %650 : vector<2x64xf32>
    %c7_427 = arith.constant 7 : index
    %c0_428 = arith.constant 0 : index
    %c0_429 = arith.constant 0 : index
    %652 = vector.load %arg42[%c7_427, %c0_428, %c0_429] : memref<9x2x2xbf16, #tpu.memory_space<vmem>>, vector<1x2x2xbf16>
    %653 = vector.shape_cast %652 : vector<1x2x2xbf16> to vector<2x2xbf16>
    %cst_430 = arith.constant dense<0.000000e+00> : vector<2x64xf32>
    %654 = tpu.matmul %653, %596, %cst_430 {dimension_numbers = #tpu.dot_dimension_numbers<[1], [0], [0], [1], [0, 0, 1, 1], [], []>} : vector<2x2xbf16>, vector<2x64xbf16>, vector<2x64xf32> -> vector<2x64xf32>
    %655 = arith.truncf %654 : vector<2x64xf32> to vector<2x64xbf16>
    %c7_431 = arith.constant 7 : index
    %c0_432 = arith.constant 0 : index
    %c0_433 = arith.constant 0 : index
    %656 = vector.load %arg49[%c7_431, %c0_432, %c0_433] : memref<9x64x64xbf16, #tpu.memory_space<vmem>>, vector<1x64x64xbf16>
    %657 = vector.shape_cast %656 : vector<1x64x64xbf16> to vector<64x64xbf16>
    %cst_434 = arith.constant dense<0.000000e+00> : vector<2x64xf32>
    %658 = tpu.matmul %655, %657, %cst_434 {dimension_numbers = #tpu.dot_dimension_numbers<[1], [0], [0], [1], [0, 0, 1, 1], [], []>} : vector<2x64xbf16>, vector<64x64xbf16>, vector<2x64xf32> -> vector<2x64xf32>
    %659 = arith.addf %651, %658 : vector<2x64xf32>
    %c8_435 = arith.constant 8 : index
    %c0_436 = arith.constant 0 : index
    %c0_437 = arith.constant 0 : index
    %660 = vector.load %arg42[%c8_435, %c0_436, %c0_437] : memref<9x2x2xbf16, #tpu.memory_space<vmem>>, vector<1x2x2xbf16>
    %661 = vector.shape_cast %660 : vector<1x2x2xbf16> to vector<2x2xbf16>
    %cst_438 = arith.constant dense<0.000000e+00> : vector<2x64xf32>
    %662 = tpu.matmul %661, %596, %cst_438 {dimension_numbers = #tpu.dot_dimension_numbers<[1], [0], [0], [1], [0, 0, 1, 1], [], []>} : vector<2x2xbf16>, vector<2x64xbf16>, vector<2x64xf32> -> vector<2x64xf32>
    %663 = arith.truncf %662 : vector<2x64xf32> to vector<2x64xbf16>
    %c8_439 = arith.constant 8 : index
    %c0_440 = arith.constant 0 : index
    %c0_441 = arith.constant 0 : index
    %664 = vector.load %arg49[%c8_439, %c0_440, %c0_441] : memref<9x64x64xbf16, #tpu.memory_space<vmem>>, vector<1x64x64xbf16>
    %665 = vector.shape_cast %664 : vector<1x64x64xbf16> to vector<64x64xbf16>
    %cst_442 = arith.constant dense<0.000000e+00> : vector<2x64xf32>
    %666 = tpu.matmul %663, %665, %cst_442 {dimension_numbers = #tpu.dot_dimension_numbers<[1], [0], [0], [1], [0, 0, 1, 1], [], []>} : vector<2x64xbf16>, vector<64x64xbf16>, vector<2x64xf32> -> vector<2x64xf32>
    %667 = arith.addf %659, %666 : vector<2x64xf32>
    %cst_443 = arith.constant dense<0.000000e+00> : vector<64xf32>
    %668 = vector.multi_reduction <add>, %667, %cst_443 [0] : vector<2x64xf32> to vector<64xf32>
    %669 = vector.shape_cast %668 : vector<64xf32> to vector<1x64xf32>
    %cst_444 = arith.constant 2.000000e+00 : f32
    %670 = vector.broadcast %cst_444 : f32 to vector<1x64xf32>
    %671 = arith.divf %669, %670 : vector<1x64xf32>
    %672 = vector.broadcast %671 : vector<1x64xf32> to vector<2x64xf32>
    %673 = arith.subf %667, %672 : vector<2x64xf32>
    %674 = arith.mulf %673, %673 : vector<2x64xf32>
    %cst_445 = arith.constant dense<0.000000e+00> : vector<64xf32>
    %675 = vector.multi_reduction <add>, %674, %cst_445 [0] : vector<2x64xf32> to vector<64xf32>
    %676 = vector.shape_cast %675 : vector<64xf32> to vector<1x64xf32>
    %cst_446 = arith.constant 2.000000e+00 : f32
    %677 = vector.broadcast %cst_446 : f32 to vector<1x64xf32>
    %678 = arith.divf %676, %677 : vector<1x64xf32>
    %679 = vector.broadcast %671 : vector<1x64xf32> to vector<2x64xf32>
    %680 = arith.subf %667, %679 : vector<2x64xf32>
    %cst_447 = arith.constant 9.99999974E-6 : f32
    %681 = vector.broadcast %cst_447 : f32 to vector<1x64xf32>
    %682 = arith.addf %678, %681 : vector<1x64xf32>
    %683 = math.rsqrt %682 : vector<1x64xf32>
    %684 = vector.broadcast %683 : vector<1x64xf32> to vector<2x64xf32>
    %685 = arith.mulf %680, %684 : vector<2x64xf32>
    %c0_448 = arith.constant 0 : index
    %c0_449 = arith.constant 0 : index
    %686 = vector.load %arg46[%c0_448, %c0_449] : memref<1x64xf32, #tpu.memory_space<vmem>>, vector<1x64xf32>
    %687 = vector.broadcast %686 : vector<1x64xf32> to vector<2x64xf32>
    %688 = arith.mulf %685, %687 : vector<2x64xf32>
    %c0_450 = arith.constant 0 : index
    %c0_451 = arith.constant 0 : index
    %689 = vector.load %arg45[%c0_450, %c0_451] : memref<1x64xf32, #tpu.memory_space<vmem>>, vector<1x64xf32>
    %690 = vector.broadcast %689 : vector<1x64xf32> to vector<2x64xf32>
    %691 = arith.addf %688, %690 : vector<2x64xf32>
    %cst_452 = arith.constant 0.000000e+00 : f32
    %692 = vector.broadcast %cst_452 : f32 to vector<2x64xf32>
    %693 = arith.maximumf %691, %692 : vector<2x64xf32>
    %c0_453 = arith.constant 0 : index
    %c0_454 = arith.constant 0 : index
    %694 = vector.load %arg50[%c0_453, %c0_454] : memref<64x64xbf16, #tpu.memory_space<vmem>>, vector<64x64xbf16>
    %695 = arith.truncf %693 : vector<2x64xf32> to vector<2x64xbf16>
    %cst_455 = arith.constant dense<0.000000e+00> : vector<2x64xf32>
    %696 = tpu.matmul %695, %694, %cst_455 {dimension_numbers = #tpu.dot_dimension_numbers<[1], [0], [0], [1], [0, 0, 1, 1], [], []>} : vector<2x64xbf16>, vector<64x64xbf16>, vector<2x64xf32> -> vector<2x64xf32>
    %cst_456 = arith.constant dense<0.000000e+00> : vector<64xf32>
    %697 = vector.multi_reduction <add>, %696, %cst_456 [0] : vector<2x64xf32> to vector<64xf32>
    %698 = vector.shape_cast %697 : vector<64xf32> to vector<1x64xf32>
    %cst_457 = arith.constant 2.000000e+00 : f32
    %699 = vector.broadcast %cst_457 : f32 to vector<1x64xf32>
    %700 = arith.divf %698, %699 : vector<1x64xf32>
    %701 = vector.broadcast %700 : vector<1x64xf32> to vector<2x64xf32>
    %702 = arith.subf %696, %701 : vector<2x64xf32>
    %703 = arith.mulf %702, %702 : vector<2x64xf32>
    %cst_458 = arith.constant dense<0.000000e+00> : vector<64xf32>
    %704 = vector.multi_reduction <add>, %703, %cst_458 [0] : vector<2x64xf32> to vector<64xf32>
    %705 = vector.shape_cast %704 : vector<64xf32> to vector<1x64xf32>
    %cst_459 = arith.constant 2.000000e+00 : f32
    %706 = vector.broadcast %cst_459 : f32 to vector<1x64xf32>
    %707 = arith.divf %705, %706 : vector<1x64xf32>
    %708 = vector.broadcast %700 : vector<1x64xf32> to vector<2x64xf32>
    %709 = arith.subf %696, %708 : vector<2x64xf32>
    %cst_460 = arith.constant 9.99999974E-6 : f32
    %710 = vector.broadcast %cst_460 : f32 to vector<1x64xf32>
    %711 = arith.addf %707, %710 : vector<1x64xf32>
    %712 = math.rsqrt %711 : vector<1x64xf32>
    %713 = vector.broadcast %712 : vector<1x64xf32> to vector<2x64xf32>
    %714 = arith.mulf %709, %713 : vector<2x64xf32>
    %c0_461 = arith.constant 0 : index
    %c0_462 = arith.constant 0 : index
    %715 = vector.load %arg48[%c0_461, %c0_462] : memref<1x64xf32, #tpu.memory_space<vmem>>, vector<1x64xf32>
    %716 = vector.broadcast %715 : vector<1x64xf32> to vector<2x64xf32>
    %717 = arith.mulf %714, %716 : vector<2x64xf32>
    %c0_463 = arith.constant 0 : index
    %c0_464 = arith.constant 0 : index
    %718 = vector.load %arg47[%c0_463, %c0_464] : memref<1x64xf32, #tpu.memory_space<vmem>>, vector<1x64xf32>
    %719 = vector.broadcast %718 : vector<1x64xf32> to vector<2x64xf32>
    %720 = arith.addf %717, %719 : vector<2x64xf32>
    %721 = arith.addf %569, %720 : vector<2x64xf32>
    %cst_465 = arith.constant dense<0.000000e+00> : vector<64xf32>
    %722 = vector.multi_reduction <add>, %721, %cst_465 [0] : vector<2x64xf32> to vector<64xf32>
    %723 = vector.shape_cast %722 : vector<64xf32> to vector<1x64xf32>
    %cst_466 = arith.constant 2.000000e+00 : f32
    %724 = vector.broadcast %cst_466 : f32 to vector<1x64xf32>
    %725 = arith.divf %723, %724 : vector<1x64xf32>
    %726 = vector.broadcast %725 : vector<1x64xf32> to vector<2x64xf32>
    %727 = arith.subf %721, %726 : vector<2x64xf32>
    %728 = arith.mulf %727, %727 : vector<2x64xf32>
    %cst_467 = arith.constant dense<0.000000e+00> : vector<64xf32>
    %729 = vector.multi_reduction <add>, %728, %cst_467 [0] : vector<2x64xf32> to vector<64xf32>
    %730 = vector.shape_cast %729 : vector<64xf32> to vector<1x64xf32>
    %cst_468 = arith.constant 2.000000e+00 : f32
    %731 = vector.broadcast %cst_468 : f32 to vector<1x64xf32>
    %732 = arith.divf %730, %731 : vector<1x64xf32>
    %733 = vector.broadcast %725 : vector<1x64xf32> to vector<2x64xf32>
    %734 = arith.subf %721, %733 : vector<2x64xf32>
    %cst_469 = arith.constant 9.99999974E-6 : f32
    %735 = vector.broadcast %cst_469 : f32 to vector<1x64xf32>
    %736 = arith.addf %732, %735 : vector<1x64xf32>
    %737 = math.rsqrt %736 : vector<1x64xf32>
    %738 = vector.broadcast %737 : vector<1x64xf32> to vector<2x64xf32>
    %739 = arith.mulf %734, %738 : vector<2x64xf32>
    %c0_470 = arith.constant 0 : index
    %c0_471 = arith.constant 0 : index
    %740 = vector.load %arg53[%c0_470, %c0_471] : memref<1x64xf32, #tpu.memory_space<vmem>>, vector<1x64xf32>
    %741 = vector.broadcast %740 : vector<1x64xf32> to vector<2x64xf32>
    %742 = arith.mulf %739, %741 : vector<2x64xf32>
    %c0_472 = arith.constant 0 : index
    %c0_473 = arith.constant 0 : index
    %743 = vector.load %arg52[%c0_472, %c0_473] : memref<1x64xf32, #tpu.memory_space<vmem>>, vector<1x64xf32>
    %744 = vector.broadcast %743 : vector<1x64xf32> to vector<2x64xf32>
    %745 = arith.addf %742, %744 : vector<2x64xf32>
    %cst_474 = arith.constant 0.000000e+00 : f32
    %746 = vector.broadcast %cst_474 : f32 to vector<2x64xf32>
    %747 = arith.maximumf %745, %746 : vector<2x64xf32>
    %748 = arith.truncf %747 : vector<2x64xf32> to vector<2x64xbf16>
    %c0_475 = arith.constant 0 : index
    %c0_476 = arith.constant 0 : index
    %c0_477 = arith.constant 0 : index
    %749 = vector.load %arg51[%c0_475, %c0_476, %c0_477] : memref<9x2x2xbf16, #tpu.memory_space<vmem>>, vector<1x2x2xbf16>
    %750 = vector.shape_cast %749 : vector<1x2x2xbf16> to vector<2x2xbf16>
    %cst_478 = arith.constant dense<0.000000e+00> : vector<2x64xf32>
    %751 = tpu.matmul %750, %748, %cst_478 {dimension_numbers = #tpu.dot_dimension_numbers<[1], [0], [0], [1], [0, 0, 1, 1], [], []>} : vector<2x2xbf16>, vector<2x64xbf16>, vector<2x64xf32> -> vector<2x64xf32>
    %752 = arith.truncf %751 : vector<2x64xf32> to vector<2x64xbf16>
    %c0_479 = arith.constant 0 : index
    %c0_480 = arith.constant 0 : index
    %c0_481 = arith.constant 0 : index
    %753 = vector.load %arg58[%c0_479, %c0_480, %c0_481] : memref<9x64x64xbf16, #tpu.memory_space<vmem>>, vector<1x64x64xbf16>
    %754 = vector.shape_cast %753 : vector<1x64x64xbf16> to vector<64x64xbf16>
    %cst_482 = arith.constant dense<0.000000e+00> : vector<2x64xf32>
    %755 = tpu.matmul %752, %754, %cst_482 {dimension_numbers = #tpu.dot_dimension_numbers<[1], [0], [0], [1], [0, 0, 1, 1], [], []>} : vector<2x64xbf16>, vector<64x64xbf16>, vector<2x64xf32> -> vector<2x64xf32>
    %c1_483 = arith.constant 1 : index
    %c0_484 = arith.constant 0 : index
    %c0_485 = arith.constant 0 : index
    %756 = vector.load %arg51[%c1_483, %c0_484, %c0_485] : memref<9x2x2xbf16, #tpu.memory_space<vmem>>, vector<1x2x2xbf16>
    %757 = vector.shape_cast %756 : vector<1x2x2xbf16> to vector<2x2xbf16>
    %cst_486 = arith.constant dense<0.000000e+00> : vector<2x64xf32>
    %758 = tpu.matmul %757, %748, %cst_486 {dimension_numbers = #tpu.dot_dimension_numbers<[1], [0], [0], [1], [0, 0, 1, 1], [], []>} : vector<2x2xbf16>, vector<2x64xbf16>, vector<2x64xf32> -> vector<2x64xf32>
    %759 = arith.truncf %758 : vector<2x64xf32> to vector<2x64xbf16>
    %c1_487 = arith.constant 1 : index
    %c0_488 = arith.constant 0 : index
    %c0_489 = arith.constant 0 : index
    %760 = vector.load %arg58[%c1_487, %c0_488, %c0_489] : memref<9x64x64xbf16, #tpu.memory_space<vmem>>, vector<1x64x64xbf16>
    %761 = vector.shape_cast %760 : vector<1x64x64xbf16> to vector<64x64xbf16>
    %cst_490 = arith.constant dense<0.000000e+00> : vector<2x64xf32>
    %762 = tpu.matmul %759, %761, %cst_490 {dimension_numbers = #tpu.dot_dimension_numbers<[1], [0], [0], [1], [0, 0, 1, 1], [], []>} : vector<2x64xbf16>, vector<64x64xbf16>, vector<2x64xf32> -> vector<2x64xf32>
    %763 = arith.addf %755, %762 : vector<2x64xf32>
    %c2_491 = arith.constant 2 : index
    %c0_492 = arith.constant 0 : index
    %c0_493 = arith.constant 0 : index
    %764 = vector.load %arg51[%c2_491, %c0_492, %c0_493] : memref<9x2x2xbf16, #tpu.memory_space<vmem>>, vector<1x2x2xbf16>
    %765 = vector.shape_cast %764 : vector<1x2x2xbf16> to vector<2x2xbf16>
    %cst_494 = arith.constant dense<0.000000e+00> : vector<2x64xf32>
    %766 = tpu.matmul %765, %748, %cst_494 {dimension_numbers = #tpu.dot_dimension_numbers<[1], [0], [0], [1], [0, 0, 1, 1], [], []>} : vector<2x2xbf16>, vector<2x64xbf16>, vector<2x64xf32> -> vector<2x64xf32>
    %767 = arith.truncf %766 : vector<2x64xf32> to vector<2x64xbf16>
    %c2_495 = arith.constant 2 : index
    %c0_496 = arith.constant 0 : index
    %c0_497 = arith.constant 0 : index
    %768 = vector.load %arg58[%c2_495, %c0_496, %c0_497] : memref<9x64x64xbf16, #tpu.memory_space<vmem>>, vector<1x64x64xbf16>
    %769 = vector.shape_cast %768 : vector<1x64x64xbf16> to vector<64x64xbf16>
    %cst_498 = arith.constant dense<0.000000e+00> : vector<2x64xf32>
    %770 = tpu.matmul %767, %769, %cst_498 {dimension_numbers = #tpu.dot_dimension_numbers<[1], [0], [0], [1], [0, 0, 1, 1], [], []>} : vector<2x64xbf16>, vector<64x64xbf16>, vector<2x64xf32> -> vector<2x64xf32>
    %771 = arith.addf %763, %770 : vector<2x64xf32>
    %c3_499 = arith.constant 3 : index
    %c0_500 = arith.constant 0 : index
    %c0_501 = arith.constant 0 : index
    %772 = vector.load %arg51[%c3_499, %c0_500, %c0_501] : memref<9x2x2xbf16, #tpu.memory_space<vmem>>, vector<1x2x2xbf16>
    %773 = vector.shape_cast %772 : vector<1x2x2xbf16> to vector<2x2xbf16>
    %cst_502 = arith.constant dense<0.000000e+00> : vector<2x64xf32>
    %774 = tpu.matmul %773, %748, %cst_502 {dimension_numbers = #tpu.dot_dimension_numbers<[1], [0], [0], [1], [0, 0, 1, 1], [], []>} : vector<2x2xbf16>, vector<2x64xbf16>, vector<2x64xf32> -> vector<2x64xf32>
    %775 = arith.truncf %774 : vector<2x64xf32> to vector<2x64xbf16>
    %c3_503 = arith.constant 3 : index
    %c0_504 = arith.constant 0 : index
    %c0_505 = arith.constant 0 : index
    %776 = vector.load %arg58[%c3_503, %c0_504, %c0_505] : memref<9x64x64xbf16, #tpu.memory_space<vmem>>, vector<1x64x64xbf16>
    %777 = vector.shape_cast %776 : vector<1x64x64xbf16> to vector<64x64xbf16>
    %cst_506 = arith.constant dense<0.000000e+00> : vector<2x64xf32>
    %778 = tpu.matmul %775, %777, %cst_506 {dimension_numbers = #tpu.dot_dimension_numbers<[1], [0], [0], [1], [0, 0, 1, 1], [], []>} : vector<2x64xbf16>, vector<64x64xbf16>, vector<2x64xf32> -> vector<2x64xf32>
    %779 = arith.addf %771, %778 : vector<2x64xf32>
    %c4_507 = arith.constant 4 : index
    %c0_508 = arith.constant 0 : index
    %c0_509 = arith.constant 0 : index
    %780 = vector.load %arg51[%c4_507, %c0_508, %c0_509] : memref<9x2x2xbf16, #tpu.memory_space<vmem>>, vector<1x2x2xbf16>
    %781 = vector.shape_cast %780 : vector<1x2x2xbf16> to vector<2x2xbf16>
    %cst_510 = arith.constant dense<0.000000e+00> : vector<2x64xf32>
    %782 = tpu.matmul %781, %748, %cst_510 {dimension_numbers = #tpu.dot_dimension_numbers<[1], [0], [0], [1], [0, 0, 1, 1], [], []>} : vector<2x2xbf16>, vector<2x64xbf16>, vector<2x64xf32> -> vector<2x64xf32>
    %783 = arith.truncf %782 : vector<2x64xf32> to vector<2x64xbf16>
    %c4_511 = arith.constant 4 : index
    %c0_512 = arith.constant 0 : index
    %c0_513 = arith.constant 0 : index
    %784 = vector.load %arg58[%c4_511, %c0_512, %c0_513] : memref<9x64x64xbf16, #tpu.memory_space<vmem>>, vector<1x64x64xbf16>
    %785 = vector.shape_cast %784 : vector<1x64x64xbf16> to vector<64x64xbf16>
    %cst_514 = arith.constant dense<0.000000e+00> : vector<2x64xf32>
    %786 = tpu.matmul %783, %785, %cst_514 {dimension_numbers = #tpu.dot_dimension_numbers<[1], [0], [0], [1], [0, 0, 1, 1], [], []>} : vector<2x64xbf16>, vector<64x64xbf16>, vector<2x64xf32> -> vector<2x64xf32>
    %787 = arith.addf %779, %786 : vector<2x64xf32>
    %c5_515 = arith.constant 5 : index
    %c0_516 = arith.constant 0 : index
    %c0_517 = arith.constant 0 : index
    %788 = vector.load %arg51[%c5_515, %c0_516, %c0_517] : memref<9x2x2xbf16, #tpu.memory_space<vmem>>, vector<1x2x2xbf16>
    %789 = vector.shape_cast %788 : vector<1x2x2xbf16> to vector<2x2xbf16>
    %cst_518 = arith.constant dense<0.000000e+00> : vector<2x64xf32>
    %790 = tpu.matmul %789, %748, %cst_518 {dimension_numbers = #tpu.dot_dimension_numbers<[1], [0], [0], [1], [0, 0, 1, 1], [], []>} : vector<2x2xbf16>, vector<2x64xbf16>, vector<2x64xf32> -> vector<2x64xf32>
    %791 = arith.truncf %790 : vector<2x64xf32> to vector<2x64xbf16>
    %c5_519 = arith.constant 5 : index
    %c0_520 = arith.constant 0 : index
    %c0_521 = arith.constant 0 : index
    %792 = vector.load %arg58[%c5_519, %c0_520, %c0_521] : memref<9x64x64xbf16, #tpu.memory_space<vmem>>, vector<1x64x64xbf16>
    %793 = vector.shape_cast %792 : vector<1x64x64xbf16> to vector<64x64xbf16>
    %cst_522 = arith.constant dense<0.000000e+00> : vector<2x64xf32>
    %794 = tpu.matmul %791, %793, %cst_522 {dimension_numbers = #tpu.dot_dimension_numbers<[1], [0], [0], [1], [0, 0, 1, 1], [], []>} : vector<2x64xbf16>, vector<64x64xbf16>, vector<2x64xf32> -> vector<2x64xf32>
    %795 = arith.addf %787, %794 : vector<2x64xf32>
    %c6_523 = arith.constant 6 : index
    %c0_524 = arith.constant 0 : index
    %c0_525 = arith.constant 0 : index
    %796 = vector.load %arg51[%c6_523, %c0_524, %c0_525] : memref<9x2x2xbf16, #tpu.memory_space<vmem>>, vector<1x2x2xbf16>
    %797 = vector.shape_cast %796 : vector<1x2x2xbf16> to vector<2x2xbf16>
    %cst_526 = arith.constant dense<0.000000e+00> : vector<2x64xf32>
    %798 = tpu.matmul %797, %748, %cst_526 {dimension_numbers = #tpu.dot_dimension_numbers<[1], [0], [0], [1], [0, 0, 1, 1], [], []>} : vector<2x2xbf16>, vector<2x64xbf16>, vector<2x64xf32> -> vector<2x64xf32>
    %799 = arith.truncf %798 : vector<2x64xf32> to vector<2x64xbf16>
    %c6_527 = arith.constant 6 : index
    %c0_528 = arith.constant 0 : index
    %c0_529 = arith.constant 0 : index
    %800 = vector.load %arg58[%c6_527, %c0_528, %c0_529] : memref<9x64x64xbf16, #tpu.memory_space<vmem>>, vector<1x64x64xbf16>
    %801 = vector.shape_cast %800 : vector<1x64x64xbf16> to vector<64x64xbf16>
    %cst_530 = arith.constant dense<0.000000e+00> : vector<2x64xf32>
    %802 = tpu.matmul %799, %801, %cst_530 {dimension_numbers = #tpu.dot_dimension_numbers<[1], [0], [0], [1], [0, 0, 1, 1], [], []>} : vector<2x64xbf16>, vector<64x64xbf16>, vector<2x64xf32> -> vector<2x64xf32>
    %803 = arith.addf %795, %802 : vector<2x64xf32>
    %c7_531 = arith.constant 7 : index
    %c0_532 = arith.constant 0 : index
    %c0_533 = arith.constant 0 : index
    %804 = vector.load %arg51[%c7_531, %c0_532, %c0_533] : memref<9x2x2xbf16, #tpu.memory_space<vmem>>, vector<1x2x2xbf16>
    %805 = vector.shape_cast %804 : vector<1x2x2xbf16> to vector<2x2xbf16>
    %cst_534 = arith.constant dense<0.000000e+00> : vector<2x64xf32>
    %806 = tpu.matmul %805, %748, %cst_534 {dimension_numbers = #tpu.dot_dimension_numbers<[1], [0], [0], [1], [0, 0, 1, 1], [], []>} : vector<2x2xbf16>, vector<2x64xbf16>, vector<2x64xf32> -> vector<2x64xf32>
    %807 = arith.truncf %806 : vector<2x64xf32> to vector<2x64xbf16>
    %c7_535 = arith.constant 7 : index
    %c0_536 = arith.constant 0 : index
    %c0_537 = arith.constant 0 : index
    %808 = vector.load %arg58[%c7_535, %c0_536, %c0_537] : memref<9x64x64xbf16, #tpu.memory_space<vmem>>, vector<1x64x64xbf16>
    %809 = vector.shape_cast %808 : vector<1x64x64xbf16> to vector<64x64xbf16>
    %cst_538 = arith.constant dense<0.000000e+00> : vector<2x64xf32>
    %810 = tpu.matmul %807, %809, %cst_538 {dimension_numbers = #tpu.dot_dimension_numbers<[1], [0], [0], [1], [0, 0, 1, 1], [], []>} : vector<2x64xbf16>, vector<64x64xbf16>, vector<2x64xf32> -> vector<2x64xf32>
    %811 = arith.addf %803, %810 : vector<2x64xf32>
    %c8_539 = arith.constant 8 : index
    %c0_540 = arith.constant 0 : index
    %c0_541 = arith.constant 0 : index
    %812 = vector.load %arg51[%c8_539, %c0_540, %c0_541] : memref<9x2x2xbf16, #tpu.memory_space<vmem>>, vector<1x2x2xbf16>
    %813 = vector.shape_cast %812 : vector<1x2x2xbf16> to vector<2x2xbf16>
    %cst_542 = arith.constant dense<0.000000e+00> : vector<2x64xf32>
    %814 = tpu.matmul %813, %748, %cst_542 {dimension_numbers = #tpu.dot_dimension_numbers<[1], [0], [0], [1], [0, 0, 1, 1], [], []>} : vector<2x2xbf16>, vector<2x64xbf16>, vector<2x64xf32> -> vector<2x64xf32>
    %815 = arith.truncf %814 : vector<2x64xf32> to vector<2x64xbf16>
    %c8_543 = arith.constant 8 : index
    %c0_544 = arith.constant 0 : index
    %c0_545 = arith.constant 0 : index
    %816 = vector.load %arg58[%c8_543, %c0_544, %c0_545] : memref<9x64x64xbf16, #tpu.memory_space<vmem>>, vector<1x64x64xbf16>
    %817 = vector.shape_cast %816 : vector<1x64x64xbf16> to vector<64x64xbf16>
    %cst_546 = arith.constant dense<0.000000e+00> : vector<2x64xf32>
    %818 = tpu.matmul %815, %817, %cst_546 {dimension_numbers = #tpu.dot_dimension_numbers<[1], [0], [0], [1], [0, 0, 1, 1], [], []>} : vector<2x64xbf16>, vector<64x64xbf16>, vector<2x64xf32> -> vector<2x64xf32>
    %819 = arith.addf %811, %818 : vector<2x64xf32>
    %cst_547 = arith.constant dense<0.000000e+00> : vector<64xf32>
    %820 = vector.multi_reduction <add>, %819, %cst_547 [0] : vector<2x64xf32> to vector<64xf32>
    %821 = vector.shape_cast %820 : vector<64xf32> to vector<1x64xf32>
    %cst_548 = arith.constant 2.000000e+00 : f32
    %822 = vector.broadcast %cst_548 : f32 to vector<1x64xf32>
    %823 = arith.divf %821, %822 : vector<1x64xf32>
    %824 = vector.broadcast %823 : vector<1x64xf32> to vector<2x64xf32>
    %825 = arith.subf %819, %824 : vector<2x64xf32>
    %826 = arith.mulf %825, %825 : vector<2x64xf32>
    %cst_549 = arith.constant dense<0.000000e+00> : vector<64xf32>
    %827 = vector.multi_reduction <add>, %826, %cst_549 [0] : vector<2x64xf32> to vector<64xf32>
    %828 = vector.shape_cast %827 : vector<64xf32> to vector<1x64xf32>
    %cst_550 = arith.constant 2.000000e+00 : f32
    %829 = vector.broadcast %cst_550 : f32 to vector<1x64xf32>
    %830 = arith.divf %828, %829 : vector<1x64xf32>
    %831 = vector.broadcast %823 : vector<1x64xf32> to vector<2x64xf32>
    %832 = arith.subf %819, %831 : vector<2x64xf32>
    %cst_551 = arith.constant 9.99999974E-6 : f32
    %833 = vector.broadcast %cst_551 : f32 to vector<1x64xf32>
    %834 = arith.addf %830, %833 : vector<1x64xf32>
    %835 = math.rsqrt %834 : vector<1x64xf32>
    %836 = vector.broadcast %835 : vector<1x64xf32> to vector<2x64xf32>
    %837 = arith.mulf %832, %836 : vector<2x64xf32>
    %c0_552 = arith.constant 0 : index
    %c0_553 = arith.constant 0 : index
    %838 = vector.load %arg55[%c0_552, %c0_553] : memref<1x64xf32, #tpu.memory_space<vmem>>, vector<1x64xf32>
    %839 = vector.broadcast %838 : vector<1x64xf32> to vector<2x64xf32>
    %840 = arith.mulf %837, %839 : vector<2x64xf32>
    %c0_554 = arith.constant 0 : index
    %c0_555 = arith.constant 0 : index
    %841 = vector.load %arg54[%c0_554, %c0_555] : memref<1x64xf32, #tpu.memory_space<vmem>>, vector<1x64xf32>
    %842 = vector.broadcast %841 : vector<1x64xf32> to vector<2x64xf32>
    %843 = arith.addf %840, %842 : vector<2x64xf32>
    %cst_556 = arith.constant 0.000000e+00 : f32
    %844 = vector.broadcast %cst_556 : f32 to vector<2x64xf32>
    %845 = arith.maximumf %843, %844 : vector<2x64xf32>
    %c0_557 = arith.constant 0 : index
    %c0_558 = arith.constant 0 : index
    %846 = vector.load %arg59[%c0_557, %c0_558] : memref<64x64xbf16, #tpu.memory_space<vmem>>, vector<64x64xbf16>
    %847 = arith.truncf %845 : vector<2x64xf32> to vector<2x64xbf16>
    %cst_559 = arith.constant dense<0.000000e+00> : vector<2x64xf32>
    %848 = tpu.matmul %847, %846, %cst_559 {dimension_numbers = #tpu.dot_dimension_numbers<[1], [0], [0], [1], [0, 0, 1, 1], [], []>} : vector<2x64xbf16>, vector<64x64xbf16>, vector<2x64xf32> -> vector<2x64xf32>
    %cst_560 = arith.constant dense<0.000000e+00> : vector<64xf32>
    %849 = vector.multi_reduction <add>, %848, %cst_560 [0] : vector<2x64xf32> to vector<64xf32>
    %850 = vector.shape_cast %849 : vector<64xf32> to vector<1x64xf32>
    %cst_561 = arith.constant 2.000000e+00 : f32
    %851 = vector.broadcast %cst_561 : f32 to vector<1x64xf32>
    %852 = arith.divf %850, %851 : vector<1x64xf32>
    %853 = vector.broadcast %852 : vector<1x64xf32> to vector<2x64xf32>
    %854 = arith.subf %848, %853 : vector<2x64xf32>
    %855 = arith.mulf %854, %854 : vector<2x64xf32>
    %cst_562 = arith.constant dense<0.000000e+00> : vector<64xf32>
    %856 = vector.multi_reduction <add>, %855, %cst_562 [0] : vector<2x64xf32> to vector<64xf32>
    %857 = vector.shape_cast %856 : vector<64xf32> to vector<1x64xf32>
    %cst_563 = arith.constant 2.000000e+00 : f32
    %858 = vector.broadcast %cst_563 : f32 to vector<1x64xf32>
    %859 = arith.divf %857, %858 : vector<1x64xf32>
    %860 = vector.broadcast %852 : vector<1x64xf32> to vector<2x64xf32>
    %861 = arith.subf %848, %860 : vector<2x64xf32>
    %cst_564 = arith.constant 9.99999974E-6 : f32
    %862 = vector.broadcast %cst_564 : f32 to vector<1x64xf32>
    %863 = arith.addf %859, %862 : vector<1x64xf32>
    %864 = math.rsqrt %863 : vector<1x64xf32>
    %865 = vector.broadcast %864 : vector<1x64xf32> to vector<2x64xf32>
    %866 = arith.mulf %861, %865 : vector<2x64xf32>
    %c0_565 = arith.constant 0 : index
    %c0_566 = arith.constant 0 : index
    %867 = vector.load %arg57[%c0_565, %c0_566] : memref<1x64xf32, #tpu.memory_space<vmem>>, vector<1x64xf32>
    %868 = vector.broadcast %867 : vector<1x64xf32> to vector<2x64xf32>
    %869 = arith.mulf %866, %868 : vector<2x64xf32>
    %c0_567 = arith.constant 0 : index
    %c0_568 = arith.constant 0 : index
    %870 = vector.load %arg56[%c0_567, %c0_568] : memref<1x64xf32, #tpu.memory_space<vmem>>, vector<1x64xf32>
    %871 = vector.broadcast %870 : vector<1x64xf32> to vector<2x64xf32>
    %872 = arith.addf %869, %871 : vector<2x64xf32>
    %873 = arith.addf %721, %872 : vector<2x64xf32>
    %cst_569 = arith.constant dense<0.000000e+00> : vector<64xf32>
    %874 = vector.multi_reduction <add>, %873, %cst_569 [0] : vector<2x64xf32> to vector<64xf32>
    %875 = vector.shape_cast %874 : vector<64xf32> to vector<1x64xf32>
    %cst_570 = arith.constant 2.000000e+00 : f32
    %876 = vector.broadcast %cst_570 : f32 to vector<1x64xf32>
    %877 = arith.divf %875, %876 : vector<1x64xf32>
    %878 = vector.broadcast %877 : vector<1x64xf32> to vector<2x64xf32>
    %879 = arith.subf %873, %878 : vector<2x64xf32>
    %880 = arith.mulf %879, %879 : vector<2x64xf32>
    %cst_571 = arith.constant dense<0.000000e+00> : vector<64xf32>
    %881 = vector.multi_reduction <add>, %880, %cst_571 [0] : vector<2x64xf32> to vector<64xf32>
    %882 = vector.shape_cast %881 : vector<64xf32> to vector<1x64xf32>
    %cst_572 = arith.constant 2.000000e+00 : f32
    %883 = vector.broadcast %cst_572 : f32 to vector<1x64xf32>
    %884 = arith.divf %882, %883 : vector<1x64xf32>
    %885 = vector.broadcast %877 : vector<1x64xf32> to vector<2x64xf32>
    %886 = arith.subf %873, %885 : vector<2x64xf32>
    %cst_573 = arith.constant 9.99999974E-6 : f32
    %887 = vector.broadcast %cst_573 : f32 to vector<1x64xf32>
    %888 = arith.addf %884, %887 : vector<1x64xf32>
    %889 = math.rsqrt %888 : vector<1x64xf32>
    %890 = vector.broadcast %889 : vector<1x64xf32> to vector<2x64xf32>
    %891 = arith.mulf %886, %890 : vector<2x64xf32>
    %c0_574 = arith.constant 0 : index
    %c0_575 = arith.constant 0 : index
    %892 = vector.load %arg62[%c0_574, %c0_575] : memref<1x64xf32, #tpu.memory_space<vmem>>, vector<1x64xf32>
    %893 = vector.broadcast %892 : vector<1x64xf32> to vector<2x64xf32>
    %894 = arith.mulf %891, %893 : vector<2x64xf32>
    %c0_576 = arith.constant 0 : index
    %c0_577 = arith.constant 0 : index
    %895 = vector.load %arg61[%c0_576, %c0_577] : memref<1x64xf32, #tpu.memory_space<vmem>>, vector<1x64xf32>
    %896 = vector.broadcast %895 : vector<1x64xf32> to vector<2x64xf32>
    %897 = arith.addf %894, %896 : vector<2x64xf32>
    %cst_578 = arith.constant 0.000000e+00 : f32
    %898 = vector.broadcast %cst_578 : f32 to vector<2x64xf32>
    %899 = arith.maximumf %897, %898 : vector<2x64xf32>
    %900 = arith.truncf %899 : vector<2x64xf32> to vector<2x64xbf16>
    %c0_579 = arith.constant 0 : index
    %c0_580 = arith.constant 0 : index
    %c0_581 = arith.constant 0 : index
    %901 = vector.load %arg60[%c0_579, %c0_580, %c0_581] : memref<9x2x2xbf16, #tpu.memory_space<vmem>>, vector<1x2x2xbf16>
    %902 = vector.shape_cast %901 : vector<1x2x2xbf16> to vector<2x2xbf16>
    %cst_582 = arith.constant dense<0.000000e+00> : vector<2x64xf32>
    %903 = tpu.matmul %902, %900, %cst_582 {dimension_numbers = #tpu.dot_dimension_numbers<[1], [0], [0], [1], [0, 0, 1, 1], [], []>} : vector<2x2xbf16>, vector<2x64xbf16>, vector<2x64xf32> -> vector<2x64xf32>
    %904 = arith.truncf %903 : vector<2x64xf32> to vector<2x64xbf16>
    %c0_583 = arith.constant 0 : index
    %c0_584 = arith.constant 0 : index
    %c0_585 = arith.constant 0 : index
    %905 = vector.load %arg67[%c0_583, %c0_584, %c0_585] : memref<9x64x64xbf16, #tpu.memory_space<vmem>>, vector<1x64x64xbf16>
    %906 = vector.shape_cast %905 : vector<1x64x64xbf16> to vector<64x64xbf16>
    %cst_586 = arith.constant dense<0.000000e+00> : vector<2x64xf32>
    %907 = tpu.matmul %904, %906, %cst_586 {dimension_numbers = #tpu.dot_dimension_numbers<[1], [0], [0], [1], [0, 0, 1, 1], [], []>} : vector<2x64xbf16>, vector<64x64xbf16>, vector<2x64xf32> -> vector<2x64xf32>
    %c1_587 = arith.constant 1 : index
    %c0_588 = arith.constant 0 : index
    %c0_589 = arith.constant 0 : index
    %908 = vector.load %arg60[%c1_587, %c0_588, %c0_589] : memref<9x2x2xbf16, #tpu.memory_space<vmem>>, vector<1x2x2xbf16>
    %909 = vector.shape_cast %908 : vector<1x2x2xbf16> to vector<2x2xbf16>
    %cst_590 = arith.constant dense<0.000000e+00> : vector<2x64xf32>
    %910 = tpu.matmul %909, %900, %cst_590 {dimension_numbers = #tpu.dot_dimension_numbers<[1], [0], [0], [1], [0, 0, 1, 1], [], []>} : vector<2x2xbf16>, vector<2x64xbf16>, vector<2x64xf32> -> vector<2x64xf32>
    %911 = arith.truncf %910 : vector<2x64xf32> to vector<2x64xbf16>
    %c1_591 = arith.constant 1 : index
    %c0_592 = arith.constant 0 : index
    %c0_593 = arith.constant 0 : index
    %912 = vector.load %arg67[%c1_591, %c0_592, %c0_593] : memref<9x64x64xbf16, #tpu.memory_space<vmem>>, vector<1x64x64xbf16>
    %913 = vector.shape_cast %912 : vector<1x64x64xbf16> to vector<64x64xbf16>
    %cst_594 = arith.constant dense<0.000000e+00> : vector<2x64xf32>
    %914 = tpu.matmul %911, %913, %cst_594 {dimension_numbers = #tpu.dot_dimension_numbers<[1], [0], [0], [1], [0, 0, 1, 1], [], []>} : vector<2x64xbf16>, vector<64x64xbf16>, vector<2x64xf32> -> vector<2x64xf32>
    %915 = arith.addf %907, %914 : vector<2x64xf32>
    %c2_595 = arith.constant 2 : index
    %c0_596 = arith.constant 0 : index
    %c0_597 = arith.constant 0 : index
    %916 = vector.load %arg60[%c2_595, %c0_596, %c0_597] : memref<9x2x2xbf16, #tpu.memory_space<vmem>>, vector<1x2x2xbf16>
    %917 = vector.shape_cast %916 : vector<1x2x2xbf16> to vector<2x2xbf16>
    %cst_598 = arith.constant dense<0.000000e+00> : vector<2x64xf32>
    %918 = tpu.matmul %917, %900, %cst_598 {dimension_numbers = #tpu.dot_dimension_numbers<[1], [0], [0], [1], [0, 0, 1, 1], [], []>} : vector<2x2xbf16>, vector<2x64xbf16>, vector<2x64xf32> -> vector<2x64xf32>
    %919 = arith.truncf %918 : vector<2x64xf32> to vector<2x64xbf16>
    %c2_599 = arith.constant 2 : index
    %c0_600 = arith.constant 0 : index
    %c0_601 = arith.constant 0 : index
    %920 = vector.load %arg67[%c2_599, %c0_600, %c0_601] : memref<9x64x64xbf16, #tpu.memory_space<vmem>>, vector<1x64x64xbf16>
    %921 = vector.shape_cast %920 : vector<1x64x64xbf16> to vector<64x64xbf16>
    %cst_602 = arith.constant dense<0.000000e+00> : vector<2x64xf32>
    %922 = tpu.matmul %919, %921, %cst_602 {dimension_numbers = #tpu.dot_dimension_numbers<[1], [0], [0], [1], [0, 0, 1, 1], [], []>} : vector<2x64xbf16>, vector<64x64xbf16>, vector<2x64xf32> -> vector<2x64xf32>
    %923 = arith.addf %915, %922 : vector<2x64xf32>
    %c3_603 = arith.constant 3 : index
    %c0_604 = arith.constant 0 : index
    %c0_605 = arith.constant 0 : index
    %924 = vector.load %arg60[%c3_603, %c0_604, %c0_605] : memref<9x2x2xbf16, #tpu.memory_space<vmem>>, vector<1x2x2xbf16>
    %925 = vector.shape_cast %924 : vector<1x2x2xbf16> to vector<2x2xbf16>
    %cst_606 = arith.constant dense<0.000000e+00> : vector<2x64xf32>
    %926 = tpu.matmul %925, %900, %cst_606 {dimension_numbers = #tpu.dot_dimension_numbers<[1], [0], [0], [1], [0, 0, 1, 1], [], []>} : vector<2x2xbf16>, vector<2x64xbf16>, vector<2x64xf32> -> vector<2x64xf32>
    %927 = arith.truncf %926 : vector<2x64xf32> to vector<2x64xbf16>
    %c3_607 = arith.constant 3 : index
    %c0_608 = arith.constant 0 : index
    %c0_609 = arith.constant 0 : index
    %928 = vector.load %arg67[%c3_607, %c0_608, %c0_609] : memref<9x64x64xbf16, #tpu.memory_space<vmem>>, vector<1x64x64xbf16>
    %929 = vector.shape_cast %928 : vector<1x64x64xbf16> to vector<64x64xbf16>
    %cst_610 = arith.constant dense<0.000000e+00> : vector<2x64xf32>
    %930 = tpu.matmul %927, %929, %cst_610 {dimension_numbers = #tpu.dot_dimension_numbers<[1], [0], [0], [1], [0, 0, 1, 1], [], []>} : vector<2x64xbf16>, vector<64x64xbf16>, vector<2x64xf32> -> vector<2x64xf32>
    %931 = arith.addf %923, %930 : vector<2x64xf32>
    %c4_611 = arith.constant 4 : index
    %c0_612 = arith.constant 0 : index
    %c0_613 = arith.constant 0 : index
    %932 = vector.load %arg60[%c4_611, %c0_612, %c0_613] : memref<9x2x2xbf16, #tpu.memory_space<vmem>>, vector<1x2x2xbf16>
    %933 = vector.shape_cast %932 : vector<1x2x2xbf16> to vector<2x2xbf16>
    %cst_614 = arith.constant dense<0.000000e+00> : vector<2x64xf32>
    %934 = tpu.matmul %933, %900, %cst_614 {dimension_numbers = #tpu.dot_dimension_numbers<[1], [0], [0], [1], [0, 0, 1, 1], [], []>} : vector<2x2xbf16>, vector<2x64xbf16>, vector<2x64xf32> -> vector<2x64xf32>
    %935 = arith.truncf %934 : vector<2x64xf32> to vector<2x64xbf16>
    %c4_615 = arith.constant 4 : index
    %c0_616 = arith.constant 0 : index
    %c0_617 = arith.constant 0 : index
    %936 = vector.load %arg67[%c4_615, %c0_616, %c0_617] : memref<9x64x64xbf16, #tpu.memory_space<vmem>>, vector<1x64x64xbf16>
    %937 = vector.shape_cast %936 : vector<1x64x64xbf16> to vector<64x64xbf16>
    %cst_618 = arith.constant dense<0.000000e+00> : vector<2x64xf32>
    %938 = tpu.matmul %935, %937, %cst_618 {dimension_numbers = #tpu.dot_dimension_numbers<[1], [0], [0], [1], [0, 0, 1, 1], [], []>} : vector<2x64xbf16>, vector<64x64xbf16>, vector<2x64xf32> -> vector<2x64xf32>
    %939 = arith.addf %931, %938 : vector<2x64xf32>
    %c5_619 = arith.constant 5 : index
    %c0_620 = arith.constant 0 : index
    %c0_621 = arith.constant 0 : index
    %940 = vector.load %arg60[%c5_619, %c0_620, %c0_621] : memref<9x2x2xbf16, #tpu.memory_space<vmem>>, vector<1x2x2xbf16>
    %941 = vector.shape_cast %940 : vector<1x2x2xbf16> to vector<2x2xbf16>
    %cst_622 = arith.constant dense<0.000000e+00> : vector<2x64xf32>
    %942 = tpu.matmul %941, %900, %cst_622 {dimension_numbers = #tpu.dot_dimension_numbers<[1], [0], [0], [1], [0, 0, 1, 1], [], []>} : vector<2x2xbf16>, vector<2x64xbf16>, vector<2x64xf32> -> vector<2x64xf32>
    %943 = arith.truncf %942 : vector<2x64xf32> to vector<2x64xbf16>
    %c5_623 = arith.constant 5 : index
    %c0_624 = arith.constant 0 : index
    %c0_625 = arith.constant 0 : index
    %944 = vector.load %arg67[%c5_623, %c0_624, %c0_625] : memref<9x64x64xbf16, #tpu.memory_space<vmem>>, vector<1x64x64xbf16>
    %945 = vector.shape_cast %944 : vector<1x64x64xbf16> to vector<64x64xbf16>
    %cst_626 = arith.constant dense<0.000000e+00> : vector<2x64xf32>
    %946 = tpu.matmul %943, %945, %cst_626 {dimension_numbers = #tpu.dot_dimension_numbers<[1], [0], [0], [1], [0, 0, 1, 1], [], []>} : vector<2x64xbf16>, vector<64x64xbf16>, vector<2x64xf32> -> vector<2x64xf32>
    %947 = arith.addf %939, %946 : vector<2x64xf32>
    %c6_627 = arith.constant 6 : index
    %c0_628 = arith.constant 0 : index
    %c0_629 = arith.constant 0 : index
    %948 = vector.load %arg60[%c6_627, %c0_628, %c0_629] : memref<9x2x2xbf16, #tpu.memory_space<vmem>>, vector<1x2x2xbf16>
    %949 = vector.shape_cast %948 : vector<1x2x2xbf16> to vector<2x2xbf16>
    %cst_630 = arith.constant dense<0.000000e+00> : vector<2x64xf32>
    %950 = tpu.matmul %949, %900, %cst_630 {dimension_numbers = #tpu.dot_dimension_numbers<[1], [0], [0], [1], [0, 0, 1, 1], [], []>} : vector<2x2xbf16>, vector<2x64xbf16>, vector<2x64xf32> -> vector<2x64xf32>
    %951 = arith.truncf %950 : vector<2x64xf32> to vector<2x64xbf16>
    %c6_631 = arith.constant 6 : index
    %c0_632 = arith.constant 0 : index
    %c0_633 = arith.constant 0 : index
    %952 = vector.load %arg67[%c6_631, %c0_632, %c0_633] : memref<9x64x64xbf16, #tpu.memory_space<vmem>>, vector<1x64x64xbf16>
    %953 = vector.shape_cast %952 : vector<1x64x64xbf16> to vector<64x64xbf16>
    %cst_634 = arith.constant dense<0.000000e+00> : vector<2x64xf32>
    %954 = tpu.matmul %951, %953, %cst_634 {dimension_numbers = #tpu.dot_dimension_numbers<[1], [0], [0], [1], [0, 0, 1, 1], [], []>} : vector<2x64xbf16>, vector<64x64xbf16>, vector<2x64xf32> -> vector<2x64xf32>
    %955 = arith.addf %947, %954 : vector<2x64xf32>
    %c7_635 = arith.constant 7 : index
    %c0_636 = arith.constant 0 : index
    %c0_637 = arith.constant 0 : index
    %956 = vector.load %arg60[%c7_635, %c0_636, %c0_637] : memref<9x2x2xbf16, #tpu.memory_space<vmem>>, vector<1x2x2xbf16>
    %957 = vector.shape_cast %956 : vector<1x2x2xbf16> to vector<2x2xbf16>
    %cst_638 = arith.constant dense<0.000000e+00> : vector<2x64xf32>
    %958 = tpu.matmul %957, %900, %cst_638 {dimension_numbers = #tpu.dot_dimension_numbers<[1], [0], [0], [1], [0, 0, 1, 1], [], []>} : vector<2x2xbf16>, vector<2x64xbf16>, vector<2x64xf32> -> vector<2x64xf32>
    %959 = arith.truncf %958 : vector<2x64xf32> to vector<2x64xbf16>
    %c7_639 = arith.constant 7 : index
    %c0_640 = arith.constant 0 : index
    %c0_641 = arith.constant 0 : index
    %960 = vector.load %arg67[%c7_639, %c0_640, %c0_641] : memref<9x64x64xbf16, #tpu.memory_space<vmem>>, vector<1x64x64xbf16>
    %961 = vector.shape_cast %960 : vector<1x64x64xbf16> to vector<64x64xbf16>
    %cst_642 = arith.constant dense<0.000000e+00> : vector<2x64xf32>
    %962 = tpu.matmul %959, %961, %cst_642 {dimension_numbers = #tpu.dot_dimension_numbers<[1], [0], [0], [1], [0, 0, 1, 1], [], []>} : vector<2x64xbf16>, vector<64x64xbf16>, vector<2x64xf32> -> vector<2x64xf32>
    %963 = arith.addf %955, %962 : vector<2x64xf32>
    %c8_643 = arith.constant 8 : index
    %c0_644 = arith.constant 0 : index
    %c0_645 = arith.constant 0 : index
    %964 = vector.load %arg60[%c8_643, %c0_644, %c0_645] : memref<9x2x2xbf16, #tpu.memory_space<vmem>>, vector<1x2x2xbf16>
    %965 = vector.shape_cast %964 : vector<1x2x2xbf16> to vector<2x2xbf16>
    %cst_646 = arith.constant dense<0.000000e+00> : vector<2x64xf32>
    %966 = tpu.matmul %965, %900, %cst_646 {dimension_numbers = #tpu.dot_dimension_numbers<[1], [0], [0], [1], [0, 0, 1, 1], [], []>} : vector<2x2xbf16>, vector<2x64xbf16>, vector<2x64xf32> -> vector<2x64xf32>
    %967 = arith.truncf %966 : vector<2x64xf32> to vector<2x64xbf16>
    %c8_647 = arith.constant 8 : index
    %c0_648 = arith.constant 0 : index
    %c0_649 = arith.constant 0 : index
    %968 = vector.load %arg67[%c8_647, %c0_648, %c0_649] : memref<9x64x64xbf16, #tpu.memory_space<vmem>>, vector<1x64x64xbf16>
    %969 = vector.shape_cast %968 : vector<1x64x64xbf16> to vector<64x64xbf16>
    %cst_650 = arith.constant dense<0.000000e+00> : vector<2x64xf32>
    %970 = tpu.matmul %967, %969, %cst_650 {dimension_numbers = #tpu.dot_dimension_numbers<[1], [0], [0], [1], [0, 0, 1, 1], [], []>} : vector<2x64xbf16>, vector<64x64xbf16>, vector<2x64xf32> -> vector<2x64xf32>
    %971 = arith.addf %963, %970 : vector<2x64xf32>
    %cst_651 = arith.constant dense<0.000000e+00> : vector<64xf32>
    %972 = vector.multi_reduction <add>, %971, %cst_651 [0] : vector<2x64xf32> to vector<64xf32>
    %973 = vector.shape_cast %972 : vector<64xf32> to vector<1x64xf32>
    %cst_652 = arith.constant 2.000000e+00 : f32
    %974 = vector.broadcast %cst_652 : f32 to vector<1x64xf32>
    %975 = arith.divf %973, %974 : vector<1x64xf32>
    %976 = vector.broadcast %975 : vector<1x64xf32> to vector<2x64xf32>
    %977 = arith.subf %971, %976 : vector<2x64xf32>
    %978 = arith.mulf %977, %977 : vector<2x64xf32>
    %cst_653 = arith.constant dense<0.000000e+00> : vector<64xf32>
    %979 = vector.multi_reduction <add>, %978, %cst_653 [0] : vector<2x64xf32> to vector<64xf32>
    %980 = vector.shape_cast %979 : vector<64xf32> to vector<1x64xf32>
    %cst_654 = arith.constant 2.000000e+00 : f32
    %981 = vector.broadcast %cst_654 : f32 to vector<1x64xf32>
    %982 = arith.divf %980, %981 : vector<1x64xf32>
    %983 = vector.broadcast %975 : vector<1x64xf32> to vector<2x64xf32>
    %984 = arith.subf %971, %983 : vector<2x64xf32>
    %cst_655 = arith.constant 9.99999974E-6 : f32
    %985 = vector.broadcast %cst_655 : f32 to vector<1x64xf32>
    %986 = arith.addf %982, %985 : vector<1x64xf32>
    %987 = math.rsqrt %986 : vector<1x64xf32>
    %988 = vector.broadcast %987 : vector<1x64xf32> to vector<2x64xf32>
    %989 = arith.mulf %984, %988 : vector<2x64xf32>
    %c0_656 = arith.constant 0 : index
    %c0_657 = arith.constant 0 : index
    %990 = vector.load %arg64[%c0_656, %c0_657] : memref<1x64xf32, #tpu.memory_space<vmem>>, vector<1x64xf32>
    %991 = vector.broadcast %990 : vector<1x64xf32> to vector<2x64xf32>
    %992 = arith.mulf %989, %991 : vector<2x64xf32>
    %c0_658 = arith.constant 0 : index
    %c0_659 = arith.constant 0 : index
    %993 = vector.load %arg63[%c0_658, %c0_659] : memref<1x64xf32, #tpu.memory_space<vmem>>, vector<1x64xf32>
    %994 = vector.broadcast %993 : vector<1x64xf32> to vector<2x64xf32>
    %995 = arith.addf %992, %994 : vector<2x64xf32>
    %cst_660 = arith.constant 0.000000e+00 : f32
    %996 = vector.broadcast %cst_660 : f32 to vector<2x64xf32>
    %997 = arith.maximumf %995, %996 : vector<2x64xf32>
    %c0_661 = arith.constant 0 : index
    %c0_662 = arith.constant 0 : index
    %998 = vector.load %arg68[%c0_661, %c0_662] : memref<64x64xbf16, #tpu.memory_space<vmem>>, vector<64x64xbf16>
    %999 = arith.truncf %997 : vector<2x64xf32> to vector<2x64xbf16>
    %cst_663 = arith.constant dense<0.000000e+00> : vector<2x64xf32>
    %1000 = tpu.matmul %999, %998, %cst_663 {dimension_numbers = #tpu.dot_dimension_numbers<[1], [0], [0], [1], [0, 0, 1, 1], [], []>} : vector<2x64xbf16>, vector<64x64xbf16>, vector<2x64xf32> -> vector<2x64xf32>
    %cst_664 = arith.constant dense<0.000000e+00> : vector<64xf32>
    %1001 = vector.multi_reduction <add>, %1000, %cst_664 [0] : vector<2x64xf32> to vector<64xf32>
    %1002 = vector.shape_cast %1001 : vector<64xf32> to vector<1x64xf32>
    %cst_665 = arith.constant 2.000000e+00 : f32
    %1003 = vector.broadcast %cst_665 : f32 to vector<1x64xf32>
    %1004 = arith.divf %1002, %1003 : vector<1x64xf32>
    %1005 = vector.broadcast %1004 : vector<1x64xf32> to vector<2x64xf32>
    %1006 = arith.subf %1000, %1005 : vector<2x64xf32>
    %1007 = arith.mulf %1006, %1006 : vector<2x64xf32>
    %cst_666 = arith.constant dense<0.000000e+00> : vector<64xf32>
    %1008 = vector.multi_reduction <add>, %1007, %cst_666 [0] : vector<2x64xf32> to vector<64xf32>
    %1009 = vector.shape_cast %1008 : vector<64xf32> to vector<1x64xf32>
    %cst_667 = arith.constant 2.000000e+00 : f32
    %1010 = vector.broadcast %cst_667 : f32 to vector<1x64xf32>
    %1011 = arith.divf %1009, %1010 : vector<1x64xf32>
    %1012 = vector.broadcast %1004 : vector<1x64xf32> to vector<2x64xf32>
    %1013 = arith.subf %1000, %1012 : vector<2x64xf32>
    %cst_668 = arith.constant 9.99999974E-6 : f32
    %1014 = vector.broadcast %cst_668 : f32 to vector<1x64xf32>
    %1015 = arith.addf %1011, %1014 : vector<1x64xf32>
    %1016 = math.rsqrt %1015 : vector<1x64xf32>
    %1017 = vector.broadcast %1016 : vector<1x64xf32> to vector<2x64xf32>
    %1018 = arith.mulf %1013, %1017 : vector<2x64xf32>
    %c0_669 = arith.constant 0 : index
    %c0_670 = arith.constant 0 : index
    %1019 = vector.load %arg66[%c0_669, %c0_670] : memref<1x64xf32, #tpu.memory_space<vmem>>, vector<1x64xf32>
    %1020 = vector.broadcast %1019 : vector<1x64xf32> to vector<2x64xf32>
    %1021 = arith.mulf %1018, %1020 : vector<2x64xf32>
    %c0_671 = arith.constant 0 : index
    %c0_672 = arith.constant 0 : index
    %1022 = vector.load %arg65[%c0_671, %c0_672] : memref<1x64xf32, #tpu.memory_space<vmem>>, vector<1x64xf32>
    %1023 = vector.broadcast %1022 : vector<1x64xf32> to vector<2x64xf32>
    %1024 = arith.addf %1021, %1023 : vector<2x64xf32>
    %1025 = arith.addf %873, %1024 : vector<2x64xf32>
    %cst_673 = arith.constant dense<0.000000e+00> : vector<64xf32>
    %1026 = vector.multi_reduction <add>, %1025, %cst_673 [0] : vector<2x64xf32> to vector<64xf32>
    %1027 = vector.shape_cast %1026 : vector<64xf32> to vector<1x64xf32>
    %cst_674 = arith.constant 2.000000e+00 : f32
    %1028 = vector.broadcast %cst_674 : f32 to vector<1x64xf32>
    %1029 = arith.divf %1027, %1028 : vector<1x64xf32>
    %1030 = vector.broadcast %1029 : vector<1x64xf32> to vector<2x64xf32>
    %1031 = arith.subf %1025, %1030 : vector<2x64xf32>
    %1032 = arith.mulf %1031, %1031 : vector<2x64xf32>
    %cst_675 = arith.constant dense<0.000000e+00> : vector<64xf32>
    %1033 = vector.multi_reduction <add>, %1032, %cst_675 [0] : vector<2x64xf32> to vector<64xf32>
    %1034 = vector.shape_cast %1033 : vector<64xf32> to vector<1x64xf32>
    %cst_676 = arith.constant 2.000000e+00 : f32
    %1035 = vector.broadcast %cst_676 : f32 to vector<1x64xf32>
    %1036 = arith.divf %1034, %1035 : vector<1x64xf32>
    %1037 = vector.broadcast %1029 : vector<1x64xf32> to vector<2x64xf32>
    %1038 = arith.subf %1025, %1037 : vector<2x64xf32>
    %cst_677 = arith.constant 9.99999974E-6 : f32
    %1039 = vector.broadcast %cst_677 : f32 to vector<1x64xf32>
    %1040 = arith.addf %1036, %1039 : vector<1x64xf32>
    %1041 = math.rsqrt %1040 : vector<1x64xf32>
    %1042 = vector.broadcast %1041 : vector<1x64xf32> to vector<2x64xf32>
    %1043 = arith.mulf %1038, %1042 : vector<2x64xf32>
    %c0_678 = arith.constant 0 : index
    %c0_679 = arith.constant 0 : index
    %1044 = vector.load %arg72[%c0_678, %c0_679] : memref<1x64xf32, #tpu.memory_space<vmem>>, vector<1x64xf32>
    %1045 = vector.broadcast %1044 : vector<1x64xf32> to vector<2x64xf32>
    %1046 = arith.mulf %1043, %1045 : vector<2x64xf32>
    %c0_680 = arith.constant 0 : index
    %c0_681 = arith.constant 0 : index
    %1047 = vector.load %arg71[%c0_680, %c0_681] : memref<1x64xf32, #tpu.memory_space<vmem>>, vector<1x64xf32>
    %1048 = vector.broadcast %1047 : vector<1x64xf32> to vector<2x64xf32>
    %1049 = arith.addf %1046, %1048 : vector<2x64xf32>
    %cst_682 = arith.constant 0.000000e+00 : f32
    %1050 = vector.broadcast %cst_682 : f32 to vector<2x64xf32>
    %1051 = arith.maximumf %1049, %1050 : vector<2x64xf32>
    %c0_683 = arith.constant 0 : index
    %c0_684 = arith.constant 0 : index
    %1052 = vector.load %arg1[%c0_683, %c0_684] : memref<2x2xf32, #tpu.memory_space<vmem>>, vector<2x2xf32>
    %cst_685 = arith.constant dense<0.000000e+00> : vector<2x64xf32>
    %1053 = tpu.matmul %1052, %1051, %cst_685 {dimension_numbers = #tpu.dot_dimension_numbers<[1], [0], [0], [1], [0, 0, 1, 1], [], []>} : vector<2x2xf32>, vector<2x64xf32>, vector<2x64xf32> -> vector<2x64xf32>
    %c0_686 = arith.constant 0 : index
    %c0_687 = arith.constant 0 : index
    %1054 = vector.load %arg75[%c0_686, %c0_687] : memref<64x1xbf16, #tpu.memory_space<vmem>>, vector<64x1xbf16>
    %1055 = arith.truncf %1053 : vector<2x64xf32> to vector<2x64xbf16>
    %cst_688 = arith.constant dense<0.000000e+00> : vector<2x1xf32>
    %1056 = tpu.matmul %1055, %1054, %cst_688 {dimension_numbers = #tpu.dot_dimension_numbers<[1], [0], [0], [1], [0, 0, 1, 1], [], []>} : vector<2x64xbf16>, vector<64x1xbf16>, vector<2x1xf32> -> vector<2x1xf32>
    %c0_689 = arith.constant 0 : index
    %c0_690 = arith.constant 0 : index
    %1057 = vector.load %arg2[%c0_689, %c0_690] : memref<1x1xf32, #tpu.memory_space<vmem>>, vector<1x1xf32>
    %1058 = vector.broadcast %1057 : vector<1x1xf32> to vector<2x1xf32>
    %1059 = arith.addf %1056, %1058 : vector<2x1xf32>
    %1060 = arith.negf %1059 : vector<2x1xf32>
    %1061 = math.exp %1060 : vector<2x1xf32>
    %cst_691 = arith.constant 1.000000e+00 : f32
    %1062 = vector.broadcast %cst_691 : f32 to vector<2x1xf32>
    %1063 = arith.addf %1062, %1061 : vector<2x1xf32>
    %1064 = arith.divf %1062, %1063 : vector<2x1xf32>
    %c0_692 = arith.constant 0 : index
    %c0_693 = arith.constant 0 : index
    %1065 = vector.load %arg76[%c0_692, %c0_693] : memref<2x1xf32, #tpu.memory_space<vmem>>, vector<2x1xf32>
    tpu.vector_store %arg76[%c0_692, %c0_693], %1064 {strides = array<i32>} : memref<2x1xf32, #tpu.memory_space<vmem>>, vector<2x1xf32>,
    return
  }
  func.func @transform_0(%arg0: i32) -> (i32, i32) {
    %c0_i32 = arith.constant 0 : i32
    %c0_i32_0 = arith.constant 0 : i32
    %c0_i32_1 = arith.constant 0 : i32
    return %c0_i32, %c0_i32_0 : i32, i32
  }
  func.func @transform_1(%arg0: i32) -> (i32, i32) {
    %c0_i32 = arith.constant 0 : i32
    %c0_i32_0 = arith.constant 0 : i32
    %c0_i32_1 = arith.constant 0 : i32
    return %c0_i32, %c0_i32_0 : i32, i32
  }
  func.func @transform_2(%arg0: i32) -> (i32, i32) {
    %c0_i32 = arith.constant 0 : i32
    %c0_i32_0 = arith.constant 0 : i32
    %c0_i32_1 = arith.constant 0 : i32
    return %c0_i32, %c0_i32_0 : i32, i32
  }
  func.func @transform_3(%arg0: i32) -> (i32, i32, i32) {
    %c0_i32 = arith.constant 0 : i32
    %c0_i32_0 = arith.constant 0 : i32
    %c0_i32_1 = arith.constant 0 : i32
    %c0_i32_2 = arith.constant 0 : i32
    return %c0_i32, %c0_i32_0, %c0_i32_1 : i32, i32, i32
  }
  func.func @transform_4(%arg0: i32) -> (i32, i32) {
    %c0_i32 = arith.constant 0 : i32
    %c0_i32_0 = arith.constant 0 : i32
    %c0_i32_1 = arith.constant 0 : i32
    return %c0_i32, %c0_i32_0 : i32, i32
  }
  func.func @transform_5(%arg0: i32) -> (i32, i32) {
    %c0_i32 = arith.constant 0 : i32
    %c0_i32_0 = arith.constant 0 : i32
    %c0_i32_1 = arith.constant 0 : i32
    return %c0_i32, %c0_i32_0 : i32, i32
  }
  func.func @transform_6(%arg0: i32) -> (i32, i32) {
    %c0_i32 = arith.constant 0 : i32
    %c0_i32_0 = arith.constant 0 : i32
    %c0_i32_1 = arith.constant 0 : i32
    return %c0_i32, %c0_i32_0 : i32, i32
  }
  func.func @transform_7(%arg0: i32) -> (i32, i32) {
    %c0_i32 = arith.constant 0 : i32
    %c0_i32_0 = arith.constant 0 : i32
    %c0_i32_1 = arith.constant 0 : i32
    return %c0_i32, %c0_i32_0 : i32, i32
  }
  func.func @transform_8(%arg0: i32) -> (i32, i32) {
    %c0_i32 = arith.constant 0 : i32
    %c0_i32_0 = arith.constant 0 : i32
    %c0_i32_1 = arith.constant 0 : i32
    return %c0_i32, %c0_i32_0 : i32, i32
  }
  func.func @transform_9(%arg0: i32) -> (i32, i32) {
    %c0_i32 = arith.constant 0 : i32
    %c0_i32_0 = arith.constant 0 : i32
    %c0_i32_1 = arith.constant 0 : i32
    return %c0_i32, %c0_i32_0 : i32, i32
  }
  func.func @transform_10(%arg0: i32) -> (i32, i32) {
    %c0_i32 = arith.constant 0 : i32
    %c0_i32_0 = arith.constant 0 : i32
    %c0_i32_1 = arith.constant 0 : i32
    return %c0_i32, %c0_i32_0 : i32, i32
  }
  func.func @transform_11(%arg0: i32) -> (i32, i32) {
    %c0_i32 = arith.constant 0 : i32
    %c0_i32_0 = arith.constant 0 : i32
    %c0_i32_1 = arith.constant 0 : i32
    return %c0_i32, %c0_i32_0 : i32, i32
  }
  func.func @transform_12(%arg0: i32) -> (i32, i32, i32) {
    %c0_i32 = arith.constant 0 : i32
    %c0_i32_0 = arith.constant 0 : i32
    %c0_i32_1 = arith.constant 0 : i32
    %c0_i32_2 = arith.constant 0 : i32
    return %c0_i32, %c0_i32_0, %c0_i32_1 : i32, i32, i32
  }
  func.func @transform_13(%arg0: i32) -> (i32, i32) {
    %c0_i32 = arith.constant 0 : i32
    %c0_i32_0 = arith.constant 0 : i32
    %c0_i32_1 = arith.constant 0 : i32
    return %c0_i32, %c0_i32_0 : i32, i32
  }
  func.func @transform_14(%arg0: i32) -> (i32, i32) {
    %c0_i32 = arith.constant 0 : i32
    %c0_i32_0 = arith.constant 0 : i32
    %c0_i32_1 = arith.constant 0 : i32
    return %c0_i32, %c0_i32_0 : i32, i32
  }
  func.func @transform_15(%arg0: i32) -> (i32, i32) {
    %c0_i32 = arith.constant 0 : i32
    %c0_i32_0 = arith.constant 0 : i32
    %c0_i32_1 = arith.constant 0 : i32
    return %c0_i32, %c0_i32_0 : i32, i32
  }
  func.func @transform_16(%arg0: i32) -> (i32, i32, i32) {
    %c0_i32 = arith.constant 0 : i32
    %c0_i32_0 = arith.constant 0 : i32
    %c0_i32_1 = arith.constant 0 : i32
    %c0_i32_2 = arith.constant 0 : i32
    return %c0_i32, %c0_i32_0, %c0_i32_1 : i32, i32, i32
  }
  func.func @transform_17(%arg0: i32) -> (i32, i32) {
    %c0_i32 = arith.constant 0 : i32
    %c0_i32_0 = arith.constant 0 : i32
    %c0_i32_1 = arith.constant 0 : i32
    return %c0_i32, %c0_i32_0 : i32, i32
  }
  func.func @transform_18(%arg0: i32) -> (i32, i32) {
    %c0_i32 = arith.constant 0 : i32
    %c0_i32_0 = arith.constant 0 : i32
    %c0_i32_1 = arith.constant 0 : i32
    return %c0_i32, %c0_i32_0 : i32, i32
  }
  func.func @transform_19(%arg0: i32) -> (i32, i32) {
    %c0_i32 = arith.constant 0 : i32
    %c0_i32_0 = arith.constant 0 : i32
    %c0_i32_1 = arith.constant 0 : i32
    return %c0_i32, %c0_i32_0 : i32, i32
  }
  func.func @transform_20(%arg0: i32) -> (i32, i32) {
    %c0_i32 = arith.constant 0 : i32
    %c0_i32_0 = arith.constant 0 : i32
    %c0_i32_1 = arith.constant 0 : i32
    return %c0_i32, %c0_i32_0 : i32, i32
  }
  func.func @transform_21(%arg0: i32) -> (i32, i32) {
    %c0_i32 = arith.constant 0 : i32
    %c0_i32_0 = arith.constant 0 : i32
    %c0_i32_1 = arith.constant 0 : i32
    return %c0_i32, %c0_i32_0 : i32, i32
  }
  func.func @transform_22(%arg0: i32) -> (i32, i32) {
    %c0_i32 = arith.constant 0 : i32
    %c0_i32_0 = arith.constant 0 : i32
    %c0_i32_1 = arith.constant 0 : i32
    return %c0_i32, %c0_i32_0 : i32, i32
  }
  func.func @transform_23(%arg0: i32) -> (i32, i32) {
    %c0_i32 = arith.constant 0 : i32
    %c0_i32_0 = arith.constant 0 : i32
    %c0_i32_1 = arith.constant 0 : i32
    return %c0_i32, %c0_i32_0 : i32, i32
  }
  func.func @transform_24(%arg0: i32) -> (i32, i32) {
    %c0_i32 = arith.constant 0 : i32
    %c0_i32_0 = arith.constant 0 : i32
    %c0_i32_1 = arith.constant 0 : i32
    return %c0_i32, %c0_i32_0 : i32, i32
  }
  func.func @transform_25(%arg0: i32) -> (i32, i32, i32) {
    %c0_i32 = arith.constant 0 : i32
    %c0_i32_0 = arith.constant 0 : i32
    %c0_i32_1 = arith.constant 0 : i32
    %c0_i32_2 = arith.constant 0 : i32
    return %c0_i32, %c0_i32_0, %c0_i32_1 : i32, i32, i32
  }
  func.func @transform_26(%arg0: i32) -> (i32, i32) {
    %c0_i32 = arith.constant 0 : i32
    %c0_i32_0 = arith.constant 0 : i32
    %c0_i32_1 = arith.constant 0 : i32
    return %c0_i32, %c0_i32_0 : i32, i32
  }
  func.func @transform_27(%arg0: i32) -> (i32, i32) {
    %c0_i32 = arith.constant 0 : i32
    %c0_i32_0 = arith.constant 0 : i32
    %c0_i32_1 = arith.constant 0 : i32
    return %c0_i32, %c0_i32_0 : i32, i32
  }
  func.func @transform_28(%arg0: i32) -> (i32, i32) {
    %c0_i32 = arith.constant 0 : i32
    %c0_i32_0 = arith.constant 0 : i32
    %c0_i32_1 = arith.constant 0 : i32
    return %c0_i32, %c0_i32_0 : i32, i32
  }
  func.func @transform_29(%arg0: i32) -> (i32, i32, i32) {
    %c0_i32 = arith.constant 0 : i32
    %c0_i32_0 = arith.constant 0 : i32
    %c0_i32_1 = arith.constant 0 : i32
    %c0_i32_2 = arith.constant 0 : i32
    return %c0_i32, %c0_i32_0, %c0_i32_1 : i32, i32, i32
  }
  func.func @transform_30(%arg0: i32) -> (i32, i32) {
    %c0_i32 = arith.constant 0 : i32
    %c0_i32_0 = arith.constant 0 : i32
    %c0_i32_1 = arith.constant 0 : i32
    return %c0_i32, %c0_i32_0 : i32, i32
  }
  func.func @transform_31(%arg0: i32) -> (i32, i32) {
    %c0_i32 = arith.constant 0 : i32
    %c0_i32_0 = arith.constant 0 : i32
    %c0_i32_1 = arith.constant 0 : i32
    return %c0_i32, %c0_i32_0 : i32, i32
  }
  func.func @transform_32(%arg0: i32) -> (i32, i32) {
    %c0_i32 = arith.constant 0 : i32
    %c0_i32_0 = arith.constant 0 : i32
    %c0_i32_1 = arith.constant 0 : i32
    return %c0_i32, %c0_i32_0 : i32, i32
  }
  func.func @transform_33(%arg0: i32) -> (i32, i32) {
    %c0_i32 = arith.constant 0 : i32
    %c0_i32_0 = arith.constant 0 : i32
    %c0_i32_1 = arith.constant 0 : i32
    return %c0_i32, %c0_i32_0 : i32, i32
  }
  func.func @transform_34(%arg0: i32) -> (i32, i32) {
    %c0_i32 = arith.constant 0 : i32
    %c0_i32_0 = arith.constant 0 : i32
    %c0_i32_1 = arith.constant 0 : i32
    return %c0_i32, %c0_i32_0 : i32, i32
  }
  func.func @transform_35(%arg0: i32) -> (i32, i32) {
    %c0_i32 = arith.constant 0 : i32
    %c0_i32_0 = arith.constant 0 : i32
    %c0_i32_1 = arith.constant 0 : i32
    return %c0_i32, %c0_i32_0 : i32, i32
  }
  func.func @transform_36(%arg0: i32) -> (i32, i32) {
    %c0_i32 = arith.constant 0 : i32
    %c0_i32_0 = arith.constant 0 : i32
    %c0_i32_1 = arith.constant 0 : i32
    return %c0_i32, %c0_i32_0 : i32, i32
  }
  func.func @transform_37(%arg0: i32) -> (i32, i32) {
    %c0_i32 = arith.constant 0 : i32
    %c0_i32_0 = arith.constant 0 : i32
    %c0_i32_1 = arith.constant 0 : i32
    return %c0_i32, %c0_i32_0 : i32, i32
  }
  func.func @transform_38(%arg0: i32) -> (i32, i32, i32) {
    %c0_i32 = arith.constant 0 : i32
    %c0_i32_0 = arith.constant 0 : i32
    %c0_i32_1 = arith.constant 0 : i32
    %c0_i32_2 = arith.constant 0 : i32
    return %c0_i32, %c0_i32_0, %c0_i32_1 : i32, i32, i32
  }
  func.func @transform_39(%arg0: i32) -> (i32, i32) {
    %c0_i32 = arith.constant 0 : i32
    %c0_i32_0 = arith.constant 0 : i32
    %c0_i32_1 = arith.constant 0 : i32
    return %c0_i32, %c0_i32_0 : i32, i32
  }
  func.func @transform_40(%arg0: i32) -> (i32, i32) {
    %c0_i32 = arith.constant 0 : i32
    %c0_i32_0 = arith.constant 0 : i32
    %c0_i32_1 = arith.constant 0 : i32
    return %c0_i32, %c0_i32_0 : i32, i32
  }
  func.func @transform_41(%arg0: i32) -> (i32, i32, i32) {
    %c0_i32 = arith.constant 0 : i32
    %c0_i32_0 = arith.constant 0 : i32
    %c0_i32_1 = arith.constant 0 : i32
    %c0_i32_2 = arith.constant 0 : i32
    return %c0_i32, %c0_i32_0, %c0_i32_1 : i32, i32, i32
  }
  func.func @transform_42(%arg0: i32) -> (i32, i32) {
    %c0_i32 = arith.constant 0 : i32
    %c0_i32_0 = arith.constant 0 : i32
    %c0_i32_1 = arith.constant 0 : i32
    return %c0_i32, %c0_i32_0 : i32, i32
  }
  func.func @transform_43(%arg0: i32) -> (i32, i32) {
    %c0_i32 = arith.constant 0 : i32
    %c0_i32_0 = arith.constant 0 : i32
    %c0_i32_1 = arith.constant 0 : i32
    return %c0_i32, %c0_i32_0 : i32, i32
  }
  func.func @transform_44(%arg0: i32) -> (i32, i32) {
    %c0_i32 = arith.constant 0 : i32
    %c0_i32_0 = arith.constant 0 : i32
    %c0_i32_1 = arith.constant 0 : i32
    return %c0_i32, %c0_i32_0 : i32, i32
  }
  func.func @transform_45(%arg0: i32) -> (i32, i32) {
    %c0_i32 = arith.constant 0 : i32
    %c0_i32_0 = arith.constant 0 : i32
    %c0_i32_1 = arith.constant 0 : i32
    return %c0_i32, %c0_i32_0 : i32, i32
  }
  func.func @transform_46(%arg0: i32) -> (i32, i32) {
    %c0_i32 = arith.constant 0 : i32
    %c0_i32_0 = arith.constant 0 : i32
    %c0_i32_1 = arith.constant 0 : i32
    return %c0_i32, %c0_i32_0 : i32, i32
  }
  func.func @transform_47(%arg0: i32) -> (i32, i32) {
    %c0_i32 = arith.constant 0 : i32
    %c0_i32_0 = arith.constant 0 : i32
    %c0_i32_1 = arith.constant 0 : i32
    return %c0_i32, %c0_i32_0 : i32, i32
  }
  func.func @transform_48(%arg0: i32) -> (i32, i32, i32) {
    %c0_i32 = arith.constant 0 : i32
    %c0_i32_0 = arith.constant 0 : i32
    %c0_i32_1 = arith.constant 0 : i32
    %c0_i32_2 = arith.constant 0 : i32
    return %c0_i32, %c0_i32_0, %c0_i32_1 : i32, i32, i32
  }
  func.func @transform_49(%arg0: i32) -> (i32, i32) {
    %c0_i32 = arith.constant 0 : i32
    %c0_i32_0 = arith.constant 0 : i32
    %c0_i32_1 = arith.constant 0 : i32
    return %c0_i32, %c0_i32_0 : i32, i32
  }
  func.func @transform_50(%arg0: i32) -> (i32, i32, i32) {
    %c0_i32 = arith.constant 0 : i32
    %c0_i32_0 = arith.constant 0 : i32
    %c0_i32_1 = arith.constant 0 : i32
    %c0_i32_2 = arith.constant 0 : i32
    return %c0_i32, %c0_i32_0, %c0_i32_1 : i32, i32, i32
  }
  func.func @transform_51(%arg0: i32) -> (i32, i32) {
    %c0_i32 = arith.constant 0 : i32
    %c0_i32_0 = arith.constant 0 : i32
    %c0_i32_1 = arith.constant 0 : i32
    return %c0_i32, %c0_i32_0 : i32, i32
  }
  func.func @transform_52(%arg0: i32) -> (i32, i32) {
    %c0_i32 = arith.constant 0 : i32
    %c0_i32_0 = arith.constant 0 : i32
    %c0_i32_1 = arith.constant 0 : i32
    return %c0_i32, %c0_i32_0 : i32, i32
  }
  func.func @transform_53(%arg0: i32) -> (i32, i32) {
    %c0_i32 = arith.constant 0 : i32
    %c0_i32_0 = arith.constant 0 : i32
    %c0_i32_1 = arith.constant 0 : i32
    return %c0_i32, %c0_i32_0 : i32, i32
  }
  func.func @transform_54(%arg0: i32) -> (i32, i32) {
    %c0_i32 = arith.constant 0 : i32
    %c0_i32_0 = arith.constant 0 : i32
    %c0_i32_1 = arith.constant 0 : i32
    return %c0_i32, %c0_i32_0 : i32, i32
  }
  func.func @transform_55(%arg0: i32) -> (i32, i32) {
    %c0_i32 = arith.constant 0 : i32
    %c0_i32_0 = arith.constant 0 : i32
    %c0_i32_1 = arith.constant 0 : i32
    return %c0_i32, %c0_i32_0 : i32, i32
  }
  func.func @transform_56(%arg0: i32) -> (i32, i32) {
    %c0_i32 = arith.constant 0 : i32
    %c0_i32_0 = arith.constant 0 : i32
    %c0_i32_1 = arith.constant 0 : i32
    return %c0_i32, %c0_i32_0 : i32, i32
  }
  func.func @transform_57(%arg0: i32) -> (i32, i32, i32) {
    %c0_i32 = arith.constant 0 : i32
    %c0_i32_0 = arith.constant 0 : i32
    %c0_i32_1 = arith.constant 0 : i32
    %c0_i32_2 = arith.constant 0 : i32
    return %c0_i32, %c0_i32_0, %c0_i32_1 : i32, i32, i32
  }
  func.func @transform_58(%arg0: i32) -> (i32, i32) {
    %c0_i32 = arith.constant 0 : i32
    %c0_i32_0 = arith.constant 0 : i32
    %c0_i32_1 = arith.constant 0 : i32
    return %c0_i32, %c0_i32_0 : i32, i32
  }
  func.func @transform_59(%arg0: i32) -> (i32, i32, i32) {
    %c0_i32 = arith.constant 0 : i32
    %c0_i32_0 = arith.constant 0 : i32
    %c0_i32_1 = arith.constant 0 : i32
    %c0_i32_2 = arith.constant 0 : i32
    return %c0_i32, %c0_i32_0, %c0_i32_1 : i32, i32, i32
  }
  func.func @transform_60(%arg0: i32) -> (i32, i32) {
    %c0_i32 = arith.constant 0 : i32
    %c0_i32_0 = arith.constant 0 : i32
    %c0_i32_1 = arith.constant 0 : i32
    return %c0_i32, %c0_i32_0 : i32, i32
  }
  func.func @transform_61(%arg0: i32) -> (i32, i32) {
    %c0_i32 = arith.constant 0 : i32
    %c0_i32_0 = arith.constant 0 : i32
    %c0_i32_1 = arith.constant 0 : i32
    return %c0_i32, %c0_i32_0 : i32, i32
  }
  func.func @transform_62(%arg0: i32) -> (i32, i32) {
    %c0_i32 = arith.constant 0 : i32
    %c0_i32_0 = arith.constant 0 : i32
    %c0_i32_1 = arith.constant 0 : i32
    return %c0_i32, %c0_i32_0 : i32, i32
  }
  func.func @transform_63(%arg0: i32) -> (i32, i32) {
    %c0_i32 = arith.constant 0 : i32
    %c0_i32_0 = arith.constant 0 : i32
    %c0_i32_1 = arith.constant 0 : i32
    return %c0_i32, %c0_i32_0 : i32, i32
  }
  func.func @transform_64(%arg0: i32) -> (i32, i32) {
    %c0_i32 = arith.constant 0 : i32
    %c0_i32_0 = arith.constant 0 : i32
    %c0_i32_1 = arith.constant 0 : i32
    return %c0_i32, %c0_i32_0 : i32, i32
  }
  func.func @transform_65(%arg0: i32) -> (i32, i32) {
    %c0_i32 = arith.constant 0 : i32
    %c0_i32_0 = arith.constant 0 : i32
    %c0_i32_1 = arith.constant 0 : i32
    return %c0_i32, %c0_i32_0 : i32, i32
  }
  func.func @transform_66(%arg0: i32) -> (i32, i32, i32) {
    %c0_i32 = arith.constant 0 : i32
    %c0_i32_0 = arith.constant 0 : i32
    %c0_i32_1 = arith.constant 0 : i32
    %c0_i32_2 = arith.constant 0 : i32
    return %c0_i32, %c0_i32_0, %c0_i32_1 : i32, i32, i32
  }
  func.func @transform_67(%arg0: i32) -> (i32, i32) {
    %c0_i32 = arith.constant 0 : i32
    %c0_i32_0 = arith.constant 0 : i32
    %c0_i32_1 = arith.constant 0 : i32
    return %c0_i32, %c0_i32_0 : i32, i32
  }
  func.func @transform_68(%arg0: i32) -> (i32, i32) {
    %c0_i32 = arith.constant 0 : i32
    %c0_i32_0 = arith.constant 0 : i32
    %c0_i32_1 = arith.constant 0 : i32
    return %c0_i32, %c0_i32_0 : i32, i32
  }
  func.func @transform_69(%arg0: i32) -> (i32, i32) {
    %c0_i32 = arith.constant 0 : i32
    %c0_i32_0 = arith.constant 0 : i32
    %c0_i32_1 = arith.constant 0 : i32
    return %c0_i32, %c0_i32_0 : i32, i32
  }
  func.func @transform_70(%arg0: i32) -> (i32, i32) {
    %c0_i32 = arith.constant 0 : i32
    %c0_i32_0 = arith.constant 0 : i32
    %c0_i32_1 = arith.constant 0 : i32
    return %c0_i32, %c0_i32_0 : i32, i32
  }
  func.func @transform_71(%arg0: i32) -> (i32, i32) {
    %c0_i32 = arith.constant 0 : i32
    %c0_i32_0 = arith.constant 0 : i32
    %c0_i32_1 = arith.constant 0 : i32
    return %c0_i32, %c0_i32_0 : i32, i32
  }
  func.func @transform_72(%arg0: i32) -> (i32, i32) {
    %c0_i32 = arith.constant 0 : i32
    %c0_i32_0 = arith.constant 0 : i32
    %c0_i32_1 = arith.constant 0 : i32
    return %c0_i32, %c0_i32_0 : i32, i32
  }
  func.func @transform_73(%arg0: i32) -> (i32, i32) {
    %c0_i32 = arith.constant 0 : i32
    %c0_i32_0 = arith.constant 0 : i32
    %c0_i32_1 = arith.constant 0 : i32
    return %c0_i32, %c0_i32_0 : i32, i32
  }
  func.func @transform_74(%arg0: i32) -> (i32, i32) {
    %c0_i32 = arith.constant 0 : i32
    %c0_i32_0 = arith.constant 0 : i32
    %c0_i32_1 = arith.constant 0 : i32
    return %c0_i32, %c0_i32_0 : i32, i32
  }
  func.func @transform_75(%arg0: i32) -> (i32, i32) {
    %c0_i32 = arith.constant 0 : i32
    %c0_i32_0 = arith.constant 0 : i32
    %c0_i32_1 = arith.constant 0 : i32
    return %c0_i32, %c0_i32_0 : i32, i32
  }
}

</mosaic_0001>

<bundles_post_ra>
// kernel: discriminator_forward.1
= control target key start
LH: loop header
LB: loop body
LE: loop exit
PB: predicated region body
PF: predicated region fallthrough
CT: control target
= control target key end

     0   :  { %s12475_s6 = smov 1   ;;  %s12476_s10 = smov 2   ;;  %s14553_s0 = inlined_call_operand.smem [shape: u32[76], index: -1, kind: input, shape index: {}] }
   0x1   :  { %s12578_s5 = sld [smem:[%s14553_s0]]   ;;  %s12477_s14 = smov 3  }
   0x2   :  { %s9380_s9 = sld [smem:[%s14553_s0 + %s12475_s6]]   ;;  %s12478_s18 = smov 4  }
   0x3   :  { %s12586_s13 = sld [smem:[%s14553_s0 + %s12476_s10]]   ;;  %s12479_s22 = smov 5  }
   0x4   :  { %s12591_s17 = sld [smem:[%s14553_s0 + %s12477_s14]]   ;;  %s12480_s26 = smov 6  }
   0x5   :  { %s12596_s21 = sld [smem:[%s14553_s0 + %s12478_s18]]   ;;  %s12481_s30 = smov 7  }
   0x6   :  { %s12601_s25 = sld [smem:[%s14553_s0 + %s12479_s22]]   ;;  %s12482_s4 = smov 8  }
   0x7   :  { %14573 = sst [smem:[#allocation38_spill]] %s12578_s5  ;;  %s12483_s10 = smov 9  }
   0x8   :  { %s12606_s29 = sld [smem:[%s14553_s0 + %s12480_s26]]   ;;  %v156_v0 = vstv %s9380_s9  ;;  %s12484_s15 = smov 10  }
   0x9   :  { %14574 = sst [smem:[#allocation39_spill]] %s12586_s13  ;;  %157 = vst [vmem:[#allocation2] sm:$0x1] %v156_v0  ;;  %s12485_s9 = smov 11  }
   0xa   :  { %14575 = sst [smem:[#allocation40_spill]] %s12591_s17  ;;  %s12486_s24 = smov 12  }
   0xb   :  { %14576 = sst [smem:[#allocation41_spill]] %s12596_s21  ;;  %s12488_s6 = smov 14  }
   0xc   :  { %14577 = sst [smem:[#allocation42_spill]] %s12601_s25  ;;  %s12489_s12 = smov 15  }
   0xd   :  { %s12611_s3 = sld [smem:[%s14553_s0 + %s12481_s30]]   ;;  %s12487_s30 = smov 13  }
   0xe   :  { %14578 = sst [smem:[#allocation43_spill]] %s12606_s29  ;;  %s12491_s26 = smov 17  }
   0xf   :  { %s12616_s8 = sld [smem:[%s14553_s0 + %s12482_s4]]   ;;  %s12492_s2 = smov 18  }
  0x10   :  { %s12621_s14 = sld [smem:[%s14553_s0 + %s12483_s10]]  }
  0x11   :  { %s12626_s19 = sld [smem:[%s14553_s0 + %s12484_s15]]  }
  0x12   :  { %s12631_s23 = sld [smem:[%s14553_s0 + %s12485_s9]]   ;;  %s12490_s9 = smov 16  }
  0x13   :  { %14579 = sst [smem:[#allocation44_spill]] %s12611_s3 }
  0x14   :  { %s12636_s28 = sld [smem:[%s14553_s0 + %s12486_s24]]  }
  0x15   :  { %14580 = sst [smem:[#allocation45_spill]] %s12616_s8 }
  0x16   :  { %14581 = sst [smem:[#allocation46_spill]] %s12621_s14 }
  0x17   :  { %14582 = sst [smem:[#allocation47_spill]] %s12626_s19 }
  0x18   :  { %14583 = sst [smem:[#allocation48_spill]] %s12631_s23 }
  0x19   :  { %s12641_s4 = sld [smem:[%s14553_s0 + %s12487_s30]]  }
  0x1a   :  { %14584 = sst [smem:[#allocation49_spill]] %s12636_s28 }
  0x1b   :  { %s12646_s11 = sld [smem:[%s14553_s0 + %s12488_s6]]  }
  0x1c   :  { %s12651_s18 = sld [smem:[%s14553_s0 + %s12489_s12]]   ;;  %s12493_s12 = smov 19  }
  0x1d   :  { %s12656_s24 = sld [smem:[%s14553_s0 + %s12490_s9]]   ;;  %s12494_s9 = smov 20  }
  0x1e   :  { %s12661_s1 = sld [smem:[%s14553_s0 + %s12491_s26]]   ;;  %s12495_s26 = smov 21  }
  0x1f   :  { %14585 = sst [smem:[#allocation50_spill]] %s12641_s4 }
  0x20   :  { %s12666_s10 = sld [smem:[%s14553_s0 + %s12492_s2]]   ;;  %s12496_s2 = smov 22  }
  0x21   :  { %14586 = sst [smem:[#allocation51_spill]] %s12646_s11 }
  0x22   :  { %14587 = sst [smem:[#allocation52_spill]] %s12651_s18 }
  0x23   :  { %14588 = sst [smem:[#allocation53_spill]] %s12656_s24 }
  0x24   :  { %14589 = sst [smem:[#allocation54_spill]] %s12661_s1 }
  0x25   :  { %s12671_s5 = sld [smem:[%s14553_s0 + %s12493_s12]]   ;;  %s12497_s12 = smov 23  }
  0x26   :  { %14590 = sst [smem:[#allocation55_spill]] %s12666_s10 }
  0x27   :  { %s12676_s18 = sld [smem:[%s14553_s0 + %s12494_s9]]   ;;  %s12498_s9 = smov 24  }
  0x28   :  { %s12681_s24 = sld [smem:[%s14553_s0 + %s12495_s26]]   ;;  %s12499_s26 = smov 25  }
  0x29   :  { %s12686_s1 = sld [smem:[%s14553_s0 + %s12496_s2]]   ;;  %s12500_s2 = smov 26  }
  0x2b   :  { %14591 = sst [smem:[#allocation56_spill]] %s12671_s5 }
  0x2c   :  { %s12691_s5 = sld [smem:[%s14553_s0 + %s12497_s12]]   ;;  %s12501_s12 = smov 27  }
  0x2d   :  { %14592 = sst [smem:[#allocation57_spill]] %s12676_s18 }
  0x2e   :  { %14593 = sst [smem:[#allocation58_spill]] %s12681_s24 }
  0x2f   :  { %14594 = sst [smem:[#allocation59_spill]] %s12686_s1 }
  0x30   :  { %s12696_s18 = sld [smem:[%s14553_s0 + %s12498_s9]]   ;;  %s12502_s9 = smov 28  }
  0x31   :  { %s12701_s24 = sld [smem:[%s14553_s0 + %s12499_s26]]   ;;  %s12503_s26 = smov 29  }
  0x32   :  { %14595 = sst [smem:[#allocation60_spill]] %s12691_s5 }
  0x33   :  { %s12706_s1 = sld [smem:[%s14553_s0 + %s12500_s2]]   ;;  %s12504_s2 = smov 30  }
  0x34   :  { %s12711_s5 = sld [smem:[%s14553_s0 + %s12501_s12]]   ;;  %s12505_s12 = smov 31  }
  0x36   :  { %14596 = sst [smem:[#allocation61_spill]] %s12696_s18 }
  0x37   :  { %14597 = sst [smem:[#allocation62_spill]] %s12701_s24 }
  0x38   :  { %s12716_s18 = sld [smem:[%s14553_s0 + %s12502_s9]]   ;;  %s12506_s9 = smov 32  }
  0x39   :  { %14598 = sst [smem:[#allocation63_spill]] %s12706_s1 }
  0x3a   :  { %14599 = sst [smem:[#allocation64_spill]] %s12711_s5 }
  0x3b   :  { %s12721_s24 = sld [smem:[%s14553_s0 + %s12503_s26]]   ;;  %s12507_s26 = smov 33  }
  0x3c   :  { %s12726_s1 = sld [smem:[%s14553_s0 + %s12504_s2]]   ;;  %s12508_s2 = smov 34  }
  0x3d   :  { %s12731_s5 = sld [smem:[%s14553_s0 + %s12505_s12]]   ;;  %s12509_s12 = smov 35  }
  0x3e   :  { %14600 = sst [smem:[#allocation65_spill]] %s12716_s18 }
  0x3f   :  { %s12736_s18 = sld [smem:[%s14553_s0 + %s12506_s9]]   ;;  %s12510_s9 = smov 36  }
  0x41   :  { %14601 = sst [smem:[#allocation66_spill]] %s12721_s24 }
  0x42   :  { %14602 = sst [smem:[#allocation67_spill]] %s12726_s1 }
  0x43   :  { %14603 = sst [smem:[#allocation68_spill]] %s12731_s5 }
  0x44   :  { %s12741_s24 = sld [smem:[%s14553_s0 + %s12507_s26]]   ;;  %s12511_s26 = smov 37  }
  0x45   :  { %14604 = sst [smem:[#allocation69_spill]] %s12736_s18 }
  0x46   :  { %s12746_s1 = sld [smem:[%s14553_s0 + %s12508_s2]]   ;;  %s12512_s2 = smov 38  }
  0x47   :  { %s12751_s5 = sld [smem:[%s14553_s0 + %s12509_s12]]   ;;  %s12513_s12 = smov 39  }
  0x48   :  { %s12756_s18 = sld [smem:[%s14553_s0 + %s12510_s9]]   ;;  %s12514_s9 = smov 40  }
  0x4a   :  { %14605 = sst [smem:[#allocation70_spill]] %s12741_s24 }
  0x4b   :  { %s12761_s24 = sld [smem:[%s14553_s0 + %s12511_s26]]   ;;  %s12515_s26 = smov 41  }
  0x4c   :  { %14606 = sst [smem:[#allocation71_spill]] %s12746_s1 }
  0x4d   :  { %14607 = sst [smem:[#allocation72_spill]] %s12751_s5 }
  0x4e   :  { %14608 = sst [smem:[#allocation73_spill]] %s12756_s18 }
  0x4f   :  { %s12766_s1 = sld [smem:[%s14553_s0 + %s12512_s2]]   ;;  %s12516_s2 = smov 42  }
  0x50   :  { %s12771_s5 = sld [smem:[%s14553_s0 + %s12513_s12]]   ;;  %s12517_s12 = smov 43  }
  0x51   :  { %14609 = sst [smem:[#allocation74_spill]] %s12761_s24 }
  0x52   :  { %s12776_s18 = sld [smem:[%s14553_s0 + %s12514_s9]]   ;;  %s12518_s9 = smov 44  }
  0x53   :  { %s12781_s24 = sld [smem:[%s14553_s0 + %s12515_s26]]   ;;  %s12519_s26 = smov 45  }
  0x55   :  { %14610 = sst [smem:[#allocation75_spill]] %s12766_s1 }
  0x56   :  { %14611 = sst [smem:[#allocation76_spill]] %s12771_s5 }
  0x57   :  { %s12786_s1 = sld [smem:[%s14553_s0 + %s12516_s2]]   ;;  %s12520_s2 = smov 46  }
  0x58   :  { %14612 = sst [smem:[#allocation77_spill]] %s12776_s18 }
  0x59   :  { %14613 = sst [smem:[#allocation78_spill]] %s12781_s24 }
  0x5a   :  { %s12791_s5 = sld [smem:[%s14553_s0 + %s12517_s12]]   ;;  %s12521_s12 = smov 47  }
  0x5b   :  { %s12796_s18 = sld [smem:[%s14553_s0 + %s12518_s9]]   ;;  %s12522_s9 = smov 48  }
  0x5c   :  { %s12801_s24 = sld [smem:[%s14553_s0 + %s12519_s26]]   ;;  %s12523_s26 = smov 49  }
  0x5d   :  { %14614 = sst [smem:[#allocation79_spill]] %s12786_s1 }
  0x5e   :  { %s12806_s1 = sld [smem:[%s14553_s0 + %s12520_s2]]   ;;  %s12524_s2 = smov 50  }
  0x60   :  { %14615 = sst [smem:[#allocation80_spill]] %s12791_s5 }
  0x61   :  { %14616 = sst [smem:[#allocation81_spill]] %s12796_s18 }
  0x62   :  { %14617 = sst [smem:[#allocation82_spill]] %s12801_s24 }
  0x63   :  { %s12811_s5 = sld [smem:[%s14553_s0 + %s12521_s12]]   ;;  %s12525_s12 = smov 51  }
  0x64   :  { %14618 = sst [smem:[#allocation83_spill]] %s12806_s1 }
  0x65   :  { %s12816_s18 = sld [smem:[%s14553_s0 + %s12522_s9]]   ;;  %s12526_s9 = smov 52  }
  0x66   :  { %s12821_s24 = sld [smem:[%s14553_s0 + %s12523_s26]]   ;;  %s12527_s26 = smov 53  }
  0x67   :  { %s12826_s1 = sld [smem:[%s14553_s0 + %s12524_s2]]   ;;  %s12528_s2 = smov 54  }
  0x68   :  { %s12831_s10 = sld [smem:[%s14553_s0 + %s12525_s12]]   ;;  %s12529_s12 = smov 55  }
  0x69   :  { %s12851_s19 = sld [smem:[%s14553_s0 + %s12529_s12]]   ;;  %s12533_s12 = smov 59  }
  0x6a   :  { %s12871_s11 = sld [smem:[%s14553_s0 + %s12533_s12]]   ;;  %s12537_s12 = smov 63  }
  0x6b   :  { %14619 = sst [smem:[#allocation84_spill]] %s12816_s18 }
  0x6c   :  { %14620 = sst [smem:[#allocation85_spill]] %s12821_s24 }
  0x6d   :  { %14621 = sst [smem:[#allocation86_spill]] %s12826_s1 }
  0x6e   :  { %s12836_s18 = sld [smem:[%s14553_s0 + %s12526_s9]]   ;;  %s12530_s9 = smov 56  }
  0x6f   :  { %s12841_s24 = sld [smem:[%s14553_s0 + %s12527_s26]]   ;;  %s12531_s26 = smov 57  }
  0x70   :  { %s12846_s1 = sld [smem:[%s14553_s0 + %s12528_s2]]   ;;  %s12532_s2 = smov 58  }
  0x71   :  { %s12856_s8 = sld [smem:[%s14553_s0 + %s12530_s9]]   ;;  %s12534_s9 = smov 60  }
  0x72   :  { %s12861_s23 = sld [smem:[%s14553_s0 + %s12531_s26]]   ;;  %s12535_s26 = smov 61  }
  0x73   :  { %s12866_s14 = sld [smem:[%s14553_s0 + %s12532_s2]]   ;;  %s12536_s2 = smov 62  }
  0x74   :  { %14624 = sst [smem:[#allocation89_spill]] %s12871_s11 }
  0x75   :  { %s12876_s13 = sld [smem:[%s14553_s0 + %s12534_s9]]   ;;  %s12538_s9 = smov 64  }
  0x76   :  { %s12891_s11 = sld [smem:[%s14553_s0 + %s12537_s12]]   ;;  %s12541_s12 = smov 67  }
  0x77   :  { %s12896_s29 = sld [smem:[%s14553_s0 + %s12538_s9]]   ;;  %s12542_s9 = smov 68  }
  0x78   :  { %14622 = sst [smem:[#allocation87_spill]] %s12861_s23 }
  0x79   :  { %14623 = sst [smem:[#allocation88_spill]] %s12866_s14 }
  0x7a   :  { %s12881_s23 = sld [smem:[%s14553_s0 + %s12535_s26]]   ;;  %s12539_s26 = smov 65  }
  0x7b   :  { %s12886_s14 = sld [smem:[%s14553_s0 + %s12536_s2]]   ;;  %s12540_s2 = smov 66  }
  0x7c   :  { %s12901_s3 = sld [smem:[%s14553_s0 + %s12539_s26]]   ;;  %s12543_s26 = smov 69  }
  0x7d   :  { %s12906_s4 = sld [smem:[%s14553_s0 + %s12540_s2]]   ;;  %s12544_s2 = smov 70  }
  0x7e   :  { %s12911_s28 = sld [smem:[%s14553_s0 + %s12541_s12]]   ;;  %s12545_s12 = smov 71  }
  0x7f   :  { %s12916_s21 = sld [smem:[%s14553_s0 + %s12542_s9]]   ;;  %s12546_s9 = smov 72  }
  0x80   :  { %s12921_s25 = sld [smem:[%s14553_s0 + %s12543_s26]]   ;;  %s12547_s26 = smov 73  }
  0x81   :  { %s12936_s17 = sld [smem:[%s14553_s0 + %s12546_s9]]  }
  0x82   :  { %14625 = sst [smem:[#allocation90_spill]] %s12901_s3 }
  0x83   :  { %14626 = sst [smem:[#allocation91_spill]] %s12906_s4 }
  0x84   :  { %14627 = sst [smem:[#allocation92_spill]] %s12911_s28 }
  0x85   :  { %s12926_s4 = sld [smem:[%s14553_s0 + %s12544_s2]]   ;;  %s12548_s2 = smov 74  }
  0x86   :  { %14628 = sst [smem:[#allocation93_spill]] %s12921_s25 }
  0x87   :  { %s12931_s28 = sld [smem:[%s14553_s0 + %s12545_s12]]   ;;  %s12549_s12 = smov 75  }
  0x88   :  { %s12941_s25 = sld [smem:[%s14553_s0 + %s12547_s26]]  }
  0x89   :  { %s12946_s3 = sld [smem:[%s14553_s0 + %s12548_s2]]  }
  0x8d   :  { %14629 = sst [smem:[#allocation94_spill]] %s12931_s28 }
  0x8e   :  { %s12951_s28 = sld [smem:[%s14553_s0 + %s12549_s12]]  }
  0x8f   :  { %158 = vsyncpa [#allocation4], 0 }
  0x90   :  { %159 = vsyncpa [#allocation6], 0 }
  0x91   :  { %160 = vsyncpa [#allocation9], 0 }
  0x92   :  { %161 = vsyncpa [#allocation12], 0 }
  0x93   :  { %162 = vsyncpa [#allocation15], 0 }
  0x94   :  { %163 = vsyncpa [#allocation18], 0 }
  0x95   :  { %164 = vsyncpa [#allocation21], 0 }
  0x96   :  { %165 = vsyncpa [#allocation24], 0 }
  0x97   :  { %166 = vsyncpa [#allocation27], 0  ;;  %s12550_s9 = smov [#allocation5]   ;;  %s12551_s22 = smov [#allocation8]  }
  0x98   :  { %s283_s20 = sshll.u32 %s12550_s9, 4  ;;  %s303_s26 = sshll.u32 %s12551_s22, 4  ;;  %s284_s20 = int_to_ptr.vmem [resolvable:$true] %s283_s20  ;;  %s304_s26 = int_to_ptr.vmem [resolvable:$true] %s303_s26 }
  0x99   :  { %s12125_s27 = scalar_lea.vmem %s284_s20, 16  ;;  %s12129_s30 = scalar_lea.vmem %s284_s20, 32 }
  0x9a   :  { %p12126_p0 = scmp.ne.s32.totalorder %s284_s20, %s12125_s27  ;;  %p12130_p1 = scmp.lt.s32.totalorder %s284_s20, %s284_s20 }
  0x9b   :  { %p12131_p2 = scmp.lt.s32.totalorder %s12129_s30, %s12125_s27 }
  0x9d   :  { %p12132_p3 = por %p12131_p2, %p12130_p1 }
  0x9f   :  { %p12133_p4 = pnand %p12132_p3, %p12126_p0 }
  0xa1   :  { %12136 = shalt.err (!%p12133_p4)
}
  0xa2   :  { %286 = dma.hbm_to_vmem [thread:$0]  %s12831_s10, 16, %s284_s20, [#allocation6]  }
  0xa3   :  { %s12145_s0 = scalar_lea.vmem %s304_s26, 16  ;;  %s12149_s2 = scalar_lea.vmem %s304_s26, 32 }
  0xa4   :  { %p12146_p5 = scmp.ne.s32.totalorder %s304_s26, %s12145_s0  ;;  %p12150_p6 = scmp.lt.s32.totalorder %s304_s26, %s304_s26 }
  0xa5   :  { %p12151_p7 = scmp.lt.s32.totalorder %s12149_s2, %s12145_s0 }
  0xa7   :  { %p12152_p8 = por %p12151_p7, %p12150_p6 }
  0xa9   :  { %p12153_p9 = pnand %p12152_p8, %p12146_p5 }
  0xab   :  { %12156 = shalt.err (!%p12153_p9)
}
  0xac   :  { %306 = dma.hbm_to_vmem [thread:$0]  %s12841_s24, 16, %s304_s26, [#allocation9]  }
  0xad   :  { %s12552_s6 = smov [#allocation11]   ;;  %s12553_s12 = smov [#allocation14]  }
  0xae   :  { %s323_s7 = sshll.u32 %s12552_s6, 4  ;;  %s349_s15 = sshll.u32 %s12553_s12, 4  ;;  %s324_s7 = int_to_ptr.vmem [resolvable:$true] %s323_s7  ;;  %s350_s15 = int_to_ptr.vmem [resolvable:$true] %s349_s15 }
  0xaf   :  { %s12165_s16 = scalar_lea.vmem %s324_s7, 16  ;;  %s12169_s9 = scalar_lea.vmem %s324_s7, 32 }
  0xb0   :  { %p12166_p10 = scmp.ne.s32.totalorder %s324_s7, %s12165_s16  ;;  %p12170_p11 = scmp.lt.s32.totalorder %s324_s7, %s324_s7 }
  0xb1   :  { %p12171_p12 = scmp.lt.s32.totalorder %s12169_s9, %s12165_s16 }
  0xb3   :  { %p12172_p13 = por %p12171_p12, %p12170_p11 }
  0xb5   :  { %p12173_p0 = pnand %p12172_p13, %p12166_p10 }
  0xb7   :  { %12176 = shalt.err (!%p12173_p0)
}
  0xb8   :  { %326 = dma.hbm_to_vmem [thread:$0]  %s12851_s19, 16, %s324_s7, [#allocation12]  }
  0xb9   :  { %s12185_s10 = scalar_lea.vmem %s350_s15, 16  ;;  %s12189_s20 = scalar_lea.vmem %s350_s15, 32 }
  0xba   :  { %p12186_p1 = scmp.ne.s32.totalorder %s350_s15, %s12185_s10  ;;  %p12190_p2 = scmp.lt.s32.totalorder %s350_s15, %s350_s15 }
  0xbb   :  { %p12191_p3 = scmp.lt.s32.totalorder %s12189_s20, %s12185_s10 }
  0xbd   :  { %p12192_p4 = por %p12191_p3, %p12190_p2 }
  0xbf   :  { %p12193_p5 = pnand %p12192_p4, %p12186_p1 }
  0xc1   :  { %12196 = shalt.err (!%p12193_p5)
}
  0xc2   :  { %352 = dma.hbm_to_vmem [thread:$0]  %s12876_s13, 16, %s350_s15, [#allocation15]  }
  0xc3   :  { %s12554_s24 = smov [#allocation17]   ;;  %s12555_s26 = smov [#allocation20]  }
  0xc4   :  { %s369_s22 = sshll.u32 %s12554_s24, 4  ;;  %s389_s27 = sshll.u32 %s12555_s26, 4  ;;  %s370_s22 = int_to_ptr.vmem [resolvable:$true] %s369_s22  ;;  %s390_s27 = int_to_ptr.vmem [resolvable:$true] %s389_s27 }
  0xc5   :  { %s12205_s30 = scalar_lea.vmem %s370_s22, 16  ;;  %s12209_s0 = scalar_lea.vmem %s370_s22, 32 }
  0xc6   :  { %p12206_p6 = scmp.ne.s32.totalorder %s370_s22, %s12205_s30  ;;  %p12210_p7 = scmp.lt.s32.totalorder %s370_s22, %s370_s22 }
  0xc7   :  { %p12211_p8 = scmp.lt.s32.totalorder %s12209_s0, %s12205_s30 }
  0xc9   :  { %p12212_p9 = por %p12211_p8, %p12210_p7 }
  0xcb   :  { %p12213_p10 = pnand %p12212_p9, %p12206_p6 }
  0xcd   :  { %12216 = shalt.err (!%p12213_p10)
}
  0xce   :  { %372 = dma.hbm_to_vmem [thread:$0]  %s12886_s14, 16, %s370_s22, [#allocation18]  }
  0xcf   :  { %s12225_s19 = scalar_lea.vmem %s390_s27, 16  ;;  %s12229_s2 = scalar_lea.vmem %s390_s27, 32 }
  0xd0   :  { %p12226_p11 = scmp.ne.s32.totalorder %s390_s27, %s12225_s19  ;;  %p12230_p12 = scmp.lt.s32.totalorder %s390_s27, %s390_s27 }
  0xd1   :  { %p12231_p13 = scmp.lt.s32.totalorder %s12229_s2, %s12225_s19 }
  0xd3   :  { %p12232_p0 = por %p12231_p13, %p12230_p12 }
  0xd5   :  { %p12233_p1 = pnand %p12232_p0, %p12226_p11 }
  0xd7   :  { %12236 = shalt.err (!%p12233_p1)
}
  0xd8   :  { %392 = dma.hbm_to_vmem [thread:$0]  %s12896_s29, 16, %s390_s27, [#allocation21]  }
  0xd9   :  { %s12556_s13 = smov [#allocation23]   ;;  %s12557_s7 = smov [#allocation26]  }
  0xda   :  { %s413_s6 = sshll.u32 %s12556_s13, 4  ;;  %s433_s12 = sshll.u32 %s12557_s7, 4  ;;  %s414_s6 = int_to_ptr.vmem [resolvable:$true] %s413_s6  ;;  %s434_s12 = int_to_ptr.vmem [resolvable:$true] %s433_s12 }
  0xdb   :  { %s12245_s15 = scalar_lea.vmem %s414_s6, 16  ;;  %s12249_s16 = scalar_lea.vmem %s414_s6, 32 }
  0xdc   :  { %p12246_p2 = scmp.ne.s32.totalorder %s414_s6, %s12245_s15  ;;  %p12250_p3 = scmp.lt.s32.totalorder %s414_s6, %s414_s6 }
  0xdd   :  { %p12251_p4 = scmp.lt.s32.totalorder %s12249_s16, %s12245_s15 }
  0xdf   :  { %p12252_p5 = por %p12251_p4, %p12250_p3 }
  0xe1   :  { %p12253_p6 = pnand %p12252_p5, %p12246_p2 }
  0xe3   :  { %12256 = shalt.err (!%p12253_p6)
}
  0xe4   :  { %416 = dma.hbm_to_vmem [thread:$0]  %s12916_s21, 16, %s414_s6, [#allocation24]  }
  0xe5   :  { %s12265_s14 = scalar_lea.vmem %s434_s12, 16  ;;  %s12269_s9 = scalar_lea.vmem %s434_s12, 32 }
  0xe6   :  { %p12266_p7 = scmp.ne.s32.totalorder %s434_s12, %s12265_s14  ;;  %p12270_p8 = scmp.lt.s32.totalorder %s434_s12, %s434_s12 }
  0xe7   :  { %p12271_p9 = scmp.lt.s32.totalorder %s12269_s9, %s12265_s14 }
  0xe9   :  { %p12272_p10 = por %p12271_p9, %p12270_p8 }
  0xeb   :  { %p12273_p11 = pnand %p12272_p10, %p12266_p7 }
  0xed   :  { %12276 = shalt.err (!%p12273_p11)
}
  0xee   :  { %436 = dma.hbm_to_vmem [thread:$0]  %s12926_s4, 16, %s434_s12, [#allocation27]  }
  0xef   :  { %s12558_s29 = smov [#allocation3]   ;;  %s12559_s20 = smov [#allocation7]  }
  0xf0   :  { %s267_s10 = sshll.u32 %s12558_s29, 4  ;;  %s293_s24 = sshll.u32 %s12559_s20, 4  ;;  %s268_s10 = int_to_ptr.vmem [resolvable:$true] %s267_s10  ;;  %s294_s24 = int_to_ptr.vmem [resolvable:$true] %s293_s24 }
  0xf1   :  { %s12285_s22 = scalar_lea.vmem %s268_s10, 16  ;;  %s12289_s26 = scalar_lea.vmem %s268_s10, 32 }
  0xf2   :  { %p12286_p12 = scmp.ne.s32.totalorder %s268_s10, %s12285_s22  ;;  %p12290_p13 = scmp.lt.s32.totalorder %s268_s10, %s268_s10 }
  0xf3   :  { %p12291_p0 = scmp.lt.s32.totalorder %s12289_s26, %s12285_s22 }
  0xf5   :  { %p12292_p1 = por %p12291_p0, %p12290_p13 }
  0xf7   :  { %p12293_p2 = pnand %p12292_p1, %p12286_p12 }
  0xf9   :  { %12296 = shalt.err (!%p12293_p2)
}
  0xfa   :  { %270 = dma.hbm_to_vmem [thread:$0]  %s12811_s5, 16, %s268_s10, [#allocation4]  }
  0xfb   :  { %s12305_s21 = scalar_lea.vmem %s294_s24, 16  ;;  %s12309_s27 = scalar_lea.vmem %s294_s24, 32 }
  0xfc   :  { %p12306_p3 = scmp.ne.s32.totalorder %s294_s24, %s12305_s21  ;;  %p12310_p4 = scmp.lt.s32.totalorder %s294_s24, %s294_s24 }
  0xfd   :  { %p12311_p5 = scmp.lt.s32.totalorder %s12309_s27, %s12305_s21 }
  0xff   :  { %p12312_p6 = por %p12311_p5, %p12310_p4 }
 0x101   :  { %p12313_p7 = pnand %p12312_p6, %p12306_p3 }
 0x103   :  { %12316 = shalt.err (!%p12313_p7)
}
 0x104   :  { %296 = dma.hbm_to_vmem [thread:$0]  %s12836_s18, 16, %s294_s24, [#allocation6]  }
 0x105   :  { %s12560_s4 = smov [#allocation10]   ;;  %s12561_s0 = smov [#allocation13]  }
 0x106   :  { %s313_s30 = sshll.u32 %s12560_s4, 4  ;;  %s333_s19 = sshll.u32 %s12561_s0, 4  ;;  %s314_s30 = int_to_ptr.vmem [resolvable:$true] %s313_s30  ;;  %s334_s19 = int_to_ptr.vmem [resolvable:$true] %s333_s19 }
 0x107   :  { %s12325_s2 = scalar_lea.vmem %s314_s30, 16  ;;  %s12329_s13 = scalar_lea.vmem %s314_s30, 32 }
 0x108   :  { %p12326_p8 = scmp.ne.s32.totalorder %s314_s30, %s12325_s2  ;;  %p12330_p9 = scmp.lt.s32.totalorder %s314_s30, %s314_s30 }
 0x109   :  { %p12331_p10 = scmp.lt.s32.totalorder %s12329_s13, %s12325_s2 }
 0x10b   :  { %p12332_p11 = por %p12331_p10, %p12330_p9 }
 0x10d   :  { %p12333_p12 = pnand %p12332_p11, %p12326_p8 }
 0x10f   :  { %12336 = shalt.err (!%p12333_p12)
}
 0x110   :  { %316 = dma.hbm_to_vmem [thread:$0]  %s12846_s1, 16, %s314_s30, [#allocation9]  }
 0x111   :  { %s12345_s5 = scalar_lea.vmem %s334_s19, 16  ;;  %s12349_s6 = scalar_lea.vmem %s334_s19, 32 }
 0x112   :  { %p12346_p13 = scmp.ne.s32.totalorder %s334_s19, %s12345_s5  ;;  %p12350_p0 = scmp.lt.s32.totalorder %s334_s19, %s334_s19 }
 0x113   :  { %p12351_p1 = scmp.lt.s32.totalorder %s12349_s6, %s12345_s5 }
 0x115   :  { %p12352_p2 = por %p12351_p1, %p12350_p0 }
 0x117   :  { %p12353_p3 = pnand %p12352_p2, %p12346_p13 }
 0x119   :  { %12356 = shalt.err (!%p12353_p3)
}
 0x11a   :  { %336 = dma.hbm_to_vmem [thread:$0]  %s12856_s8, 16, %s334_s19, [#allocation12]  }
 0x11b   :  { %s12562_s18 = smov [#allocation16]   ;;  %s12563_s12 = smov [#allocation19]  }
 0x11c   :  { %s359_s7 = sshll.u32 %s12562_s18, 4  ;;  %s379_s15 = sshll.u32 %s12563_s12, 4  ;;  %s360_s7 = int_to_ptr.vmem [resolvable:$true] %s359_s7  ;;  %s380_s15 = int_to_ptr.vmem [resolvable:$true] %s379_s15 }
 0x11d   :  { %s12365_s16 = scalar_lea.vmem %s360_s7, 16  ;;  %s12369_s14 = scalar_lea.vmem %s360_s7, 32 }
 0x11e   :  { %p12366_p4 = scmp.ne.s32.totalorder %s360_s7, %s12365_s16  ;;  %p12370_p5 = scmp.lt.s32.totalorder %s360_s7, %s360_s7 }
 0x11f   :  { %p12371_p6 = scmp.lt.s32.totalorder %s12369_s14, %s12365_s16 }
 0x121   :  { %p12372_p7 = por %p12371_p6, %p12370_p5 }
 0x123   :  { %p12373_p8 = pnand %p12372_p7, %p12366_p4 }
 0x125   :  { %12376 = shalt.err (!%p12373_p8)
}
 0x126   :  { %362 = dma.hbm_to_vmem [thread:$0]  %s12881_s23, 16, %s360_s7, [#allocation15]  }
 0x127   :  { %s12385_s1 = scalar_lea.vmem %s380_s15, 16  ;;  %s12389_s9 = scalar_lea.vmem %s380_s15, 32 }
 0x128   :  { %p12386_p9 = scmp.ne.s32.totalorder %s380_s15, %s12385_s1  ;;  %p12390_p10 = scmp.lt.s32.totalorder %s380_s15, %s380_s15 }
 0x129   :  { %p12391_p11 = scmp.lt.s32.totalorder %s12389_s9, %s12385_s1 }
 0x12b   :  { %p12392_p12 = por %p12391_p11, %p12390_p10 }
 0x12d   :  { %p12393_p13 = pnand %p12392_p12, %p12386_p9 }
 0x12f   :  { %12396 = shalt.err (!%p12393_p13)
}
 0x130   :  { %382 = dma.hbm_to_vmem [thread:$0]  %s12891_s11, 16, %s380_s15, [#allocation18]  }
 0x131   :  { %s12564_s8 = smov [#allocation22]   ;;  %s12565_s10 = smov [#allocation25]  }
 0x132   :  { %s399_s29 = sshll.u32 %s12564_s8, 4  ;;  %s423_s20 = sshll.u32 %s12565_s10, 4  ;;  %s400_s29 = int_to_ptr.vmem [resolvable:$true] %s399_s29  ;;  %s424_s20 = int_to_ptr.vmem [resolvable:$true] %s423_s20 }
 0x133   :  { %s12405_s24 = scalar_lea.vmem %s400_s29, 16  ;;  %s12409_s22 = scalar_lea.vmem %s400_s29, 32 }
 0x134   :  { %p12406_p0 = scmp.ne.s32.totalorder %s400_s29, %s12405_s24  ;;  %p12410_p1 = scmp.lt.s32.totalorder %s400_s29, %s400_s29 }
 0x135   :  { %p12411_p2 = scmp.lt.s32.totalorder %s12409_s22, %s12405_s24 }
 0x137   :  { %p12412_p3 = por %p12411_p2, %p12410_p1 }
 0x139   :  { %p12413_p4 = pnand %p12412_p3, %p12406_p0 }
 0x13b   :  { %12416 = shalt.err (!%p12413_p4)
}
 0x13c   :  { %s14630_s23 = sld [smem:[#allocation90_spill]]  ;;  %s12425_s26 = scalar_lea.vmem %s424_s20, 16 }
 0x13d   :  { %p12426_p5 = scmp.ne.s32.totalorder %s424_s20, %s12425_s26  ;;  %s12429_s21 = scalar_lea.vmem %s424_s20, 32 }
 0x13e   :  { %p12430_p6 = scmp.lt.s32.totalorder %s424_s20, %s424_s20  ;;  %p12431_p7 = scmp.lt.s32.totalorder %s12429_s21, %s12425_s26 }
 0x140   :  { %p12432_p8 = por %p12431_p7, %p12430_p6 }
 0x142   :  { %402 = dma.hbm_to_vmem [thread:$0]  %s14630_s23, 16, %s400_s29, [#allocation21]  }
 0x143   :  { %p12433_p9 = pnand %p12432_p8, %p12426_p5 }
 0x145   :  { %12436 = shalt.err (!%p12433_p9)
}
 0x146   :  { %s14631_s11 = sld [smem:[#allocation93_spill]]  ;;  %s12566_s27 = smov [#allocation28]  }
 0x147   :  { %s443_s4 = sshll.u32 %s12566_s27, 4  ;;  %s444_s4 = int_to_ptr.vmem [resolvable:$true] %s443_s4 }
 0x148   :  { %s12445_s30 = scalar_lea.vmem %s444_s4, 16  ;;  %s12449_s0 = scalar_lea.vmem %s444_s4, 32 }
 0x149   :  { %p12446_p10 = scmp.ne.s32.totalorder %s444_s4, %s12445_s30  ;;  %p12450_p11 = scmp.lt.s32.totalorder %s444_s4, %s444_s4 }
 0x14a   :  { %p12451_p12 = scmp.lt.s32.totalorder %s12449_s0, %s12445_s30 }
 0x14c   :  { %426 = dma.hbm_to_vmem [thread:$0]  %s14631_s11, 16, %s424_s20, [#allocation24]  }
 0x14d   :  { %p12452_p13 = por %p12451_p12, %p12450_p11 }
 0x14f   :  { %p12453_p0 = pnand %p12452_p13, %p12446_p10 }
 0x151   :  { %12456 = shalt.err (!%p12453_p0)
}
 0x152   :  { %s14632_s19 = sld [smem:[#allocation94_spill]] }
 0x158   :  { %446 = dma.hbm_to_vmem [thread:$0]  %s14632_s19, 16, %s444_s4, [#allocation27]  }
 0x159   :  { %12457 = dma.done.wait [#allocation4], 16  }
 0x15a   :  { %12458 = vsyncadd [#allocation4], 4294967280 }
 0x15b   :  { %12459 = dma.done.wait [#allocation6], 32  }
 0x15c   :  { %12460 = vsyncadd [#allocation6], 4294967264 }
 0x15d   :  { %12461 = dma.done.wait [#allocation9], 32  }
 0x15e   :  { %12462 = vsyncadd [#allocation9], 4294967264 }
 0x15f   :  { %12463 = dma.done.wait [#allocation12], 32  }
 0x160   :  { %12464 = vsyncadd [#allocation12], 4294967264 }
 0x161   :  { %12465 = dma.done.wait [#allocation15], 32  }
 0x162   :  { %12466 = vsyncadd [#allocation15], 4294967264 }
 0x163   :  { %12467 = dma.done.wait [#allocation18], 32  }
 0x164   :  { %12468 = vsyncadd [#allocation18], 4294967264 }
 0x165   :  { %12469 = dma.done.wait [#allocation21], 32  }
 0x166   :  { %12470 = vsyncadd [#allocation21], 4294967264 }
 0x167   :  { %12471 = dma.done.wait [#allocation24], 32  }
 0x168   :  { %12472 = vsyncadd [#allocation24], 4294967264 }
 0x169   :  { %12473 = dma.done.wait [#allocation27], 32  }
 0x16a   :  { %12474 = vsyncadd [#allocation27], 4294967264  ;;  %vm614_vm0 = vcmask 1040384   ;;  %v12567_v1 = vmov 0   ;;  %v11877_v5 = vld [vmem:[%s12941_s25 + $0x10] sm:$0xff]   ;;  %vm589_vm1 = vcmask 400384  }
 0x16b   :  { %v616_v2 = vsel %vm614_vm0, 65535, %v12567_v1  ;;  %v11876_v3 = vld [vmem:[%s12941_s25 + $0x18] ss:$0 sps:$4 sm:$0x11]   ;;  %v11880_v6 = vld [vmem:[%s12936_s17] sm:$0xff]   ;;  %v11878_v7 = vld [vmem:[%s12941_s25 + $0x8] sm:$0xff]  }
 0x16c   :  { %v618_v4 = vand.u32 %v11876_v3, %v616_v2  ;;  %10630 = vmatprep.mubr.msk.bf16.mxu0 %vm589_vm1, %v11880_v6  ;;  %v11879_v8 = vld [vmem:[%s12941_s25] sm:$0xff]   ;;  %v11881_v9 = vld [vmem:[%s12936_s17 + $0x8] sm:$0xff]   ;;  %v11882_v10 = vld [vmem:[%s12936_s17 + $0x10] sm:$0xff]   ;;  %vm717_vm2 = vcmask 64512   ;;  %s14634_s25 = sld [smem:[#allocation42_spill]]  ;;  %vm1231_vm3 = vcmask 1043456  }
 0x16d   :  { %v11883_v11 = vld [vmem:[%s12936_s17 + $0x18] sm:$0xff]   ;;  %v11884_v12 = vld [vmem:[%s12936_s17 + $0x20] sm:$0xff]   ;;  %v11885_v13 = vld [vmem:[%s12936_s17 + $0x28] sm:$0xff]   ;;  %s14635_s2 = sld [smem:[#allocation41_spill]]  ;;  %vm2266_vm4 = vcmask 130048   ;;  %vm12569_vm5 = vmmov 0  }
 0x16e   :  { %10622 = vmatprep.subr.bf16.mxu0 %v618_v4  ;;  %v11886_v14 = vld [vmem:[%s12936_s17 + $0x30] sm:$0xff]   ;;  %v11887_v15 = vld [vmem:[%s12936_s17 + $0x38] sm:$0xff]   ;;  %s14633_s17 = sld [smem:[#allocation40_spill]]  ;;  %vm2754_vm6 = vcmask 261120   ;;  %vm4942_vm7 = vcmask 517120   ;;  %vm5015_vm8 = vcmask 523264  }
 0x16f   :  { %10623 = vmatpush3.bf16.msra.mxu0 %v618_v4  ;;  %s14636_s13 = sld [smem:[#allocation49_spill]]  ;;  %vm5308_vm9 = vcmask 15360   ;;  %vm9202_vm10 = vcmask 1041408   ;;  %vm9365_vm11 = vcmask 1024  }
 0x170   :  { %10624 = vmatprep.subr.bf16.mxu0 %v11877_v5  ;;  %s14637_s5 = sld [smem:[#allocation50_spill]] }
 0x171   :  { %s14638_s6 = sld [smem:[#allocation44_spill]] }
 0x172   :  { %s14639_s18 = sld [smem:[#allocation43_spill]] }
 0x173   :  { %10625 = vmatpush3.bf16.msra.mxu0 %v11877_v5  ;;  %s14640_s7 = sld [smem:[#allocation39_spill]] }
 0x174   :  { %10626 = vmatprep.subr.bf16.mxu0 %v11878_v7  ;;  %s14641_s12 = sld [smem:[#allocation51_spill]] }
 0x175   :  { %s14642_s15 = sld [smem:[#allocation46_spill]] }
 0x176   :  { %s14643_s16 = sld [smem:[#allocation48_spill]] }
 0x177   :  { %10627 = vmatpush3.bf16.msra.mxu0 %v11878_v7  ;;  %s14644_s14 = sld [smem:[#allocation45_spill]] }
 0x178   :  { %10628 = vmatprep.subr.bf16.mxu0 %v11879_v8  ;;  %s14645_s1 = sld [smem:[#allocation47_spill]] }
 0x179   :  { %s14646_s9 = sld [smem:[#allocation55_spill]] }
 0x17a   :  { %s14647_s8 = sld [smem:[#allocation54_spill]] }
 0x17b   :  { %10629 = vmatpush3.bf16.msra.mxu0 %v11879_v8  ;;  %s14648_s29 = sld [smem:[#allocation53_spill]] }
 0x17c   :  { %s14649_s10 = sld [smem:[#allocation62_spill]] }
 0x17d   :  { %s14650_s20 = sld [smem:[#allocation52_spill]] }
 0x17e   :  { %10631 = vmatmul.mubr.msk.bf16.vlgmr.msra.gmra.mxu0 %vm589_vm1, %v11881_v9  ;;  %s14651_s24 = sld [smem:[#allocation63_spill]] }
 0x17f   :  { %10634 = vmatprep.mubr.msk.bf16.mxu0 %vm589_vm1, %v11882_v10  ;;  %s14652_s22 = sld [smem:[#allocation57_spill]] }
 0x180   :  { %s14653_s23 = sld [smem:[#allocation56_spill]] }
 0x181   :  { %s14654_s26 = sld [smem:[#allocation64_spill]] }
 0x182   :  { %s14655_s21 = sld [smem:[#allocation59_spill]] }
 0x183   :  { %s14656_s11 = sld [smem:[#allocation61_spill]] }
 0x184   :  { %s14657_s27 = sld [smem:[#allocation58_spill]] }
 0x185   :  { %s14658_s4 = sld [smem:[#allocation60_spill]] }
 0x186   :  { %10635 = vmatmul.mubr.msk.bf16.gmra.mxu0 %vm589_vm1, %v11883_v11  ;;  %s14659_s30 = sld [smem:[#allocation68_spill]] }
 0x187   :  { %10638 = vmatprep.mubr.msk.bf16.mxu0 %vm589_vm1, %v11884_v12  ;;  %s14660_s0 = sld [smem:[#allocation67_spill]] }
 0x188   :  { %s14661_s19 = sld [smem:[#allocation66_spill]] }
 0x18e   :  { %10639 = vmatmul.mubr.msk.bf16.gmra.mxu0 %vm589_vm1, %v11885_v13 }
 0x18f   :  { %10642 = vmatprep.mubr.msk.bf16.mxu0 %vm589_vm1, %v11886_v14 }
 0x196   :  { %10643 = vmatmul.mubr.msk.bf16.gmra.mxu0 %vm589_vm1, %v11887_v15 }
 0x23e   :  { %v10632_v16 = vpop.f32.mrf.mxu0 }
 0x23f   :  { %v721_v24 = vsel %vm717_vm2, %v10632_v16, 0.0 }
 0x240   :  { %v654_v17 = vpop.f32.mrf.mxu0 }
 0x241   :  { %v718_v20 = vsel %vm717_vm2, %v654_v17, 0.0 }
 0x242   :  { %v10633_v18 = vpop.f32.mrf.mxu0 }
 0x243   :  { %v723_v27 = vsel %vm717_vm2, %v10633_v18, 0.0 }
 0x244   :  { %v657_v19 = vpop.f32.mrf.mxu0 }
 0x245   :  { %v719_v21 = vsel %vm717_vm2, %v657_v19, 0.0 }
 0x246   :  { %v720_v22 = vadd.f32 %v719_v21, %v718_v20  ;;  %v10636_v23 = vpop.f32.mrf.mxu0 }
 0x247   :  { %v729_v36 = vsel %vm717_vm2, %v10636_v23, 0.0 }
 0x248   :  { %v722_v25 = vadd.f32 %v721_v24, %v720_v22  ;;  %v670_v26 = vpop.f32.mrf.mxu0 }
 0x249   :  { %v725_v30 = vsel %vm717_vm2, %v670_v26, 0.0 }
 0x24a   :  { %v724_v28 = vadd.f32 %v723_v27, %v722_v25  ;;  %v10637_v29 = vpop.f32.mrf.mxu0 }
 0x24b   :  { %v731_v39 = vsel %vm717_vm2, %v10637_v29, 0.0 }
 0x24c   :  { %v726_v31 = vadd.f32 %v725_v30, %v724_v28  ;;  %v673_v32 = vpop.f32.mrf.mxu0 }
 0x24d   :  { %v727_v33 = vsel %vm717_vm2, %v673_v32, 0.0 }
 0x24e   :  { %v728_v34 = vadd.f32 %v727_v33, %v726_v31  ;;  %v12997_v35 = vpop.f32.mrf.mxu0 }
 0x24f   :  { %v737_v48 = vsel %vm717_vm2, %v12997_v35, 0.0 }
 0x250   :  { %v730_v37 = vadd.f32 %v729_v36, %v728_v34  ;;  %v686_v38 = vpop.f32.mrf.mxu0 }
 0x251   :  { %v733_v42 = vsel %vm717_vm2, %v686_v38, 0.0 }
 0x252   :  { %v732_v40 = vadd.f32 %v731_v39, %v730_v37  ;;  %v10641_v41 = vpop.f32.mrf.mxu0 }
 0x253   :  { %v739_v51 = vsel %vm717_vm2, %v10641_v41, 0.0 }
 0x254   :  { %v734_v43 = vadd.f32 %v733_v42, %v732_v40  ;;  %v689_v44 = vpop.f32.mrf.mxu0 }
 0x255   :  { %v735_v45 = vsel %vm717_vm2, %v689_v44, 0.0 }
 0x256   :  { %v736_v46 = vadd.f32 %v735_v45, %v734_v43  ;;  %v13003_v47 = vpop.f32.mrf.mxu0 }
 0x257   :  { %v745_v59 = vsel %vm717_vm2, %v13003_v47, 0.0 }
 0x258   :  { %v738_v49 = vadd.f32 %v737_v48, %v736_v46  ;;  %v702_v50 = vpop.f32.mrf.mxu0 }
 0x259   :  { %v741_v54 = vsel %vm717_vm2, %v702_v50, 0.0 }
 0x25a   :  { %v740_v52 = vadd.f32 %v739_v51, %v738_v49  ;;  %v13008_v53 = vpop.f32.mrf.mxu0 }
 0x25b   :  { %v747_v61 = vsel %vm717_vm2, %v13008_v53, 0.0 }
 0x25c   :  { %v742_v55 = vadd.f32 %v741_v54, %v740_v52  ;;  %v705_v56 = vpop.f32.mrf.mxu0 }
 0x25d   :  { %v743_v57 = vsel %vm717_vm2, %v705_v56, 0.0 }
 0x25e   :  { %v744_v58 = vadd.f32 %v743_v57, %v742_v55 }
 0x260   :  { %v746_v60 = vadd.f32 %v745_v59, %v744_v58 }
 0x262   :  { %v748_v62 = vadd.f32 %v747_v61, %v746_v60 }
 0x264   :  { %v749_v63 = vrot.slane %v748_v62, 4 }
 0x266   :  { %v750_v0 = vadd.f32 %v749_v63, %v748_v62 }
 0x268   :  { %v751_v1 = vrot.slane %v750_v0, 2 }
 0x26a   :  { %v752_v2 = vadd.f32 %v751_v1, %v750_v0 }
 0x26c   :  { %v753_v3 = vrot.slane %v752_v2, 1 }
 0x26e   :  { %v754_v4 = vadd.f32 %v753_v3, %v752_v2 }
 0x270   :  { %v756_v5 = vmul.f32 0.0078125, %v754_v4 }
 0x272   :  { %v13016_v6 = vsub.f32 %v654_v17, %v756_v5  ;;  %v13018_v7 = vsub.f32 %v657_v19, %v756_v5  ;;  %v13020_v8 = vsub.f32 %v10632_v16, %v756_v5  ;;  %v13022_v9 = vsub.f32 %v10633_v18, %v756_v5 }
 0x273   :  { %v13028_v12 = vsub.f32 %v670_v26, %v756_v5  ;;  %v13032_v14 = vsub.f32 %v673_v32, %v756_v5  ;;  %v13038_v19 = vsub.f32 %v10636_v23, %v756_v5  ;;  %v13043_v24 = vsub.f32 %v10637_v29, %v756_v5 }
 0x274   :  { %v773_v10 = vmul.f32 %v13016_v6, %v13016_v6  ;;  %v774_v11 = vmul.f32 %v13018_v7, %v13018_v7  ;;  %v775_v13 = vmul.f32 %v13020_v8, %v13020_v8  ;;  %v776_v15 = vmul.f32 %v13022_v9, %v13022_v9 }
 0x275   :  { %v777_v20 = vmul.f32 %v13028_v12, %v13028_v12  ;;  %v778_v25 = vmul.f32 %v13032_v14, %v13032_v14  ;;  %v13048_v28 = vsub.f32 %v686_v38, %v756_v5  ;;  %v779_v23 = vmul.f32 %v13038_v19, %v13038_v19 }
 0x276   :  { %v789_v16 = vsel %vm717_vm2, %v773_v10, 0.0  ;;  %v790_v17 = vsel %vm717_vm2, %v774_v11, 0.0  ;;  %v792_v21 = vsel %vm717_vm2, %v775_v13, 0.0  ;;  %v794_v26 = vsel %vm717_vm2, %v776_v15, 0.0 }
 0x277   :  { %v791_v18 = vadd.f32 %v790_v17, %v789_v16  ;;  %v796_v30 = vsel %vm717_vm2, %v777_v20, 0.0  ;;  %v13053_v32 = vsub.f32 %v689_v44, %v756_v5  ;;  %v780_v29 = vmul.f32 %v13043_v24, %v13043_v24 }
 0x278   :  { %v798_v33 = vsel %vm717_vm2, %v778_v25, 0.0  ;;  %v13059_v36 = vsub.f32 %v12997_v35, %v756_v5  ;;  %v781_v37 = vmul.f32 %v13048_v28, %v13048_v28  ;;  %v800_v38 = vsel %vm717_vm2, %v779_v23, 0.0  ;;  %v13101_v25 = vld [vmem:[#allocation25] ss:$0 sm:$0xff] }
 0x279   :  { %v793_v22 = vadd.f32 %v792_v21, %v791_v18  ;;  %v13064_v40 = vsub.f32 %v10641_v41, %v756_v5  ;;  %v782_v42 = vmul.f32 %v13053_v32, %v13053_v32  ;;  %v802_v43 = vsel %vm717_vm2, %v780_v29, 0.0 }
 0x27a   :  { %v13069_v45 = vsub.f32 %v702_v50, %v756_v5  ;;  %v783_v35 = vmul.f32 %v13059_v36, %v13059_v36  ;;  %v804_v46 = vsel %vm717_vm2, %v781_v37, 0.0  ;;  %v13074_v49 = vsub.f32 %v705_v56, %v756_v5 }
 0x27b   :  { %v795_v27 = vadd.f32 %v794_v26, %v793_v22  ;;  %v784_v41 = vmul.f32 %v13064_v40, %v13064_v40  ;;  %v806_v51 = vsel %vm717_vm2, %v782_v42, 0.0  ;;  %v13080_v54 = vsub.f32 %v13003_v47, %v756_v5 }
 0x27c   :  { %v785_v50 = vmul.f32 %v13069_v45, %v13069_v45  ;;  %v808_v55 = vsel %vm717_vm2, %v783_v35, 0.0  ;;  %v13086_v58 = vsub.f32 %v13008_v53, %v756_v5  ;;  %v786_v56 = vmul.f32 %v13074_v49, %v13074_v49 }
 0x27d   :  { %v797_v31 = vadd.f32 %v796_v30, %v795_v27  ;;  %v810_v59 = vsel %vm717_vm2, %v784_v41, 0.0  ;;  %v787_v61 = vmul.f32 %v13080_v54, %v13080_v54 }
 0x27e   :  { %v812_v47 = vsel %vm717_vm2, %v785_v50, 0.0  ;;  %v788_v63 = vmul.f32 %v13086_v58, %v13086_v58  ;;  %v814_v0 = vsel %vm717_vm2, %v786_v56, 0.0 }
 0x27f   :  { %v799_v34 = vadd.f32 %v798_v33, %v797_v31  ;;  %v816_v53 = vsel %vm717_vm2, %v787_v61, 0.0  ;;  %v13107_v31 = vld [vmem:[#allocation23] ss:$0 sm:$0xff] }
 0x280   :  { %v818_v3 = vsel %vm717_vm2, %v788_v63, 0.0 }
 0x281   :  { %v801_v39 = vadd.f32 %v800_v38, %v799_v34 }
 0x283   :  { %v803_v44 = vadd.f32 %v802_v43, %v801_v39 }
 0x285   :  { %v805_v48 = vadd.f32 %v804_v46, %v803_v44 }
 0x287   :  { %v807_v52 = vadd.f32 %v806_v51, %v805_v48 }
 0x289   :  { %v809_v57 = vadd.f32 %v808_v55, %v807_v52 }
 0x28b   :  { %v811_v60 = vadd.f32 %v810_v59, %v809_v57 }
 0x28d   :  { %v813_v62 = vadd.f32 %v812_v47, %v811_v60 }
 0x28f   :  { %v815_v1 = vadd.f32 %v814_v0, %v813_v62 }
 0x291   :  { %v817_v2 = vadd.f32 %v816_v53, %v815_v1 }
 0x293   :  { %v819_v4 = vadd.f32 %v818_v3, %v817_v2 }
 0x295   :  { %v820_v5 = vrot.slane %v819_v4, 4 }
 0x297   :  { %v821_v10 = vadd.f32 %v820_v5, %v819_v4 }
 0x299   :  { %v822_v11 = vrot.slane %v821_v10, 2 }
 0x29b   :  { %v823_v13 = vadd.f32 %v822_v11, %v821_v10 }
 0x29d   :  { %v824_v15 = vrot.slane %v823_v13, 1 }
 0x29f   :  { %v825_v16 = vadd.f32 %v824_v15, %v823_v13 }
 0x2a1   :  { %v826_v17 = vmul.f32 0.0078125, %v825_v16 }
 0x2a3   :  { %v827_v18 = vadd.f32 1e-05, %v826_v17 }
 0x2a5   :  { %12067 = vrsqrt.f32 %v827_v18 }
 0x2b2   :  { %v12068_v20 = vpop.eup %12067 }
 0x2b3   :  { %v829_v21 = vmul.f32 %v12068_v20, %v13016_v6  ;;  %v830_v22 = vmul.f32 %v12068_v20, %v13018_v7  ;;  %v831_v26 = vmul.f32 %v12068_v20, %v13020_v8  ;;  %v832_v27 = vmul.f32 %v12068_v20, %v13022_v9 }
 0x2b4   :  { %v833_v29 = vmul.f32 %v12068_v20, %v13028_v12  ;;  %v834_v6 = vmul.f32 %v12068_v20, %v13032_v14  ;;  %v835_v9 = vmul.f32 %v12068_v20, %v13038_v19  ;;  %v836_v12 = vmul.f32 %v12068_v20, %v13043_v24 }
 0x2b5   :  { %v852_v23 = vmul.f32 %v13101_v25, %v829_v21  ;;  %v853_v30 = vmul.f32 %v13101_v25, %v830_v22  ;;  %v854_v33 = vmul.f32 %v13101_v25, %v831_v26  ;;  %v855_v7 = vmul.f32 %v13101_v25, %v832_v27 }
 0x2b6   :  { %v856_v37 = vmul.f32 %v13101_v25, %v833_v29  ;;  %v857_v39 = vmul.f32 %v13101_v25, %v834_v6  ;;  %v837_v19 = vmul.f32 %v12068_v20, %v13048_v28  ;;  %v858_v35 = vmul.f32 %v13101_v25, %v835_v9 }
 0x2b7   :  { %v13114_v34 = vadd.f32 %v13107_v31, %v852_v23  ;;  %v13117_v8 = vadd.f32 %v13107_v31, %v853_v30  ;;  %v13122_v38 = vadd.f32 %v13107_v31, %v854_v33  ;;  %v13127_v14 = vadd.f32 %v13107_v31, %v855_v7 }
 0x2b8   :  { %v13136_v46 = vadd.f32 %v13107_v31, %v856_v37  ;;  %v838_v41 = vmul.f32 %v12068_v20, %v13053_v32  ;;  %v859_v51 = vmul.f32 %v13101_v25, %v836_v12  ;;  %v13143_v52 = vadd.f32 %v13107_v31, %v857_v39 }
 0x2b9   :  { %v891_v42 = vsel %vm717_vm2, %v13114_v34, 0.0  ;;  %v892_v43 = vsel %vm717_vm2, %v13117_v8, 0.0  ;;  %v894_v24 = vsel %vm717_vm2, %v13122_v38, 0.0  ;;  %v896_v50 = vsel %vm717_vm2, %v13127_v14, 0.0 }
 0x2ba   :  { %v893_v44 = vadd.f32 %v892_v43, %v891_v42  ;;  %v839_v55 = vmul.f32 %v12068_v20, %v13059_v36  ;;  %v860_v57 = vmul.f32 %v13101_v25, %v837_v19  ;;  %v13150_v56 = vadd.f32 %v13107_v31, %v858_v35  ;;  %v11888_v35 = vld [vmem:[%s14633_s17 + $0x10] sm:$0xff]  }
 0x2bb   :  { %v898_v59 = vsel %vm717_vm2, %v13136_v46, 0.0  ;;  %v840_v60 = vmul.f32 %v12068_v20, %v13064_v40  ;;  %v861_v61 = vmul.f32 %v13101_v25, %v838_v41  ;;  %v13157_v47 = vadd.f32 %v13107_v31, %v859_v51  ;;  %10682 = vmatprep.mubr.bf16.mxu0 %v11888_v35  ;;  %v11890_v51 = vld [vmem:[%s14633_s17] sm:$0xff]  }
 0x2bc   :  { %v895_v48 = vadd.f32 %v894_v24, %v893_v44  ;;  %v900_v62 = vsel %vm717_vm2, %v13143_v52, 0.0  ;;  %v841_v63 = vmul.f32 %v12068_v20, %v13069_v45  ;;  %v862_v0 = vmul.f32 %v13101_v25, %v839_v55  ;;  %10662 = vmatprep.mubr.bf16.mxu1 %v11890_v51 }
 0x2bd   :  { %v13164_v1 = vadd.f32 %v13107_v31, %v860_v57  ;;  %v902_v53 = vsel %vm717_vm2, %v13150_v56, 0.0  ;;  %v842_v2 = vmul.f32 %v12068_v20, %v13074_v49  ;;  %v863_v3 = vmul.f32 %v13101_v25, %v840_v60 }
 0x2be   :  { %v897_v28 = vadd.f32 %v896_v50, %v895_v48  ;;  %v13171_v4 = vadd.f32 %v13107_v31, %v861_v61  ;;  %v904_v5 = vsel %vm717_vm2, %v13157_v47, 0.0  ;;  %v843_v10 = vmul.f32 %v12068_v20, %v13080_v54 }
 0x2bf   :  { %v864_v11 = vmul.f32 %v13101_v25, %v841_v63  ;;  %v13178_v13 = vadd.f32 %v13107_v31, %v862_v0  ;;  %v906_v15 = vsel %vm717_vm2, %v13164_v1, 0.0  ;;  %v844_v16 = vmul.f32 %v12068_v20, %v13086_v58 }
 0x2c0   :  { %v899_v32 = vadd.f32 %v898_v59, %v897_v28  ;;  %v865_v17 = vmul.f32 %v13101_v25, %v842_v2  ;;  %v13185_v18 = vadd.f32 %v13107_v31, %v863_v3  ;;  %v908_v21 = vsel %vm717_vm2, %v13171_v4, 0.0 }
 0x2c1   :  { %v866_v22 = vmul.f32 %v13101_v25, %v843_v10  ;;  %v13191_v26 = vadd.f32 %v13107_v31, %v864_v11  ;;  %v910_v27 = vsel %vm717_vm2, %v13178_v13, 0.0  ;;  %v867_v58 = vmul.f32 %v13101_v25, %v844_v16 }
 0x2c2   :  { %v901_v36 = vadd.f32 %v900_v62, %v899_v32  ;;  %v13197_v20 = vadd.f32 %v13107_v31, %v865_v17  ;;  %v912_v30 = vsel %vm717_vm2, %v13185_v18, 0.0 }
 0x2c3   :  { %v13202_v33 = vadd.f32 %v13107_v31, %v866_v22  ;;  %v914_v6 = vsel %vm717_vm2, %v13191_v26, 0.0  ;;  %v13207_v9 = vadd.f32 %v13107_v31, %v867_v58 }
 0x2c4   :  { %v903_v40 = vadd.f32 %v902_v53, %v901_v36  ;;  %v916_v25 = vsel %vm717_vm2, %v13197_v20, 0.0 }
 0x2c5   :  { %v918_v12 = vsel %vm717_vm2, %v13202_v33, 0.0  ;;  %v920_v42 = vsel %vm717_vm2, %v13207_v9, 0.0 }
 0x2c6   :  { %v905_v45 = vadd.f32 %v904_v5, %v903_v40 }
 0x2c8   :  { %v907_v49 = vadd.f32 %v906_v15, %v905_v45 }
 0x2ca   :  { %v909_v54 = vadd.f32 %v908_v21, %v907_v49 }
 0x2cc   :  { %v911_v23 = vadd.f32 %v910_v27, %v909_v54 }
 0x2ce   :  { %v913_v29 = vadd.f32 %v912_v30, %v911_v23 }
 0x2d0   :  { %v915_v7 = vadd.f32 %v914_v6, %v913_v29 }
 0x2d2   :  { %v917_v37 = vadd.f32 %v916_v25, %v915_v7 }
 0x2d4   :  { %v919_v39 = vadd.f32 %v918_v12, %v917_v37 }
 0x2d6   :  { %v921_v43 = vadd.f32 %v920_v42, %v919_v39 }
 0x2d8   :  { %v922_v44 = vrot.slane %v921_v43, 4 }
 0x2da   :  { %v923_v19 = vadd.f32 %v922_v44, %v921_v43 }
 0x2dc   :  { %v924_v24 = vrot.slane %v923_v19, 2 }
 0x2de   :  { %v925_v48 = vadd.f32 %v924_v24, %v923_v19 }
 0x2e0   :  { %v926_v31 = vrot.slane %v925_v48, 1 }
 0x2e2   :  { %v927_v41 = vadd.f32 %v926_v31, %v925_v48 }
 0x2e4   :  { %v928_v50 = vmul.f32 0.0078125, %v927_v41 }
 0x2e6   :  { %v13218_v28 = vsub.f32 %v13114_v34, %v928_v50  ;;  %v13221_v55 = vsub.f32 %v13117_v8, %v928_v50  ;;  %v13224_v57 = vsub.f32 %v13122_v38, %v928_v50  ;;  %v13227_v59 = vsub.f32 %v13127_v14, %v928_v50 }
 0x2e7   :  { %v13234_v61 = vsub.f32 %v13136_v46, %v928_v50  ;;  %v13239_v36 = vsub.f32 %v13143_v52, %v928_v50  ;;  %v13246_v2 = vsub.f32 %v13150_v56, %v928_v50  ;;  %v13252_v10 = vsub.f32 %v13157_v47, %v928_v50 }
 0x2e8   :  { %v945_v32 = vmul.f32 %v13218_v28, %v13218_v28  ;;  %v946_v60 = vmul.f32 %v13221_v55, %v13221_v55  ;;  %v947_v62 = vmul.f32 %v13224_v57, %v13224_v57  ;;  %v948_v63 = vmul.f32 %v13227_v59, %v13227_v59 }
 0x2e9   :  { %v949_v3 = vmul.f32 %v13234_v61, %v13234_v61  ;;  %v950_v11 = vmul.f32 %v13239_v36, %v13239_v36  ;;  %v13258_v16 = vsub.f32 %v13164_v1, %v928_v50  ;;  %v951_v17 = vmul.f32 %v13246_v2, %v13246_v2 }
 0x2ea   :  { %v961_v0 = vsel %vm717_vm2, %v945_v32, 0.0  ;;  %v962_v53 = vsel %vm717_vm2, %v946_v60, 0.0  ;;  %v964_v5 = vsel %vm717_vm2, %v947_v62, 0.0  ;;  %v966_v15 = vsel %vm717_vm2, %v948_v63, 0.0 }
 0x2eb   :  { %v963_v40 = vadd.f32 %v962_v53, %v961_v0  ;;  %v968_v21 = vsel %vm717_vm2, %v949_v3, 0.0  ;;  %v938_v22 = vsub.f32 %v13171_v4, %v928_v50  ;;  %v952_v27 = vmul.f32 %v13252_v10, %v13252_v10 }
 0x2ec   :  { %v970_v23 = vsel %vm717_vm2, %v950_v11, 0.0  ;;  %v939_v30 = vsub.f32 %v13178_v13, %v928_v50  ;;  %v953_v29 = vmul.f32 %v13258_v16, %v13258_v16  ;;  %v972_v6 = vsel %vm717_vm2, %v951_v17, 0.0 }
 0x2ed   :  { %v965_v45 = vadd.f32 %v964_v5, %v963_v40  ;;  %v940_v25 = vsub.f32 %v13185_v18, %v928_v50  ;;  %v954_v37 = vmul.f32 %v938_v22, %v938_v22  ;;  %v974_v12 = vsel %vm717_vm2, %v952_v27, 0.0 }
 0x2ee   :  { %v941_v42 = vsub.f32 %v13191_v26, %v928_v50  ;;  %v955_v43 = vmul.f32 %v939_v30, %v939_v30  ;;  %v976_v44 = vsel %vm717_vm2, %v953_v29, 0.0  ;;  %v942_v35 = vsub.f32 %v13197_v20, %v928_v50 }
 0x2ef   :  { %v967_v49 = vadd.f32 %v966_v15, %v965_v45  ;;  %v956_v24 = vmul.f32 %v940_v25, %v940_v25  ;;  %v978_v48 = vsel %vm717_vm2, %v954_v37, 0.0  ;;  %v943_v41 = vsub.f32 %v13202_v33, %v928_v50 }
 0x2f0   :  { %v957_v51 = vmul.f32 %v941_v42, %v941_v42  ;;  %v980_v32 = vsel %vm717_vm2, %v955_v43, 0.0  ;;  %v944_v62 = vsub.f32 %v13207_v9, %v928_v50  ;;  %v958_v63 = vmul.f32 %v942_v35, %v942_v35 }
 0x2f1   :  { %v969_v54 = vadd.f32 %v968_v21, %v967_v49  ;;  %v982_v0 = vsel %vm717_vm2, %v956_v24, 0.0  ;;  %v959_v40 = vmul.f32 %v943_v41, %v943_v41  ;;  %v13286_v24 = vld [vmem:[%s14634_s25] ss:$0 sm:$0xff]  ;;  %s14663_s25 = sld [smem:[#allocation65_spill]] }
 0x2f2   :  { %v984_v3 = vsel %vm717_vm2, %v957_v51, 0.0  ;;  %v960_v45 = vmul.f32 %v944_v62, %v944_v62  ;;  %v986_v11 = vsel %vm717_vm2, %v958_v63, 0.0 }
 0x2f3   :  { %v971_v58 = vadd.f32 %v970_v23, %v969_v54  ;;  %v988_v49 = vsel %vm717_vm2, %v959_v40, 0.0 }
 0x2f4   :  { %v990_v21 = vsel %vm717_vm2, %v960_v45, 0.0 }
 0x2f5   :  { %v973_v7 = vadd.f32 %v972_v6, %v971_v58 }
 0x2f7   :  { %v975_v39 = vadd.f32 %v974_v12, %v973_v7 }
 0x2f9   :  { %v977_v19 = vadd.f32 %v976_v44, %v975_v39 }
 0x2fb   :  { %v979_v31 = vadd.f32 %v978_v48, %v977_v19 }
 0x2fd   :  { %v981_v60 = vadd.f32 %v980_v32, %v979_v31 }
 0x2ff   :  { %v983_v53 = vadd.f32 %v982_v0, %v981_v60  ;;  %v13293_v0 = vld [vmem:[%s14635_s2] ss:$0 sm:$0xff]  ;;  %s14664_s2 = sld [smem:[#allocation77_spill]] }
 0x301   :  { %v985_v5 = vadd.f32 %v984_v3, %v983_v53 }
 0x303   :  { %v987_v15 = vadd.f32 %v986_v11, %v985_v5 }
 0x305   :  { %v989_v17 = vadd.f32 %v988_v49, %v987_v15 }
 0x307   :  { %v991_v54 = vadd.f32 %v990_v21, %v989_v17 }
 0x309   :  { %v992_v50 = vrot.slane %v991_v54, 4 }
 0x30b   :  { %v993_v27 = vadd.f32 %v992_v50, %v991_v54 }
 0x30d   :  { %v994_v23 = vrot.slane %v993_v27, 2 }
 0x30f   :  { %v995_v58 = vadd.f32 %v994_v23, %v993_v27 }
 0x311   :  { %v996_v29 = vrot.slane %v995_v58, 1 }
 0x313   :  { %v997_v6 = vadd.f32 %v996_v29, %v995_v58 }
 0x315   :  { %v998_v7 = vmul.f32 0.0078125, %v997_v6 }
 0x317   :  { %v999_v37 = vadd.f32 1e-05, %v998_v7 }
 0x319   :  { %12069 = vrsqrt.f32 %v999_v37 }
 0x326   :  { %v12070_v12 = vpop.eup %12069 }
 0x327   :  { %v1013_v39 = vmul.f32 %v12070_v12, %v941_v42  ;;  %v1014_v43 = vmul.f32 %v12070_v12, %v942_v35  ;;  %v1015_v44 = vmul.f32 %v12070_v12, %v943_v41  ;;  %v1016_v19 = vmul.f32 %v12070_v12, %v944_v62 }
 0x328   :  { %v1011_v48 = vmul.f32 %v12070_v12, %v939_v30  ;;  %v1012_v31 = vmul.f32 %v12070_v12, %v940_v25  ;;  %v1009_v53 = vmul.f32 %v12070_v12, %v13258_v16  ;;  %v1010_v42 = vmul.f32 %v12070_v12, %v938_v22 }
 0x329   :  { %v1036_v51 = vmul.f32 %v13286_v24, %v1013_v39  ;;  %v1037_v32 = vmul.f32 %v13286_v24, %v1014_v43  ;;  %v1038_v60 = vmul.f32 %v13286_v24, %v1015_v44  ;;  %v1039_v63 = vmul.f32 %v13286_v24, %v1016_v19 }
 0x32a   :  { %v1034_v35 = vmul.f32 %v13286_v24, %v1011_v48  ;;  %v1035_v41 = vmul.f32 %v13286_v24, %v1012_v31  ;;  %v1007_v3 = vmul.f32 %v12070_v12, %v13246_v2  ;;  %v1008_v5 = vmul.f32 %v12070_v12, %v13252_v10 }
 0x32b   :  { %v1059_v30 = vadd.f32 %v13293_v0, %v1036_v51  ;;  %v1060_v25 = vadd.f32 %v13293_v0, %v1037_v32  ;;  %v1061_v62 = vadd.f32 %v13293_v0, %v1038_v60  ;;  %v1062_v40 = vadd.f32 %v13293_v0, %v1039_v63 }
 0x32c   :  { %v1032_v45 = vmul.f32 %v13286_v24, %v1009_v53  ;;  %v1033_v16 = vmul.f32 %v13286_v24, %v1010_v42  ;;  %v1057_v22 = vadd.f32 %v13293_v0, %v1034_v35  ;;  %v1058_v11 = vadd.f32 %v13293_v0, %v1035_v41 }
 0x32d   :  { %v1075_v15 = vmax.f32 %v1059_v30, 0.0  ;;  %v1076_v49 = vmax.f32 %v1060_v25, 0.0  ;;  %v1077_v17 = vmax.f32 %v1061_v62, 0.0  ;;  %v1078_v21 = vmax.f32 %v1062_v40, 0.0 }
 0x32e   :  { %v1005_v54 = vmul.f32 %v12070_v12, %v13234_v61  ;;  %v1006_v2 = vmul.f32 %v12070_v12, %v13239_v36  ;;  %v1030_v10 = vmul.f32 %v13286_v24, %v1007_v3  ;;  %v1031_v27 = vmul.f32 %v13286_v24, %v1008_v5 }
 0x32f   :  { %v13309_v50 = vpack.c.bf16 %v1078_v21, %v1077_v17  ;;  %v1055_v23 = vadd.f32 %v13293_v0, %v1032_v45  ;;  %v1056_v58 = vadd.f32 %v13293_v0, %v1033_v16  ;;  %v1073_v29 = vmax.f32 %v1057_v22, 0.0  ;;  %v11892_v17 = vld [vmem:[%s14633_s17 + $0x20] sm:$0xff]   ;;  %v11893_v21 = vld [vmem:[%s14633_s17 + $0x28] sm:$0xff]  }
 0x330   :  { %v1074_v6 = vmax.f32 %v1058_v11, 0.0  ;;  %v13316_v7 = vpack.c.bf16 %v1076_v49, %v1075_v15  ;;  %v1003_v61 = vmul.f32 %v12070_v12, %v13224_v57  ;;  %v1004_v36 = vmul.f32 %v12070_v12, %v13227_v59  ;;  %v11889_v15 = vld [vmem:[%s14633_s17 + $0x18] sm:$0xff]   ;;  %v11891_v49 = vld [vmem:[%s14633_s17 + $0x8] sm:$0xff]  }
 0x331   :  { %10646 = vmatprep.subr.bf16.mxu1 %v13309_v50  ;;  %10666 = vmatprep.subr.bf16.mxu0 %v13309_v50  ;;  %v1028_v37 = vmul.f32 %v13286_v24, %v1005_v54  ;;  %v1029_v39 = vmul.f32 %v13286_v24, %v1006_v2  ;;  %v1053_v43 = vadd.f32 %v13293_v0, %v1030_v10  ;;  %v1071_v19 = vmax.f32 %v1055_v23, 0.0  ;;  %v11894_v54 = vld [vmem:[%s14633_s17 + $0x40] sm:$0xff]   ;;  %v9525_v2 = vld [vmem:[%s14636_s13 + $0x14] sm:$0xf]  ;;  %v11895_v10 = vld [vmem:[%s14633_s17 + $0x48] sm:$0xff]  }
 0x332   :  { %10647 = vmatpush3.bf16.msra.mxu1 %v13309_v50  ;;  %10667 = vmatpush3.bf16.msra.mxu0 %v13309_v50  ;;  %v1054_v44 = vadd.f32 %v13293_v0, %v1031_v27  ;;  %v1072_v48 = vmax.f32 %v1056_v58, 0.0  ;;  %v13330_v31 = vpack.c.bf16 %v1074_v6, %v1073_v29  ;;  %v1001_v57 = vmul.f32 %v12070_v12, %v13218_v28  ;;  %v9487_v23 = vld [vmem:[%s14636_s13 + $0x4] sm:$0xf]  ;;  %v1154_v29 = vld [vmem:[%s14636_s13] sm:$0xf] }
 0x333   :  { %10648 = vmatprep.subr.bf16.mxu1 %v13316_v7  ;;  %10668 = vmatprep.subr.bf16.mxu0 %v13316_v7  ;;  %v1002_v59 = vmul.f32 %v12070_v12, %v13221_v55  ;;  %v1026_v51 = vmul.f32 %v13286_v24, %v1003_v61  ;;  %v1027_v32 = vmul.f32 %v13286_v24, %v1004_v36  ;;  %v1069_v53 = vmax.f32 %v1053_v43, 0.0 }
 0x334   :  { %v1051_v60 = vadd.f32 %v13293_v0, %v1028_v37  ;;  %v1052_v63 = vadd.f32 %v13293_v0, %v1029_v39  ;;  %v1070_v42 = vmax.f32 %v1054_v44, 0.0  ;;  %v13342_v35 = vpack.c.bf16 %v1072_v48, %v1071_v19 }
 0x335   :  { %v1024_v28 = vmul.f32 %v13286_v24, %v1001_v57  ;;  %v1025_v55 = vmul.f32 %v13286_v24, %v1002_v59  ;;  %v1049_v12 = vadd.f32 %v13293_v0, %v1026_v51  ;;  %v1050_v41 = vadd.f32 %v13293_v0, %v1027_v32  ;;  %v9498_v32 = vld [vmem:[%s14636_s13 + $0x8] sm:$0xf] }
 0x336   :  { %10649 = vmatpush3.bf16.msra.mxu1 %v13316_v7  ;;  %10669 = vmatpush3.bf16.msra.mxu0 %v13316_v7  ;;  %v1067_v30 = vmax.f32 %v1051_v60, 0.0  ;;  %v1068_v25 = vmax.f32 %v1052_v63, 0.0  ;;  %v13352_v62 = vpack.c.bf16 %v1070_v42, %v1069_v53  ;;  %v1815_v27 = vsel %vm1231_vm3, %v9525_v2, 0 }
 0x337   :  { %10650 = vmatprep.subr.bf16.mxu1 %v13330_v31  ;;  %10670 = vmatprep.subr.bf16.mxu0 %v13330_v31  ;;  %v1047_v40 = vadd.f32 %v13293_v0, %v1024_v28  ;;  %v1048_v24 = vadd.f32 %v13293_v0, %v1025_v55  ;;  %v1065_v3 = vmax.f32 %v1049_v12, 0.0  ;;  %v1066_v5 = vmax.f32 %v1050_v41, 0.0  ;;  %v11896_v41 = vld [vmem:[%s14633_s17 + $0x30] sm:$0xff]  }
 0x338   :  { %v13360_v45 = vpack.c.bf16 %v1068_v25, %v1067_v30  ;;  %v1233_v58 = vsel %vm1231_vm3, %v9487_v23, 0  ;;  %v1291_v51 = vsel %vm1231_vm3, %v1154_v29, 0  ;;  %v1419_v63 = vsel %vm1231_vm3, %v9498_v32, 0  ;;  %v11897_v25 = vld [vmem:[%s14633_s17 + $0x38] sm:$0xff]  }
 0x339   :  { %v1063_v16 = vmax.f32 %v1047_v40, 0.0  ;;  %v1064_v22 = vmax.f32 %v1048_v24, 0.0  ;;  %v13366_v11 = vpack.c.bf16 %v1066_v5, %v1065_v3  ;;  %v9507_v40 = vld [vmem:[%s14636_s13 + $0xc] sm:$0xf]  ;;  %v9516_v3 = vld [vmem:[%s14636_s13 + $0x10] sm:$0xf] }
 0x33a   :  { %10651 = vmatpush3.bf16.msra.mxu1 %v13330_v31  ;;  %10671 = vmatpush3.bf16.msra.mxu0 %v13330_v31  ;;  %v1551_v24 = vsel %vm1231_vm3, %v9507_v40, 0 }
 0x33b   :  { %10652 = vmatprep.subr.bf16.mxu1 %v13342_v35  ;;  %10672 = vmatprep.subr.bf16.mxu0 %v13342_v35  ;;  %v13372_v0 = vpack.c.bf16 %v1064_v22, %v1063_v16 }
 0x33e   :  { %10653 = vmatpush3.bf16.msra.mxu1 %v13342_v35  ;;  %10673 = vmatpush3.bf16.msra.mxu0 %v13342_v35 }
 0x33f   :  { %10654 = vmatprep.subr.bf16.mxu1 %v13352_v62  ;;  %10674 = vmatprep.subr.bf16.mxu0 %v13352_v62 }
 0x342   :  { %10655 = vmatpush3.bf16.msra.mxu1 %v13352_v62  ;;  %10675 = vmatpush3.bf16.msra.mxu0 %v13352_v62 }
 0x343   :  { %10656 = vmatprep.subr.bf16.mxu1 %v13360_v45  ;;  %10676 = vmatprep.subr.bf16.mxu0 %v13360_v45 }
 0x346   :  { %10657 = vmatpush3.bf16.msra.mxu1 %v13360_v45  ;;  %10677 = vmatpush3.bf16.msra.mxu0 %v13360_v45 }
 0x347   :  { %10658 = vmatprep.subr.bf16.mxu1 %v13366_v11  ;;  %10678 = vmatprep.subr.bf16.mxu0 %v13366_v11 }
 0x34a   :  { %10659 = vmatpush3.bf16.msra.mxu1 %v13366_v11  ;;  %10679 = vmatpush3.bf16.msra.mxu0 %v13366_v11 }
 0x34b   :  { %10660 = vmatprep.subr.bf16.mxu1 %v13372_v0  ;;  %10680 = vmatprep.subr.bf16.mxu0 %v13372_v0 }
 0x34e   :  { %10661 = vmatpush3.bf16.msra.mxu1 %v13372_v0  ;;  %10681 = vmatpush3.bf16.msra.mxu0 %v13372_v0 }
 0x34f   :  { %10698 = vmatprep.subr.bf16.mxu0 %v13309_v50  ;;  %11771 = vmatprep.subr.msk.bf16.mxu1 %vm1231_vm3, %v9487_v23 }
 0x351   :  { %10683 = vmatmul.mubr.bf16.vlgmr.msra.gmra.mxu0 %v11889_v15  ;;  %10663 = vmatmul.mubr.bf16.vlgmr.msra.gmra.mxu1 %v11891_v49 }
 0x352   :  { %10699 = vmatpush3.bf16.msra.mxu0 %v13309_v50  ;;  %10714 = vmatprep.mubr.bf16.mxu0 %v11892_v17 }
 0x353   :  { %10700 = vmatprep.subr.bf16.mxu0 %v13316_v7  ;;  %10687 = vmatpush3.bf16.msra.mxu1 %v1233_v58 }
 0x354   :  { %11772 = vmatprep.subr.msk.bf16.mxu1 %vm1231_vm3, %v1154_v29 }
 0x356   :  { %10701 = vmatpush3.bf16.msra.mxu0 %v13316_v7 }
 0x357   :  { %10702 = vmatprep.subr.bf16.mxu0 %v13330_v31 }
 0x35a   :  { %10703 = vmatpush3.bf16.msra.mxu0 %v13330_v31 }
 0x35b   :  { %10704 = vmatprep.subr.bf16.mxu0 %v13342_v35 }
 0x35e   :  { %10705 = vmatpush3.bf16.msra.mxu0 %v13342_v35 }
 0x35f   :  { %10706 = vmatprep.subr.bf16.mxu0 %v13352_v62 }
 0x362   :  { %10707 = vmatpush3.bf16.msra.mxu0 %v13352_v62 }
 0x363   :  { %10708 = vmatprep.subr.bf16.mxu0 %v13360_v45 }
 0x366   :  { %10709 = vmatpush3.bf16.msra.mxu0 %v13360_v45 }
 0x367   :  { %10710 = vmatprep.subr.bf16.mxu0 %v13366_v11 }
 0x36a   :  { %10711 = vmatpush3.bf16.msra.mxu0 %v13366_v11 }
 0x36b   :  { %10712 = vmatprep.subr.bf16.mxu0 %v13372_v0 }
 0x36e   :  { %10713 = vmatpush3.bf16.msra.mxu0 %v13372_v0 }
 0x36f   :  { %10750 = vmatprep.subr.bf16.mxu0 %v13309_v50 }
 0x371   :  { %10715 = vmatmul.mubr.bf16.vlgmr.msra.gmra.mxu0 %v11893_v21 }
 0x372   :  { %10751 = vmatpush3.bf16.msra.mxu0 %v13309_v50  ;;  %10766 = vmatprep.mubr.bf16.mxu0 %v11894_v54 }
 0x373   :  { %10752 = vmatprep.subr.bf16.mxu0 %v13316_v7 }
 0x376   :  { %10753 = vmatpush3.bf16.msra.mxu0 %v13316_v7 }
 0x377   :  { %10754 = vmatprep.subr.bf16.mxu0 %v13330_v31 }
 0x37a   :  { %10755 = vmatpush3.bf16.msra.mxu0 %v13330_v31 }
 0x37b   :  { %10756 = vmatprep.subr.bf16.mxu0 %v13342_v35 }
 0x37e   :  { %10757 = vmatpush3.bf16.msra.mxu0 %v13342_v35 }
 0x37f   :  { %10758 = vmatprep.subr.bf16.mxu0 %v13352_v62 }
 0x382   :  { %10759 = vmatpush3.bf16.msra.mxu0 %v13352_v62 }
 0x383   :  { %10760 = vmatprep.subr.bf16.mxu0 %v13360_v45 }
 0x386   :  { %10761 = vmatpush3.bf16.msra.mxu0 %v13360_v45 }
 0x387   :  { %10762 = vmatprep.subr.bf16.mxu0 %v13366_v11 }
 0x38a   :  { %10763 = vmatpush3.bf16.msra.mxu0 %v13366_v11 }
 0x38b   :  { %10764 = vmatprep.subr.bf16.mxu0 %v13372_v0 }
 0x38e   :  { %10765 = vmatpush3.bf16.msra.mxu0 %v13372_v0 }
 0x38f   :  { %11776 = vmatprep.subr.msk.bf16.mxu0 %vm1231_vm3, %v9525_v2 }
 0x391   :  { %10767 = vmatmul.mubr.bf16.vlgmr.msra.gmra.mxu0 %v11895_v10 }
 0x392   :  { %10797 = vmatpush3.bf16.msra.mxu0 %v1815_v27 }
 0x393   :  { %10802 = vmatprep.subr.bf16.mxu0 %v13309_v50 }
 0x411   :  { %v10684_v6 = vpop.f32.mrf.mxu0  ;;  %v10664_v61 = vpop.f32.mrf.mxu1 }
 0x413   :  { %v1206_v36 = vpop.f32.mrf.mxu0  ;;  %v1137_v37 = vpop.f32.mrf.mxu1 }
 0x415   :  { %v10685_v39 = vpop.f32.mrf.mxu0  ;;  %v10665_v43 = vpop.f32.mrf.mxu1 }
 0x416   :  { %v1222_v59 = vpack.c.bf16 %v10685_v39, %v10684_v6  ;;  %v1153_v60 = vpack.c.bf16 %v10665_v43, %v10664_v61 }
 0x417   :  { %v1209_v44 = vpop.f32.mrf.mxu0  ;;  %v1140_v19 = vpop.f32.mrf.mxu1 }
 0x418   :  { %v1221_v48 = vpack.c.bf16 %v1209_v44, %v1206_v36  ;;  %v1152_v57 = vpack.c.bf16 %v1140_v19, %v1137_v37 }
 0x41a   :  { %10688 = vmatprep.mubr.msk.bf16.mxu1 %vm717_vm2, %v1221_v48 }
 0x41b   :  { %10689 = vmatmul.mubr.msk.bf16.vlgmr.msra.gmra.mxu1 %vm717_vm2, %v1222_v59 }
 0x41c   :  { %10693 = vmatpush3.bf16.msra.mxu1 %v1291_v51  ;;  %10694 = vmatprep.mubr.msk.bf16.mxu1 %vm717_vm2, %v1152_v57 }
 0x41d   :  { %11773 = vmatprep.subr.msk.bf16.mxu1 %vm1231_vm3, %v9498_v32 }
 0x423   :  { %10695 = vmatmul.mubr.msk.bf16.vlgmr.msra.gmra.mxu1 %vm717_vm2, %v1153_v60 }
 0x424   :  { %10719 = vmatpush3.bf16.msra.mxu1 %v1419_v63 }
 0x425   :  { %10724 = vmatprep.subr.bf16.mxu1 %v13309_v50 }
 0x431   :  { %v10716_v53 = vpop.f32.mrf.mxu0 }
 0x433   :  { %v1393_v42 = vpop.f32.mrf.mxu0 }
 0x435   :  { %v10717_v28 = vpop.f32.mrf.mxu0 }
 0x436   :  { %v1409_v30 = vpack.c.bf16 %v10717_v28, %v10716_v53  ;;  %v1683_v53 = vsel %vm1231_vm3, %v9516_v3, 0 }
 0x437   :  { %v1396_v55 = vpop.f32.mrf.mxu0 }
 0x438   :  { %v1408_v12 = vpack.c.bf16 %v1396_v55, %v1393_v42  ;;  %v11898_v42 = vld [vmem:[%s14633_s17 + $0x50] sm:$0xff]   ;;  %v9534_v55 = vld [vmem:[%s14636_s13 + $0x18] sm:$0xf] }
 0x43a   :  { %10720 = vmatprep.mubr.msk.bf16.mxu1 %vm717_vm2, %v1408_v12  ;;  %v11899_v12 = vld [vmem:[%s14633_s17 + $0x58] sm:$0xff]  }
 0x43b   :  { %10721 = vmatmul.mubr.msk.bf16.vlgmr.msra.gmra.mxu1 %vm717_vm2, %v1409_v30 }
 0x43c   :  { %10725 = vmatpush3.bf16.msra.mxu1 %v13309_v50  ;;  %10740 = vmatprep.mubr.bf16.mxu1 %v11896_v41  ;;  %v1947_v41 = vsel %vm1231_vm3, %v9534_v55, 0 }
 0x43d   :  { %10726 = vmatprep.subr.bf16.mxu1 %v13316_v7 }
 0x440   :  { %10727 = vmatpush3.bf16.msra.mxu1 %v13316_v7 }
 0x441   :  { %10728 = vmatprep.subr.bf16.mxu1 %v13330_v31 }
 0x444   :  { %10729 = vmatpush3.bf16.msra.mxu1 %v13330_v31 }
 0x445   :  { %10730 = vmatprep.subr.bf16.mxu1 %v13342_v35 }
 0x448   :  { %10731 = vmatpush3.bf16.msra.mxu1 %v13342_v35 }
 0x449   :  { %10732 = vmatprep.subr.bf16.mxu1 %v13352_v62 }
 0x44c   :  { %10733 = vmatpush3.bf16.msra.mxu1 %v13352_v62 }
 0x44d   :  { %10734 = vmatprep.subr.bf16.mxu1 %v13360_v45 }
 0x450   :  { %10735 = vmatpush3.bf16.msra.mxu1 %v13360_v45 }
 0x451   :  { %10736 = vmatprep.subr.bf16.mxu1 %v13366_v11  ;;  %v10768_v37 = vpop.f32.mrf.mxu0 }
 0x453   :  { %v1657_v39 = vpop.f32.mrf.mxu0 }
 0x454   :  { %10737 = vmatpush3.bf16.msra.mxu1 %v13366_v11 }
 0x455   :  { %10738 = vmatprep.subr.bf16.mxu1 %v13372_v0  ;;  %v10769_v19 = vpop.f32.mrf.mxu0 }
 0x456   :  { %v1673_v28 = vpack.c.bf16 %v10769_v19, %v10768_v37 }
 0x457   :  { %v1660_v59 = vpop.f32.mrf.mxu0 }
 0x458   :  { %10739 = vmatpush3.bf16.msra.mxu1 %v13372_v0  ;;  %v1672_v60 = vpack.c.bf16 %v1660_v59, %v1657_v39 }
 0x459   :  { %11774 = vmatprep.subr.msk.bf16.mxu1 %vm1231_vm3, %v9507_v40 }
 0x45b   :  { %10741 = vmatmul.mubr.bf16.vlgmr.msra.gmra.mxu1 %v11897_v25 }
 0x45c   :  { %10745 = vmatpush3.bf16.msra.mxu1 %v1551_v24 }
 0x45d   :  { %11775 = vmatprep.subr.msk.bf16.mxu1 %vm1231_vm3, %v9516_v3 }
 0x4db   :  { %v10690_v5 = vpop.f32.mrf.mxu1 }
 0x4dd   :  { %v1269_v16 = vpop.f32.mrf.mxu1 }
 0x4df   :  { %v10691_v22 = vpop.f32.mrf.mxu1 }
 0x4e1   :  { %v13460_v15 = vpop.f32.mrf.mxu1 }
 0x4e3   :  { %v10696_v49 = vpop.f32.mrf.mxu1 }
 0x4e4   :  { %v1336_v17 = vadd.f32 %v10696_v49, %v10690_v5 }
 0x4e5   :  { %v1327_v21 = vpop.f32.mrf.mxu1 }
 0x4e6   :  { %v1328_v54 = vadd.f32 %v1327_v21, %v1269_v16 }
 0x4e7   :  { %v10697_v2 = vpop.f32.mrf.mxu1 }
 0x4e8   :  { %v1339_v10 = vadd.f32 %v10697_v2, %v10691_v22 }
 0x4e9   :  { %v1330_v27 = vpop.f32.mrf.mxu1 }
 0x4ea   :  { %v1331_v22 = vadd.f32 %v1330_v27, %v13460_v15  ;;  %v9543_v15 = vld [vmem:[%s14636_s13 + $0x1c] sm:$0xf]  ;;  %v11901_v27 = vld [vmem:[%s14633_s17 + $0x68] sm:$0xff]  }
 0x4fb   :  { %v10722_v23 = vpop.f32.mrf.mxu1 }
 0x4fc   :  { %v1472_v58 = vadd.f32 %v10722_v23, %v1336_v17 }
 0x4fd   :  { %v1455_v29 = vpop.f32.mrf.mxu1 }
 0x4fe   :  { %v13462_v6 = vadd.f32 %v1455_v29, %v1328_v54 }
 0x4ff   :  { %v10723_v61 = vpop.f32.mrf.mxu1 }
 0x500   :  { %v1473_v36 = vadd.f32 %v10723_v61, %v1339_v10 }
 0x501   :  { %v1458_v43 = vpop.f32.mrf.mxu1 }
 0x502   :  { %v1471_v21 = vadd.f32 %v1458_v43, %v1331_v22  ;;  %v2079_v43 = vsel %vm1231_vm3, %v9543_v15, 0 }
 0x51b   :  { %v10742_v44 = vpop.f32.mrf.mxu1 }
 0x51d   :  { %v1525_v48 = vpop.f32.mrf.mxu1 }
 0x51f   :  { %v10743_v57 = vpop.f32.mrf.mxu1 }
 0x520   :  { %v1541_v63 = vpack.c.bf16 %v10743_v57, %v10742_v44 }
 0x521   :  { %v1528_v51 = vpop.f32.mrf.mxu1 }
 0x522   :  { %v1540_v32 = vpack.c.bf16 %v1528_v51, %v1525_v48 }
 0x524   :  { %10746 = vmatprep.mubr.msk.bf16.mxu1 %vm717_vm2, %v1540_v32 }
 0x525   :  { %10747 = vmatmul.mubr.msk.bf16.vlgmr.msra.gmra.mxu1 %vm717_vm2, %v1541_v63 }
 0x526   :  { %10771 = vmatpush3.bf16.msra.mxu1 %v1683_v53  ;;  %10772 = vmatprep.mubr.msk.bf16.mxu1 %vm717_vm2, %v1672_v60 }
 0x527   :  { %10776 = vmatprep.subr.bf16.mxu1 %v13309_v50 }
 0x52d   :  { %10773 = vmatmul.mubr.msk.bf16.vlgmr.msra.gmra.mxu1 %vm717_vm2, %v1673_v28 }
 0x52e   :  { %10777 = vmatpush3.bf16.msra.mxu1 %v13309_v50  ;;  %10792 = vmatprep.mubr.bf16.mxu1 %v11898_v42 }
 0x52f   :  { %10778 = vmatprep.subr.bf16.mxu1 %v13316_v7 }
 0x532   :  { %10779 = vmatpush3.bf16.msra.mxu1 %v13316_v7 }
 0x533   :  { %10780 = vmatprep.subr.bf16.mxu1 %v13330_v31 }
 0x536   :  { %10781 = vmatpush3.bf16.msra.mxu1 %v13330_v31 }
 0x537   :  { %10782 = vmatprep.subr.bf16.mxu1 %v13342_v35 }
 0x53a   :  { %10783 = vmatpush3.bf16.msra.mxu1 %v13342_v35 }
 0x53b   :  { %10784 = vmatprep.subr.bf16.mxu1 %v13352_v62 }
 0x53e   :  { %10785 = vmatpush3.bf16.msra.mxu1 %v13352_v62 }
 0x53f   :  { %10786 = vmatprep.subr.bf16.mxu1 %v13360_v45 }
 0x542   :  { %10787 = vmatpush3.bf16.msra.mxu1 %v13360_v45 }
 0x543   :  { %10788 = vmatprep.subr.bf16.mxu1 %v13366_v11 }
 0x546   :  { %10789 = vmatpush3.bf16.msra.mxu1 %v13366_v11 }
 0x547   :  { %10790 = vmatprep.subr.bf16.mxu1 %v13372_v0 }
 0x54a   :  { %10791 = vmatpush3.bf16.msra.mxu1 %v13372_v0 }
 0x54b   :  { %11777 = vmatprep.subr.msk.bf16.mxu1 %vm1231_vm3, %v9534_v55 }
 0x54d   :  { %10793 = vmatmul.mubr.bf16.vlgmr.msra.gmra.mxu1 %v11899_v12 }
 0x54e   :  { %10823 = vmatpush3.bf16.msra.mxu1 %v1947_v41  ;;  %v11902_v41 = vld [vmem:[%s14633_s17 + $0x70] sm:$0xff]  }
 0x54f   :  { %10828 = vmatprep.subr.bf16.mxu1 %v13309_v50 }
 0x5e5   :  { %v10748_v30 = vpop.f32.mrf.mxu1 }
 0x5e6   :  { %v1604_v25 = vadd.f32 %v10748_v30, %v1472_v58 }
 0x5e7   :  { %v13491_v40 = vpop.f32.mrf.mxu1 }
 0x5e9   :  { %v10749_v24 = vpop.f32.mrf.mxu1 }
 0x5ea   :  { %v1605_v3 = vadd.f32 %v10749_v24, %v1473_v36  ;;  %v11900_v36 = vld [vmem:[%s14633_s17 + $0x60] sm:$0xff]  }
 0x5eb   :  { %v1590_v5 = vpop.f32.mrf.mxu1 }
 0x5ec   :  { %v1603_v2 = vadd.f32 %v1590_v5, %v1471_v21 }
 0x5ed   :  { %v10774_v16 = vpop.f32.mrf.mxu1 }
 0x5ee   :  { %v1736_v49 = vadd.f32 %v10774_v16, %v1604_v25  ;;  %v11903_v25 = vld [vmem:[%s14633_s17 + $0x78] sm:$0xff]  }
 0x5ef   :  { %v13494_v17 = vpop.f32.mrf.mxu1 }
 0x5f1   :  { %v10775_v54 = vpop.f32.mrf.mxu1 }
 0x5f2   :  { %v1737_v10 = vadd.f32 %v10775_v54, %v1605_v3 }
 0x5f3   :  { %v1722_v23 = vpop.f32.mrf.mxu1 }
 0x5f4   :  { %v1735_v29 = vadd.f32 %v1722_v23, %v1603_v2 }
 0x60d   :  { %v10794_v61 = vpop.f32.mrf.mxu1 }
 0x60f   :  { %v1789_v58 = vpop.f32.mrf.mxu1 }
 0x611   :  { %v10795_v37 = vpop.f32.mrf.mxu1 }
 0x612   :  { %v1805_v19 = vpack.c.bf16 %v10795_v37, %v10794_v61  ;;  %v11904_v61 = vld [vmem:[%s14633_s17 + $0x80] sm:$0xff]  }
 0x613   :  { %v1792_v39 = vpop.f32.mrf.mxu1 }
 0x614   :  { %v1804_v44 = vpack.c.bf16 %v1792_v39, %v1789_v58 }
 0x616   :  { %10798 = vmatprep.mubr.msk.bf16.mxu0 %vm717_vm2, %v1804_v44 }
 0x617   :  { %10799 = vmatmul.mubr.msk.bf16.vlgmr.msra.gmra.mxu0 %vm717_vm2, %v1805_v19 }
 0x618   :  { %10803 = vmatpush3.bf16.msra.mxu0 %v13309_v50  ;;  %10818 = vmatprep.mubr.bf16.mxu0 %v11900_v36 }
 0x619   :  { %10804 = vmatprep.subr.bf16.mxu0 %v13316_v7 }
 0x61c   :  { %10805 = vmatpush3.bf16.msra.mxu0 %v13316_v7 }
 0x61d   :  { %10806 = vmatprep.subr.bf16.mxu0 %v13330_v31 }
 0x620   :  { %10807 = vmatpush3.bf16.msra.mxu0 %v13330_v31 }
 0x621   :  { %10808 = vmatprep.subr.bf16.mxu0 %v13342_v35 }
 0x624   :  { %10809 = vmatpush3.bf16.msra.mxu0 %v13342_v35 }
 0x625   :  { %10810 = vmatprep.subr.bf16.mxu0 %v13352_v62 }
 0x628   :  { %10811 = vmatpush3.bf16.msra.mxu0 %v13352_v62 }
 0x629   :  { %10812 = vmatprep.subr.bf16.mxu0 %v13360_v45 }
 0x62c   :  { %10813 = vmatpush3.bf16.msra.mxu0 %v13360_v45 }
 0x62d   :  { %10814 = vmatprep.subr.bf16.mxu0 %v13366_v11 }
 0x630   :  { %10815 = vmatpush3.bf16.msra.mxu0 %v13366_v11 }
 0x631   :  { %10816 = vmatprep.subr.bf16.mxu0 %v13372_v0 }
 0x634   :  { %10817 = vmatpush3.bf16.msra.mxu0 %v13372_v0 }
 0x635   :  { %11778 = vmatprep.subr.msk.bf16.mxu0 %vm1231_vm3, %v9543_v15 }
 0x637   :  { %10819 = vmatmul.mubr.bf16.vlgmr.msra.gmra.mxu0 %v11901_v27 }
 0x638   :  { %10849 = vmatpush3.bf16.msra.mxu0 %v2079_v43 }
 0x639   :  { %10854 = vmatprep.subr.bf16.mxu0 %v13309_v50 }
 0x6d7   :  { %v10800_v48 = vpop.f32.mrf.mxu0 }
 0x6d8   :  { %v1868_v57 = vadd.f32 %v10800_v48, %v1736_v49 }
 0x6d9   :  { %v13519_v59 = vpop.f32.mrf.mxu0 }
 0x6db   :  { %v10801_v51 = vpop.f32.mrf.mxu0 }
 0x6dc   :  { %v1869_v32 = vadd.f32 %v10801_v51, %v1737_v10 }
 0x6dd   :  { %v1854_v60 = vpop.f32.mrf.mxu0 }
 0x6de   :  { %v1867_v63 = vadd.f32 %v1854_v60, %v1735_v29 }
 0x6f7   :  { %v10820_v53 = vpop.f32.mrf.mxu0 }
 0x6f9   :  { %v1921_v42 = vpop.f32.mrf.mxu0 }
 0x6fb   :  { %v10821_v28 = vpop.f32.mrf.mxu0 }
 0x6fc   :  { %v1937_v30 = vpack.c.bf16 %v10821_v28, %v10820_v53 }
 0x6fd   :  { %v1924_v55 = vpop.f32.mrf.mxu0 }
 0x6fe   :  { %v1936_v12 = vpack.c.bf16 %v1924_v55, %v1921_v42 }
 0x700   :  { %10824 = vmatprep.mubr.msk.bf16.mxu1 %vm717_vm2, %v1936_v12 }
 0x701   :  { %10825 = vmatmul.mubr.msk.bf16.vlgmr.msra.gmra.mxu1 %vm717_vm2, %v1937_v30 }
 0x702   :  { %10829 = vmatpush3.bf16.msra.mxu1 %v13309_v50  ;;  %10844 = vmatprep.mubr.bf16.mxu1 %v11902_v41 }
 0x703   :  { %10830 = vmatprep.subr.bf16.mxu1 %v13316_v7 }
 0x706   :  { %10831 = vmatpush3.bf16.msra.mxu1 %v13316_v7 }
 0x707   :  { %10832 = vmatprep.subr.bf16.mxu1 %v13330_v31 }
 0x70a   :  { %10833 = vmatpush3.bf16.msra.mxu1 %v13330_v31 }
 0x70b   :  { %10834 = vmatprep.subr.bf16.mxu1 %v13342_v35 }
 0x70e   :  { %10835 = vmatpush3.bf16.msra.mxu1 %v13342_v35 }
 0x70f   :  { %10836 = vmatprep.subr.bf16.mxu1 %v13352_v62 }
 0x712   :  { %10837 = vmatpush3.bf16.msra.mxu1 %v13352_v62 }
 0x713   :  { %10838 = vmatprep.subr.bf16.mxu1 %v13360_v45 }
 0x716   :  { %10839 = vmatpush3.bf16.msra.mxu1 %v13360_v45 }
 0x717   :  { %10840 = vmatprep.subr.bf16.mxu1 %v13366_v11 }
 0x71a   :  { %10841 = vmatpush3.bf16.msra.mxu1 %v13366_v11 }
 0x71b   :  { %10842 = vmatprep.subr.bf16.mxu1 %v13372_v0 }
 0x71e   :  { %10843 = vmatpush3.bf16.msra.mxu1 %v13372_v0 }
 0x721   :  { %10845 = vmatmul.mubr.bf16.vlgmr.msra.gmra.mxu1 %v11903_v25 }
 0x7c1   :  { %v10826_v24 = vpop.f32.mrf.mxu1 }
 0x7c2   :  { %v2000_v3 = vadd.f32 %v10826_v24, %v1868_v57  ;;  %v1602_v57 = vadd.f32 %v13491_v40, %v13462_v6 }
 0x7c3   :  { %v1983_v5 = vpop.f32.mrf.mxu1 }
 0x7c4   :  { %v1734_v51 = vadd.f32 %v13494_v17, %v1602_v57 }
 0x7c5   :  { %v10827_v16 = vpop.f32.mrf.mxu1 }
 0x7c6   :  { %v2001_v22 = vadd.f32 %v10827_v16, %v1869_v32  ;;  %v1866_v32 = vadd.f32 %v13519_v59, %v1734_v51 }
 0x7c7   :  { %v1986_v49 = vpop.f32.mrf.mxu1 }
 0x7c8   :  { %v1999_v21 = vadd.f32 %v1986_v49, %v1867_v63  ;;  %v1998_v63 = vadd.f32 %v1983_v5, %v1866_v32 }
 0x7e1   :  { %v10846_v54 = vpop.f32.mrf.mxu1 }
 0x7e3   :  { %v2053_v2 = vpop.f32.mrf.mxu1 }
 0x7e5   :  { %v10847_v10 = vpop.f32.mrf.mxu1 }
 0x7e6   :  { %v2069_v58 = vpack.c.bf16 %v10847_v10, %v10846_v54 }
 0x7e7   :  { %v2056_v23 = vpop.f32.mrf.mxu1 }
 0x7e8   :  { %v2068_v29 = vpack.c.bf16 %v2056_v23, %v2053_v2 }
 0x7ea   :  { %10850 = vmatprep.mubr.msk.bf16.mxu0 %vm717_vm2, %v2068_v29 }
 0x7eb   :  { %10851 = vmatmul.mubr.msk.bf16.vlgmr.msra.gmra.mxu0 %vm717_vm2, %v2069_v58 }
 0x7ec   :  { %10855 = vmatpush3.bf16.msra.mxu0 %v13309_v50  ;;  %10870 = vmatprep.mubr.bf16.mxu0 %v11904_v61  ;;  %v11905_v50 = vld [vmem:[%s14633_s17 + $0x88] sm:$0xff]   ;;  %s14662_s17 = sld [smem:[#allocation75_spill]] }
 0x7ed   :  { %10856 = vmatprep.subr.bf16.mxu0 %v13316_v7 }
 0x7f0   :  { %10857 = vmatpush3.bf16.msra.mxu0 %v13316_v7  ;;  %v9552_v7 = vld [vmem:[%s14636_s13 + $0x20] sm:$0xf]  ;;  %s14665_s13 = sld [smem:[#allocation76_spill]] }
 0x7f1   :  { %10858 = vmatprep.subr.bf16.mxu0 %v13330_v31  ;;  %11779 = vmatprep.subr.msk.bf16.mxu1 %vm1231_vm3, %v9552_v7 }
 0x7f4   :  { %10859 = vmatpush3.bf16.msra.mxu0 %v13330_v31  ;;  %v2211_v31 = vsel %vm1231_vm3, %v9552_v7, 0 }
 0x7f5   :  { %10860 = vmatprep.subr.bf16.mxu0 %v13342_v35  ;;  %10875 = vmatpush3.bf16.msra.mxu1 %v2211_v31 }
 0x7f8   :  { %10861 = vmatpush3.bf16.msra.mxu0 %v13342_v35  ;;  %v11906_v35 = vld [vmem:[%s14637_s5] sm:$0xff]   ;;  %s14666_s5 = sld [smem:[#allocation70_spill]] }
 0x7f9   :  { %10862 = vmatprep.subr.bf16.mxu0 %v13352_v62  ;;  %10880 = vmatprep.subr.bf16.mxu1 %v11906_v35 }
 0x7fc   :  { %10863 = vmatpush3.bf16.msra.mxu0 %v13352_v62 }
 0x7fd   :  { %10864 = vmatprep.subr.bf16.mxu0 %v13360_v45 }
 0x800   :  { %10865 = vmatpush3.bf16.msra.mxu0 %v13360_v45 }
 0x801   :  { %10866 = vmatprep.subr.bf16.mxu0 %v13366_v11 }
 0x804   :  { %10867 = vmatpush3.bf16.msra.mxu0 %v13366_v11 }
 0x805   :  { %10868 = vmatprep.subr.bf16.mxu0 %v13372_v0 }
 0x808   :  { %10869 = vmatpush3.bf16.msra.mxu0 %v13372_v0 }
 0x80b   :  { %10871 = vmatmul.mubr.bf16.vlgmr.msra.gmra.mxu0 %v11905_v50 }
 0x8ab   :  { %v10852_v62 = vpop.f32.mrf.mxu0 }
 0x8ac   :  { %v2132_v45 = vadd.f32 %v10852_v62, %v2000_v3 }
 0x8ad   :  { %v2115_v37 = vpop.f32.mrf.mxu0 }
 0x8ae   :  { %v2130_v42 = vadd.f32 %v2115_v37, %v1998_v63 }
 0x8af   :  { %v10853_v39 = vpop.f32.mrf.mxu0 }
 0x8b0   :  { %v2133_v44 = vadd.f32 %v10853_v39, %v2001_v22 }
 0x8b1   :  { %v2118_v11 = vpop.f32.mrf.mxu0 }
 0x8b2   :  { %v2131_v36 = vadd.f32 %v2118_v11, %v1999_v21 }
 0x8cb   :  { %v10872_v19 = vpop.f32.mrf.mxu0 }
 0x8cd   :  { %v2185_v15 = vpop.f32.mrf.mxu0 }
 0x8cf   :  { %v10873_v27 = vpop.f32.mrf.mxu0 }
 0x8d0   :  { %v2201_v48 = vpack.c.bf16 %v10873_v27, %v10872_v19 }
 0x8d1   :  { %v2188_v0 = vpop.f32.mrf.mxu0 }
 0x8d2   :  { %v2200_v43 = vpack.c.bf16 %v2188_v0, %v2185_v15 }
 0x8d4   :  { %10876 = vmatprep.mubr.msk.bf16.mxu1 %vm717_vm2, %v2200_v43 }
 0x8d5   :  { %10877 = vmatmul.mubr.msk.bf16.vlgmr.msra.gmra.mxu1 %vm717_vm2, %v2201_v48 }
 0x8d6   :  { %10881 = vmatpush3.bf16.msra.mxu1 %v11906_v35 }
 0x8d7   :  { %10886 = vmatprep.subr.mxu1 %v13207_v9 }
 0x995   :  { %v10878_v60 = vpop.f32.mrf.mxu1 }
 0x996   :  { %v2264_v41 = vadd.f32 %v10878_v60, %v2132_v45  ;;  %v9555_v60 = vld [vmem:[%s14638_s6] ss:$0 sm:$0xff]  ;;  %s14667_s6 = sld [smem:[#allocation69_spill]] }
 0x997   :  { %v2247_v53 = vpop.f32.mrf.mxu1 }
 0x998   :  { %v2262_v55 = vadd.f32 %v2247_v53, %v2130_v42  ;;  %v2270_v40 = vsel %vm2266_vm4, %v2264_v41, 0.0 }
 0x999   :  { %v10879_v28 = vpop.f32.mrf.mxu1 }
 0x99a   :  { %v2267_v25 = vsel %vm2266_vm4, %v2262_v55, 0.0  ;;  %v2265_v24 = vadd.f32 %v10879_v28, %v2133_v44 }
 0x99b   :  { %v2250_v12 = vpop.f32.mrf.mxu1 }
 0x99c   :  { %v2263_v30 = vadd.f32 %v2250_v12, %v2131_v36  ;;  %v2272_v59 = vsel %vm2266_vm4, %v2265_v24, 0.0 }
 0x99e   :  { %v2268_v3 = vsel %vm2266_vm4, %v2263_v30, 0.0 }
 0x99f   :  { %v2269_v6 = vadd.f32 %v2268_v3, %v2267_v25 }
 0x9a1   :  { %v2271_v17 = vadd.f32 %v2270_v40, %v2269_v6 }
 0x9a3   :  { %v2273_v5 = vadd.f32 %v2272_v59, %v2271_v17 }
 0x9a5   :  { %v2274_v16 = vrot.slane %v2273_v5, 4 }
 0x9a7   :  { %v2275_v22 = vadd.f32 %v2274_v16, %v2273_v5 }
 0x9a9   :  { %v2276_v49 = vrot.slane %v2275_v22, 2 }
 0x9ab   :  { %v2277_v21 = vadd.f32 %v2276_v49, %v2275_v22 }
 0x9ad   :  { %v2278_v54 = vrot.slane %v2277_v21, 1 }
 0x9af   :  { %v2279_v2 = vadd.f32 %v2278_v54, %v2277_v21  ;;  %v2465_v21 = vld [vmem:[%s14640_s7] sm:$0xff] }
 0x9b1   :  { %v2281_v10 = vmul.f32 0.03125, %v2279_v2 }
 0x9b3   :  { %v2282_v23 = vsub.f32 %v2262_v55, %v2281_v10  ;;  %v2283_v29 = vsub.f32 %v2263_v30, %v2281_v10  ;;  %v2284_v61 = vsub.f32 %v2264_v41, %v2281_v10  ;;  %v2285_v58 = vsub.f32 %v2265_v24, %v2281_v10  ;;  %v9556_v55 = vld [vmem:[%s14639_s18] ss:$0 sm:$0xff]  ;;  %s14668_s18 = sld [smem:[#allocation74_spill]] }
 0x9b5   :  { %v2286_v50 = vmul.f32 %v2282_v23, %v2282_v23  ;;  %v2287_v7 = vmul.f32 %v2283_v29, %v2283_v29  ;;  %v2288_v31 = vmul.f32 %v2284_v61, %v2284_v61  ;;  %v2289_v35 = vmul.f32 %v2285_v58, %v2285_v58 }
 0x9b7   :  { %v2290_v62 = vsel %vm2266_vm4, %v2286_v50, 0.0  ;;  %v2291_v45 = vsel %vm2266_vm4, %v2287_v7, 0.0  ;;  %v2293_v39 = vsel %vm2266_vm4, %v2288_v31, 0.0  ;;  %v2295_v11 = vsel %vm2266_vm4, %v2289_v35, 0.0 }
 0x9b8   :  { %v2292_v37 = vadd.f32 %v2291_v45, %v2290_v62 }
 0x9ba   :  { %v2294_v44 = vadd.f32 %v2293_v39, %v2292_v37 }
 0x9bc   :  { %v2296_v36 = vadd.f32 %v2295_v11, %v2294_v44 }
 0x9be   :  { %v2297_v19 = vrot.slane %v2296_v36, 4 }
 0x9c0   :  { %v2298_v15 = vadd.f32 %v2297_v19, %v2296_v36 }
 0x9c2   :  { %v2299_v27 = vrot.slane %v2298_v15, 2 }
 0x9c4   :  { %v2300_v0 = vadd.f32 %v2299_v27, %v2298_v15 }
 0x9c6   :  { %v2301_v43 = vrot.slane %v2300_v0, 1 }
 0x9c8   :  { %v2302_v48 = vadd.f32 %v2301_v43, %v2300_v0 }
 0x9ca   :  { %v2303_v57 = vmul.f32 0.03125, %v2302_v48 }
 0x9cc   :  { %v2304_v51 = vadd.f32 1e-05, %v2303_v57 }
 0x9ce   :  { %12071 = vrsqrt.f32 %v2304_v51 }
 0x9db   :  { %v12072_v32 = vpop.eup %12071 }
 0x9dc   :  { %v2307_v63 = vmul.f32 %v12072_v32, %v2283_v29  ;;  %v2308_v53 = vmul.f32 %v12072_v32, %v2284_v61  ;;  %v2309_v42 = vmul.f32 %v12072_v32, %v2285_v58  ;;  %v2306_v28 = vmul.f32 %v12072_v32, %v2282_v23 }
 0x9de   :  { %v2318_v12 = vmul.f32 %v9555_v60, %v2307_v63  ;;  %v2319_v41 = vmul.f32 %v9555_v60, %v2308_v53  ;;  %v2320_v30 = vmul.f32 %v9555_v60, %v2309_v42  ;;  %v2317_v25 = vmul.f32 %v9555_v60, %v2306_v28 }
 0x9e0   :  { %v2329_v24 = vadd.f32 %v9556_v55, %v2318_v12  ;;  %v2328_v3 = vadd.f32 %v9556_v55, %v2317_v25  ;;  %v2330_v6 = vadd.f32 %v9556_v55, %v2319_v41  ;;  %v2331_v40 = vadd.f32 %v9556_v55, %v2320_v30 }
 0x9e2   :  { %v2333_v17 = vmax.f32 %v2329_v24, 0.0  ;;  %v2332_v59 = vmax.f32 %v2328_v3, 0.0  ;;  %v2334_v5 = vmax.f32 %v2330_v6, 0.0  ;;  %v2335_v16 = vmax.f32 %v2331_v40, 0.0 }
 0x9e4   :  { %v2338_v22 = vpack.c.bf16 %v2333_v17, %v2332_v59  ;;  %v2339_v49 = vpack.c.bf16 %v2335_v16, %v2334_v5 }
 0x9e6   :  { %10882 = vmatprep.mubr.msk.bf16.mxu1 %vm2266_vm4, %v2338_v22 }
 0x9e7   :  { %10883 = vmatmul.mubr.msk.bf16.vlgmr.msra.gmra.mxu1 %vm2266_vm4, %v2339_v49 }
 0x9e8   :  { %10887 = vmatpush3.msra.mxu1 %v13207_v9  ;;  %10918 = vmatprep.mubr.f32.mxu1 %v2465_v21 }
 0x9e9   :  { %10888 = vmatprep.subr.mxu1 %v13202_v33 }
 0x9ea   :  { %10889 = vmatpush3.msra.mxu1 %v13202_v33 }
 0x9eb   :  { %10890 = vmatprep.subr.mxu1 %v13197_v20 }
 0x9ec   :  { %10891 = vmatpush3.msra.mxu1 %v13197_v20 }
 0x9ed   :  { %10892 = vmatprep.subr.mxu1 %v13191_v26 }
 0x9ee   :  { %10893 = vmatpush3.msra.mxu1 %v13191_v26 }
 0x9ef   :  { %10894 = vmatprep.subr.mxu1 %v13185_v18 }
 0x9f0   :  { %10895 = vmatpush3.msra.mxu1 %v13185_v18 }
 0x9f1   :  { %10896 = vmatprep.subr.mxu1 %v13178_v13 }
 0x9f2   :  { %10897 = vmatpush3.msra.mxu1 %v13178_v13 }
 0x9f3   :  { %10898 = vmatprep.subr.mxu1 %v13171_v4 }
 0x9f4   :  { %10899 = vmatpush3.msra.mxu1 %v13171_v4 }
 0x9f5   :  { %10900 = vmatprep.subr.mxu1 %v13164_v1 }
 0x9f6   :  { %10901 = vmatpush3.msra.mxu1 %v13164_v1 }
 0x9f7   :  { %10902 = vmatprep.subr.mxu1 %v13157_v47 }
 0x9f8   :  { %10903 = vmatpush3.msra.mxu1 %v13157_v47  ;;  %v2554_v47 = vld [vmem:[%s14641_s12] sm:$0xf]  ;;  %s14670_s12 = sld [smem:[#allocation73_spill]] }
 0x9f9   :  { %10904 = vmatprep.subr.mxu1 %v13150_v56  ;;  %11780 = vmatprep.subr.msk.bf16.mxu0 %vm1231_vm3, %v2554_v47 }
 0x9fa   :  { %10905 = vmatpush3.msra.mxu1 %v13150_v56  ;;  %v2466_v56 = vld [vmem:[%s14640_s7 + $0x8] sm:$0xff] }
 0x9fb   :  { %10906 = vmatprep.subr.mxu1 %v13143_v52 }
 0x9fc   :  { %10907 = vmatpush3.msra.mxu1 %v13143_v52  ;;  %v2467_v52 = vld [vmem:[%s14640_s7 + $0x10] sm:$0xff] }
 0x9fd   :  { %10908 = vmatprep.subr.mxu1 %v13136_v46 }
 0x9fe   :  { %10909 = vmatpush3.msra.mxu1 %v13136_v46  ;;  %v2468_v46 = vld [vmem:[%s14640_s7 + $0x18] sm:$0xff]  ;;  %s14669_s7 = sld [smem:[#allocation72_spill]] }
 0x9ff   :  { %10910 = vmatprep.subr.mxu1 %v13127_v14 }
 0xa00   :  { %10911 = vmatpush3.msra.mxu1 %v13127_v14  ;;  %v2564_v14 = vsel %vm1231_vm3, %v2554_v47, 0 }
 0xa01   :  { %10912 = vmatprep.subr.mxu1 %v13122_v38  ;;  %10925 = vmatpush3.bf16.msra.mxu0 %v2564_v14 }
 0xa02   :  { %10913 = vmatpush3.msra.mxu1 %v13122_v38 }
 0xa03   :  { %10914 = vmatprep.subr.mxu1 %v13117_v8 }
 0xa04   :  { %10915 = vmatpush3.msra.mxu1 %v13117_v8 }
 0xa05   :  { %10916 = vmatprep.subr.mxu1 %v13114_v34 }
 0xa06   :  { %10917 = vmatpush3.msra.mxu1 %v13114_v34 }
 0xa07   :  { %10919 = vmatmul.mubr.f32.vlgmr.msra.gmra.mxu1 %v2466_v56 }
 0xa08   :  { %10921 = vmatprep.mubr.f32.mxu1 %v2467_v52 }
 0xa0b   :  { %10922 = vmatmul.mubr.f32.gmra.mxu1 %v2468_v46 }
 0xaa7   :  { %v10884_v38 = vpop.f32.mrf.mxu1 }
 0xaa8   :  { %v2404_v34 = vsel %vm2266_vm4, %v10884_v38, 0.0 }
 0xaa9   :  { %v2386_v1 = vpop.f32.mrf.mxu1 }
 0xaaa   :  { %v2401_v13 = vsel %vm2266_vm4, %v2386_v1, 0.0 }
 0xaab   :  { %v10885_v4 = vpop.f32.mrf.mxu1 }
 0xaac   :  { %v2406_v33 = vsel %vm2266_vm4, %v10885_v4, 0.0 }
 0xaad   :  { %v2389_v8 = vpop.f32.mrf.mxu1 }
 0xaae   :  { %v2402_v18 = vsel %vm2266_vm4, %v2389_v8, 0.0 }
 0xaaf   :  { %v2403_v26 = vadd.f32 %v2402_v18, %v2401_v13 }
 0xab1   :  { %v2405_v20 = vadd.f32 %v2404_v34, %v2403_v26 }
 0xab3   :  { %v2407_v9 = vadd.f32 %v2406_v33, %v2405_v20 }
 0xab5   :  { %v2408_v54 = vrot.slane %v2407_v9, 4 }
 0xab7   :  { %v2409_v2 = vadd.f32 %v2408_v54, %v2407_v9 }
 0xab9   :  { %v2410_v10 = vrot.slane %v2409_v2, 2 }
 0xabb   :  { %v2411_v23 = vadd.f32 %v2410_v10, %v2409_v2 }
 0xabd   :  { %v2412_v29 = vrot.slane %v2411_v23, 1 }
 0xabf   :  { %v2413_v61 = vadd.f32 %v2412_v29, %v2411_v23 }
 0xac1   :  { %v2414_v58 = vmul.f32 0.03125, %v2413_v61 }
 0xac3   :  { %v2415_v50 = vsub.f32 %v2386_v1, %v2414_v58  ;;  %v2416_v7 = vsub.f32 %v2389_v8, %v2414_v58  ;;  %v2417_v31 = vsub.f32 %v10884_v38, %v2414_v58  ;;  %v2418_v35 = vsub.f32 %v10885_v4, %v2414_v58 }
 0xac4   :  { %v12568_v8 = vmov 0.0  }
 0xac5   :  { %v2419_v62 = vmul.f32 %v2415_v50, %v2415_v50  ;;  %v2420_v45 = vmul.f32 %v2416_v7, %v2416_v7  ;;  %v2421_v37 = vmul.f32 %v2417_v31, %v2417_v31  ;;  %v2422_v39 = vmul.f32 %v2418_v35, %v2418_v35  ;;  %10930 = vmatprep.subr.bf16.mxu0 %v12568_v8 }
 0xac6   :  { %10946 = vmatprep.subr.bf16.mxu1 %v12568_v8  ;;  %10948 = vmatprep.mubr.msk.bf16.mxu1 %vm12569_vm5, %v12568_v8 }
 0xac7   :  { %v2423_v44 = vsel %vm2266_vm4, %v2419_v62, 0.0  ;;  %v2424_v11 = vsel %vm2266_vm4, %v2420_v45, 0.0  ;;  %v10920_v36 = vpop.f32.mrf.mxu1  ;;  %v2426_v15 = vsel %vm2266_vm4, %v2421_v37, 0.0  ;;  %v2428_v48 = vsel %vm2266_vm4, %v2422_v39, 0.0 }
 0xac8   :  { %v2425_v19 = vadd.f32 %v2424_v11, %v2423_v44 }
 0xac9   :  { %v2535_v27 = vpop.f32.mrf.mxu1 }
 0xaca   :  { %v2427_v0 = vadd.f32 %v2426_v15, %v2425_v19  ;;  %v2555_v43 = vpack.c.bf16 %v10920_v36, %v2535_v27  ;;  %v9560_v15 = vld [vmem:[%s14642_s15] ss:$0 sm:$0xff]  ;;  %s14671_s15 = sld [smem:[#allocation71_spill]] }
 0xacb   :  { %v10923_v57 = vpop.f32.mrf.mxu1 }
 0xacc   :  { %v2429_v51 = vadd.f32 %v2428_v48, %v2427_v0  ;;  %10926 = vmatprep.mubr.msk.bf16.mxu0 %vm717_vm2, %v2555_v43 }
 0xacd   :  { %v2545_v32 = vpop.f32.mrf.mxu1 }
 0xace   :  { %v2430_v60 = vrot.slane %v2429_v51, 4  ;;  %v2556_v63 = vpack.c.bf16 %v10923_v57, %v2545_v32  ;;  %v9564_v57 = vld [vmem:[%s14643_s16] ss:$0 sm:$0xff]  ;;  %s14672_s16 = sld [smem:[#allocation80_spill]] }
 0xad0   :  { %v2431_v53 = vadd.f32 %v2430_v60, %v2429_v51  ;;  %10927 = vmatmul.mubr.msk.bf16.vlgmr.msra.gmra.mxu0 %vm717_vm2, %v2556_v63  ;;  %v9561_v51 = vld [vmem:[%s14644_s14] ss:$0 sm:$0xff]  ;;  %s14673_s14 = sld [smem:[#allocation79_spill]] }
 0xad1   :  { %10934 = vmatprep.mubr.msk.bf16.mxu0 %vm12569_vm5, %v12568_v8 }
 0xad2   :  { %v2432_v42 = vrot.slane %v2431_v53, 2 }
 0xad4   :  { %v2433_v28 = vadd.f32 %v2432_v42, %v2431_v53 }
 0xad6   :  { %v2434_v55 = vrot.slane %v2433_v28, 1 }
 0xad8   :  { %v2435_v12 = vadd.f32 %v2434_v55, %v2433_v28  ;;  %v9565_v28 = vld [vmem:[%s14645_s1] ss:$0 sm:$0xff]  ;;  %s14674_s1 = sld [smem:[#allocation78_spill]] }
 0xada   :  { %v2436_v41 = vmul.f32 0.03125, %v2435_v12 }
 0xadc   :  { %v2437_v30 = vadd.f32 1e-05, %v2436_v41 }
 0xade   :  { %12073 = vrsqrt.f32 %v2437_v30 }
 0xaeb   :  { %v12074_v25 = vpop.eup %12073 }
 0xaec   :  { %v2439_v24 = vmul.f32 %v12074_v25, %v2415_v50  ;;  %v2440_v3 = vmul.f32 %v12074_v25, %v2416_v7  ;;  %v2441_v6 = vmul.f32 %v12074_v25, %v2417_v31  ;;  %v2442_v40 = vmul.f32 %v12074_v25, %v2418_v35 }
 0xaee   :  { %v2450_v0 = vmul.f32 %v9560_v15, %v2439_v24  ;;  %v2451_v43 = vmul.f32 %v9560_v15, %v2440_v3  ;;  %v2452_v48 = vmul.f32 %v9560_v15, %v2441_v6  ;;  %v2453_v42 = vmul.f32 %v9560_v15, %v2442_v40 }
 0xaf0   :  { %v2461_v25 = vadd.f32 %v9561_v51, %v2450_v0  ;;  %v2464_v6 = vadd.f32 %v9561_v51, %v2453_v42 }
 0xb90   :  { %v10928_v17 = vpop.f32.mrf.mxu0 }
 0xb91   :  { %v2618_v56 = vsel %vm2266_vm4, %v10928_v17, 0.0 }
 0xb92   :  { %v2600_v59 = vpop.f32.mrf.mxu0 }
 0xb93   :  { %v2615_v22 = vsel %vm2266_vm4, %v2600_v59, 0.0 }
 0xb94   :  { %v10929_v5 = vpop.f32.mrf.mxu0 }
 0xb95   :  { %v2620_v46 = vsel %vm2266_vm4, %v10929_v5, 0.0 }
 0xb96   :  { %v2603_v16 = vpop.f32.mrf.mxu0 }
 0xb97   :  { %v2616_v49 = vsel %vm2266_vm4, %v2603_v16, 0.0 }
 0xb98   :  { %v2617_v21 = vadd.f32 %v2616_v49, %v2615_v22 }
 0xb9a   :  { %v2619_v52 = vadd.f32 %v2618_v56, %v2617_v21 }
 0xb9c   :  { %v2621_v47 = vadd.f32 %v2620_v46, %v2619_v52 }
 0xb9e   :  { %v2622_v14 = vrot.slane %v2621_v47, 4 }
 0xba0   :  { %v2623_v38 = vadd.f32 %v2622_v14, %v2621_v47 }
 0xba2   :  { %v2624_v1 = vrot.slane %v2623_v38, 2 }
 0xba4   :  { %v2625_v4 = vadd.f32 %v2624_v1, %v2623_v38 }
 0xba6   :  { %v2626_v13 = vrot.slane %v2625_v4, 1 }
 0xba8   :  { %v2627_v18 = vadd.f32 %v2626_v13, %v2625_v4 }
 0xbaa   :  { %v2628_v26 = vmul.f32 0.03125, %v2627_v18 }
 0xbac   :  { %v2629_v34 = vsub.f32 %v2600_v59, %v2628_v26  ;;  %v2630_v20 = vsub.f32 %v2603_v16, %v2628_v26  ;;  %v2631_v33 = vsub.f32 %v10928_v17, %v2628_v26  ;;  %v2632_v9 = vsub.f32 %v10929_v5, %v2628_v26 }
 0xbad   :  { %v2462_v17 = vadd.f32 %v9561_v51, %v2451_v43  ;;  %v2463_v59 = vadd.f32 %v9561_v51, %v2452_v48  ;;  %v9566_v48 = vld [vmem:[%s14646_s9] ss:$0 sm:$0xff]  ;;  %s14675_s9 = sld [smem:[#allocation84_spill]] }
 0xbae   :  { %v2633_v54 = vmul.f32 %v2629_v34, %v2629_v34  ;;  %v2634_v2 = vmul.f32 %v2630_v20, %v2630_v20  ;;  %v2635_v10 = vmul.f32 %v2631_v33, %v2631_v33  ;;  %v2636_v23 = vmul.f32 %v2632_v9, %v2632_v9 }
 0xbb0   :  { %v2637_v29 = vsel %vm2266_vm4, %v2633_v54, 0.0  ;;  %v2638_v61 = vsel %vm2266_vm4, %v2634_v2, 0.0  ;;  %v2640_v50 = vsel %vm2266_vm4, %v2635_v10, 0.0  ;;  %v2642_v31 = vsel %vm2266_vm4, %v2636_v23, 0.0 }
 0xbb1   :  { %v2639_v58 = vadd.f32 %v2638_v61, %v2637_v29 }
 0xbb3   :  { %v2641_v7 = vadd.f32 %v2640_v50, %v2639_v58 }
 0xbb5   :  { %v2643_v35 = vadd.f32 %v2642_v31, %v2641_v7 }
 0xbb7   :  { %v2644_v62 = vrot.slane %v2643_v35, 4 }
 0xbb9   :  { %v2645_v45 = vadd.f32 %v2644_v62, %v2643_v35 }
 0xbbb   :  { %v2646_v37 = vrot.slane %v2645_v45, 2 }
 0xbbd   :  { %v2647_v39 = vadd.f32 %v2646_v37, %v2645_v45 }
 0xbbf   :  { %v2648_v44 = vrot.slane %v2647_v39, 1 }
 0xbc1   :  { %v2649_v11 = vadd.f32 %v2648_v44, %v2647_v39 }
 0xbc3   :  { %v2650_v36 = vmul.f32 0.03125, %v2649_v11 }
 0xbc5   :  { %v2651_v19 = vadd.f32 1e-05, %v2650_v36 }
 0xbc7   :  { %12075 = vrsqrt.f32 %v2651_v19 }
 0xbd4   :  { %v12076_v27 = vpop.eup %12075 }
 0xbd5   :  { %v2653_v32 = vmul.f32 %v12076_v27, %v2629_v34  ;;  %v2654_v60 = vmul.f32 %v12076_v27, %v2630_v20  ;;  %v2655_v63 = vmul.f32 %v12076_v27, %v2631_v33  ;;  %v2656_v53 = vmul.f32 %v12076_v27, %v2632_v9 }
 0xbd7   :  { %v2664_v55 = vmul.f32 %v9564_v57, %v2653_v32  ;;  %v2665_v12 = vmul.f32 %v9564_v57, %v2654_v60  ;;  %v2666_v41 = vmul.f32 %v9564_v57, %v2655_v63  ;;  %v2667_v30 = vmul.f32 %v9564_v57, %v2656_v53  ;;  %v9567_v63 = vld [vmem:[%s14647_s8] ss:$0 sm:$0xff]  ;;  %s14676_s8 = sld [smem:[#allocation85_spill]] }
 0xbd9   :  { %v2675_v5 = vadd.f32 %v9565_v28, %v2664_v55  ;;  %v2676_v16 = vadd.f32 %v9565_v28, %v2665_v12  ;;  %v2677_v24 = vadd.f32 %v9565_v28, %v2666_v41  ;;  %v2678_v3 = vadd.f32 %v9565_v28, %v2667_v30 }
 0xbdb   :  { %v13648_v22 = vadd.f32 %v2675_v5, %v2461_v25  ;;  %v13650_v49 = vadd.f32 %v2676_v16, %v2462_v17  ;;  %v13652_v21 = vadd.f32 %v2677_v24, %v2463_v59  ;;  %v13654_v40 = vadd.f32 %v2678_v3, %v2464_v6  ;;  %v2753_v6 = vld [vmem:[%s14648_s29] sm:$0xf] }
 0xbdd   :  { %v2683_v56 = vsel %vm2266_vm4, %v13648_v22, 0.0  ;;  %v2684_v52 = vsel %vm2266_vm4, %v13650_v49, 0.0  ;;  %v2686_v47 = vsel %vm2266_vm4, %v13652_v21, 0.0  ;;  %v2688_v38 = vsel %vm2266_vm4, %v13654_v40, 0.0 }
 0xbde   :  { %v2685_v46 = vadd.f32 %v2684_v52, %v2683_v56  ;;  %v9569_v56 = vld [vmem:[%s14648_s29 + $0x4] sm:$0xf] }
 0xbdf   :  { %v11907_v52 = vld [vmem:[%s14649_s10] sm:$0xff]  }
 0xbe0   :  { %v2687_v14 = vadd.f32 %v2686_v47, %v2685_v46  ;;  %v11908_v46 = vld [vmem:[%s14649_s10 + $0x8] sm:$0xff]  }
 0xbe1   :  { %10947 = vmatpush3.bf16.msra.mxu1 %v11908_v46  ;;  %v11915_v46 = vld [vmem:[%s14649_s10 + $0x40] sm:$0xff]  }
 0xbe2   :  { %v2689_v1 = vadd.f32 %v2688_v38, %v2687_v14  ;;  %10958 = vmatprep.subr.bf16.mxu1 %v12568_v8 }
 0xbe4   :  { %v2690_v4 = vrot.slane %v2689_v1, 4 }
 0xbe6   :  { %v2691_v13 = vadd.f32 %v2690_v4, %v2689_v1 }
 0xbe8   :  { %v2692_v18 = vrot.slane %v2691_v13, 2 }
 0xbea   :  { %v2693_v26 = vadd.f32 %v2692_v18, %v2691_v13 }
 0xbec   :  { %v2694_v34 = vrot.slane %v2693_v26, 1 }
 0xbee   :  { %v2695_v20 = vadd.f32 %v2694_v34, %v2693_v26 }
 0xbf0   :  { %v2696_v33 = vmul.f32 0.03125, %v2695_v20 }
 0xbf2   :  { %v2697_v9 = vsub.f32 %v13648_v22, %v2696_v33  ;;  %v2698_v54 = vsub.f32 %v13650_v49, %v2696_v33  ;;  %v2699_v2 = vsub.f32 %v13652_v21, %v2696_v33  ;;  %v2700_v10 = vsub.f32 %v13654_v40, %v2696_v33  ;;  %v9577_v33 = vld [vmem:[%s14648_s29 + $0x8] sm:$0xf] }
 0xbf4   :  { %v2701_v23 = vmul.f32 %v2697_v9, %v2697_v9  ;;  %v2702_v29 = vmul.f32 %v2698_v54, %v2698_v54  ;;  %v2703_v61 = vmul.f32 %v2699_v2, %v2699_v2  ;;  %v2704_v58 = vmul.f32 %v2700_v10, %v2700_v10 }
 0xbf6   :  { %v2705_v50 = vsel %vm2266_vm4, %v2701_v23, 0.0  ;;  %v2706_v7 = vsel %vm2266_vm4, %v2702_v29, 0.0  ;;  %v2708_v35 = vsel %vm2266_vm4, %v2703_v61, 0.0  ;;  %v2710_v45 = vsel %vm2266_vm4, %v2704_v58, 0.0  ;;  %v9607_v23 = vld [vmem:[%s14648_s29 + $0x1c] sm:$0xf] }
 0xbf7   :  { %v2707_v31 = vadd.f32 %v2706_v7, %v2705_v50  ;;  %v9613_v29 = vld [vmem:[%s14648_s29 + $0x20] sm:$0xf]  ;;  %v11909_v61 = vld [vmem:[%s14649_s10 + $0x10] sm:$0xff]  }
 0xbf9   :  { %v2709_v62 = vadd.f32 %v2708_v35, %v2707_v31 }
 0xbfb   :  { %v2711_v37 = vadd.f32 %v2710_v45, %v2709_v62 }
 0xbfd   :  { %v2712_v39 = vrot.slane %v2711_v37, 4 }
 0xbff   :  { %v2713_v44 = vadd.f32 %v2712_v39, %v2711_v37 }
 0xc01   :  { %v2714_v11 = vrot.slane %v2713_v44, 2 }
 0xc03   :  { %v2715_v36 = vadd.f32 %v2714_v11, %v2713_v44  ;;  %v11910_v11 = vld [vmem:[%s14649_s10 + $0x18] sm:$0xff]  }
 0xc05   :  { %v2716_v19 = vrot.slane %v2715_v36, 1 }
 0xc07   :  { %v2717_v15 = vadd.f32 %v2716_v19, %v2715_v36 }
 0xc09   :  { %v2718_v27 = vmul.f32 0.03125, %v2717_v15 }
 0xc0b   :  { %v2719_v0 = vadd.f32 1e-05, %v2718_v27 }
 0xc0d   :  { %12077 = vrsqrt.f32 %v2719_v0 }
 0xc1a   :  { %v12078_v43 = vpop.eup %12077 }
 0xc1b   :  { %v2721_v57 = vmul.f32 %v12078_v43, %v2697_v9  ;;  %v2722_v51 = vmul.f32 %v12078_v43, %v2698_v54  ;;  %v2723_v32 = vmul.f32 %v12078_v43, %v2699_v2  ;;  %v2724_v60 = vmul.f32 %v12078_v43, %v2700_v10  ;;  %v9583_v9 = vld [vmem:[%s14648_s29 + $0xc] sm:$0xf]  ;;  %v9589_v54 = vld [vmem:[%s14648_s29 + $0x10] sm:$0xf]  ;;  %v9595_v2 = vld [vmem:[%s14648_s29 + $0x14] sm:$0xf] }
 0xc1c   :  { %v9601_v10 = vld [vmem:[%s14648_s29 + $0x18] sm:$0xf]  ;;  %v11911_v43 = vld [vmem:[%s14649_s10 + $0x20] sm:$0xff]   ;;  %s14677_s29 = sld [smem:[#allocation82_spill]] }
 0xc1d   :  { %v2732_v53 = vmul.f32 %v9566_v48, %v2721_v57  ;;  %v2733_v42 = vmul.f32 %v9566_v48, %v2722_v51  ;;  %v2734_v28 = vmul.f32 %v9566_v48, %v2723_v32  ;;  %v2735_v55 = vmul.f32 %v9566_v48, %v2724_v60 }
 0xc1f   :  { %v2743_v12 = vadd.f32 %v9567_v63, %v2732_v53  ;;  %v2744_v41 = vadd.f32 %v9567_v63, %v2733_v42  ;;  %v2745_v30 = vadd.f32 %v9567_v63, %v2734_v28  ;;  %v2746_v25 = vadd.f32 %v9567_v63, %v2735_v55  ;;  %v11912_v63 = vld [vmem:[%s14649_s10 + $0x28] sm:$0xff]  }
 0xc21   :  { %v2749_v17 = vmax.f32 %v2745_v30, 0.0  ;;  %v2750_v59 = vmax.f32 %v2746_v25, 0.0  ;;  %v2747_v5 = vmax.f32 %v2743_v12, 0.0  ;;  %v2748_v16 = vmax.f32 %v2744_v41, 0.0  ;;  %v11913_v41 = vld [vmem:[%s14649_s10 + $0x30] sm:$0xff]  }
 0xc23   :  { %v13674_v24 = vpack.c.bf16 %v2750_v59, %v2749_v17  ;;  %v13678_v3 = vpack.c.bf16 %v2748_v16, %v2747_v5  ;;  %v11914_v16 = vld [vmem:[%s14649_s10 + $0x38] sm:$0xff]   ;;  %s14678_s10 = sld [smem:[#allocation81_spill]] }
 0xc25   :  { %10931 = vmatpush3.bf16.msra.mxu0 %v13674_v24 }
 0xc26   :  { %10932 = vmatprep.subr.bf16.mxu0 %v12568_v8 }
 0xc29   :  { %10933 = vmatpush3.bf16.msra.mxu0 %v13678_v3 }
 0xc2a   :  { %10938 = vmatprep.subr.bf16.mxu0 %v12568_v8 }
 0xc2c   :  { %10935 = vmatmul.mubr.msk.bf16.vlgmr.msra.gmra.mxu0 %vm2754_vm6, %v2753_v6 }
 0xc2d   :  { %10939 = vmatpush3.bf16.msra.mxu0 %v13674_v24  ;;  %10942 = vmatprep.mubr.msk.bf16.mxu0 %vm12569_vm5, %v12568_v8 }
 0xc2e   :  { %10940 = vmatprep.subr.bf16.mxu0 %v12568_v8 }
 0xc31   :  { %10941 = vmatpush3.bf16.msra.mxu0 %v13678_v3 }
 0xc32   :  { %10952 = vmatprep.subr.bf16.mxu0 %v12568_v8 }
 0xc34   :  { %10943 = vmatmul.mubr.msk.bf16.vlgmr.msra.gmra.mxu0 %vm2754_vm6, %v9569_v56 }
 0xc35   :  { %10954 = vmatprep.mubr.msk.bf16.mxu0 %vm12569_vm5, %v12568_v8  ;;  %10953 = vmatpush3.bf16.msra.mxu0 %v11907_v52 }
 0xc36   :  { %10966 = vmatprep.subr.bf16.mxu0 %v12568_v8 }
 0xcec   :  { %v2792_v47 = vpop.f32.mrf.mxu0 }
 0xced   :  { %v2798_v14 = vpack.c.bf16 %v2792_v47, %v2792_v47 }
 0xcee   :  { %v10936_v38 = vpop.f32.mrf.mxu0 }
 0xcef   :  { %10955 = vmatmul.mubr.msk.bf16.vlgmr.msra.gmra.mxu0 %vm2266_vm4, %v2798_v14 }
 0xcf0   :  { %v2795_v1 = vpop.f32.mrf.mxu0  ;;  %10968 = vmatprep.mubr.msk.bf16.mxu0 %vm12569_vm5, %v12568_v8  ;;  %10967 = vmatpush3.bf16.msra.mxu0 %v11909_v61 }
 0xcf1   :  { %10980 = vmatprep.subr.bf16.mxu0 %v12568_v8 }
 0xcf2   :  { %v10937_v4 = vpop.f32.mrf.mxu0 }
 0xcf4   :  { %v2840_v13 = vpop.f32.mrf.mxu0 }
 0xcf5   :  { %v2846_v18 = vpack.c.bf16 %v2840_v13, %v2840_v13 }
 0xcf6   :  { %v10944_v26 = vpop.f32.mrf.mxu0 }
 0xcf7   :  { %10949 = vmatmul.mubr.msk.bf16.vlgmr.msra.gmra.mxu1 %vm2266_vm4, %v2846_v18 }
 0xcf8   :  { %10959 = vmatpush3.bf16.msra.mxu1 %v13674_v24  ;;  %v2843_v34 = vpop.f32.mrf.mxu0  ;;  %10962 = vmatprep.mubr.msk.bf16.mxu1 %vm12569_vm5, %v12568_v8 }
 0xcf9   :  { %10960 = vmatprep.subr.bf16.mxu1 %v12568_v8 }
 0xcfa   :  { %v10945_v20 = vpop.f32.mrf.mxu0 }
 0xcfb   :  { %v3777_v20 = vld [vmem:[%s14650_s20] sm:$0xff]  ;;  %s14679_s20 = sld [smem:[#allocation83_spill]] }
 0xcfc   :  { %10961 = vmatpush3.bf16.msra.mxu1 %v13678_v3 }
 0xcfd   :  { %10972 = vmatprep.subr.bf16.mxu1 %v12568_v8 }
 0xcff   :  { %10963 = vmatmul.mubr.msk.bf16.vlgmr.msra.gmra.mxu1 %vm2754_vm6, %v9577_v33 }
 0xd00   :  { %10973 = vmatpush3.bf16.msra.mxu1 %v13674_v24  ;;  %10976 = vmatprep.mubr.msk.bf16.mxu1 %vm12569_vm5, %v12568_v8 }
 0xd01   :  { %10974 = vmatprep.subr.bf16.mxu1 %v12568_v8 }
 0xd04   :  { %10975 = vmatpush3.bf16.msra.mxu1 %v13678_v3 }
 0xd05   :  { %10986 = vmatprep.subr.bf16.mxu1 %v12568_v8 }
 0xd07   :  { %10977 = vmatmul.mubr.msk.bf16.vlgmr.msra.gmra.mxu1 %vm2754_vm6, %v9583_v9 }
 0xd08   :  { %10987 = vmatpush3.bf16.msra.mxu1 %v13674_v24  ;;  %10990 = vmatprep.mubr.msk.bf16.mxu1 %vm12569_vm5, %v12568_v8 }
 0xd09   :  { %10988 = vmatprep.subr.bf16.mxu1 %v12568_v8 }
 0xd0c   :  { %10989 = vmatpush3.bf16.msra.mxu1 %v13678_v3 }
 0xd0d   :  { %11000 = vmatprep.subr.bf16.mxu1 %v12568_v8 }
 0xd0f   :  { %10991 = vmatmul.mubr.msk.bf16.vlgmr.msra.gmra.mxu1 %vm2754_vm6, %v9589_v54 }
 0xd10   :  { %11001 = vmatpush3.bf16.msra.mxu1 %v13674_v24  ;;  %11004 = vmatprep.mubr.msk.bf16.mxu1 %vm12569_vm5, %v12568_v8 }
 0xd11   :  { %11002 = vmatprep.subr.bf16.mxu1 %v12568_v8 }
 0xd14   :  { %11003 = vmatpush3.bf16.msra.mxu1 %v13678_v3 }
 0xd15   :  { %11014 = vmatprep.subr.bf16.mxu1 %v12568_v8 }
 0xd17   :  { %11005 = vmatmul.mubr.msk.bf16.vlgmr.msra.gmra.mxu1 %vm2754_vm6, %v9595_v2 }
 0xd18   :  { %11015 = vmatpush3.bf16.msra.mxu1 %v13674_v24  ;;  %11018 = vmatprep.mubr.msk.bf16.mxu1 %vm12569_vm5, %v12568_v8 }
 0xd19   :  { %11016 = vmatprep.subr.bf16.mxu1 %v12568_v8 }
 0xd1c   :  { %11017 = vmatpush3.bf16.msra.mxu1 %v13678_v3 }
 0xd1d   :  { %11028 = vmatprep.subr.bf16.mxu1 %v12568_v8 }
 0xd1f   :  { %11019 = vmatmul.mubr.msk.bf16.vlgmr.msra.gmra.mxu1 %vm2754_vm6, %v9601_v10 }
 0xd20   :  { %11029 = vmatpush3.bf16.msra.mxu1 %v13674_v24  ;;  %11032 = vmatprep.mubr.msk.bf16.mxu1 %vm12569_vm5, %v12568_v8 }
 0xd21   :  { %11030 = vmatprep.subr.bf16.mxu1 %v12568_v8 }
 0xd24   :  { %11031 = vmatpush3.bf16.msra.mxu1 %v13678_v3 }
 0xd25   :  { %11042 = vmatprep.subr.bf16.mxu1 %v12568_v8 }
 0xd27   :  { %11033 = vmatmul.mubr.msk.bf16.vlgmr.msra.gmra.mxu1 %vm2754_vm6, %v9607_v23 }
 0xd28   :  { %11043 = vmatpush3.bf16.msra.mxu1 %v13674_v24  ;;  %11046 = vmatprep.mubr.msk.bf16.mxu1 %vm12569_vm5, %v12568_v8 }
 0xd29   :  { %11044 = vmatprep.subr.bf16.mxu1 %v12568_v8 }
 0xd2c   :  { %11045 = vmatpush3.bf16.msra.mxu1 %v13678_v3 }
 0xd2d   :  { %11056 = vmatprep.subr.bf16.mxu1 %v12568_v8 }
 0xd2f   :  { %11047 = vmatmul.mubr.msk.bf16.vlgmr.msra.gmra.mxu1 %vm2754_vm6, %v9613_v29 }
 0xd30   :  { %11060 = vmatprep.mubr.msk.bf16.mxu1 %vm12569_vm5, %v12568_v8 }
 0xdaf   :  { %v2942_v58 = vpop.f32.mrf.mxu0 }
 0xdb1   :  { %v10956_v50 = vpop.f32.mrf.mxu0 }
 0xdb3   :  { %v2945_v7 = vpop.f32.mrf.mxu0 }
 0xdb5   :  { %v10957_v31 = vpop.f32.mrf.mxu0 }
 0xdb7   :  { %v2893_v35 = vpop.f32.mrf.mxu1 }
 0xdb8   :  { %v13762_v62 = vadd.f32 %v2942_v58, %v2893_v35 }
 0xdb9   :  { %v10950_v45 = vpop.f32.mrf.mxu1 }
 0xdbb   :  { %v2896_v37 = vpop.f32.mrf.mxu1 }
 0xdbd   :  { %v10951_v39 = vpop.f32.mrf.mxu1 }
 0xdbf   :  { %v2987_v44 = vpop.f32.mrf.mxu1 }
 0xdc0   :  { %v2993_v36 = vpack.c.bf16 %v2987_v44, %v2987_v44 }
 0xdc1   :  { %v10964_v19 = vpop.f32.mrf.mxu1 }
 0xdc2   :  { %10969 = vmatmul.mubr.msk.bf16.vlgmr.msra.gmra.mxu0 %vm2266_vm4, %v2993_v36 }
 0xdc3   :  { %v2990_v15 = vpop.f32.mrf.mxu1  ;;  %10981 = vmatpush3.bf16.msra.mxu0 %v11910_v11  ;;  %10982 = vmatprep.mubr.msk.bf16.mxu0 %vm12569_vm5, %v12568_v8 }
 0xdc4   :  { %10994 = vmatprep.subr.bf16.mxu0 %v12568_v8 }
 0xdc5   :  { %v10965_v27 = vpop.f32.mrf.mxu1 }
 0xdc7   :  { %v3086_v0 = vpop.f32.mrf.mxu1 }
 0xdc8   :  { %v3092_v48 = vpack.c.bf16 %v3086_v0, %v3086_v0 }
 0xdc9   :  { %v10978_v57 = vpop.f32.mrf.mxu1 }
 0xdca   :  { %10983 = vmatmul.mubr.msk.bf16.vlgmr.msra.gmra.mxu0 %vm2266_vm4, %v3092_v48 }
 0xdcb   :  { %v3089_v51 = vpop.f32.mrf.mxu1  ;;  %10995 = vmatpush3.bf16.msra.mxu0 %v11911_v43  ;;  %10996 = vmatprep.mubr.msk.bf16.mxu0 %vm12569_vm5, %v12568_v8 }
 0xdcc   :  { %11008 = vmatprep.subr.bf16.mxu0 %v12568_v8 }
 0xdcd   :  { %v10979_v32 = vpop.f32.mrf.mxu1 }
 0xdcf   :  { %v3185_v60 = vpop.f32.mrf.mxu1 }
 0xdd0   :  { %v3191_v53 = vpack.c.bf16 %v3185_v60, %v3185_v60 }
 0xdd1   :  { %v10992_v42 = vpop.f32.mrf.mxu1 }
 0xdd2   :  { %10997 = vmatmul.mubr.msk.bf16.vlgmr.msra.gmra.mxu0 %vm2266_vm4, %v3191_v53 }
 0xdd3   :  { %v3188_v28 = vpop.f32.mrf.mxu1  ;;  %11009 = vmatpush3.bf16.msra.mxu0 %v11912_v63  ;;  %11010 = vmatprep.mubr.msk.bf16.mxu0 %vm12569_vm5, %v12568_v8 }
 0xdd4   :  { %11022 = vmatprep.subr.bf16.mxu0 %v12568_v8 }
 0xdd5   :  { %v10993_v55 = vpop.f32.mrf.mxu1 }
 0xdd7   :  { %v3284_v12 = vpop.f32.mrf.mxu1 }
 0xdd8   :  { %v3290_v30 = vpack.c.bf16 %v3284_v12, %v3284_v12 }
 0xdd9   :  { %v11006_v25 = vpop.f32.mrf.mxu1 }
 0xdda   :  { %11011 = vmatmul.mubr.msk.bf16.vlgmr.msra.gmra.mxu0 %vm2266_vm4, %v3290_v30 }
 0xddb   :  { %v3287_v17 = vpop.f32.mrf.mxu1  ;;  %11023 = vmatpush3.bf16.msra.mxu0 %v11913_v41  ;;  %11024 = vmatprep.mubr.msk.bf16.mxu0 %vm12569_vm5, %v12568_v8 }
 0xddc   :  { %11036 = vmatprep.subr.bf16.mxu0 %v12568_v8 }
 0xddd   :  { %v11007_v59 = vpop.f32.mrf.mxu1 }
 0xddf   :  { %v3383_v5 = vpop.f32.mrf.mxu1 }
 0xde0   :  { %v3389_v24 = vpack.c.bf16 %v3383_v5, %v3383_v5 }
 0xde1   :  { %v11020_v3 = vpop.f32.mrf.mxu1 }
 0xde2   :  { %11025 = vmatmul.mubr.msk.bf16.vlgmr.msra.gmra.mxu0 %vm2266_vm4, %v3389_v24 }
 0xde3   :  { %v3386_v6 = vpop.f32.mrf.mxu1  ;;  %11037 = vmatpush3.bf16.msra.mxu0 %v11914_v16  ;;  %11038 = vmatprep.mubr.msk.bf16.mxu0 %vm12569_vm5, %v12568_v8 }
 0xde4   :  { %11050 = vmatprep.subr.bf16.mxu0 %v12568_v8 }
 0xde5   :  { %v11021_v56 = vpop.f32.mrf.mxu1 }
 0xde7   :  { %v3482_v52 = vpop.f32.mrf.mxu1 }
 0xde8   :  { %v3488_v47 = vpack.c.bf16 %v3482_v52, %v3482_v52 }
 0xde9   :  { %v11034_v14 = vpop.f32.mrf.mxu1 }
 0xdea   :  { %11039 = vmatmul.mubr.msk.bf16.vlgmr.msra.gmra.mxu0 %vm2266_vm4, %v3488_v47 }
 0xdeb   :  { %v3485_v38 = vpop.f32.mrf.mxu1  ;;  %11051 = vmatpush3.bf16.msra.mxu0 %v11915_v46  ;;  %11052 = vmatprep.mubr.msk.bf16.mxu0 %vm12569_vm5, %v12568_v8 }
 0xdec   :  { %11064 = vmatprep.subr.mxu0 %v12568_v8 }
 0xded   :  { %v11035_v1 = vpop.f32.mrf.mxu1 }
 0xdef   :  { %v3581_v4 = vpop.f32.mrf.mxu1 }
 0xdf0   :  { %v3587_v13 = vpack.c.bf16 %v3581_v4, %v3581_v4 }
 0xdf1   :  { %v11048_v18 = vpop.f32.mrf.mxu1 }
 0xdf2   :  { %11053 = vmatmul.mubr.msk.bf16.vlgmr.msra.gmra.mxu0 %vm2266_vm4, %v3587_v13  ;;  %v9619_v18 = vld [vmem:[%s14652_s22] ss:$0 sm:$0xff]  ;;  %s14681_s22 = sld [smem:[#allocation87_spill]] }
 0xdf3   :  { %11065 = vmatpush3.msra.mxu0 %v13654_v40  ;;  %v3584_v26 = vpop.f32.mrf.mxu1  ;;  %11072 = vmatprep.mubr.msk.f32.mxu0 %vm12569_vm5, %v12568_v8  ;;  %v11916_v40 = vld [vmem:[%s14651_s24 + $0x8] sm:$0xff]  }
 0xdf4   :  { %11066 = vmatprep.subr.mxu0 %v12568_v8  ;;  %11057 = vmatpush3.bf16.msra.mxu1 %v11916_v40 }
 0xdf5   :  { %11067 = vmatpush3.msra.mxu0 %v13652_v21  ;;  %v11049_v34 = vpop.f32.mrf.mxu1  ;;  %11058 = vmatprep.subr.bf16.mxu1 %v12568_v8  ;;  %v11917_v21 = vld [vmem:[%s14651_s24] sm:$0xff]   ;;  %s14680_s24 = sld [smem:[#allocation86_spill]] }
 0xdf6   :  { %11068 = vmatprep.subr.mxu0 %v12568_v8  ;;  %v9620_v34 = vld [vmem:[%s14653_s23] ss:$0 sm:$0xff]  ;;  %s14682_s23 = sld [smem:[#allocation88_spill]] }
 0xdf7   :  { %11069 = vmatpush3.msra.mxu0 %v13650_v49 }
 0xdf8   :  { %11070 = vmatprep.subr.mxu0 %v12568_v8  ;;  %11059 = vmatpush3.bf16.msra.mxu1 %v11917_v21 }
 0xdf9   :  { %11071 = vmatpush3.msra.mxu0 %v13648_v22  ;;  %11075 = vmatprep.subr.bf16.mxu1 %v12568_v8 }
 0xdfa   :  { %11073 = vmatmul.mubr.msk.f32.vlgmr.msra.gmra.mxu0 %vm2754_vm6, %v3777_v20  ;;  %11081 = vmatprep.subr.bf16.mxu0 %v12568_v8 }
 0xdfb   :  { %11083 = vmatprep.mubr.msk.bf16.mxu0 %vm12569_vm5, %v12568_v8 }
 0xe82   :  { %v3040_v49 = vpop.f32.mrf.mxu0 }
 0xe83   :  { %v3046_v11 = vadd.f32 %v3040_v49, %v13762_v62  ;;  %v11918_v49 = vld [vmem:[%s14654_s26] sm:$0xff]   ;;  %s14683_s26 = sld [smem:[#allocation89_spill]] }
 0xe84   :  { %v10970_v33 = vpop.f32.mrf.mxu0 }
 0xe86   :  { %v3043_v9 = vpop.f32.mrf.mxu0 }
 0xe88   :  { %v10971_v54 = vpop.f32.mrf.mxu0 }
 0xe8a   :  { %v3139_v22 = vpop.f32.mrf.mxu0 }
 0xe8b   :  { %v3145_v19 = vadd.f32 %v3139_v22, %v3046_v11 }
 0xe8c   :  { %v10984_v2 = vpop.f32.mrf.mxu0 }
 0xe8e   :  { %v3142_v10 = vpop.f32.mrf.mxu0 }
 0xe90   :  { %v10985_v23 = vpop.f32.mrf.mxu0 }
 0xe92   :  { %v3238_v29 = vpop.f32.mrf.mxu0 }
 0xe93   :  { %v3244_v27 = vadd.f32 %v3238_v29, %v3145_v19 }
 0xe94   :  { %v10998_v61 = vpop.f32.mrf.mxu0 }
 0xe96   :  { %v3241_v58 = vpop.f32.mrf.mxu0 }
 0xe98   :  { %v10999_v50 = vpop.f32.mrf.mxu0 }
 0xe9a   :  { %v3337_v7 = vpop.f32.mrf.mxu0 }
 0xe9b   :  { %v3343_v43 = vadd.f32 %v3337_v7, %v3244_v27 }
 0xe9c   :  { %v11012_v31 = vpop.f32.mrf.mxu0 }
 0xe9e   :  { %v3340_v35 = vpop.f32.mrf.mxu0 }
 0xea0   :  { %v11013_v45 = vpop.f32.mrf.mxu0 }
 0xea2   :  { %v3436_v37 = vpop.f32.mrf.mxu0 }
 0xea3   :  { %v3442_v57 = vadd.f32 %v3436_v37, %v3343_v43 }
 0xea4   :  { %v11026_v39 = vpop.f32.mrf.mxu0 }
 0xea6   :  { %v3439_v44 = vpop.f32.mrf.mxu0 }
 0xea8   :  { %v11027_v36 = vpop.f32.mrf.mxu0 }
 0xeaa   :  { %v3535_v15 = vpop.f32.mrf.mxu0 }
 0xeab   :  { %v3541_v32 = vadd.f32 %v3535_v15, %v3442_v57 }
 0xeac   :  { %v11040_v0 = vpop.f32.mrf.mxu0 }
 0xeae   :  { %v3538_v48 = vpop.f32.mrf.mxu0 }
 0xeb0   :  { %v11041_v51 = vpop.f32.mrf.mxu0 }
 0xeb2   :  { %v3634_v60 = vpop.f32.mrf.mxu0 }
 0xeb3   :  { %v3640_v63 = vadd.f32 %v3634_v60, %v3541_v32 }
 0xeb4   :  { %v11054_v53 = vpop.f32.mrf.mxu0 }
 0xeb5   :  { %v3641_v42 = vsel %vm2754_vm6, %v3640_v63, 0.0 }
 0xeb6   :  { %v3642_v28 = vrot.slane %v3641_v42, 4  ;;  %v3637_v55 = vpop.f32.mrf.mxu0 }
 0xeb8   :  { %v3643_v12 = vadd.f32 %v3642_v28, %v3641_v42  ;;  %v11055_v41 = vpop.f32.mrf.mxu0 }
 0xeba   :  { %v3644_v62 = vrot.slane %v3643_v12, 2  ;;  %v3847_v30 = vpop.f32.mrf.mxu0 }
 0xebb   :  { %v3853_v9 = vpack.c.bf16 %v3847_v30, %v3847_v30 }
 0xebc   :  { %v3645_v25 = vadd.f32 %v3644_v62, %v3643_v12  ;;  %v11074_v17 = vpop.f32.mrf.mxu0 }
 0xebe   :  { %v3646_v59 = vrot.slane %v3645_v25, 1 }
 0xec0   :  { %v3647_v5 = vadd.f32 %v3646_v59, %v3645_v25 }
 0xec2   :  { %v3649_v16 = vmul.f32 0.125, %v3647_v5 }
 0xec4   :  { %v3650_v24 = vsub.f32 %v3640_v63, %v3649_v16 }
 0xec6   :  { %v3651_v3 = vmul.f32 %v3650_v24, %v3650_v24 }
 0xec8   :  { %v3652_v6 = vsel %vm2754_vm6, %v3651_v3, 0.0 }
 0xec9   :  { %v3653_v56 = vrot.slane %v3652_v6, 4 }
 0xecb   :  { %v3654_v52 = vadd.f32 %v3653_v56, %v3652_v6 }
 0xecd   :  { %v3655_v46 = vrot.slane %v3654_v52, 2 }
 0xecf   :  { %v3656_v47 = vadd.f32 %v3655_v46, %v3654_v52 }
 0xed1   :  { %v3657_v14 = vrot.slane %v3656_v47, 1 }
 0xed3   :  { %v3658_v38 = vadd.f32 %v3657_v14, %v3656_v47  ;;  %v9624_v47 = vld [vmem:[%s14655_s21] ss:$0 sm:$0xff]  ;;  %s14684_s21 = sld [smem:[#allocation91_spill]] }
 0xed5   :  { %v3659_v1 = vmul.f32 0.125, %v3658_v38  ;;  %v9629_v38 = vld [vmem:[%s14656_s11] ss:$0 sm:$0xff]  ;;  %s14685_s11 = sld [smem:[#allocation92_spill]] }
 0xed7   :  { %v3660_v4 = vadd.f32 1e-05, %v3659_v1 }
 0xed9   :  { %12079 = vrsqrt.f32 %v3660_v4 }
 0xee6   :  { %v12080_v13 = vpop.eup %12079 }
 0xee7   :  { %v3662_v26 = vmul.f32 %v12080_v13, %v3650_v24  ;;  %v9625_v13 = vld [vmem:[%s14657_s27] ss:$0 sm:$0xff]  ;;  %s14686_s27 = sld [smem:[#allocation38_spill]] }
 0xee9   :  { %v3670_v20 = vmul.f32 %v9619_v18, %v3662_v26  ;;  %v9630_v18 = vld [vmem:[%s14658_s4] ss:$0 sm:$0xff] }
 0xeeb   :  { %v3678_v40 = vadd.f32 %v9620_v34, %v3670_v20 }
 0xeed   :  { %v3679_v21 = vmax.f32 %v3678_v40, 0.0 }
 0xeef   :  { %v3684_v33 = vpack.c.bf16 %v3679_v21, %v3679_v21 }
 0xef1   :  { %11061 = vmatmul.mubr.msk.bf16.vlgmr.msra.gmra.mxu1 %vm2754_vm6, %v3684_v33 }
 0xef2   :  { %11076 = vmatpush3.bf16.msra.mxu1 %v11918_v49  ;;  %11077 = vmatprep.mubr.msk.bf16.mxu1 %vm12569_vm5, %v12568_v8 }
 0xef3   :  { %11087 = vmatprep.subr.bf16.mxu1 %v12568_v8 }
 0xef9   :  { %11078 = vmatmul.mubr.msk.bf16.vlgmr.msra.gmra.mxu1 %vm2266_vm4, %v3853_v9 }
 0xefa   :  { %11089 = vmatprep.mubr.msk.bf16.mxu1 %vm12569_vm5, %v12568_v8 }
 0xfb1   :  { %v3734_v54 = vpop.f32.mrf.mxu1 }
 0xfb2   :  { %v3740_v22 = vsel %vm2754_vm6, %v3734_v54, 0.0 }
 0xfb3   :  { %v3741_v2 = vrot.slane %v3740_v22, 4  ;;  %v11062_v10 = vpop.f32.mrf.mxu1 }
 0xfb5   :  { %v3742_v23 = vadd.f32 %v3741_v2, %v3740_v22  ;;  %v3737_v29 = vpop.f32.mrf.mxu1 }
 0xfb7   :  { %v3743_v61 = vrot.slane %v3742_v23, 2  ;;  %v11063_v58 = vpop.f32.mrf.mxu1 }
 0xfb9   :  { %v3744_v50 = vadd.f32 %v3743_v61, %v3742_v23  ;;  %v3897_v7 = vpop.f32.mrf.mxu1 }
 0xfba   :  { %v3903_v31 = vsel %vm2754_vm6, %v3897_v7, 0.0 }
 0xfbb   :  { %v3745_v35 = vrot.slane %v3744_v50, 1  ;;  %v3904_v45 = vrot.slane %v3903_v31, 4  ;;  %v11079_v37 = vpop.f32.mrf.mxu1 }
 0xfbd   :  { %v3746_v39 = vadd.f32 %v3745_v35, %v3744_v50  ;;  %v3905_v44 = vadd.f32 %v3904_v45, %v3903_v31  ;;  %v3900_v11 = vpop.f32.mrf.mxu1 }
 0xfbe   :  { %v9631_v11 = vld [vmem:[%s14659_s30] ss:$0 sm:$0xff] }
 0xfbf   :  { %v3747_v36 = vmul.f32 0.125, %v3746_v39  ;;  %v3906_v19 = vrot.slane %v3905_v44, 2  ;;  %v11080_v15 = vpop.f32.mrf.mxu1 }
 0xfc1   :  { %v3748_v27 = vsub.f32 %v3734_v54, %v3747_v36  ;;  %v3907_v0 = vadd.f32 %v3906_v19, %v3905_v44  ;;  %v9632_v19 = vld [vmem:[%s14660_s0] ss:$0 sm:$0xff] }
 0xfc3   :  { %v3749_v43 = vmul.f32 %v3748_v27, %v3748_v27  ;;  %v3908_v48 = vrot.slane %v3907_v0, 1 }
 0xfc5   :  { %v3750_v57 = vsel %vm2754_vm6, %v3749_v43, 0.0  ;;  %v3909_v51 = vadd.f32 %v3908_v48, %v3907_v0 }
 0xfc6   :  { %v3751_v32 = vrot.slane %v3750_v57, 4 }
 0xfc7   :  { %v3910_v60 = vmul.f32 0.125, %v3909_v51  ;;  %v9634_v51 = vld [vmem:[%s14661_s19 + $0x1] sm:$0x1] }
 0xfc8   :  { %v3752_v63 = vadd.f32 %v3751_v32, %v3750_v57  ;;  %v3980_v57 = vld [vmem:[%s14661_s19] sm:$0x1]  ;;  %v11919_v32 = vld [vmem:[%s14662_s17 + $0x18] sm:$0xff]  }
 0xfc9   :  { %v3911_v53 = vsub.f32 %v3897_v7, %v3910_v60  ;;  %v11920_v60 = vld [vmem:[%s14662_s17 + $0x8] sm:$0xff]  }
 0xfca   :  { %v3753_v42 = vrot.slane %v3752_v63, 2 }
 0xfcb   :  { %v3912_v28 = vmul.f32 %v3911_v53, %v3911_v53 }
 0xfcc   :  { %v3754_v55 = vadd.f32 %v3753_v42, %v3752_v63  ;;  %v11921_v63 = vld [vmem:[%s14662_s17 + $0x10] sm:$0xff]  }
 0xfcd   :  { %v3913_v12 = vsel %vm2754_vm6, %v3912_v28, 0.0 }
 0xfce   :  { %v3755_v41 = vrot.slane %v3754_v55, 1  ;;  %v3914_v62 = vrot.slane %v3913_v12, 4 }
 0xfd0   :  { %v3756_v30 = vadd.f32 %v3755_v41, %v3754_v55  ;;  %v3915_v25 = vadd.f32 %v3914_v62, %v3913_v12 }
 0xfd2   :  { %v3757_v17 = vmul.f32 0.125, %v3756_v30  ;;  %v3916_v59 = vrot.slane %v3915_v25, 2 }
 0xfd4   :  { %v3758_v5 = vadd.f32 1e-05, %v3757_v17  ;;  %v3917_v16 = vadd.f32 %v3916_v59, %v3915_v25 }
 0xfd6   :  { %v3918_v24 = vrot.slane %v3917_v16, 1  ;;  %12081 = vrsqrt.f32 %v3758_v5  ;;  %v9646_v5 = vld [vmem:[%s14661_s19 + $0x2] sm:$0x1] }
 0xfd8   :  { %v3919_v3 = vadd.f32 %v3918_v24, %v3917_v16  ;;  %v9655_v16 = vld [vmem:[%s14661_s19 + $0x3] sm:$0x1]  ;;  %v9664_v24 = vld [vmem:[%s14661_s19 + $0x4] sm:$0x1] }
 0xfda   :  { %v3920_v6 = vmul.f32 0.125, %v3919_v3  ;;  %v9673_v3 = vld [vmem:[%s14661_s19 + $0x5] sm:$0x1] }
 0xfdc   :  { %v3921_v56 = vadd.f32 1e-05, %v3920_v6  ;;  %v9682_v6 = vld [vmem:[%s14661_s19 + $0x6] sm:$0x1] }
 0xfde   :  { %12083 = vrsqrt.f32 %v3921_v56  ;;  %v9691_v56 = vld [vmem:[%s14661_s19 + $0x7] sm:$0x1] }
 0xfe3   :  { %v12082_v52 = vpop.eup %12081 }
 0xfe4   :  { %v3760_v46 = vmul.f32 %v12082_v52, %v3748_v27  ;;  %v9700_v52 = vld [vmem:[%s14661_s19 + $0x8] sm:$0x1] }
 0xfe6   :  { %v3768_v1 = vmul.f32 %v9624_v47, %v3760_v46  ;;  %v11923_v46 = vld [vmem:[%s14662_s17 + $0x28] sm:$0xff]   ;;  %v11924_v47 = vld [vmem:[%s14662_s17 + $0x20] sm:$0xff]  }
 0xfe8   :  { %v3776_v34 = vadd.f32 %v9625_v13, %v3768_v1 }
 0xfeb   :  { %v12084_v14 = vpop.eup %12083 }
 0xfec   :  { %v3923_v4 = vmul.f32 %v12084_v14, %v3911_v53  ;;  %v11922_v53 = vld [vmem:[%s14662_s17] sm:$0xff]  }
 0xfee   :  { %v3931_v26 = vmul.f32 %v9629_v38, %v3923_v4 }
 0xff0   :  { %v3939_v20 = vadd.f32 %v9630_v18, %v3931_v26 }
 0xff2   :  { %v13834_v40 = vadd.f32 %v3939_v20, %v3776_v34 }
 0xff4   :  { %v3941_v21 = vsel %vm2754_vm6, %v13834_v40, 0.0 }
 0xff5   :  { %v3942_v49 = vrot.slane %v3941_v21, 4 }
 0xff7   :  { %v3943_v33 = vadd.f32 %v3942_v49, %v3941_v21  ;;  %v11925_v49 = vld [vmem:[%s14662_s17 + $0x38] sm:$0xff]  }
 0xff9   :  { %v3944_v9 = vrot.slane %v3943_v33, 2 }
 0xffb   :  { %v3945_v54 = vadd.f32 %v3944_v9, %v3943_v33 }
 0xffd   :  { %v3946_v22 = vrot.slane %v3945_v54, 1 }
 0xfff   :  { %v3947_v2 = vadd.f32 %v3946_v22, %v3945_v54  ;;  %v11926_v22 = vld [vmem:[%s14662_s17 + $0x30] sm:$0xff]  }
0x1001   :  { %v3948_v10 = vmul.f32 0.125, %v3947_v2 }
0x1003   :  { %v3949_v23 = vsub.f32 %v13834_v40, %v3948_v10 }
0x1005   :  { %v3950_v29 = vmul.f32 %v3949_v23, %v3949_v23 }
0x1007   :  { %v3951_v61 = vsel %vm2754_vm6, %v3950_v29, 0.0 }
0x1008   :  { %v3952_v58 = vrot.slane %v3951_v61, 4 }
0x100a   :  { %v3953_v50 = vadd.f32 %v3952_v58, %v3951_v61 }
0x100c   :  { %v3954_v7 = vrot.slane %v3953_v50, 2 }
0x100e   :  { %v3955_v31 = vadd.f32 %v3954_v7, %v3953_v50  ;;  %v11928_v50 = vld [vmem:[%s14662_s17 + $0x40] sm:$0xff]  }
0x1010   :  { %v3956_v35 = vrot.slane %v3955_v31, 1 }
0x1012   :  { %v3957_v45 = vadd.f32 %v3956_v35, %v3955_v31  ;;  %v11929_v35 = vld [vmem:[%s14662_s17 + $0x58] sm:$0xff]  }
0x1014   :  { %v3958_v37 = vmul.f32 0.125, %v3957_v45 }
0x1016   :  { %v3959_v39 = vadd.f32 1e-05, %v3958_v37 }
0x1018   :  { %12085 = vrsqrt.f32 %v3959_v39 }
0x1025   :  { %v12086_v44 = vpop.eup %12085 }
0x1026   :  { %v3961_v36 = vmul.f32 %v12086_v44, %v3949_v23  ;;  %v11927_v23 = vld [vmem:[%s14662_s17 + $0x48] sm:$0xff]   ;;  %v11930_v44 = vld [vmem:[%s14662_s17 + $0x50] sm:$0xff]  }
0x1028   :  { %v3969_v15 = vmul.f32 %v9631_v11, %v3961_v36 }
0x102a   :  { %v3977_v27 = vadd.f32 %v9632_v19, %v3969_v15  ;;  %v11931_v19 = vld [vmem:[%s14662_s17 + $0x68] sm:$0xff]  }
0x102c   :  { %v3978_v0 = vmax.f32 %v3977_v27, 0.0 }
0x102e   :  { %v3979_v43 = vpack.c.bf16 %v3978_v0, %v3978_v0 }
0x1030   :  { %v13843_v48 = vsel %vm1231_vm3, %v3979_v43, 0  ;;  %v11932_v43 = vld [vmem:[%s14662_s17 + $0x60] sm:$0xff]  }
0x1031   :  { %11082 = vmatpush3.bf16.msra.mxu0 %v13843_v48  ;;  %11088 = vmatpush3.bf16.msra.mxu1 %v13843_v48 }
0x1032   :  { %11093 = vmatprep.subr.bf16.mxu0 %v12568_v8  ;;  %11101 = vmatprep.subr.bf16.mxu1 %v12568_v8 }
0x1034   :  { %11084 = vmatmul.mubr.msk.bf16.vlgmr.msra.gmra.mxu0 %vm717_vm2, %v3980_v57  ;;  %11090 = vmatmul.mubr.msk.bf16.vlgmr.msra.gmra.mxu1 %vm717_vm2, %v9634_v51  ;;  %v11933_v51 = vld [vmem:[%s14662_s17 + $0x78] sm:$0xff]  }
0x1035   :  { %11094 = vmatpush3.bf16.msra.mxu0 %v11919_v32  ;;  %11102 = vmatpush3.bf16.msra.mxu1 %v11920_v60 }
0x1036   :  { %11095 = vmatprep.subr.bf16.mxu0 %v12568_v8  ;;  %11103 = vmatprep.subr.bf16.mxu1 %v12568_v8 }
0x1037   :  { %11097 = vmatprep.mubr.msk.bf16.mxu0 %vm12569_vm5, %v12568_v8  ;;  %11105 = vmatprep.mubr.msk.bf16.mxu1 %vm12569_vm5, %v12568_v8 }
0x1039   :  { %11096 = vmatpush3.bf16.msra.mxu0 %v11921_v63  ;;  %11104 = vmatpush3.bf16.msra.mxu1 %v11922_v53  ;;  %v11934_v53 = vld [vmem:[%s14662_s17 + $0x70] sm:$0xff]  }
0x103a   :  { %11109 = vmatprep.subr.bf16.mxu0 %v12568_v8  ;;  %11115 = vmatprep.subr.bf16.mxu1 %v12568_v8 }
0x10f4   :  { %v4021_v42 = vpop.f32.mrf.mxu0  ;;  %v4071_v28 = vpop.f32.mrf.mxu1 }
0x10f5   :  { %v4027_v55 = vpack.c.bf16 %v4021_v42, %v4021_v42  ;;  %v4077_v12 = vpack.c.bf16 %v4071_v28, %v4071_v28 }
0x10f6   :  { %v11091_v41 = vpop.f32.mrf.mxu1  ;;  %v11085_v62 = vpop.f32.mrf.mxu0 }
0x10f7   :  { %11098 = vmatmul.mubr.msk.bf16.vlgmr.msra.gmra.mxu0 %vm2754_vm6, %v4077_v12  ;;  %11106 = vmatmul.mubr.msk.bf16.vlgmr.msra.gmra.mxu1 %vm2754_vm6, %v4027_v55  ;;  %v11935_v55 = vld [vmem:[%s14662_s17 + $0x88] sm:$0xff]  }
0x10f8   :  { %11110 = vmatpush3.bf16.msra.mxu0 %v13843_v48  ;;  %v4074_v30 = vpop.f32.mrf.mxu1  ;;  %11111 = vmatprep.mubr.msk.bf16.mxu0 %vm12569_vm5, %v12568_v8  ;;  %v4024_v25 = vpop.f32.mrf.mxu0 }
0x10f9   :  { %11123 = vmatprep.subr.bf16.mxu0 %v12568_v8  ;;  %11119 = vmatprep.mubr.msk.bf16.mxu1 %vm12569_vm5, %v12568_v8  ;;  %v11936_v30 = vld [vmem:[%s14662_s17 + $0x80] sm:$0xff]  }
0x10fa   :  { %v11092_v17 = vpop.f32.mrf.mxu1  ;;  %v11086_v59 = vpop.f32.mrf.mxu0  ;;  %11116 = vmatpush3.bf16.msra.mxu1 %v11923_v46  ;;  %v11941_v46 = vld [vmem:[%s14665_s13 + $0x8] sm:$0xff]  }
0x10fb   :  { %11117 = vmatprep.subr.bf16.mxu1 %v12568_v8 }
0x10fe   :  { %11118 = vmatpush3.bf16.msra.mxu1 %v11924_v47  ;;  %v11942_v47 = vld [vmem:[%s14665_s13] sm:$0xff]  }
0x10ff   :  { %11112 = vmatmul.mubr.msk.bf16.vlgmr.msra.gmra.mxu0 %vm717_vm2, %v9646_v5  ;;  %11129 = vmatprep.subr.bf16.mxu1 %v12568_v8 }
0x1100   :  { %11124 = vmatpush3.bf16.msra.mxu0 %v13843_v48  ;;  %11125 = vmatprep.mubr.msk.bf16.mxu0 %vm12569_vm5, %v12568_v8 }
0x1101   :  { %11137 = vmatprep.subr.bf16.mxu0 %v12568_v8 }
0x1107   :  { %11126 = vmatmul.mubr.msk.bf16.vlgmr.msra.gmra.mxu0 %vm717_vm2, %v9655_v16 }
0x1108   :  { %11138 = vmatpush3.bf16.msra.mxu0 %v13843_v48  ;;  %11139 = vmatprep.mubr.msk.bf16.mxu0 %vm12569_vm5, %v12568_v8 }
0x1109   :  { %11151 = vmatprep.subr.bf16.mxu0 %v12568_v8 }
0x110f   :  { %11140 = vmatmul.mubr.msk.bf16.vlgmr.msra.gmra.mxu0 %vm717_vm2, %v9664_v24 }
0x1110   :  { %11152 = vmatpush3.bf16.msra.mxu0 %v13843_v48  ;;  %11153 = vmatprep.mubr.msk.bf16.mxu0 %vm12569_vm5, %v12568_v8 }
0x1111   :  { %11165 = vmatprep.subr.bf16.mxu0 %v12568_v8 }
0x1117   :  { %11154 = vmatmul.mubr.msk.bf16.vlgmr.msra.gmra.mxu0 %vm717_vm2, %v9673_v3  ;;  %v5096_v3 = vld [vmem:[%s14663_s25] sm:$0x3] }
0x1118   :  { %11166 = vmatpush3.bf16.msra.mxu0 %v13843_v48  ;;  %11167 = vmatprep.mubr.msk.bf16.mxu0 %vm12569_vm5, %v12568_v8 }
0x1119   :  { %11179 = vmatprep.subr.bf16.mxu0 %v12568_v8 }
0x111f   :  { %11168 = vmatmul.mubr.msk.bf16.vlgmr.msra.gmra.mxu0 %vm717_vm2, %v9682_v6  ;;  %v11937_v6 = vld [vmem:[%s14664_s2 + $0x8] sm:$0xff]  }
0x1120   :  { %11180 = vmatpush3.bf16.msra.mxu0 %v13843_v48  ;;  %11181 = vmatprep.mubr.msk.bf16.mxu0 %vm12569_vm5, %v12568_v8 }
0x1121   :  { %11193 = vmatprep.subr.bf16.mxu0 %v12568_v8 }
0x1127   :  { %11182 = vmatmul.mubr.msk.bf16.vlgmr.msra.gmra.mxu0 %vm717_vm2, %v9691_v56  ;;  %v11939_v56 = vld [vmem:[%s14665_s13 + $0x18] sm:$0xff]  }
0x1128   :  { %11194 = vmatpush3.bf16.msra.mxu0 %v13843_v48  ;;  %11195 = vmatprep.mubr.msk.bf16.mxu0 %vm12569_vm5, %v12568_v8 }
0x1129   :  { %11207 = vmatprep.subr.bf16.mxu0 %v12568_v8 }
0x112f   :  { %11196 = vmatmul.mubr.msk.bf16.vlgmr.msra.gmra.mxu0 %vm717_vm2, %v9700_v52  ;;  %v11940_v52 = vld [vmem:[%s14665_s13 + $0x10] sm:$0xff]  }
0x1130   :  { %11215 = vmatprep.mubr.msk.bf16.mxu0 %vm12569_vm5, %v12568_v8  ;;  %11208 = vmatpush3.bf16.msra.mxu0 %v11939_v56 }
0x1131   :  { %11209 = vmatprep.subr.bf16.mxu0 %v12568_v8 }
0x1134   :  { %11210 = vmatpush3.bf16.msra.mxu0 %v11940_v52  ;;  %v9710_v52 = vld [vmem:[%s14667_s6] ss:$0 sm:$0xff] }
0x1135   :  { %11211 = vmatprep.subr.bf16.mxu0 %v12568_v8 }
0x1138   :  { %11212 = vmatpush3.bf16.msra.mxu0 %v11941_v46 }
0x1139   :  { %11213 = vmatprep.subr.bf16.mxu0 %v12568_v8 }
0x113c   :  { %11214 = vmatpush3.bf16.msra.mxu0 %v11942_v47 }
0x113d   :  { %11232 = vmatprep.subr.bf16.mxu0 %v12568_v8 }
0x11b7   :  { %v4132_v14 = vpop.f32.mrf.mxu0  ;;  %v4187_v38 = vpop.f32.mrf.mxu1 }
0x11b8   :  { %v13917_v1 = vadd.f32 %v4187_v38, %v4132_v14 }
0x11b9   :  { %v11099_v4 = vpop.f32.mrf.mxu0  ;;  %v11107_v13 = vpop.f32.mrf.mxu1 }
0x11bb   :  { %v4135_v18 = vpop.f32.mrf.mxu0  ;;  %v4190_v26 = vpop.f32.mrf.mxu1 }
0x11bd   :  { %v11100_v34 = vpop.f32.mrf.mxu0  ;;  %v11108_v20 = vpop.f32.mrf.mxu1 }
0x11bf   :  { %v4232_v21 = vpop.f32.mrf.mxu0 }
0x11c0   :  { %v4238_v33 = vpack.c.bf16 %v4232_v21, %v4232_v21 }
0x11c1   :  { %v11113_v9 = vpop.f32.mrf.mxu0 }
0x11c2   :  { %11120 = vmatmul.mubr.msk.bf16.vlgmr.msra.gmra.mxu1 %vm2754_vm6, %v4238_v33 }
0x11c3   :  { %11130 = vmatpush3.bf16.msra.mxu1 %v11925_v49  ;;  %v4235_v54 = vpop.f32.mrf.mxu0  ;;  %11133 = vmatprep.mubr.msk.bf16.mxu1 %vm12569_vm5, %v12568_v8 }
0x11c4   :  { %11131 = vmatprep.subr.bf16.mxu1 %v12568_v8 }
0x11c5   :  { %v11114_v2 = vpop.f32.mrf.mxu0 }
0x11c7   :  { %11132 = vmatpush3.bf16.msra.mxu1 %v11926_v22  ;;  %v4339_v10 = vpop.f32.mrf.mxu0 }
0x11c8   :  { %v4345_v29 = vpack.c.bf16 %v4339_v10, %v4339_v10  ;;  %11143 = vmatprep.subr.bf16.mxu1 %v12568_v8 }
0x11c9   :  { %v11127_v61 = vpop.f32.mrf.mxu0 }
0x11ca   :  { %11134 = vmatmul.mubr.msk.bf16.vlgmr.msra.gmra.mxu1 %vm2754_vm6, %v4345_v29 }
0x11cb   :  { %11144 = vmatpush3.bf16.msra.mxu1 %v11927_v23  ;;  %v4342_v58 = vpop.f32.mrf.mxu0  ;;  %11147 = vmatprep.mubr.msk.bf16.mxu1 %vm12569_vm5, %v12568_v8 }
0x11cc   :  { %11145 = vmatprep.subr.bf16.mxu1 %v12568_v8 }
0x11cd   :  { %v11128_v7 = vpop.f32.mrf.mxu0 }
0x11cf   :  { %11146 = vmatpush3.bf16.msra.mxu1 %v11928_v50  ;;  %v4446_v31 = vpop.f32.mrf.mxu0 }
0x11d0   :  { %v4452_v45 = vpack.c.bf16 %v4446_v31, %v4446_v31  ;;  %11157 = vmatprep.subr.bf16.mxu1 %v12568_v8 }
0x11d1   :  { %v11141_v37 = vpop.f32.mrf.mxu0 }
0x11d2   :  { %11148 = vmatmul.mubr.msk.bf16.vlgmr.msra.gmra.mxu1 %vm2754_vm6, %v4452_v45 }
0x11d3   :  { %11158 = vmatpush3.bf16.msra.mxu1 %v11929_v35  ;;  %v4449_v39 = vpop.f32.mrf.mxu0  ;;  %11161 = vmatprep.mubr.msk.bf16.mxu1 %vm12569_vm5, %v12568_v8 }
0x11d4   :  { %11159 = vmatprep.subr.bf16.mxu1 %v12568_v8 }
0x11d5   :  { %v11142_v11 = vpop.f32.mrf.mxu0 }
0x11d7   :  { %11160 = vmatpush3.bf16.msra.mxu1 %v11930_v44  ;;  %v4553_v36 = vpop.f32.mrf.mxu0 }
0x11d8   :  { %v4559_v15 = vpack.c.bf16 %v4553_v36, %v4553_v36  ;;  %11171 = vmatprep.subr.bf16.mxu1 %v12568_v8 }
0x11d9   :  { %v11155_v27 = vpop.f32.mrf.mxu0 }
0x11da   :  { %11162 = vmatmul.mubr.msk.bf16.vlgmr.msra.gmra.mxu1 %vm2754_vm6, %v4559_v15 }
0x11db   :  { %11172 = vmatpush3.bf16.msra.mxu1 %v11931_v19  ;;  %v4556_v0 = vpop.f32.mrf.mxu0  ;;  %11175 = vmatprep.mubr.msk.bf16.mxu1 %vm12569_vm5, %v12568_v8 }
0x11dc   :  { %11173 = vmatprep.subr.bf16.mxu1 %v12568_v8 }
0x11dd   :  { %v11156_v48 = vpop.f32.mrf.mxu0 }
0x11df   :  { %11174 = vmatpush3.bf16.msra.mxu1 %v11932_v43  ;;  %v4660_v57 = vpop.f32.mrf.mxu0 }
0x11e0   :  { %v4666_v32 = vpack.c.bf16 %v4660_v57, %v4660_v57  ;;  %11185 = vmatprep.subr.bf16.mxu1 %v12568_v8 }
0x11e1   :  { %v11169_v60 = vpop.f32.mrf.mxu0 }
0x11e2   :  { %11176 = vmatmul.mubr.msk.bf16.vlgmr.msra.gmra.mxu1 %vm2754_vm6, %v4666_v32 }
0x11e3   :  { %11186 = vmatpush3.bf16.msra.mxu1 %v11933_v51  ;;  %v4663_v63 = vpop.f32.mrf.mxu0  ;;  %11189 = vmatprep.mubr.msk.bf16.mxu1 %vm12569_vm5, %v12568_v8 }
0x11e4   :  { %11187 = vmatprep.subr.bf16.mxu1 %v12568_v8 }
0x11e5   :  { %v11170_v42 = vpop.f32.mrf.mxu0 }
0x11e7   :  { %11188 = vmatpush3.bf16.msra.mxu1 %v11934_v53  ;;  %v4767_v28 = vpop.f32.mrf.mxu0 }
0x11e8   :  { %v4773_v12 = vpack.c.bf16 %v4767_v28, %v4767_v28  ;;  %11199 = vmatprep.subr.bf16.mxu1 %v12568_v8 }
0x11e9   :  { %v11183_v41 = vpop.f32.mrf.mxu0 }
0x11ea   :  { %11190 = vmatmul.mubr.msk.bf16.vlgmr.msra.gmra.mxu1 %vm2754_vm6, %v4773_v12 }
0x11eb   :  { %11200 = vmatpush3.bf16.msra.mxu1 %v11935_v55  ;;  %v4770_v62 = vpop.f32.mrf.mxu0  ;;  %11203 = vmatprep.mubr.msk.bf16.mxu1 %vm12569_vm5, %v12568_v8 }
0x11ec   :  { %11201 = vmatprep.subr.bf16.mxu1 %v12568_v8 }
0x11ed   :  { %v11184_v25 = vpop.f32.mrf.mxu0 }
0x11ef   :  { %11202 = vmatpush3.bf16.msra.mxu1 %v11936_v30  ;;  %v4874_v17 = vpop.f32.mrf.mxu0 }
0x11f0   :  { %v4880_v59 = vpack.c.bf16 %v4874_v17, %v4874_v17  ;;  %11219 = vmatprep.subr.mxu1 %v12568_v8 }
0x11f1   :  { %v11197_v5 = vpop.f32.mrf.mxu0 }
0x11f2   :  { %11204 = vmatmul.mubr.msk.bf16.vlgmr.msra.gmra.mxu1 %vm2754_vm6, %v4880_v59 }
0x11f3   :  { %11220 = vmatpush3.msra.mxu1 %v13834_v40  ;;  %v4877_v16 = vpop.f32.mrf.mxu0  ;;  %11221 = vmatprep.mubr.msk.f32.mxu1 %vm12569_vm5, %v12568_v8  ;;  %v11938_v40 = vld [vmem:[%s14664_s2] sm:$0xff]  }
0x11f4   :  { %11224 = vmatprep.subr.bf16.mxu1 %v12568_v8 }
0x11f5   :  { %v11198_v24 = vpop.f32.mrf.mxu0 }
0x11fa   :  { %11222 = vmatmul.mubr.msk.f32.vlgmr.msra.gmra.mxu1 %vm717_vm2, %v5096_v3 }
0x11fb   :  { %11228 = vmatprep.mubr.msk.bf16.mxu1 %vm12569_vm5, %v12568_v8  ;;  %11225 = vmatpush3.bf16.msra.mxu1 %v11937_v6 }
0x11fc   :  { %11226 = vmatprep.subr.bf16.mxu1 %v12568_v8 }
0x11ff   :  { %11227 = vmatpush3.bf16.msra.mxu1 %v11938_v40  ;;  %v9709_v40 = vld [vmem:[%s14666_s5] ss:$0 sm:$0xff] }
0x1200   :  { %11238 = vmatprep.subr.bf16.mxu1 %v12568_v8 }
0x1282   :  { %v4293_v14 = vpop.f32.mrf.mxu1 }
0x1283   :  { %v4299_v58 = vadd.f32 %v4293_v14, %v13917_v1 }
0x1284   :  { %v11121_v38 = vpop.f32.mrf.mxu1 }
0x1286   :  { %v4296_v4 = vpop.f32.mrf.mxu1 }
0x1288   :  { %v11122_v13 = vpop.f32.mrf.mxu1 }
0x128a   :  { %v4400_v18 = vpop.f32.mrf.mxu1 }
0x128b   :  { %v4406_v7 = vadd.f32 %v4400_v18, %v4299_v58 }
0x128c   :  { %v11135_v26 = vpop.f32.mrf.mxu1 }
0x128e   :  { %v4403_v34 = vpop.f32.mrf.mxu1 }
0x1290   :  { %v11136_v20 = vpop.f32.mrf.mxu1 }
0x1292   :  { %v4507_v21 = vpop.f32.mrf.mxu1 }
0x1293   :  { %v4513_v35 = vadd.f32 %v4507_v21, %v4406_v7 }
0x1294   :  { %v11149_v49 = vpop.f32.mrf.mxu1 }
0x1296   :  { %v4510_v33 = vpop.f32.mrf.mxu1 }
0x1298   :  { %v11150_v9 = vpop.f32.mrf.mxu1 }
0x129a   :  { %v4614_v54 = vpop.f32.mrf.mxu1 }
0x129b   :  { %v4620_v37 = vadd.f32 %v4614_v54, %v4513_v35 }
0x129c   :  { %v11163_v22 = vpop.f32.mrf.mxu1 }
0x129e   :  { %v4617_v2 = vpop.f32.mrf.mxu1 }
0x12a0   :  { %v11164_v10 = vpop.f32.mrf.mxu1 }
0x12a2   :  { %v4721_v23 = vpop.f32.mrf.mxu1 }
0x12a3   :  { %v4727_v44 = vadd.f32 %v4721_v23, %v4620_v37 }
0x12a4   :  { %v11177_v29 = vpop.f32.mrf.mxu1 }
0x12a6   :  { %v4724_v61 = vpop.f32.mrf.mxu1 }
0x12a8   :  { %v11178_v50 = vpop.f32.mrf.mxu1 }
0x12aa   :  { %v4828_v31 = vpop.f32.mrf.mxu1 }
0x12ab   :  { %v4834_v36 = vadd.f32 %v4828_v31, %v4727_v44 }
0x12ac   :  { %v11191_v45 = vpop.f32.mrf.mxu1 }
0x12ae   :  { %v4831_v39 = vpop.f32.mrf.mxu1 }
0x12b0   :  { %v11192_v11 = vpop.f32.mrf.mxu1 }
0x12b2   :  { %v4935_v19 = vpop.f32.mrf.mxu1 }
0x12b3   :  { %v4941_v15 = vadd.f32 %v4935_v19, %v4834_v36 }
0x12b4   :  { %v11205_v27 = vpop.f32.mrf.mxu1 }
0x12b5   :  { %v4943_v0 = vsel %vm4942_vm7, %v4941_v15, 0.0 }
0x12b6   :  { %v4944_v43 = vrot.slane %v4943_v0, 4  ;;  %v4938_v48 = vpop.f32.mrf.mxu1 }
0x12b8   :  { %v4945_v57 = vadd.f32 %v4944_v43, %v4943_v0  ;;  %v11206_v1 = vpop.f32.mrf.mxu1 }
0x12ba   :  { %v4946_v51 = vrot.slane %v4945_v57, 2  ;;  %v5166_v32 = vpop.f32.mrf.mxu1 }
0x12bb   :  { %v5174_v60 = vpack.c.bf16 %v5166_v32, %v5166_v32 }
0x12bc   :  { %v4947_v63 = vadd.f32 %v4946_v51, %v4945_v57  ;;  %v11223_v53 = vpop.f32.mrf.mxu1 }
0x12bd   :  { %11229 = vmatmul.mubr.msk.bf16.vlgmr.msra.gmra.mxu1 %vm2754_vm6, %v5174_v60 }
0x12be   :  { %v4948_v42 = vrot.slane %v4947_v63, 1  ;;  %11240 = vmatprep.mubr.msk.bf16.mxu1 %vm12569_vm5, %v12568_v8 }
0x12c0   :  { %v4949_v28 = vadd.f32 %v4948_v42, %v4947_v63 }
0x12c2   :  { %v4951_v55 = vmul.f32 0.5, %v4949_v28 }
0x12c4   :  { %v4952_v12 = vsub.f32 %v4941_v15, %v4951_v55 }
0x12c6   :  { %v4953_v41 = vmul.f32 %v4952_v12, %v4952_v12 }
0x12c8   :  { %v4954_v62 = vsel %vm4942_vm7, %v4953_v41, 0.0 }
0x12c9   :  { %v4955_v30 = vrot.slane %v4954_v62, 4 }
0x12cb   :  { %v4956_v25 = vadd.f32 %v4955_v30, %v4954_v62 }
0x12cd   :  { %v4957_v17 = vrot.slane %v4956_v25, 2 }
0x12cf   :  { %v4958_v59 = vadd.f32 %v4957_v17, %v4956_v25  ;;  %v9722_v25 = vld [vmem:[%s14668_s18] ss:$0 sm:$0xff] }
0x12d1   :  { %v4959_v5 = vrot.slane %v4958_v59, 1 }
0x12d3   :  { %v4960_v16 = vadd.f32 %v4959_v5, %v4958_v59  ;;  %v9716_v59 = vld [vmem:[%s14669_s7] ss:$0 sm:$0xff] }
0x12d5   :  { %v4961_v24 = vmul.f32 0.5, %v4960_v16 }
0x12d7   :  { %v4962_v3 = vadd.f32 1e-05, %v4961_v24  ;;  %v9723_v24 = vld [vmem:[%s14670_s12] ss:$0 sm:$0xff] }
0x12d9   :  { %12087 = vrsqrt.f32 %v4962_v3  ;;  %v9717_v3 = vld [vmem:[%s14671_s15] ss:$0 sm:$0xff] }
0x12e6   :  { %v12088_v6 = vpop.eup %12087 }
0x12e7   :  { %v4964_v56 = vmul.f32 %v12088_v6, %v4952_v12 }
0x12e9   :  { %v4972_v46 = vmul.f32 %v9709_v40, %v4964_v56 }
0x12eb   :  { %v4980_v47 = vadd.f32 %v9710_v52, %v4972_v46 }
0x12ed   :  { %v4981_v14 = vmax.f32 %v4980_v47, 0.0 }
0x12ef   :  { %v4990_v38 = vpack.c.bf16 %v4981_v14, %v4981_v14 }
0x12f1   :  { %11216 = vmatmul.mubr.msk.bf16.vlgmr.msra.gmra.mxu0 %vm5015_vm8, %v4990_v38 }
0x12f2   :  { %11234 = vmatprep.mubr.msk.bf16.mxu0 %vm12569_vm5, %v12568_v8 }
0x137d   :  { %v5224_v4 = vpop.f32.mrf.mxu1 }
0x137e   :  { %v5230_v34 = vsel %vm4942_vm7, %v5224_v4, 0.0 }
0x137f   :  { %v11230_v13 = vpop.f32.mrf.mxu1  ;;  %v5231_v20 = vrot.slane %v5230_v34, 4 }
0x1381   :  { %v5227_v18 = vpop.f32.mrf.mxu1  ;;  %v5232_v21 = vadd.f32 %v5231_v20, %v5230_v34 }
0x1383   :  { %v11231_v26 = vpop.f32.mrf.mxu1  ;;  %v5233_v49 = vrot.slane %v5232_v21, 2 }
0x1385   :  { %v5234_v33 = vadd.f32 %v5233_v49, %v5232_v21 }
0x1387   :  { %v5235_v9 = vrot.slane %v5234_v33, 1 }
0x1389   :  { %v5236_v54 = vadd.f32 %v5235_v9, %v5234_v33 }
0x138b   :  { %v5237_v22 = vmul.f32 0.5, %v5236_v54 }
0x138d   :  { %v5238_v2 = vsub.f32 %v5224_v4, %v5237_v22 }
0x138f   :  { %v5239_v10 = vmul.f32 %v5238_v2, %v5238_v2 }
0x1391   :  { %v5240_v23 = vsel %vm4942_vm7, %v5239_v10, 0.0 }
0x1392   :  { %v5241_v29 = vrot.slane %v5240_v23, 4 }
0x1394   :  { %v5242_v31 = vadd.f32 %v5241_v29, %v5240_v23 }
0x1396   :  { %v5243_v44 = vrot.slane %v5242_v31, 2 }
0x1398   :  { %v5244_v19 = vadd.f32 %v5243_v44, %v5242_v31  ;;  %v9727_v44 = vld [vmem:[%s14674_s1 + $0x1] sm:$0x1] }
0x139a   :  { %v5245_v0 = vrot.slane %v5244_v19, 1 }
0x139c   :  { %v5246_v57 = vadd.f32 %v5245_v0, %v5244_v19  ;;  %v11945_v19 = vld [vmem:[%s14675_s9 + $0x30] sm:$0xff]   ;;  %v11948_v0 = vld [vmem:[%s14675_s9 + $0x8] sm:$0xff]  }
0x139e   :  { %v5247_v32 = vmul.f32 0.5, %v5246_v57 }
0x13a0   :  { %v5248_v53 = vadd.f32 1e-05, %v5247_v32 }
0x13a2   :  { %12089 = vrsqrt.f32 %v5248_v53 }
0x13af   :  { %v12090_v62 = vpop.eup %12089 }
0x13b0   :  { %v5250_v30 = vmul.f32 %v12090_v62, %v5238_v2  ;;  %v9747_v62 = vld [vmem:[%s14674_s1 + $0x2] sm:$0x1] }
0x13b1   :  { %v5053_v61 = vpop.f32.mrf.mxu0 }
0x13b2   :  { %v5059_v58 = vsel %vm4942_vm7, %v5053_v61, 0.0  ;;  %v5258_v5 = vmul.f32 %v9722_v25, %v5250_v30  ;;  %v9762_v30 = vld [vmem:[%s14674_s1 + $0x3] sm:$0x1]  ;;  %v11953_v25 = vld [vmem:[%s14675_s9 + $0x48] sm:$0xff]  }
0x13b3   :  { %v5060_v50 = vrot.slane %v5059_v58, 4  ;;  %v11217_v7 = vpop.f32.mrf.mxu0 }
0x13b4   :  { %v5266_v40 = vadd.f32 %v9723_v24, %v5258_v5  ;;  %v11956_v5 = vld [vmem:[%s14675_s9 + $0x70] sm:$0xff]   ;;  %v11958_v24 = vld [vmem:[%s14675_s9 + $0x60] sm:$0xff]  }
0x13b5   :  { %v5061_v35 = vadd.f32 %v5060_v50, %v5059_v58  ;;  %v5056_v45 = vpop.f32.mrf.mxu0  ;;  %v9725_v50 = vld [vmem:[%s14673_s14] ss:$0 sm:$0xff] }
0x13b7   :  { %v5062_v37 = vrot.slane %v5061_v35, 2  ;;  %v11218_v39 = vpop.f32.mrf.mxu0 }
0x13b8   :  { %v5307_v39 = vld [vmem:[%s14674_s1] sm:$0x1] }
0x13b9   :  { %v5063_v11 = vadd.f32 %v5062_v37, %v5061_v35 }
0x13bb   :  { %v5064_v36 = vrot.slane %v5063_v11, 1 }
0x13bd   :  { %v5065_v15 = vadd.f32 %v5064_v36, %v5063_v11  ;;  %v11943_v11 = vld [vmem:[%s14675_s9 + $0x38] sm:$0xff]  }
0x13be   :  { %v11944_v36 = vld [vmem:[%s14675_s9 + $0x18] sm:$0xff]  }
0x13bf   :  { %v5066_v27 = vmul.f32 0.5, %v5065_v15  ;;  %v11946_v15 = vld [vmem:[%s14675_s9 + $0x10] sm:$0xff]  }
0x13c1   :  { %v5067_v43 = vsub.f32 %v5053_v61, %v5066_v27  ;;  %v9724_v61 = vld [vmem:[%s14672_s16] ss:$0 sm:$0xff]  ;;  %v11947_v27 = vld [vmem:[%s14675_s9 + $0x28] sm:$0xff]  }
0x13c3   :  { %v5068_v48 = vmul.f32 %v5067_v43, %v5067_v43 }
0x13c5   :  { %v5069_v1 = vsel %vm4942_vm7, %v5068_v48, 0.0  ;;  %v11950_v48 = vld [vmem:[%s14675_s9] sm:$0xff]  }
0x13c6   :  { %v5070_v51 = vrot.slane %v5069_v1, 4 }
0x13c8   :  { %v5071_v60 = vadd.f32 %v5070_v51, %v5069_v1 }
0x13ca   :  { %v5072_v63 = vrot.slane %v5071_v60, 2 }
0x13cc   :  { %v5073_v42 = vadd.f32 %v5072_v63, %v5071_v60  ;;  %v11951_v60 = vld [vmem:[%s14675_s9 + $0x58] sm:$0xff]  }
0x13ce   :  { %v5074_v28 = vrot.slane %v5073_v42, 1 }
0x13d0   :  { %v5075_v55 = vadd.f32 %v5074_v28, %v5073_v42 }
0x13d2   :  { %v5076_v12 = vmul.f32 0.5, %v5075_v55  ;;  %v11952_v55 = vld [vmem:[%s14675_s9 + $0x50] sm:$0xff]  }
0x13d4   :  { %v5077_v41 = vadd.f32 1e-05, %v5076_v12 }
0x13d6   :  { %12091 = vrsqrt.f32 %v5077_v41 }
0x13e3   :  { %v12092_v17 = vpop.eup %12091 }
0x13e4   :  { %v5079_v16 = vmul.f32 %v12092_v17, %v5067_v43  ;;  %v11949_v43 = vld [vmem:[%s14675_s9 + $0x20] sm:$0xff]   ;;  %v11954_v17 = vld [vmem:[%s14675_s9 + $0x78] sm:$0xff]  }
0x13e6   :  { %v5087_v6 = vmul.f32 %v9716_v59, %v5079_v16  ;;  %v11955_v59 = vld [vmem:[%s14675_s9 + $0x40] sm:$0xff]   ;;  %v11957_v16 = vld [vmem:[%s14675_s9 + $0x68] sm:$0xff]  }
0x13e8   :  { %v5095_v56 = vadd.f32 %v9717_v3, %v5087_v6 }
0x13ea   :  { %v14001_v52 = vadd.f32 %v5266_v40, %v5095_v56 }
0x13ec   :  { %v5268_v46 = vsel %vm4942_vm7, %v14001_v52, 0.0 }
0x13ed   :  { %v5269_v47 = vrot.slane %v5268_v46, 4 }
0x13ef   :  { %v5270_v14 = vadd.f32 %v5269_v47, %v5268_v46 }
0x13f1   :  { %v5271_v38 = vrot.slane %v5270_v14, 2 }
0x13f3   :  { %v5272_v4 = vadd.f32 %v5271_v38, %v5270_v14 }
0x13f5   :  { %v5273_v13 = vrot.slane %v5272_v4, 1 }
0x13f7   :  { %v5274_v18 = vadd.f32 %v5273_v13, %v5272_v4 }
0x13f9   :  { %v5275_v26 = vmul.f32 0.5, %v5274_v18 }
0x13fb   :  { %v5276_v34 = vsub.f32 %v14001_v52, %v5275_v26 }
0x13fd   :  { %v5277_v20 = vmul.f32 %v5276_v34, %v5276_v34 }
0x13ff   :  { %v5278_v21 = vsel %vm4942_vm7, %v5277_v20, 0.0 }
0x1400   :  { %v5279_v49 = vrot.slane %v5278_v21, 4 }
0x1402   :  { %v5280_v33 = vadd.f32 %v5279_v49, %v5278_v21  ;;  %v9777_v49 = vld [vmem:[%s14674_s1 + $0x4] sm:$0x1] }
0x1404   :  { %v5281_v9 = vrot.slane %v5280_v33, 2 }
0x1406   :  { %v5282_v54 = vadd.f32 %v5281_v9, %v5280_v33  ;;  %v11959_v9 = vld [vmem:[%s14675_s9 + $0x98] sm:$0xff]  }
0x1408   :  { %v5283_v22 = vrot.slane %v5282_v54, 1 }
0x140a   :  { %v5284_v2 = vadd.f32 %v5283_v22, %v5282_v54 }
0x140c   :  { %v5285_v10 = vmul.f32 0.5, %v5284_v2  ;;  %v11960_v2 = vld [vmem:[%s14675_s9 + $0x90] sm:$0xff]  }
0x140e   :  { %v5286_v23 = vadd.f32 1e-05, %v5285_v10 }
0x1410   :  { %12093 = vrsqrt.f32 %v5286_v23  ;;  %v9792_v23 = vld [vmem:[%s14674_s1 + $0x5] sm:$0x1] }
0x141d   :  { %v12094_v29 = vpop.eup %12093 }
0x141e   :  { %v5288_v58 = vmul.f32 %v12094_v29, %v5276_v34  ;;  %v11961_v29 = vld [vmem:[%s14675_s9 + $0x88] sm:$0xff]  }
0x1420   :  { %v5296_v7 = vmul.f32 %v9724_v61, %v5288_v58  ;;  %v11962_v61 = vld [vmem:[%s14675_s9 + $0xb8] sm:$0xff]   ;;  %v11963_v58 = vld [vmem:[%s14675_s9 + $0x80] sm:$0xff]  }
0x1422   :  { %v5304_v31 = vadd.f32 %v9725_v50, %v5296_v7  ;;  %v11964_v50 = vld [vmem:[%s14675_s9 + $0xb0] sm:$0xff]   ;;  %v11965_v7 = vld [vmem:[%s14675_s9 + $0xa8] sm:$0xff]  }
0x1424   :  { %v5305_v35 = vmax.f32 %v5304_v31, 0.0  ;;  %v11966_v31 = vld [vmem:[%s14675_s9 + $0xa0] sm:$0xff]  }
0x1426   :  { %v5306_v45 = vpack.c.bf16 %v5305_v35, %v5305_v35 }
0x1428   :  { %v14010_v37 = vsel %vm614_vm0, %v5306_v45, 0 }
0x1429   :  { %11233 = vmatpush3.bf16.msra.mxu0 %v14010_v37  ;;  %11239 = vmatpush3.bf16.msra.mxu1 %v14010_v37 }
0x142a   :  { %11244 = vmatprep.subr.bf16.mxu0 %v12568_v8  ;;  %11256 = vmatprep.subr.bf16.mxu1 %v12568_v8 }
0x142c   :  { %11235 = vmatmul.mubr.msk.bf16.vlgmr.msra.gmra.mxu0 %vm5308_vm9, %v5307_v39  ;;  %11241 = vmatmul.mubr.msk.bf16.vlgmr.msra.gmra.mxu1 %vm5308_vm9, %v9727_v44 }
0x142d   :  { %11245 = vmatpush3.bf16.msra.mxu0 %v11943_v11  ;;  %11257 = vmatpush3.bf16.msra.mxu1 %v11944_v36 }
0x142e   :  { %11246 = vmatprep.subr.bf16.mxu0 %v12568_v8  ;;  %11258 = vmatprep.subr.bf16.mxu1 %v12568_v8 }
0x142f   :  { %11252 = vmatprep.mubr.msk.bf16.mxu0 %vm12569_vm5, %v12568_v8  ;;  %11264 = vmatprep.mubr.msk.bf16.mxu1 %vm12569_vm5, %v12568_v8 }
0x1431   :  { %11247 = vmatpush3.bf16.msra.mxu0 %v11945_v19  ;;  %11259 = vmatpush3.bf16.msra.mxu1 %v11946_v15 }
0x1432   :  { %11248 = vmatprep.subr.bf16.mxu0 %v12568_v8  ;;  %11260 = vmatprep.subr.bf16.mxu1 %v12568_v8 }
0x1435   :  { %11249 = vmatpush3.bf16.msra.mxu0 %v11947_v27  ;;  %11261 = vmatpush3.bf16.msra.mxu1 %v11948_v0 }
0x1436   :  { %11250 = vmatprep.subr.bf16.mxu0 %v12568_v8  ;;  %11262 = vmatprep.subr.bf16.mxu1 %v12568_v8 }
0x1439   :  { %11251 = vmatpush3.bf16.msra.mxu0 %v11949_v43  ;;  %11263 = vmatpush3.bf16.msra.mxu1 %v11950_v48 }
0x143a   :  { %11268 = vmatprep.subr.bf16.mxu0 %v12568_v8  ;;  %11274 = vmatprep.subr.bf16.mxu1 %v12568_v8 }
0x14ec   :  { %v5349_v57 = vpop.f32.mrf.mxu0  ;;  %v5403_v1 = vpop.f32.mrf.mxu1 }
0x14ed   :  { %v5355_v51 = vpack.c.bf16 %v5349_v57, %v5349_v57  ;;  %v5409_v32 = vpack.c.bf16 %v5403_v1, %v5403_v1 }
0x14ee   :  { %v11242_v63 = vpop.f32.mrf.mxu1  ;;  %v11236_v53 = vpop.f32.mrf.mxu0 }
0x14ef   :  { %11253 = vmatmul.mubr.msk.bf16.vlgmr.msra.gmra.mxu0 %vm5015_vm8, %v5409_v32  ;;  %11265 = vmatmul.mubr.msk.bf16.vlgmr.msra.gmra.mxu1 %vm5015_vm8, %v5355_v51  ;;  %v11967_v53 = vld [vmem:[%s14675_s9 + $0xd8] sm:$0xff]  }
0x14f0   :  { %11269 = vmatpush3.bf16.msra.mxu0 %v14010_v37  ;;  %v5406_v42 = vpop.f32.mrf.mxu1  ;;  %11270 = vmatprep.mubr.msk.bf16.mxu0 %vm12569_vm5, %v12568_v8  ;;  %v5352_v28 = vpop.f32.mrf.mxu0 }
0x14f1   :  { %11286 = vmatprep.subr.bf16.mxu0 %v12568_v8  ;;  %11275 = vmatpush3.bf16.msra.mxu1 %v11951_v60  ;;  %v9807_v60 = vld [vmem:[%s14674_s1 + $0x6] sm:$0x1] }
0x14f2   :  { %v11243_v12 = vpop.f32.mrf.mxu1  ;;  %v11237_v41 = vpop.f32.mrf.mxu0  ;;  %11276 = vmatprep.subr.bf16.mxu1 %v12568_v8  ;;  %11282 = vmatprep.mubr.msk.bf16.mxu1 %vm12569_vm5, %v12568_v8 }
0x14f3   :  { %v9822_v41 = vld [vmem:[%s14674_s1 + $0x7] sm:$0x1] }
0x14f5   :  { %11277 = vmatpush3.bf16.msra.mxu1 %v11952_v55  ;;  %v11968_v55 = vld [vmem:[%s14675_s9 + $0xd0] sm:$0xff]  }
0x14f6   :  { %11278 = vmatprep.subr.bf16.mxu1 %v12568_v8 }
0x14f7   :  { %11271 = vmatmul.mubr.msk.bf16.vlgmr.msra.gmra.mxu0 %vm5308_vm9, %v9747_v62  ;;  %v11969_v62 = vld [vmem:[%s14675_s9 + $0xc8] sm:$0xff]  }
0x14f8   :  { %11287 = vmatpush3.bf16.msra.mxu0 %v14010_v37  ;;  %11288 = vmatprep.mubr.msk.bf16.mxu0 %vm12569_vm5, %v12568_v8 }
0x14f9   :  { %11292 = vmatprep.subr.bf16.mxu0 %v12568_v8  ;;  %11279 = vmatpush3.bf16.msra.mxu1 %v11953_v25  ;;  %v11971_v25 = vld [vmem:[%s14675_s9 + $0xc0] sm:$0xff]  }
0x14fa   :  { %11280 = vmatprep.subr.bf16.mxu1 %v12568_v8 }
0x14fd   :  { %11281 = vmatpush3.bf16.msra.mxu1 %v11955_v59  ;;  %v11973_v59 = vld [vmem:[%s14675_s9 + $0xe8] sm:$0xff]  }
0x14fe   :  { %11304 = vmatprep.subr.bf16.mxu1 %v12568_v8 }
0x14ff   :  { %11289 = vmatmul.mubr.msk.bf16.vlgmr.msra.gmra.mxu0 %vm5308_vm9, %v9762_v30  ;;  %v11970_v30 = vld [vmem:[%s14675_s9 + $0xf8] sm:$0xff]  }
0x1500   :  { %11300 = vmatprep.mubr.msk.bf16.mxu0 %vm12569_vm5, %v12568_v8  ;;  %11293 = vmatpush3.bf16.msra.mxu0 %v11954_v17  ;;  %v11972_v17 = vld [vmem:[%s14675_s9 + $0xf0] sm:$0xff]  }
0x1501   :  { %11294 = vmatprep.subr.bf16.mxu0 %v12568_v8 }
0x1504   :  { %11295 = vmatpush3.bf16.msra.mxu0 %v11956_v5  ;;  %v11974_v5 = vld [vmem:[%s14675_s9 + $0xe0] sm:$0xff]  }
0x1505   :  { %11296 = vmatprep.subr.bf16.mxu0 %v12568_v8 }
0x1508   :  { %11297 = vmatpush3.bf16.msra.mxu0 %v11957_v16 }
0x1509   :  { %11298 = vmatprep.subr.bf16.mxu0 %v12568_v8 }
0x150c   :  { %11299 = vmatpush3.bf16.msra.mxu0 %v11958_v24 }
0x150d   :  { %11322 = vmatprep.subr.bf16.mxu0 %v12568_v8 }
0x15af   :  { %v5480_v3 = vpop.f32.mrf.mxu0  ;;  %v5547_v6 = vpop.f32.mrf.mxu1 }
0x15b0   :  { %v5548_v40 = vadd.f32 %v5547_v6, %v5480_v3 }
0x15b1   :  { %v11254_v56 = vpop.f32.mrf.mxu0  ;;  %v11266_v46 = vpop.f32.mrf.mxu1 }
0x15b3   :  { %v5483_v47 = vpop.f32.mrf.mxu0  ;;  %v5550_v14 = vpop.f32.mrf.mxu1 }
0x15b5   :  { %v11255_v38 = vpop.f32.mrf.mxu0  ;;  %v11267_v4 = vpop.f32.mrf.mxu1 }
0x15b7   :  { %v5592_v13 = vpop.f32.mrf.mxu0 }
0x15b8   :  { %v5598_v18 = vpack.c.bf16 %v5592_v13, %v5592_v13 }
0x15b9   :  { %v11272_v26 = vpop.f32.mrf.mxu0 }
0x15ba   :  { %11283 = vmatmul.mubr.msk.bf16.vlgmr.msra.gmra.mxu1 %vm5015_vm8, %v5598_v18 }
0x15bb   :  { %11305 = vmatpush3.bf16.msra.mxu1 %v14010_v37  ;;  %v5595_v34 = vpop.f32.mrf.mxu0  ;;  %11306 = vmatprep.mubr.msk.bf16.mxu1 %vm12569_vm5, %v12568_v8 }
0x15bc   :  { %11310 = vmatprep.subr.bf16.mxu1 %v12568_v8 }
0x15bd   :  { %v11273_v20 = vpop.f32.mrf.mxu0 }
0x15bf   :  { %v5715_v21 = vpop.f32.mrf.mxu0 }
0x15c0   :  { %v5721_v33 = vpack.c.bf16 %v5715_v21, %v5715_v21  ;;  %v9837_v21 = vld [vmem:[%s14674_s1 + $0x8] sm:$0x1] }
0x15c1   :  { %v11290_v54 = vpop.f32.mrf.mxu0 }
0x15c2   :  { %11301 = vmatmul.mubr.msk.bf16.vlgmr.msra.gmra.mxu0 %vm5015_vm8, %v5721_v33  ;;  %11307 = vmatmul.mubr.msk.bf16.vlgmr.msra.gmra.mxu1 %vm5308_vm9, %v9777_v49  ;;  %v11975_v49 = vld [vmem:[%s14675_s9 + $0x118] sm:$0xff]  }
0x15c3   :  { %11323 = vmatpush3.bf16.msra.mxu0 %v14010_v37  ;;  %11324 = vmatprep.mubr.msk.bf16.mxu0 %vm12569_vm5, %v12568_v8  ;;  %v5718_v22 = vpop.f32.mrf.mxu0 }
0x15c4   :  { %11311 = vmatpush3.bf16.msra.mxu1 %v11959_v9  ;;  %11328 = vmatprep.subr.bf16.mxu0 %v12568_v8  ;;  %v11976_v22 = vld [vmem:[%s14675_s9 + $0x110] sm:$0xff]  }
0x15c5   :  { %11312 = vmatprep.subr.bf16.mxu1 %v12568_v8  ;;  %v11291_v10 = vpop.f32.mrf.mxu0  ;;  %11318 = vmatprep.mubr.msk.bf16.mxu1 %vm12569_vm5, %v12568_v8 }
0x15c6   :  { %v11978_v10 = vld [vmem:[%s14675_s9 + $0x100] sm:$0xff]  }
0x15c8   :  { %11313 = vmatpush3.bf16.msra.mxu1 %v11960_v2  ;;  %v11977_v2 = vld [vmem:[%s14675_s9 + $0x108] sm:$0xff]  }
0x15c9   :  { %11314 = vmatprep.subr.bf16.mxu1 %v12568_v8 }
0x15ca   :  { %11325 = vmatmul.mubr.msk.bf16.vlgmr.msra.gmra.mxu0 %vm5308_vm9, %v9792_v23 }
0x15cb   :  { %11336 = vmatprep.mubr.msk.bf16.mxu0 %vm12569_vm5, %v12568_v8  ;;  %11329 = vmatpush3.bf16.msra.mxu0 %v11962_v61 }
0x15cc   :  { %11315 = vmatpush3.bf16.msra.mxu1 %v11961_v29  ;;  %11330 = vmatprep.subr.bf16.mxu0 %v12568_v8 }
0x15cd   :  { %11316 = vmatprep.subr.bf16.mxu1 %v12568_v8 }
0x15cf   :  { %11331 = vmatpush3.bf16.msra.mxu0 %v11964_v50 }
0x15d0   :  { %11317 = vmatpush3.bf16.msra.mxu1 %v11963_v58  ;;  %11332 = vmatprep.subr.bf16.mxu0 %v12568_v8 }
0x15d1   :  { %11340 = vmatprep.subr.bf16.mxu1 %v12568_v8 }
0x15d3   :  { %11333 = vmatpush3.bf16.msra.mxu0 %v11965_v7 }
0x15d4   :  { %11334 = vmatprep.subr.bf16.mxu0 %v12568_v8 }
0x15d7   :  { %11335 = vmatpush3.bf16.msra.mxu0 %v11966_v31 }
0x15d8   :  { %11358 = vmatprep.subr.bf16.mxu0 %v12568_v8 }
0x167a   :  { %v5669_v35 = vpop.f32.mrf.mxu1 }
0x167b   :  { %v5675_v45 = vadd.f32 %v5669_v35, %v5548_v40 }
0x167c   :  { %v11284_v39 = vpop.f32.mrf.mxu1 }
0x167e   :  { %v5672_v44 = vpop.f32.mrf.mxu1 }
0x1680   :  { %v11285_v11 = vpop.f32.mrf.mxu1 }
0x1682   :  { %v5792_v36 = vpop.f32.mrf.mxu0  ;;  %v5838_v19 = vpop.f32.mrf.mxu1 }
0x1683   :  { %v5798_v15 = vadd.f32 %v5792_v36, %v5675_v45  ;;  %v5844_v27 = vpack.c.bf16 %v5838_v19, %v5838_v19 }
0x1684   :  { %v11302_v0 = vpop.f32.mrf.mxu0  ;;  %v11308_v43 = vpop.f32.mrf.mxu1 }
0x1685   :  { %11319 = vmatmul.mubr.msk.bf16.vlgmr.msra.gmra.mxu1 %vm5015_vm8, %v5844_v27  ;;  %v11979_v27 = vld [vmem:[%s14676_s8 + $0x18] sm:$0xff]   ;;  %v11980_v0 = vld [vmem:[%s14676_s8 + $0x10] sm:$0xff]   ;;  %v11981_v43 = vld [vmem:[%s14676_s8 + $0x8] sm:$0xff]  }
0x1686   :  { %11341 = vmatpush3.bf16.msra.mxu1 %v14010_v37  ;;  %v5795_v48 = vpop.f32.mrf.mxu0  ;;  %v5841_v57 = vpop.f32.mrf.mxu1  ;;  %11342 = vmatprep.mubr.msk.bf16.mxu1 %vm12569_vm5, %v12568_v8 }
0x1687   :  { %11346 = vmatprep.subr.bf16.mxu1 %v12568_v8  ;;  %v11982_v48 = vld [vmem:[%s14676_s8] sm:$0xff]  }
0x1688   :  { %v11303_v1 = vpop.f32.mrf.mxu0  ;;  %v11309_v51 = vpop.f32.mrf.mxu1 }
0x168a   :  { %v5961_v32 = vpop.f32.mrf.mxu0 }
0x168b   :  { %v5967_v63 = vpack.c.bf16 %v5961_v32, %v5961_v32 }
0x168c   :  { %v11326_v42 = vpop.f32.mrf.mxu0 }
0x168d   :  { %11337 = vmatmul.mubr.msk.bf16.vlgmr.msra.gmra.mxu0 %vm5015_vm8, %v5967_v63  ;;  %11343 = vmatmul.mubr.msk.bf16.vlgmr.msra.gmra.mxu1 %vm5308_vm9, %v9807_v60 }
0x168e   :  { %11359 = vmatpush3.bf16.msra.mxu0 %v14010_v37  ;;  %11360 = vmatprep.mubr.msk.bf16.mxu0 %vm12569_vm5, %v12568_v8  ;;  %v5964_v28 = vpop.f32.mrf.mxu0 }
0x168f   :  { %11347 = vmatpush3.bf16.msra.mxu1 %v11967_v53  ;;  %11364 = vmatprep.subr.bf16.mxu0 %v12568_v8 }
0x1690   :  { %11348 = vmatprep.subr.bf16.mxu1 %v12568_v8  ;;  %v11327_v12 = vpop.f32.mrf.mxu0  ;;  %11354 = vmatprep.mubr.msk.bf16.mxu1 %vm12569_vm5, %v12568_v8 }
0x1693   :  { %11349 = vmatpush3.bf16.msra.mxu1 %v11968_v55 }
0x1694   :  { %11350 = vmatprep.subr.bf16.mxu1 %v12568_v8 }
0x1695   :  { %11361 = vmatmul.mubr.msk.bf16.vlgmr.msra.gmra.mxu0 %vm5308_vm9, %v9822_v41 }
0x1696   :  { %11372 = vmatprep.mubr.msk.bf16.mxu0 %vm12569_vm5, %v12568_v8  ;;  %11365 = vmatpush3.bf16.msra.mxu0 %v11970_v30 }
0x1697   :  { %11351 = vmatpush3.bf16.msra.mxu1 %v11969_v62  ;;  %11366 = vmatprep.subr.bf16.mxu0 %v12568_v8 }
0x1698   :  { %11352 = vmatprep.subr.bf16.mxu1 %v12568_v8 }
0x169a   :  { %11367 = vmatpush3.bf16.msra.mxu0 %v11972_v17 }
0x169b   :  { %11353 = vmatpush3.bf16.msra.mxu1 %v11971_v25  ;;  %11368 = vmatprep.subr.bf16.mxu0 %v12568_v8 }
0x169c   :  { %11376 = vmatprep.subr.bf16.mxu1 %v12568_v8 }
0x169e   :  { %11369 = vmatpush3.bf16.msra.mxu0 %v11973_v59 }
0x169f   :  { %11370 = vmatprep.subr.bf16.mxu0 %v12568_v8 }
0x16a2   :  { %11371 = vmatpush3.bf16.msra.mxu0 %v11974_v5 }
0x16a3   :  { %11394 = vmatprep.subr.bf16.mxu0 %v12568_v8 }
0x1745   :  { %v5915_v16 = vpop.f32.mrf.mxu1 }
0x1746   :  { %v5921_v24 = vadd.f32 %v5915_v16, %v5798_v15 }
0x1747   :  { %v11320_v3 = vpop.f32.mrf.mxu1 }
0x1749   :  { %v5918_v6 = vpop.f32.mrf.mxu1 }
0x174b   :  { %v11321_v40 = vpop.f32.mrf.mxu1 }
0x174d   :  { %v6038_v56 = vpop.f32.mrf.mxu0  ;;  %v6084_v46 = vpop.f32.mrf.mxu1 }
0x174e   :  { %v6044_v47 = vadd.f32 %v6038_v56, %v5921_v24  ;;  %v6090_v14 = vpack.c.bf16 %v6084_v46, %v6084_v46 }
0x174f   :  { %v11338_v38 = vpop.f32.mrf.mxu0  ;;  %v11344_v4 = vpop.f32.mrf.mxu1 }
0x1750   :  { %11355 = vmatmul.mubr.msk.bf16.vlgmr.msra.gmra.mxu1 %vm5015_vm8, %v6090_v14  ;;  %v9853_v38 = vld [vmem:[%s14678_s10] ss:$0 sm:$0xff] }
0x1751   :  { %11377 = vmatpush3.bf16.msra.mxu1 %v14010_v37  ;;  %v6041_v13 = vpop.f32.mrf.mxu0  ;;  %v6087_v18 = vpop.f32.mrf.mxu1  ;;  %11378 = vmatprep.mubr.msk.bf16.mxu1 %vm12569_vm5, %v12568_v8 }
0x1752   :  { %11382 = vmatprep.subr.bf16.mxu1 %v12568_v8 }
0x1753   :  { %v11339_v26 = vpop.f32.mrf.mxu0  ;;  %v11345_v34 = vpop.f32.mrf.mxu1 }
0x1755   :  { %v6207_v20 = vpop.f32.mrf.mxu0 }
0x1756   :  { %v6213_v33 = vpack.c.bf16 %v6207_v20, %v6207_v20 }
0x1757   :  { %v11362_v9 = vpop.f32.mrf.mxu0 }
0x1758   :  { %11373 = vmatmul.mubr.msk.bf16.vlgmr.msra.gmra.mxu0 %vm5015_vm8, %v6213_v33  ;;  %11379 = vmatmul.mubr.msk.bf16.vlgmr.msra.gmra.mxu1 %vm5308_vm9, %v9837_v21 }
0x1759   :  { %11383 = vmatpush3.bf16.msra.mxu1 %v11975_v49  ;;  %v6210_v37 = vpop.f32.mrf.mxu0  ;;  %11390 = vmatprep.mubr.msk.bf16.mxu1 %vm12569_vm5, %v12568_v8 }
0x175a   :  { %11384 = vmatprep.subr.bf16.mxu1 %v12568_v8  ;;  %11402 = vmatprep.mubr.msk.bf16.mxu0 %vm12569_vm5, %v12568_v8 }
0x175b   :  { %v11363_v54 = vpop.f32.mrf.mxu0  ;;  %11395 = vmatpush3.bf16.msra.mxu0 %v11979_v27  ;;  %v9860_v27 = vld [vmem:[%s14679_s20] ss:$0 sm:$0xff] }
0x175c   :  { %11396 = vmatprep.subr.bf16.mxu0 %v12568_v8 }
0x175d   :  { %11385 = vmatpush3.bf16.msra.mxu1 %v11976_v22 }
0x175e   :  { %11386 = vmatprep.subr.bf16.mxu1 %v12568_v8 }
0x175f   :  { %11397 = vmatpush3.bf16.msra.mxu0 %v11980_v0 }
0x1760   :  { %11398 = vmatprep.subr.bf16.mxu0 %v12568_v8 }
0x1761   :  { %11387 = vmatpush3.bf16.msra.mxu1 %v11977_v2 }
0x1762   :  { %11388 = vmatprep.subr.bf16.mxu1 %v12568_v8 }
0x1763   :  { %11399 = vmatpush3.bf16.msra.mxu0 %v11981_v43 }
0x1764   :  { %11400 = vmatprep.subr.bf16.mxu0 %v12568_v8 }
0x1765   :  { %11389 = vmatpush3.bf16.msra.mxu1 %v11978_v10 }
0x1766   :  { %11406 = vmatprep.subr.bf16.mxu1 %v12568_v8 }
0x1767   :  { %11401 = vmatpush3.bf16.msra.mxu0 %v11982_v48 }
0x1768   :  { %11412 = vmatprep.subr.bf16.mxu0 %v12568_v8 }
0x1810   :  { %v6161_v23 = vpop.f32.mrf.mxu1 }
0x1811   :  { %v6167_v29 = vadd.f32 %v6161_v23, %v6044_v47  ;;  %v9852_v47 = vld [vmem:[%s14677_s29] ss:$0 sm:$0xff] }
0x1812   :  { %v11356_v61 = vpop.f32.mrf.mxu1 }
0x1814   :  { %v6164_v58 = vpop.f32.mrf.mxu1 }
0x1816   :  { %v11357_v50 = vpop.f32.mrf.mxu1 }
0x1818   :  { %v6284_v7 = vpop.f32.mrf.mxu0  ;;  %v6330_v31 = vpop.f32.mrf.mxu1 }
0x1819   :  { %v6290_v35 = vadd.f32 %v6284_v7, %v6167_v29  ;;  %v6336_v45 = vpack.c.bf16 %v6330_v31, %v6330_v31 }
0x181a   :  { %v11380_v39 = vpop.f32.mrf.mxu1  ;;  %v11374_v44 = vpop.f32.mrf.mxu0 }
0x181b   :  { %11391 = vmatmul.mubr.msk.bf16.vlgmr.msra.gmra.mxu1 %vm5015_vm8, %v6336_v45 }
0x181c   :  { %v6333_v11 = vpop.f32.mrf.mxu1  ;;  %v6287_v36 = vpop.f32.mrf.mxu0  ;;  %11408 = vmatprep.mubr.msk.bf16.mxu1 %vm12569_vm5, %v12568_v8 }
0x181e   :  { %v11381_v19 = vpop.f32.mrf.mxu1  ;;  %v11375_v15 = vpop.f32.mrf.mxu0 }
0x181f   :  { %v9859_v19 = vld [vmem:[#allocation3] ss:$0 sm:$0xff] }
0x18db   :  { %v6407_v57 = vpop.f32.mrf.mxu1 }
0x18dc   :  { %v6413_v1 = vadd.f32 %v6407_v57, %v6290_v35 }
0x18dd   :  { %v11392_v51 = vpop.f32.mrf.mxu1 }
0x18de   :  { %v6414_v32 = vsel %vm4942_vm7, %v6413_v1, 0.0 }
0x18df   :  { %v6415_v60 = vrot.slane %v6414_v32, 4  ;;  %v6410_v63 = vpop.f32.mrf.mxu1 }
0x18e1   :  { %v6416_v53 = vadd.f32 %v6415_v60, %v6414_v32  ;;  %v11393_v42 = vpop.f32.mrf.mxu1 }
0x18e3   :  { %v6417_v28 = vrot.slane %v6416_v53, 2 }
0x18e5   :  { %v6418_v55 = vadd.f32 %v6417_v28, %v6416_v53 }
0x18e7   :  { %v6419_v12 = vrot.slane %v6418_v55, 1 }
0x18e9   :  { %v6420_v41 = vadd.f32 %v6419_v12, %v6418_v55 }
0x18eb   :  { %v6421_v62 = vmul.f32 0.5, %v6420_v41 }
0x18ed   :  { %v6422_v30 = vsub.f32 %v6413_v1, %v6421_v62 }
0x18ef   :  { %v6423_v25 = vmul.f32 %v6422_v30, %v6422_v30 }
0x18f1   :  { %v6424_v17 = vsel %vm4942_vm7, %v6423_v25, 0.0 }
0x18f2   :  { %v6425_v59 = vrot.slane %v6424_v17, 4 }
0x18f4   :  { %v6426_v5 = vadd.f32 %v6425_v59, %v6424_v17 }
0x18f6   :  { %v6427_v16 = vrot.slane %v6426_v5, 2 }
0x18f8   :  { %v6428_v24 = vadd.f32 %v6427_v16, %v6426_v5 }
0x18fa   :  { %v6429_v3 = vrot.slane %v6428_v24, 1 }
0x18fc   :  { %v6430_v6 = vadd.f32 %v6429_v3, %v6428_v24  ;;  %v9861_v24 = vld [vmem:[#allocation7] ss:$0 sm:$0xff] }
0x18fe   :  { %v6431_v40 = vmul.f32 0.5, %v6430_v6  ;;  %v9862_v6 = vld [vmem:[#allocation5] ss:$0 sm:$0xff] }
0x1900   :  { %v6432_v56 = vadd.f32 1e-05, %v6431_v40 }
0x1902   :  { %12095 = vrsqrt.f32 %v6432_v56 }
0x190f   :  { %v12096_v46 = vpop.eup %12095 }
0x1910   :  { %v6434_v14 = vmul.f32 %v12096_v46, %v6422_v30 }
0x1912   :  { %v6442_v4 = vmul.f32 %v9852_v47, %v6434_v14 }
0x1914   :  { %v6450_v13 = vadd.f32 %v9853_v38, %v6442_v4  ;;  %v6605_v38 = vld [vmem:[%s14680_s24] sm:$0x1]  ;;  %v9864_v4 = vld [vmem:[%s14680_s24 + $0x1] sm:$0x1] }
0x1916   :  { %v6451_v18 = vmax.f32 %v6450_v13, 0.0  ;;  %v11983_v13 = vld [vmem:[%s14681_s22 + $0x38] sm:$0xff]  }
0x1918   :  { %v6460_v26 = vpack.c.bf16 %v6451_v18, %v6451_v18  ;;  %v11984_v18 = vld [vmem:[%s14681_s22 + $0x18] sm:$0xff]  }
0x191a   :  { %11403 = vmatmul.mubr.msk.bf16.vlgmr.msra.gmra.mxu0 %vm5015_vm8, %v6460_v26  ;;  %v11985_v26 = vld [vmem:[%s14681_s22 + $0x30] sm:$0xff]  }
0x191b   :  { %11414 = vmatprep.mubr.msk.bf16.mxu0 %vm12569_vm5, %v12568_v8 }
0x19da   :  { %v6522_v34 = vpop.f32.mrf.mxu0 }
0x19db   :  { %v6528_v20 = vsel %vm4942_vm7, %v6522_v34, 0.0 }
0x19dc   :  { %v6529_v21 = vrot.slane %v6528_v20, 4  ;;  %v11404_v49 = vpop.f32.mrf.mxu0 }
0x19dd   :  { %v11989_v49 = vld [vmem:[%s14681_s22 + $0x20] sm:$0xff]  }
0x19de   :  { %v6530_v33 = vadd.f32 %v6529_v21, %v6528_v20  ;;  %v6525_v9 = vpop.f32.mrf.mxu0  ;;  %v11987_v20 = vld [vmem:[%s14681_s22 + $0x28] sm:$0xff]  }
0x19df   :  { %v11988_v21 = vld [vmem:[%s14681_s22 + $0x8] sm:$0xff]  }
0x19e0   :  { %v6531_v37 = vrot.slane %v6530_v33, 2  ;;  %v11405_v54 = vpop.f32.mrf.mxu0 }
0x19e2   :  { %v6532_v22 = vadd.f32 %v6531_v37, %v6530_v33  ;;  %v11990_v33 = vld [vmem:[%s14681_s22] sm:$0xff]  }
0x19e4   :  { %v6533_v2 = vrot.slane %v6532_v22, 1 }
0x19e6   :  { %v6534_v10 = vadd.f32 %v6533_v2, %v6532_v22  ;;  %v11991_v2 = vld [vmem:[%s14681_s22 + $0x58] sm:$0xff]  }
0x19e8   :  { %v6535_v23 = vmul.f32 0.5, %v6534_v10 }
0x19ea   :  { %v6536_v29 = vsub.f32 %v6522_v34, %v6535_v23  ;;  %v11986_v34 = vld [vmem:[%s14681_s22 + $0x10] sm:$0xff]  }
0x19ec   :  { %v6537_v61 = vmul.f32 %v6536_v29, %v6536_v29 }
0x19ee   :  { %v6538_v58 = vsel %vm4942_vm7, %v6537_v61, 0.0 }
0x19ef   :  { %v6539_v50 = vrot.slane %v6538_v58, 4 }
0x19f1   :  { %v6540_v7 = vadd.f32 %v6539_v50, %v6538_v58  ;;  %v11992_v58 = vld [vmem:[%s14681_s22 + $0x50] sm:$0xff]  }
0x19f3   :  { %v6541_v31 = vrot.slane %v6540_v7, 2 }
0x19f5   :  { %v6542_v35 = vadd.f32 %v6541_v31, %v6540_v7  ;;  %v9884_v31 = vld [vmem:[%s14680_s24 + $0x2] sm:$0x1] }
0x19f7   :  { %v6543_v45 = vrot.slane %v6542_v35, 1 }
0x19f9   :  { %v6544_v39 = vadd.f32 %v6543_v45, %v6542_v35  ;;  %v9899_v35 = vld [vmem:[%s14680_s24 + $0x3] sm:$0x1]  ;;  %v11993_v45 = vld [vmem:[%s14681_s22 + $0x48] sm:$0xff]  }
0x19fb   :  { %v6545_v44 = vmul.f32 0.5, %v6544_v39  ;;  %v11994_v39 = vld [vmem:[%s14681_s22 + $0x78] sm:$0xff]  }
0x19fd   :  { %v6546_v11 = vadd.f32 1e-05, %v6545_v44  ;;  %v11995_v44 = vld [vmem:[%s14681_s22 + $0x40] sm:$0xff]  }
0x19ff   :  { %12097 = vrsqrt.f32 %v6546_v11  ;;  %v11996_v11 = vld [vmem:[%s14681_s22 + $0x70] sm:$0xff]  }
0x1a0c   :  { %v12098_v36 = vpop.eup %12097 }
0x1a0d   :  { %v6548_v15 = vmul.f32 %v12098_v36, %v6536_v29  ;;  %v11997_v36 = vld [vmem:[%s14681_s22 + $0x68] sm:$0xff]  }
0x1a0f   :  { %v6556_v0 = vmul.f32 %v9859_v19, %v6548_v15  ;;  %v11998_v19 = vld [vmem:[%s14681_s22 + $0x60] sm:$0xff]  }
0x1a11   :  { %v6564_v43 = vadd.f32 %v9860_v27, %v6556_v0 }
0x1a13   :  { %v14184_v48 = vadd.f32 %v6564_v43, %v14001_v52 }
0x1a15   :  { %v6566_v57 = vsel %vm4942_vm7, %v14184_v48, 0.0 }
0x1a16   :  { %v6567_v1 = vrot.slane %v6566_v57, 4 }
0x1a18   :  { %v6568_v51 = vadd.f32 %v6567_v1, %v6566_v57 }
0x1a1a   :  { %v6569_v32 = vrot.slane %v6568_v51, 2 }
0x1a1c   :  { %v6570_v60 = vadd.f32 %v6569_v32, %v6568_v51 }
0x1a1e   :  { %v6571_v63 = vrot.slane %v6570_v60, 1 }
0x1a20   :  { %v6572_v53 = vadd.f32 %v6571_v63, %v6570_v60 }
0x1a22   :  { %v6573_v42 = vmul.f32 0.5, %v6572_v53 }
0x1a24   :  { %v6574_v28 = vsub.f32 %v14184_v48, %v6573_v42 }
0x1a26   :  { %v6575_v55 = vmul.f32 %v6574_v28, %v6574_v28 }
0x1a28   :  { %v6576_v12 = vsel %vm4942_vm7, %v6575_v55, 0.0 }
0x1a29   :  { %v6577_v41 = vrot.slane %v6576_v12, 4 }
0x1a2b   :  { %v6578_v62 = vadd.f32 %v6577_v41, %v6576_v12  ;;  %v9914_v41 = vld [vmem:[%s14680_s24 + $0x4] sm:$0x1] }
0x1a2d   :  { %v6579_v30 = vrot.slane %v6578_v62, 2 }
0x1a2f   :  { %v6580_v52 = vadd.f32 %v6579_v30, %v6578_v62  ;;  %v11999_v30 = vld [vmem:[%s14681_s22 + $0x98] sm:$0xff]  }
0x1a31   :  { %v6581_v25 = vrot.slane %v6580_v52, 1 }
0x1a33   :  { %v6582_v17 = vadd.f32 %v6581_v25, %v6580_v52 }
0x1a35   :  { %v6583_v59 = vmul.f32 0.5, %v6582_v17  ;;  %v12000_v17 = vld [vmem:[%s14681_s22 + $0x90] sm:$0xff]  }
0x1a37   :  { %v6584_v5 = vadd.f32 1e-05, %v6583_v59 }
0x1a39   :  { %12099 = vrsqrt.f32 %v6584_v5  ;;  %v9929_v5 = vld [vmem:[%s14680_s24 + $0x5] sm:$0x1] }
0x1a46   :  { %v12100_v16 = vpop.eup %12099 }
0x1a47   :  { %v6586_v3 = vmul.f32 %v12100_v16, %v6574_v28  ;;  %v12001_v16 = vld [vmem:[%s14681_s22 + $0x88] sm:$0xff]  }
0x1a49   :  { %v6594_v40 = vmul.f32 %v9861_v24, %v6586_v3  ;;  %v12002_v24 = vld [vmem:[%s14681_s22 + $0xb8] sm:$0xff]   ;;  %v12003_v3 = vld [vmem:[%s14681_s22 + $0x80] sm:$0xff]  }
0x1a4b   :  { %v6602_v56 = vadd.f32 %v9862_v6, %v6594_v40  ;;  %v12004_v6 = vld [vmem:[%s14681_s22 + $0xb0] sm:$0xff]   ;;  %v12005_v40 = vld [vmem:[%s14681_s22 + $0xa8] sm:$0xff]  }
0x1a4d   :  { %v6603_v46 = vmax.f32 %v6602_v56, 0.0  ;;  %v12006_v56 = vld [vmem:[%s14681_s22 + $0xa0] sm:$0xff]  }
0x1a4f   :  { %v6604_v47 = vpack.c.bf16 %v6603_v46, %v6603_v46 }
0x1a51   :  { %v14191_v14 = vsel %vm614_vm0, %v6604_v47, 0 }
0x1a52   :  { %11407 = vmatpush3.bf16.msra.mxu1 %v14191_v14  ;;  %11413 = vmatpush3.bf16.msra.mxu0 %v14191_v14 }
0x1a53   :  { %11418 = vmatprep.subr.bf16.mxu1 %v12568_v8  ;;  %11430 = vmatprep.subr.bf16.mxu0 %v12568_v8 }
0x1a55   :  { %11409 = vmatmul.mubr.msk.bf16.vlgmr.msra.gmra.mxu1 %vm5308_vm9, %v6605_v38  ;;  %11415 = vmatmul.mubr.msk.bf16.vlgmr.msra.gmra.mxu0 %vm5308_vm9, %v9864_v4 }
0x1a56   :  { %11419 = vmatpush3.bf16.msra.mxu1 %v11983_v13  ;;  %11431 = vmatpush3.bf16.msra.mxu0 %v11984_v18 }
0x1a57   :  { %11420 = vmatprep.subr.bf16.mxu1 %v12568_v8  ;;  %11432 = vmatprep.subr.bf16.mxu0 %v12568_v8 }
0x1a58   :  { %11426 = vmatprep.mubr.msk.bf16.mxu1 %vm12569_vm5, %v12568_v8  ;;  %11438 = vmatprep.mubr.msk.bf16.mxu0 %vm12569_vm5, %v12568_v8 }
0x1a5a   :  { %11421 = vmatpush3.bf16.msra.mxu1 %v11985_v26  ;;  %11433 = vmatpush3.bf16.msra.mxu0 %v11986_v34 }
0x1a5b   :  { %11422 = vmatprep.subr.bf16.mxu1 %v12568_v8  ;;  %11434 = vmatprep.subr.bf16.mxu0 %v12568_v8 }
0x1a5e   :  { %11423 = vmatpush3.bf16.msra.mxu1 %v11987_v20  ;;  %11435 = vmatpush3.bf16.msra.mxu0 %v11988_v21 }
0x1a5f   :  { %11424 = vmatprep.subr.bf16.mxu1 %v12568_v8  ;;  %11436 = vmatprep.subr.bf16.mxu0 %v12568_v8 }
0x1a62   :  { %11425 = vmatpush3.bf16.msra.mxu1 %v11989_v49  ;;  %11437 = vmatpush3.bf16.msra.mxu0 %v11990_v33 }
0x1a63   :  { %11442 = vmatprep.subr.bf16.mxu1 %v12568_v8  ;;  %11448 = vmatprep.subr.bf16.mxu0 %v12568_v8 }
0x1b15   :  { %v6646_v9 = vpop.f32.mrf.mxu1  ;;  %v6700_v37 = vpop.f32.mrf.mxu0 }
0x1b16   :  { %v6652_v54 = vpack.c.bf16 %v6646_v9, %v6646_v9  ;;  %v6706_v22 = vpack.c.bf16 %v6700_v37, %v6700_v37 }
0x1b17   :  { %v11416_v10 = vpop.f32.mrf.mxu0  ;;  %v11410_v23 = vpop.f32.mrf.mxu1 }
0x1b18   :  { %11427 = vmatmul.mubr.msk.bf16.vlgmr.msra.gmra.mxu1 %vm5015_vm8, %v6706_v22  ;;  %11439 = vmatmul.mubr.msk.bf16.vlgmr.msra.gmra.mxu0 %vm5015_vm8, %v6652_v54  ;;  %v12007_v23 = vld [vmem:[%s14681_s22 + $0xd8] sm:$0xff]  }
0x1b19   :  { %11443 = vmatpush3.bf16.msra.mxu1 %v14191_v14  ;;  %v6703_v29 = vpop.f32.mrf.mxu0  ;;  %11444 = vmatprep.mubr.msk.bf16.mxu1 %vm12569_vm5, %v12568_v8  ;;  %v6649_v61 = vpop.f32.mrf.mxu1 }
0x1b1a   :  { %11460 = vmatprep.subr.bf16.mxu1 %v12568_v8  ;;  %11449 = vmatpush3.bf16.msra.mxu0 %v11991_v2  ;;  %v9944_v2 = vld [vmem:[%s14680_s24 + $0x6] sm:$0x1] }
0x1b1b   :  { %v11417_v50 = vpop.f32.mrf.mxu0  ;;  %v11411_v7 = vpop.f32.mrf.mxu1  ;;  %11450 = vmatprep.subr.bf16.mxu0 %v12568_v8  ;;  %11456 = vmatprep.mubr.msk.bf16.mxu0 %vm12569_vm5, %v12568_v8 }
0x1b1c   :  { %v9959_v7 = vld [vmem:[%s14680_s24 + $0x7] sm:$0x1] }
0x1b1e   :  { %11451 = vmatpush3.bf16.msra.mxu0 %v11992_v58  ;;  %v12008_v58 = vld [vmem:[%s14681_s22 + $0xd0] sm:$0xff]  }
0x1b1f   :  { %11452 = vmatprep.subr.bf16.mxu0 %v12568_v8 }
0x1b20   :  { %11445 = vmatmul.mubr.msk.bf16.vlgmr.msra.gmra.mxu1 %vm5308_vm9, %v9884_v31  ;;  %v12009_v31 = vld [vmem:[%s14681_s22 + $0xc8] sm:$0xff]  }
0x1b21   :  { %11461 = vmatpush3.bf16.msra.mxu1 %v14191_v14  ;;  %11462 = vmatprep.mubr.msk.bf16.mxu1 %vm12569_vm5, %v12568_v8 }
0x1b22   :  { %11466 = vmatprep.subr.bf16.mxu1 %v12568_v8  ;;  %11453 = vmatpush3.bf16.msra.mxu0 %v11993_v45  ;;  %v12011_v45 = vld [vmem:[%s14681_s22 + $0xc0] sm:$0xff]  }
0x1b23   :  { %11454 = vmatprep.subr.bf16.mxu0 %v12568_v8 }
0x1b26   :  { %11455 = vmatpush3.bf16.msra.mxu0 %v11995_v44  ;;  %v12013_v44 = vld [vmem:[%s14681_s22 + $0xe8] sm:$0xff]  }
0x1b27   :  { %11478 = vmatprep.subr.bf16.mxu0 %v12568_v8 }
0x1b28   :  { %11463 = vmatmul.mubr.msk.bf16.vlgmr.msra.gmra.mxu1 %vm5308_vm9, %v9899_v35  ;;  %v12010_v35 = vld [vmem:[%s14681_s22 + $0xf8] sm:$0xff]  }
0x1b29   :  { %11474 = vmatprep.mubr.msk.bf16.mxu1 %vm12569_vm5, %v12568_v8  ;;  %11467 = vmatpush3.bf16.msra.mxu1 %v11994_v39  ;;  %v12012_v39 = vld [vmem:[%s14681_s22 + $0xf0] sm:$0xff]  }
0x1b2a   :  { %11468 = vmatprep.subr.bf16.mxu1 %v12568_v8 }
0x1b2d   :  { %11469 = vmatpush3.bf16.msra.mxu1 %v11996_v11  ;;  %v12014_v11 = vld [vmem:[%s14681_s22 + $0xe0] sm:$0xff]  }
0x1b2e   :  { %11470 = vmatprep.subr.bf16.mxu1 %v12568_v8 }
0x1b31   :  { %11471 = vmatpush3.bf16.msra.mxu1 %v11997_v36 }
0x1b32   :  { %11472 = vmatprep.subr.bf16.mxu1 %v12568_v8 }
0x1b35   :  { %11473 = vmatpush3.bf16.msra.mxu1 %v11998_v19 }
0x1b36   :  { %11496 = vmatprep.subr.bf16.mxu1 %v12568_v8 }
0x1bd8   :  { %v6777_v15 = vpop.f32.mrf.mxu1  ;;  %v6844_v27 = vpop.f32.mrf.mxu0 }
0x1bd9   :  { %v6845_v0 = vadd.f32 %v6844_v27, %v6777_v15 }
0x1bda   :  { %v11428_v43 = vpop.f32.mrf.mxu1  ;;  %v11440_v57 = vpop.f32.mrf.mxu0 }
0x1bdc   :  { %v6780_v1 = vpop.f32.mrf.mxu1  ;;  %v6847_v51 = vpop.f32.mrf.mxu0 }
0x1bde   :  { %v11429_v32 = vpop.f32.mrf.mxu1  ;;  %v11441_v60 = vpop.f32.mrf.mxu0 }
0x1be0   :  { %v6889_v63 = vpop.f32.mrf.mxu1 }
0x1be1   :  { %v6895_v53 = vpack.c.bf16 %v6889_v63, %v6889_v63 }
0x1be2   :  { %v11446_v42 = vpop.f32.mrf.mxu1 }
0x1be3   :  { %11457 = vmatmul.mubr.msk.bf16.vlgmr.msra.gmra.mxu0 %vm5015_vm8, %v6895_v53 }
0x1be4   :  { %11479 = vmatpush3.bf16.msra.mxu0 %v14191_v14  ;;  %v6892_v28 = vpop.f32.mrf.mxu1  ;;  %11480 = vmatprep.mubr.msk.bf16.mxu0 %vm12569_vm5, %v12568_v8 }
0x1be5   :  { %11484 = vmatprep.subr.bf16.mxu0 %v12568_v8 }
0x1be6   :  { %v11447_v55 = vpop.f32.mrf.mxu1 }
0x1be8   :  { %v7012_v12 = vpop.f32.mrf.mxu1 }
0x1be9   :  { %v7018_v62 = vpack.c.bf16 %v7012_v12, %v7012_v12  ;;  %v9974_v12 = vld [vmem:[%s14680_s24 + $0x8] sm:$0x1] }
0x1bea   :  { %v11464_v52 = vpop.f32.mrf.mxu1 }
0x1beb   :  { %11475 = vmatmul.mubr.msk.bf16.vlgmr.msra.gmra.mxu1 %vm5015_vm8, %v7018_v62  ;;  %11481 = vmatmul.mubr.msk.bf16.vlgmr.msra.gmra.mxu0 %vm5308_vm9, %v9914_v41  ;;  %v12015_v41 = vld [vmem:[%s14681_s22 + $0x118] sm:$0xff]  }
0x1bec   :  { %11497 = vmatpush3.bf16.msra.mxu1 %v14191_v14  ;;  %11498 = vmatprep.mubr.msk.bf16.mxu1 %vm12569_vm5, %v12568_v8  ;;  %v7015_v25 = vpop.f32.mrf.mxu1 }
0x1bed   :  { %11485 = vmatpush3.bf16.msra.mxu0 %v11999_v30  ;;  %11502 = vmatprep.subr.bf16.mxu1 %v12568_v8  ;;  %v12016_v25 = vld [vmem:[%s14681_s22 + $0x110] sm:$0xff]  }
0x1bee   :  { %11486 = vmatprep.subr.bf16.mxu0 %v12568_v8  ;;  %v11465_v59 = vpop.f32.mrf.mxu1  ;;  %11492 = vmatprep.mubr.msk.bf16.mxu0 %vm12569_vm5, %v12568_v8 }
0x1bef   :  { %v12018_v59 = vld [vmem:[%s14681_s22 + $0x100] sm:$0xff]  }
0x1bf1   :  { %11487 = vmatpush3.bf16.msra.mxu0 %v12000_v17  ;;  %v12017_v17 = vld [vmem:[%s14681_s22 + $0x108] sm:$0xff]  }
0x1bf2   :  { %11488 = vmatprep.subr.bf16.mxu0 %v12568_v8 }
0x1bf3   :  { %11499 = vmatmul.mubr.msk.bf16.vlgmr.msra.gmra.mxu1 %vm5308_vm9, %v9929_v5 }
0x1bf4   :  { %11510 = vmatprep.mubr.msk.bf16.mxu1 %vm12569_vm5, %v12568_v8  ;;  %11503 = vmatpush3.bf16.msra.mxu1 %v12002_v24 }
0x1bf5   :  { %11489 = vmatpush3.bf16.msra.mxu0 %v12001_v16  ;;  %11504 = vmatprep.subr.bf16.mxu1 %v12568_v8 }
0x1bf6   :  { %11490 = vmatprep.subr.bf16.mxu0 %v12568_v8 }
0x1bf8   :  { %11505 = vmatpush3.bf16.msra.mxu1 %v12004_v6 }
0x1bf9   :  { %11491 = vmatpush3.bf16.msra.mxu0 %v12003_v3  ;;  %11506 = vmatprep.subr.bf16.mxu1 %v12568_v8 }
0x1bfa   :  { %11514 = vmatprep.subr.bf16.mxu0 %v12568_v8 }
0x1bfc   :  { %11507 = vmatpush3.bf16.msra.mxu1 %v12005_v40 }
0x1bfd   :  { %11508 = vmatprep.subr.bf16.mxu1 %v12568_v8 }
0x1c00   :  { %11509 = vmatpush3.bf16.msra.mxu1 %v12006_v56 }
0x1c01   :  { %11532 = vmatprep.subr.bf16.mxu1 %v12568_v8 }
0x1ca3   :  { %v6966_v46 = vpop.f32.mrf.mxu0 }
0x1ca4   :  { %v6972_v47 = vadd.f32 %v6966_v46, %v6845_v0 }
0x1ca5   :  { %v11458_v38 = vpop.f32.mrf.mxu0 }
0x1ca7   :  { %v6969_v4 = vpop.f32.mrf.mxu0 }
0x1ca9   :  { %v11459_v13 = vpop.f32.mrf.mxu0 }
0x1cab   :  { %v7089_v18 = vpop.f32.mrf.mxu1  ;;  %v7135_v26 = vpop.f32.mrf.mxu0 }
0x1cac   :  { %v7095_v34 = vadd.f32 %v7089_v18, %v6972_v47  ;;  %v7141_v20 = vpack.c.bf16 %v7135_v26, %v7135_v26 }
0x1cad   :  { %v11476_v21 = vpop.f32.mrf.mxu1  ;;  %v11482_v49 = vpop.f32.mrf.mxu0 }
0x1cae   :  { %11493 = vmatmul.mubr.msk.bf16.vlgmr.msra.gmra.mxu0 %vm5015_vm8, %v7141_v20  ;;  %v12019_v20 = vld [vmem:[%s14682_s23 + $0x18] sm:$0xff]   ;;  %v12020_v21 = vld [vmem:[%s14682_s23 + $0x10] sm:$0xff]   ;;  %v12021_v49 = vld [vmem:[%s14682_s23 + $0x8] sm:$0xff]  }
0x1caf   :  { %11515 = vmatpush3.bf16.msra.mxu0 %v14191_v14  ;;  %v7092_v33 = vpop.f32.mrf.mxu1  ;;  %v7138_v9 = vpop.f32.mrf.mxu0  ;;  %11516 = vmatprep.mubr.msk.bf16.mxu0 %vm12569_vm5, %v12568_v8 }
0x1cb0   :  { %11520 = vmatprep.subr.bf16.mxu0 %v12568_v8  ;;  %v12022_v33 = vld [vmem:[%s14682_s23] sm:$0xff]  }
0x1cb1   :  { %v11477_v37 = vpop.f32.mrf.mxu1  ;;  %v11483_v54 = vpop.f32.mrf.mxu0 }
0x1cb3   :  { %v7258_v22 = vpop.f32.mrf.mxu1 }
0x1cb4   :  { %v7264_v10 = vpack.c.bf16 %v7258_v22, %v7258_v22 }
0x1cb5   :  { %v11500_v29 = vpop.f32.mrf.mxu1 }
0x1cb6   :  { %11511 = vmatmul.mubr.msk.bf16.vlgmr.msra.gmra.mxu1 %vm5015_vm8, %v7264_v10  ;;  %11517 = vmatmul.mubr.msk.bf16.vlgmr.msra.gmra.mxu0 %vm5308_vm9, %v9944_v2 }
0x1cb7   :  { %11533 = vmatpush3.bf16.msra.mxu1 %v14191_v14  ;;  %11534 = vmatprep.mubr.msk.bf16.mxu1 %vm12569_vm5, %v12568_v8  ;;  %v7261_v61 = vpop.f32.mrf.mxu1 }
0x1cb8   :  { %11521 = vmatpush3.bf16.msra.mxu0 %v12007_v23  ;;  %11538 = vmatprep.subr.bf16.mxu1 %v12568_v8 }
0x1cb9   :  { %11522 = vmatprep.subr.bf16.mxu0 %v12568_v8  ;;  %v11501_v50 = vpop.f32.mrf.mxu1  ;;  %11528 = vmatprep.mubr.msk.bf16.mxu0 %vm12569_vm5, %v12568_v8 }
0x1cbc   :  { %11523 = vmatpush3.bf16.msra.mxu0 %v12008_v58 }
0x1cbd   :  { %11524 = vmatprep.subr.bf16.mxu0 %v12568_v8 }
0x1cbe   :  { %11535 = vmatmul.mubr.msk.bf16.vlgmr.msra.gmra.mxu1 %vm5308_vm9, %v9959_v7 }
0x1cbf   :  { %11546 = vmatprep.mubr.msk.bf16.mxu1 %vm12569_vm5, %v12568_v8  ;;  %11539 = vmatpush3.bf16.msra.mxu1 %v12010_v35 }
0x1cc0   :  { %11525 = vmatpush3.bf16.msra.mxu0 %v12009_v31  ;;  %11540 = vmatprep.subr.bf16.mxu1 %v12568_v8 }
0x1cc1   :  { %11526 = vmatprep.subr.bf16.mxu0 %v12568_v8 }
0x1cc3   :  { %11541 = vmatpush3.bf16.msra.mxu1 %v12012_v39 }
0x1cc4   :  { %11527 = vmatpush3.bf16.msra.mxu0 %v12011_v45  ;;  %11542 = vmatprep.subr.bf16.mxu1 %v12568_v8 }
0x1cc5   :  { %11550 = vmatprep.subr.bf16.mxu0 %v12568_v8 }
0x1cc7   :  { %11543 = vmatpush3.bf16.msra.mxu1 %v12013_v44 }
0x1cc8   :  { %11544 = vmatprep.subr.bf16.mxu1 %v12568_v8 }
0x1ccb   :  { %11545 = vmatpush3.bf16.msra.mxu1 %v12014_v11 }
0x1ccc   :  { %11568 = vmatprep.subr.bf16.mxu1 %v12568_v8 }
0x1d6e   :  { %v7212_v36 = vpop.f32.mrf.mxu0 }
0x1d6f   :  { %v7218_v19 = vadd.f32 %v7212_v36, %v7095_v34 }
0x1d70   :  { %v11494_v15 = vpop.f32.mrf.mxu0 }
0x1d72   :  { %v7215_v27 = vpop.f32.mrf.mxu0 }
0x1d74   :  { %v11495_v0 = vpop.f32.mrf.mxu0 }
0x1d76   :  { %v7335_v43 = vpop.f32.mrf.mxu1  ;;  %v7381_v57 = vpop.f32.mrf.mxu0 }
0x1d77   :  { %v7341_v1 = vadd.f32 %v7335_v43, %v7218_v19  ;;  %v7387_v51 = vpack.c.bf16 %v7381_v57, %v7381_v57 }
0x1d78   :  { %v11512_v32 = vpop.f32.mrf.mxu1  ;;  %v11518_v60 = vpop.f32.mrf.mxu0 }
0x1d79   :  { %11529 = vmatmul.mubr.msk.bf16.vlgmr.msra.gmra.mxu0 %vm5015_vm8, %v7387_v51  ;;  %v9990_v32 = vld [vmem:[#allocation8] ss:$0 sm:$0xff] }
0x1d7a   :  { %11551 = vmatpush3.bf16.msra.mxu0 %v14191_v14  ;;  %v7338_v63 = vpop.f32.mrf.mxu1  ;;  %v7384_v53 = vpop.f32.mrf.mxu0  ;;  %11552 = vmatprep.mubr.msk.bf16.mxu0 %vm12569_vm5, %v12568_v8 }
0x1d7b   :  { %11556 = vmatprep.subr.bf16.mxu0 %v12568_v8 }
0x1d7c   :  { %v11513_v42 = vpop.f32.mrf.mxu1  ;;  %v11519_v28 = vpop.f32.mrf.mxu0 }
0x1d7e   :  { %v7504_v55 = vpop.f32.mrf.mxu1 }
0x1d7f   :  { %v7510_v62 = vpack.c.bf16 %v7504_v55, %v7504_v55 }
0x1d80   :  { %v11536_v30 = vpop.f32.mrf.mxu1 }
0x1d81   :  { %11547 = vmatmul.mubr.msk.bf16.vlgmr.msra.gmra.mxu1 %vm5015_vm8, %v7510_v62  ;;  %11553 = vmatmul.mubr.msk.bf16.vlgmr.msra.gmra.mxu0 %vm5308_vm9, %v9974_v12 }
0x1d82   :  { %11557 = vmatpush3.bf16.msra.mxu0 %v12015_v41  ;;  %v7507_v14 = vpop.f32.mrf.mxu1  ;;  %11564 = vmatprep.mubr.msk.bf16.mxu0 %vm12569_vm5, %v12568_v8 }
0x1d83   :  { %11558 = vmatprep.subr.bf16.mxu0 %v12568_v8  ;;  %11576 = vmatprep.mubr.msk.bf16.mxu1 %vm12569_vm5, %v12568_v8 }
0x1d84   :  { %v11537_v52 = vpop.f32.mrf.mxu1  ;;  %11569 = vmatpush3.bf16.msra.mxu1 %v12019_v20  ;;  %v9997_v20 = vld [vmem:[#allocation11] ss:$0 sm:$0xff] }
0x1d85   :  { %11570 = vmatprep.subr.bf16.mxu1 %v12568_v8 }
0x1d86   :  { %11559 = vmatpush3.bf16.msra.mxu0 %v12016_v25 }
0x1d87   :  { %11560 = vmatprep.subr.bf16.mxu0 %v12568_v8 }
0x1d88   :  { %11571 = vmatpush3.bf16.msra.mxu1 %v12020_v21 }
0x1d89   :  { %11572 = vmatprep.subr.bf16.mxu1 %v12568_v8 }
0x1d8a   :  { %11561 = vmatpush3.bf16.msra.mxu0 %v12017_v17 }
0x1d8b   :  { %11562 = vmatprep.subr.bf16.mxu0 %v12568_v8 }
0x1d8c   :  { %11573 = vmatpush3.bf16.msra.mxu1 %v12021_v49 }
0x1d8d   :  { %11574 = vmatprep.subr.bf16.mxu1 %v12568_v8 }
0x1d8e   :  { %11563 = vmatpush3.bf16.msra.mxu0 %v12018_v59 }
0x1d8f   :  { %11580 = vmatprep.subr.bf16.mxu0 %v12568_v8 }
0x1d90   :  { %11575 = vmatpush3.bf16.msra.mxu1 %v12022_v33 }
0x1d91   :  { %11586 = vmatprep.subr.bf16.mxu1 %v12568_v8 }
0x1e39   :  { %v7458_v5 = vpop.f32.mrf.mxu0 }
0x1e3a   :  { %v7464_v16 = vadd.f32 %v7458_v5, %v7341_v1  ;;  %v9989_v1 = vld [vmem:[#allocation10] ss:$0 sm:$0xff] }
0x1e3b   :  { %v11530_v24 = vpop.f32.mrf.mxu0 }
0x1e3d   :  { %v7461_v3 = vpop.f32.mrf.mxu0 }
0x1e3f   :  { %v11531_v6 = vpop.f32.mrf.mxu0 }
0x1e41   :  { %v7581_v40 = vpop.f32.mrf.mxu1  ;;  %v7627_v56 = vpop.f32.mrf.mxu0 }
0x1e42   :  { %v7587_v46 = vadd.f32 %v7581_v40, %v7464_v16  ;;  %v7633_v47 = vpack.c.bf16 %v7627_v56, %v7627_v56 }
0x1e43   :  { %v11554_v38 = vpop.f32.mrf.mxu0  ;;  %v11548_v4 = vpop.f32.mrf.mxu1 }
0x1e44   :  { %11565 = vmatmul.mubr.msk.bf16.vlgmr.msra.gmra.mxu0 %vm5015_vm8, %v7633_v47 }
0x1e45   :  { %v7630_v13 = vpop.f32.mrf.mxu0  ;;  %v7584_v18 = vpop.f32.mrf.mxu1  ;;  %11582 = vmatprep.mubr.msk.bf16.mxu0 %vm12569_vm5, %v12568_v8 }
0x1e47   :  { %v11555_v26 = vpop.f32.mrf.mxu0  ;;  %v11549_v34 = vpop.f32.mrf.mxu1 }
0x1e48   :  { %v9996_v26 = vld [vmem:[#allocation13] ss:$0 sm:$0xff] }
0x1f04   :  { %v7704_v9 = vpop.f32.mrf.mxu0 }
0x1f05   :  { %v7710_v37 = vadd.f32 %v7704_v9, %v7587_v46 }
0x1f06   :  { %v11566_v54 = vpop.f32.mrf.mxu0 }
0x1f07   :  { %v7711_v22 = vsel %vm4942_vm7, %v7710_v37, 0.0 }
0x1f08   :  { %v7712_v2 = vrot.slane %v7711_v22, 4  ;;  %v7707_v10 = vpop.f32.mrf.mxu0 }
0x1f0a   :  { %v7713_v23 = vadd.f32 %v7712_v2, %v7711_v22  ;;  %v11567_v29 = vpop.f32.mrf.mxu0 }
0x1f0c   :  { %v7714_v61 = vrot.slane %v7713_v23, 2 }
0x1f0e   :  { %v7715_v58 = vadd.f32 %v7714_v61, %v7713_v23 }
0x1f10   :  { %v7716_v50 = vrot.slane %v7715_v58, 1 }
0x1f12   :  { %v7717_v7 = vadd.f32 %v7716_v50, %v7715_v58 }
0x1f14   :  { %v7718_v31 = vmul.f32 0.5, %v7717_v7 }
0x1f16   :  { %v7719_v35 = vsub.f32 %v7710_v37, %v7718_v31 }
0x1f18   :  { %v7720_v45 = vmul.f32 %v7719_v35, %v7719_v35 }
0x1f1a   :  { %v7721_v39 = vsel %vm4942_vm7, %v7720_v45, 0.0 }
0x1f1b   :  { %v7722_v44 = vrot.slane %v7721_v39, 4 }
0x1f1d   :  { %v7723_v11 = vadd.f32 %v7722_v44, %v7721_v39 }
0x1f1f   :  { %v7724_v36 = vrot.slane %v7723_v11, 2 }
0x1f21   :  { %v7725_v19 = vadd.f32 %v7724_v36, %v7723_v11 }
0x1f23   :  { %v7726_v15 = vrot.slane %v7725_v19, 1 }
0x1f25   :  { %v7727_v27 = vadd.f32 %v7726_v15, %v7725_v19  ;;  %v9998_v19 = vld [vmem:[#allocation16] ss:$0 sm:$0xff] }
0x1f27   :  { %v7728_v0 = vmul.f32 0.5, %v7727_v27  ;;  %v9999_v27 = vld [vmem:[#allocation14] ss:$0 sm:$0xff] }
0x1f29   :  { %v7729_v43 = vadd.f32 1e-05, %v7728_v0 }
0x1f2b   :  { %12101 = vrsqrt.f32 %v7729_v43 }
0x1f38   :  { %v12102_v57 = vpop.eup %12101 }
0x1f39   :  { %v7731_v51 = vmul.f32 %v12102_v57, %v7719_v35 }
0x1f3b   :  { %v7739_v60 = vmul.f32 %v9989_v1, %v7731_v51 }
0x1f3d   :  { %v7747_v63 = vadd.f32 %v9990_v32, %v7739_v60  ;;  %v7902_v32 = vld [vmem:[%s14683_s26] sm:$0x1]  ;;  %v10001_v60 = vld [vmem:[%s14683_s26 + $0x1] sm:$0x1] }
0x1f3f   :  { %v7748_v53 = vmax.f32 %v7747_v63, 0.0  ;;  %v12023_v63 = vld [vmem:[%s14684_s21 + $0x38] sm:$0xff]  }
0x1f41   :  { %v7757_v42 = vpack.c.bf16 %v7748_v53, %v7748_v53  ;;  %v12024_v53 = vld [vmem:[%s14684_s21 + $0x18] sm:$0xff]  }
0x1f43   :  { %11577 = vmatmul.mubr.msk.bf16.vlgmr.msra.gmra.mxu1 %vm5015_vm8, %v7757_v42  ;;  %v12025_v42 = vld [vmem:[%s14684_s21 + $0x30] sm:$0xff]  }
0x1f44   :  { %11588 = vmatprep.mubr.msk.bf16.mxu1 %vm12569_vm5, %v12568_v8 }
0x2003   :  { %v7819_v28 = vpop.f32.mrf.mxu1 }
0x2004   :  { %v7825_v55 = vsel %vm4942_vm7, %v7819_v28, 0.0 }
0x2005   :  { %v7826_v12 = vrot.slane %v7825_v55, 4  ;;  %v11578_v41 = vpop.f32.mrf.mxu1 }
0x2006   :  { %v12029_v41 = vld [vmem:[%s14684_s21 + $0x20] sm:$0xff]  }
0x2007   :  { %v7827_v62 = vadd.f32 %v7826_v12, %v7825_v55  ;;  %v7822_v30 = vpop.f32.mrf.mxu1  ;;  %v12027_v55 = vld [vmem:[%s14684_s21 + $0x28] sm:$0xff]  }
0x2008   :  { %v12028_v12 = vld [vmem:[%s14684_s21 + $0x8] sm:$0xff]  }
0x2009   :  { %v7828_v14 = vrot.slane %v7827_v62, 2  ;;  %v11579_v52 = vpop.f32.mrf.mxu1 }
0x200b   :  { %v7829_v25 = vadd.f32 %v7828_v14, %v7827_v62  ;;  %v12030_v62 = vld [vmem:[%s14684_s21] sm:$0xff]  }
0x200d   :  { %v7830_v17 = vrot.slane %v7829_v25, 1 }
0x200f   :  { %v7831_v59 = vadd.f32 %v7830_v17, %v7829_v25  ;;  %v12031_v17 = vld [vmem:[%s14684_s21 + $0x58] sm:$0xff]  }
0x2011   :  { %v7832_v5 = vmul.f32 0.5, %v7831_v59 }
0x2013   :  { %v7833_v16 = vsub.f32 %v7819_v28, %v7832_v5  ;;  %v12026_v28 = vld [vmem:[%s14684_s21 + $0x10] sm:$0xff]  }
0x2015   :  { %v7834_v24 = vmul.f32 %v7833_v16, %v7833_v16 }
0x2017   :  { %v7835_v3 = vsel %vm4942_vm7, %v7834_v24, 0.0 }
0x2018   :  { %v7836_v6 = vrot.slane %v7835_v3, 4 }
0x201a   :  { %v7837_v40 = vadd.f32 %v7836_v6, %v7835_v3  ;;  %v12032_v3 = vld [vmem:[%s14684_s21 + $0x50] sm:$0xff]  }
0x201c   :  { %v7838_v56 = vrot.slane %v7837_v40, 2 }
0x201e   :  { %v7839_v46 = vadd.f32 %v7838_v56, %v7837_v40  ;;  %v10021_v56 = vld [vmem:[%s14683_s26 + $0x2] sm:$0x1] }
0x2020   :  { %v7840_v47 = vrot.slane %v7839_v46, 1 }
0x2022   :  { %v7841_v38 = vadd.f32 %v7840_v47, %v7839_v46  ;;  %v10036_v46 = vld [vmem:[%s14683_s26 + $0x3] sm:$0x1]  ;;  %v12033_v47 = vld [vmem:[%s14684_s21 + $0x48] sm:$0xff]  }
0x2024   :  { %v7842_v4 = vmul.f32 0.5, %v7841_v38  ;;  %v12034_v38 = vld [vmem:[%s14684_s21 + $0x78] sm:$0xff]  }
0x2026   :  { %v7843_v13 = vadd.f32 1e-05, %v7842_v4  ;;  %v12035_v4 = vld [vmem:[%s14684_s21 + $0x40] sm:$0xff]  }
0x2028   :  { %12103 = vrsqrt.f32 %v7843_v13  ;;  %v12036_v13 = vld [vmem:[%s14684_s21 + $0x70] sm:$0xff]  }
0x2035   :  { %v12104_v18 = vpop.eup %12103 }
0x2036   :  { %v7845_v34 = vmul.f32 %v12104_v18, %v7833_v16  ;;  %v12037_v18 = vld [vmem:[%s14684_s21 + $0x68] sm:$0xff]  }
0x2038   :  { %v7853_v21 = vmul.f32 %v9996_v26, %v7845_v34  ;;  %v12038_v26 = vld [vmem:[%s14684_s21 + $0x60] sm:$0xff]  }
0x203a   :  { %v7861_v49 = vadd.f32 %v9997_v20, %v7853_v21 }
0x203c   :  { %v14362_v33 = vadd.f32 %v7861_v49, %v14184_v48 }
0x203e   :  { %v7863_v9 = vsel %vm4942_vm7, %v14362_v33, 0.0 }
0x203f   :  { %v7864_v37 = vrot.slane %v7863_v9, 4 }
0x2041   :  { %v7865_v54 = vadd.f32 %v7864_v37, %v7863_v9 }
0x2043   :  { %v7866_v22 = vrot.slane %v7865_v54, 2 }
0x2045   :  { %v7867_v2 = vadd.f32 %v7866_v22, %v7865_v54 }
0x2047   :  { %v7868_v10 = vrot.slane %v7867_v2, 1 }
0x2049   :  { %v7869_v23 = vadd.f32 %v7868_v10, %v7867_v2 }
0x204b   :  { %v7870_v29 = vmul.f32 0.5, %v7869_v23 }
0x204d   :  { %v7871_v61 = vsub.f32 %v14362_v33, %v7870_v29 }
0x204f   :  { %v7872_v58 = vmul.f32 %v7871_v61, %v7871_v61 }
0x2051   :  { %v7873_v50 = vsel %vm4942_vm7, %v7872_v58, 0.0 }
0x2052   :  { %v7874_v7 = vrot.slane %v7873_v50, 4 }
0x2054   :  { %v7875_v31 = vadd.f32 %v7874_v7, %v7873_v50  ;;  %v10051_v7 = vld [vmem:[%s14683_s26 + $0x4] sm:$0x1] }
0x2056   :  { %v7876_v35 = vrot.slane %v7875_v31, 2 }
0x2058   :  { %v7877_v48 = vadd.f32 %v7876_v35, %v7875_v31  ;;  %v12039_v35 = vld [vmem:[%s14684_s21 + $0x98] sm:$0xff]  }
0x205a   :  { %v7878_v45 = vrot.slane %v7877_v48, 1 }
0x205c   :  { %v7879_v39 = vadd.f32 %v7878_v45, %v7877_v48 }
0x205e   :  { %v7880_v44 = vmul.f32 0.5, %v7879_v39  ;;  %v12040_v39 = vld [vmem:[%s14684_s21 + $0x90] sm:$0xff]  }
0x2060   :  { %v7881_v11 = vadd.f32 1e-05, %v7880_v44 }
0x2062   :  { %12105 = vrsqrt.f32 %v7881_v11  ;;  %v10066_v11 = vld [vmem:[%s14683_s26 + $0x5] sm:$0x1] }
0x206f   :  { %v12106_v36 = vpop.eup %12105 }
0x2070   :  { %v7883_v15 = vmul.f32 %v12106_v36, %v7871_v61  ;;  %v12041_v36 = vld [vmem:[%s14684_s21 + $0x88] sm:$0xff]  }
0x2072   :  { %v7891_v0 = vmul.f32 %v9998_v19, %v7883_v15  ;;  %v12042_v19 = vld [vmem:[%s14684_s21 + $0xb8] sm:$0xff]   ;;  %v12043_v15 = vld [vmem:[%s14684_s21 + $0x80] sm:$0xff]  }
0x2074   :  { %v7899_v43 = vadd.f32 %v9999_v27, %v7891_v0  ;;  %v12044_v27 = vld [vmem:[%s14684_s21 + $0xb0] sm:$0xff]   ;;  %v12045_v0 = vld [vmem:[%s14684_s21 + $0xa8] sm:$0xff]  }
0x2076   :  { %v7900_v57 = vmax.f32 %v7899_v43, 0.0  ;;  %v12046_v43 = vld [vmem:[%s14684_s21 + $0xa0] sm:$0xff]  }
0x2078   :  { %v7901_v1 = vpack.c.bf16 %v7900_v57, %v7900_v57 }
0x207a   :  { %v14369_v51 = vsel %vm614_vm0, %v7901_v1, 0 }
0x207b   :  { %11581 = vmatpush3.bf16.msra.mxu0 %v14369_v51  ;;  %11587 = vmatpush3.bf16.msra.mxu1 %v14369_v51 }
0x207c   :  { %11592 = vmatprep.subr.bf16.mxu0 %v12568_v8  ;;  %11604 = vmatprep.subr.bf16.mxu1 %v12568_v8 }
0x207e   :  { %11583 = vmatmul.mubr.msk.bf16.vlgmr.msra.gmra.mxu0 %vm5308_vm9, %v7902_v32  ;;  %11589 = vmatmul.mubr.msk.bf16.vlgmr.msra.gmra.mxu1 %vm5308_vm9, %v10001_v60 }
0x207f   :  { %11593 = vmatpush3.bf16.msra.mxu0 %v12023_v63  ;;  %11605 = vmatpush3.bf16.msra.mxu1 %v12024_v53 }
0x2080   :  { %11594 = vmatprep.subr.bf16.mxu0 %v12568_v8  ;;  %11606 = vmatprep.subr.bf16.mxu1 %v12568_v8 }
0x2081   :  { %11600 = vmatprep.mubr.msk.bf16.mxu0 %vm12569_vm5, %v12568_v8  ;;  %11612 = vmatprep.mubr.msk.bf16.mxu1 %vm12569_vm5, %v12568_v8 }
0x2083   :  { %11595 = vmatpush3.bf16.msra.mxu0 %v12025_v42  ;;  %11607 = vmatpush3.bf16.msra.mxu1 %v12026_v28 }
0x2084   :  { %11596 = vmatprep.subr.bf16.mxu0 %v12568_v8  ;;  %11608 = vmatprep.subr.bf16.mxu1 %v12568_v8 }
0x2087   :  { %11597 = vmatpush3.bf16.msra.mxu0 %v12027_v55  ;;  %11609 = vmatpush3.bf16.msra.mxu1 %v12028_v12 }
0x2088   :  { %11598 = vmatprep.subr.bf16.mxu0 %v12568_v8  ;;  %11610 = vmatprep.subr.bf16.mxu1 %v12568_v8 }
0x208b   :  { %11599 = vmatpush3.bf16.msra.mxu0 %v12029_v41  ;;  %11611 = vmatpush3.bf16.msra.mxu1 %v12030_v62 }
0x208c   :  { %11616 = vmatprep.subr.bf16.mxu0 %v12568_v8  ;;  %11622 = vmatprep.subr.bf16.mxu1 %v12568_v8 }
0x213e   :  { %v7943_v30 = vpop.f32.mrf.mxu0  ;;  %v7997_v14 = vpop.f32.mrf.mxu1 }
0x213f   :  { %v7949_v52 = vpack.c.bf16 %v7943_v30, %v7943_v30  ;;  %v8003_v25 = vpack.c.bf16 %v7997_v14, %v7997_v14 }
0x2140   :  { %v11590_v59 = vpop.f32.mrf.mxu1  ;;  %v11584_v5 = vpop.f32.mrf.mxu0 }
0x2141   :  { %11601 = vmatmul.mubr.msk.bf16.vlgmr.msra.gmra.mxu0 %vm5015_vm8, %v8003_v25  ;;  %11613 = vmatmul.mubr.msk.bf16.vlgmr.msra.gmra.mxu1 %vm5015_vm8, %v7949_v52  ;;  %v12047_v5 = vld [vmem:[%s14684_s21 + $0xd8] sm:$0xff]  }
0x2142   :  { %11617 = vmatpush3.bf16.msra.mxu0 %v14369_v51  ;;  %v8000_v16 = vpop.f32.mrf.mxu1  ;;  %11618 = vmatprep.mubr.msk.bf16.mxu0 %vm12569_vm5, %v12568_v8  ;;  %v7946_v24 = vpop.f32.mrf.mxu0 }
0x2143   :  { %11634 = vmatprep.subr.bf16.mxu0 %v12568_v8  ;;  %11623 = vmatpush3.bf16.msra.mxu1 %v12031_v17  ;;  %v10081_v17 = vld [vmem:[%s14683_s26 + $0x6] sm:$0x1] }
0x2144   :  { %v11591_v6 = vpop.f32.mrf.mxu1  ;;  %v11585_v40 = vpop.f32.mrf.mxu0  ;;  %11624 = vmatprep.subr.bf16.mxu1 %v12568_v8  ;;  %11630 = vmatprep.mubr.msk.bf16.mxu1 %vm12569_vm5, %v12568_v8 }
0x2145   :  { %v10096_v40 = vld [vmem:[%s14683_s26 + $0x7] sm:$0x1] }
0x2147   :  { %11625 = vmatpush3.bf16.msra.mxu1 %v12032_v3  ;;  %v12048_v3 = vld [vmem:[%s14684_s21 + $0xd0] sm:$0xff]  }
0x2148   :  { %11626 = vmatprep.subr.bf16.mxu1 %v12568_v8 }
0x2149   :  { %11619 = vmatmul.mubr.msk.bf16.vlgmr.msra.gmra.mxu0 %vm5308_vm9, %v10021_v56  ;;  %v12049_v56 = vld [vmem:[%s14684_s21 + $0xc8] sm:$0xff]  }
0x214a   :  { %11635 = vmatpush3.bf16.msra.mxu0 %v14369_v51  ;;  %11636 = vmatprep.mubr.msk.bf16.mxu0 %vm12569_vm5, %v12568_v8 }
0x214b   :  { %11640 = vmatprep.subr.bf16.mxu0 %v12568_v8  ;;  %11627 = vmatpush3.bf16.msra.mxu1 %v12033_v47  ;;  %v12051_v47 = vld [vmem:[%s14684_s21 + $0xc0] sm:$0xff]  }
0x214c   :  { %11628 = vmatprep.subr.bf16.mxu1 %v12568_v8 }
0x214f   :  { %11629 = vmatpush3.bf16.msra.mxu1 %v12035_v4  ;;  %v12053_v4 = vld [vmem:[%s14684_s21 + $0xe8] sm:$0xff]  }
0x2150   :  { %11652 = vmatprep.subr.bf16.mxu1 %v12568_v8 }
0x2151   :  { %11637 = vmatmul.mubr.msk.bf16.vlgmr.msra.gmra.mxu0 %vm5308_vm9, %v10036_v46  ;;  %v12050_v46 = vld [vmem:[%s14684_s21 + $0xf8] sm:$0xff]  }
0x2152   :  { %11648 = vmatprep.mubr.msk.bf16.mxu0 %vm12569_vm5, %v12568_v8  ;;  %11641 = vmatpush3.bf16.msra.mxu0 %v12034_v38  ;;  %v12052_v38 = vld [vmem:[%s14684_s21 + $0xf0] sm:$0xff]  }
0x2153   :  { %11642 = vmatprep.subr.bf16.mxu0 %v12568_v8 }
0x2156   :  { %11643 = vmatpush3.bf16.msra.mxu0 %v12036_v13  ;;  %v12054_v13 = vld [vmem:[%s14684_s21 + $0xe0] sm:$0xff]  }
0x2157   :  { %11644 = vmatprep.subr.bf16.mxu0 %v12568_v8 }
0x215a   :  { %11645 = vmatpush3.bf16.msra.mxu0 %v12037_v18 }
0x215b   :  { %11646 = vmatprep.subr.bf16.mxu0 %v12568_v8 }
0x215e   :  { %11647 = vmatpush3.bf16.msra.mxu0 %v12038_v26 }
0x215f   :  { %11670 = vmatprep.subr.bf16.mxu0 %v12568_v8 }
0x2201   :  { %v8074_v34 = vpop.f32.mrf.mxu0  ;;  %v8141_v20 = vpop.f32.mrf.mxu1 }
0x2202   :  { %v8142_v21 = vadd.f32 %v8141_v20, %v8074_v34 }
0x2203   :  { %v11602_v49 = vpop.f32.mrf.mxu0  ;;  %v11614_v9 = vpop.f32.mrf.mxu1 }
0x2205   :  { %v8077_v37 = vpop.f32.mrf.mxu0  ;;  %v8144_v54 = vpop.f32.mrf.mxu1 }
0x2207   :  { %v11603_v22 = vpop.f32.mrf.mxu0  ;;  %v11615_v2 = vpop.f32.mrf.mxu1 }
0x2209   :  { %v8186_v10 = vpop.f32.mrf.mxu0 }
0x220a   :  { %v8192_v23 = vpack.c.bf16 %v8186_v10, %v8186_v10 }
0x220b   :  { %v11620_v29 = vpop.f32.mrf.mxu0 }
0x220c   :  { %11631 = vmatmul.mubr.msk.bf16.vlgmr.msra.gmra.mxu1 %vm5015_vm8, %v8192_v23 }
0x220d   :  { %11653 = vmatpush3.bf16.msra.mxu1 %v14369_v51  ;;  %v8189_v61 = vpop.f32.mrf.mxu0  ;;  %11654 = vmatprep.mubr.msk.bf16.mxu1 %vm12569_vm5, %v12568_v8 }
0x220e   :  { %11658 = vmatprep.subr.bf16.mxu1 %v12568_v8 }
0x220f   :  { %v11621_v58 = vpop.f32.mrf.mxu0 }
0x2211   :  { %v8309_v50 = vpop.f32.mrf.mxu0 }
0x2212   :  { %v8315_v31 = vpack.c.bf16 %v8309_v50, %v8309_v50  ;;  %v10111_v50 = vld [vmem:[%s14683_s26 + $0x8] sm:$0x1] }
0x2213   :  { %v11638_v48 = vpop.f32.mrf.mxu0 }
0x2214   :  { %11649 = vmatmul.mubr.msk.bf16.vlgmr.msra.gmra.mxu0 %vm5015_vm8, %v8315_v31  ;;  %11655 = vmatmul.mubr.msk.bf16.vlgmr.msra.gmra.mxu1 %vm5308_vm9, %v10051_v7  ;;  %v12055_v7 = vld [vmem:[%s14684_s21 + $0x118] sm:$0xff]  }
0x2215   :  { %11671 = vmatpush3.bf16.msra.mxu0 %v14369_v51  ;;  %11672 = vmatprep.mubr.msk.bf16.mxu0 %vm12569_vm5, %v12568_v8  ;;  %v8312_v45 = vpop.f32.mrf.mxu0 }
0x2216   :  { %11659 = vmatpush3.bf16.msra.mxu1 %v12039_v35  ;;  %11676 = vmatprep.subr.bf16.mxu0 %v12568_v8  ;;  %v12056_v45 = vld [vmem:[%s14684_s21 + $0x110] sm:$0xff]  }
0x2217   :  { %11660 = vmatprep.subr.bf16.mxu1 %v12568_v8  ;;  %v11639_v44 = vpop.f32.mrf.mxu0  ;;  %11666 = vmatprep.mubr.msk.bf16.mxu1 %vm12569_vm5, %v12568_v8 }
0x2218   :  { %v12058_v44 = vld [vmem:[%s14684_s21 + $0x100] sm:$0xff]  }
0x221a   :  { %11661 = vmatpush3.bf16.msra.mxu1 %v12040_v39  ;;  %v12057_v39 = vld [vmem:[%s14684_s21 + $0x108] sm:$0xff]  }
0x221b   :  { %11662 = vmatprep.subr.bf16.mxu1 %v12568_v8 }
0x221c   :  { %11673 = vmatmul.mubr.msk.bf16.vlgmr.msra.gmra.mxu0 %vm5308_vm9, %v10066_v11 }
0x221d   :  { %11684 = vmatprep.mubr.msk.bf16.mxu0 %vm12569_vm5, %v12568_v8  ;;  %11677 = vmatpush3.bf16.msra.mxu0 %v12042_v19 }
0x221e   :  { %11663 = vmatpush3.bf16.msra.mxu1 %v12041_v36  ;;  %11678 = vmatprep.subr.bf16.mxu0 %v12568_v8 }
0x221f   :  { %11664 = vmatprep.subr.bf16.mxu1 %v12568_v8 }
0x2221   :  { %11679 = vmatpush3.bf16.msra.mxu0 %v12044_v27 }
0x2222   :  { %11665 = vmatpush3.bf16.msra.mxu1 %v12043_v15  ;;  %11680 = vmatprep.subr.bf16.mxu0 %v12568_v8 }
0x2223   :  { %11688 = vmatprep.subr.bf16.mxu1 %v12568_v8 }
0x2225   :  { %11681 = vmatpush3.bf16.msra.mxu0 %v12045_v0 }
0x2226   :  { %11682 = vmatprep.subr.bf16.mxu0 %v12568_v8 }
0x2229   :  { %11683 = vmatpush3.bf16.msra.mxu0 %v12046_v43 }
0x222a   :  { %11706 = vmatprep.subr.bf16.mxu0 %v12568_v8 }
0x22cc   :  { %v8263_v57 = vpop.f32.mrf.mxu1 }
0x22cd   :  { %v8269_v1 = vadd.f32 %v8263_v57, %v8142_v21 }
0x22ce   :  { %v11632_v32 = vpop.f32.mrf.mxu1 }
0x22d0   :  { %v8266_v60 = vpop.f32.mrf.mxu1 }
0x22d2   :  { %v11633_v63 = vpop.f32.mrf.mxu1 }
0x22d4   :  { %v8386_v53 = vpop.f32.mrf.mxu0  ;;  %v8432_v42 = vpop.f32.mrf.mxu1 }
0x22d5   :  { %v8392_v28 = vadd.f32 %v8386_v53, %v8269_v1  ;;  %v8438_v55 = vpack.c.bf16 %v8432_v42, %v8432_v42 }
0x22d6   :  { %v11650_v12 = vpop.f32.mrf.mxu0  ;;  %v11656_v41 = vpop.f32.mrf.mxu1 }
0x22d7   :  { %11667 = vmatmul.mubr.msk.bf16.vlgmr.msra.gmra.mxu1 %vm5015_vm8, %v8438_v55  ;;  %v12059_v55 = vld [vmem:[%s14685_s11 + $0x18] sm:$0xff]   ;;  %v12060_v12 = vld [vmem:[%s14685_s11 + $0x10] sm:$0xff]   ;;  %v12061_v41 = vld [vmem:[%s14685_s11 + $0x8] sm:$0xff]  }
0x22d8   :  { %11689 = vmatpush3.bf16.msra.mxu1 %v14369_v51  ;;  %v8389_v62 = vpop.f32.mrf.mxu0  ;;  %v8435_v30 = vpop.f32.mrf.mxu1  ;;  %11690 = vmatprep.mubr.msk.bf16.mxu1 %vm12569_vm5, %v12568_v8 }
0x22d9   :  { %11694 = vmatprep.subr.bf16.mxu1 %v12568_v8  ;;  %v12062_v62 = vld [vmem:[%s14685_s11] sm:$0xff]  }
0x22da   :  { %v11651_v14 = vpop.f32.mrf.mxu0  ;;  %v11657_v52 = vpop.f32.mrf.mxu1 }
0x22dc   :  { %v8555_v25 = vpop.f32.mrf.mxu0 }
0x22dd   :  { %v8561_v59 = vpack.c.bf16 %v8555_v25, %v8555_v25 }
0x22de   :  { %v11674_v16 = vpop.f32.mrf.mxu0 }
0x22df   :  { %11685 = vmatmul.mubr.msk.bf16.vlgmr.msra.gmra.mxu0 %vm5015_vm8, %v8561_v59  ;;  %11691 = vmatmul.mubr.msk.bf16.vlgmr.msra.gmra.mxu1 %vm5308_vm9, %v10081_v17 }
0x22e0   :  { %11707 = vmatpush3.bf16.msra.mxu0 %v14369_v51  ;;  %11708 = vmatprep.mubr.msk.bf16.mxu0 %vm12569_vm5, %v12568_v8  ;;  %v8558_v24 = vpop.f32.mrf.mxu0 }
0x22e1   :  { %11695 = vmatpush3.bf16.msra.mxu1 %v12047_v5  ;;  %11712 = vmatprep.subr.bf16.mxu0 %v12568_v8 }
0x22e2   :  { %11696 = vmatprep.subr.bf16.mxu1 %v12568_v8  ;;  %v11675_v6 = vpop.f32.mrf.mxu0  ;;  %11702 = vmatprep.mubr.msk.bf16.mxu1 %vm12569_vm5, %v12568_v8 }
0x22e5   :  { %11697 = vmatpush3.bf16.msra.mxu1 %v12048_v3 }
0x22e6   :  { %11698 = vmatprep.subr.bf16.mxu1 %v12568_v8 }
0x22e7   :  { %11709 = vmatmul.mubr.msk.bf16.vlgmr.msra.gmra.mxu0 %vm5308_vm9, %v10096_v40 }
0x22e8   :  { %11720 = vmatprep.mubr.msk.bf16.mxu0 %vm12569_vm5, %v12568_v8  ;;  %11713 = vmatpush3.bf16.msra.mxu0 %v12050_v46 }
0x22e9   :  { %11699 = vmatpush3.bf16.msra.mxu1 %v12049_v56  ;;  %11714 = vmatprep.subr.bf16.mxu0 %v12568_v8 }
0x22ea   :  { %11700 = vmatprep.subr.bf16.mxu1 %v12568_v8 }
0x22ec   :  { %11715 = vmatpush3.bf16.msra.mxu0 %v12052_v38 }
0x22ed   :  { %11701 = vmatpush3.bf16.msra.mxu1 %v12051_v47  ;;  %11716 = vmatprep.subr.bf16.mxu0 %v12568_v8 }
0x22ee   :  { %11724 = vmatprep.subr.bf16.mxu1 %v12568_v8 }
0x22f0   :  { %11717 = vmatpush3.bf16.msra.mxu0 %v12053_v4 }
0x22f1   :  { %11718 = vmatprep.subr.bf16.mxu0 %v12568_v8 }
0x22f4   :  { %11719 = vmatpush3.bf16.msra.mxu0 %v12054_v13 }
0x22f5   :  { %11742 = vmatprep.subr.bf16.mxu0 %v12568_v8 }
0x2397   :  { %v8509_v18 = vpop.f32.mrf.mxu1 }
0x2398   :  { %v8515_v26 = vadd.f32 %v8509_v18, %v8392_v28 }
0x2399   :  { %v11668_v34 = vpop.f32.mrf.mxu1 }
0x239b   :  { %v8512_v20 = vpop.f32.mrf.mxu1 }
0x239d   :  { %v11669_v21 = vpop.f32.mrf.mxu1 }
0x239f   :  { %v8632_v49 = vpop.f32.mrf.mxu0  ;;  %v8678_v9 = vpop.f32.mrf.mxu1 }
0x23a0   :  { %v8638_v37 = vadd.f32 %v8632_v49, %v8515_v26  ;;  %v8684_v54 = vpack.c.bf16 %v8678_v9, %v8678_v9 }
0x23a1   :  { %v11686_v22 = vpop.f32.mrf.mxu0  ;;  %v11692_v2 = vpop.f32.mrf.mxu1 }
0x23a2   :  { %11703 = vmatmul.mubr.msk.bf16.vlgmr.msra.gmra.mxu1 %vm5015_vm8, %v8684_v54  ;;  %v10127_v22 = vld [vmem:[#allocation17] ss:$0 sm:$0xff] }
0x23a3   :  { %11725 = vmatpush3.bf16.msra.mxu1 %v14369_v51  ;;  %v8635_v10 = vpop.f32.mrf.mxu0  ;;  %v8681_v23 = vpop.f32.mrf.mxu1  ;;  %11726 = vmatprep.mubr.msk.bf16.mxu1 %vm12569_vm5, %v12568_v8 }
0x23a4   :  { %11730 = vmatprep.subr.bf16.mxu1 %v12568_v8 }
0x23a5   :  { %v11687_v29 = vpop.f32.mrf.mxu0  ;;  %v11693_v61 = vpop.f32.mrf.mxu1 }
0x23a6   :  { %v12063_v61 = vld [vmem:[%s12946_s3 + $0x18] sm:$0xff]  }
0x23a7   :  { %v8801_v58 = vpop.f32.mrf.mxu0 }
0x23a8   :  { %v8807_v31 = vpack.c.bf16 %v8801_v58, %v8801_v58  ;;  %v12064_v58 = vld [vmem:[%s12946_s3 + $0x10] sm:$0xff]  }
0x23a9   :  { %v11710_v35 = vpop.f32.mrf.mxu0 }
0x23aa   :  { %11721 = vmatmul.mubr.msk.bf16.vlgmr.msra.gmra.mxu0 %vm5015_vm8, %v8807_v31  ;;  %11727 = vmatmul.mubr.msk.bf16.vlgmr.msra.gmra.mxu1 %vm5308_vm9, %v10111_v50  ;;  %v12065_v50 = vld [vmem:[%s12946_s3 + $0x8] sm:$0xff]  }
0x23ab   :  { %11731 = vmatpush3.bf16.msra.mxu1 %v12055_v7  ;;  %v8804_v51 = vpop.f32.mrf.mxu0  ;;  %11738 = vmatprep.mubr.msk.bf16.mxu1 %vm12569_vm5, %v12568_v8 }
0x23ac   :  { %11732 = vmatprep.subr.bf16.mxu1 %v12568_v8  ;;  %11750 = vmatprep.mubr.msk.bf16.mxu0 %vm12569_vm5, %v12568_v8 }
0x23ad   :  { %v11711_v48 = vpop.f32.mrf.mxu0  ;;  %11743 = vmatpush3.bf16.msra.mxu0 %v12059_v55  ;;  %v10133_v55 = vld [vmem:[#allocation22] ss:$0 sm:$0xff] }
0x23ae   :  { %11744 = vmatprep.subr.bf16.mxu0 %v12568_v8 }
0x23af   :  { %11733 = vmatpush3.bf16.msra.mxu1 %v12056_v45 }
0x23b0   :  { %11734 = vmatprep.subr.bf16.mxu1 %v12568_v8 }
0x23b1   :  { %11745 = vmatpush3.bf16.msra.mxu0 %v12060_v12 }
0x23b2   :  { %11746 = vmatprep.subr.bf16.mxu0 %v12568_v8 }
0x23b3   :  { %11735 = vmatpush3.bf16.msra.mxu1 %v12057_v39 }
0x23b4   :  { %11736 = vmatprep.subr.bf16.mxu1 %v12568_v8 }
0x23b5   :  { %11747 = vmatpush3.bf16.msra.mxu0 %v12061_v41  ;;  %v10134_v41 = vld [vmem:[#allocation20] ss:$0 sm:$0xff] }
0x23b6   :  { %11748 = vmatprep.subr.bf16.mxu0 %v12568_v8 }
0x23b7   :  { %11737 = vmatpush3.bf16.msra.mxu1 %v12058_v44 }
0x23b8   :  { %11754 = vmatprep.subr.mxu1 %v12568_v8 }
0x23b9   :  { %11749 = vmatpush3.bf16.msra.mxu0 %v12062_v62 }
0x23ba   :  { %11759 = vmatprep.subr.bf16.mxu0 %v12568_v8 }
0x2462   :  { %v8755_v11 = vpop.f32.mrf.mxu1 }
0x2463   :  { %v8761_v36 = vadd.f32 %v8755_v11, %v8638_v37  ;;  %v10126_v37 = vld [vmem:[#allocation19] ss:$0 sm:$0xff] }
0x2464   :  { %v11704_v19 = vpop.f32.mrf.mxu1 }
0x2466   :  { %v8758_v15 = vpop.f32.mrf.mxu1 }
0x2468   :  { %v11705_v27 = vpop.f32.mrf.mxu1 }
0x246a   :  { %v8878_v0 = vpop.f32.mrf.mxu0  ;;  %v8924_v43 = vpop.f32.mrf.mxu1 }
0x246b   :  { %v8884_v57 = vadd.f32 %v8878_v0, %v8761_v36  ;;  %v8930_v1 = vpack.c.bf16 %v8924_v43, %v8924_v43 }
0x246c   :  { %v11728_v32 = vpop.f32.mrf.mxu1  ;;  %v11722_v60 = vpop.f32.mrf.mxu0 }
0x246d   :  { %11739 = vmatmul.mubr.msk.bf16.vlgmr.msra.gmra.mxu1 %vm5015_vm8, %v8930_v1 }
0x246e   :  { %v8927_v63 = vpop.f32.mrf.mxu1  ;;  %v8881_v53 = vpop.f32.mrf.mxu0  ;;  %11756 = vmatprep.mubr.msk.f32.mxu1 %vm12569_vm5, %v12568_v8 }
0x2470   :  { %v11729_v42 = vpop.f32.mrf.mxu1  ;;  %v11723_v28 = vpop.f32.mrf.mxu0 }
0x252d   :  { %v9001_v30 = vpop.f32.mrf.mxu1 }
0x252e   :  { %v9007_v14 = vadd.f32 %v9001_v30, %v8884_v57 }
0x252f   :  { %v11740_v52 = vpop.f32.mrf.mxu1 }
0x2530   :  { %v9008_v25 = vsel %vm4942_vm7, %v9007_v14, 0.0 }
0x2531   :  { %v9009_v17 = vrot.slane %v9008_v25, 4  ;;  %v9004_v59 = vpop.f32.mrf.mxu1 }
0x2533   :  { %v9010_v5 = vadd.f32 %v9009_v17, %v9008_v25  ;;  %v11741_v16 = vpop.f32.mrf.mxu1 }
0x2535   :  { %v9011_v24 = vrot.slane %v9010_v5, 2 }
0x2537   :  { %v9012_v3 = vadd.f32 %v9011_v24, %v9010_v5 }
0x2539   :  { %v9013_v6 = vrot.slane %v9012_v3, 1 }
0x253b   :  { %v9014_v40 = vadd.f32 %v9013_v6, %v9012_v3 }
0x253d   :  { %v9015_v56 = vmul.f32 0.5, %v9014_v40 }
0x253f   :  { %v9016_v46 = vsub.f32 %v9007_v14, %v9015_v56 }
0x2541   :  { %v9017_v47 = vmul.f32 %v9016_v46, %v9016_v46 }
0x2543   :  { %v9018_v38 = vsel %vm4942_vm7, %v9017_v47, 0.0 }
0x2544   :  { %v9019_v4 = vrot.slane %v9018_v38, 4 }
0x2546   :  { %v9020_v13 = vadd.f32 %v9019_v4, %v9018_v38 }
0x2548   :  { %v9021_v18 = vrot.slane %v9020_v13, 2 }
0x254a   :  { %v9022_v26 = vadd.f32 %v9021_v18, %v9020_v13 }
0x254c   :  { %v9023_v34 = vrot.slane %v9022_v26, 1 }
0x254e   :  { %v9024_v20 = vadd.f32 %v9023_v34, %v9022_v26 }
0x2550   :  { %v9025_v21 = vmul.f32 0.5, %v9024_v20  ;;  %v10135_v20 = vld [vmem:[#allocation28] ss:$0 sm:$0xff] }
0x2552   :  { %v9026_v49 = vadd.f32 1e-05, %v9025_v21 }
0x2554   :  { %12107 = vrsqrt.f32 %v9026_v49  ;;  %v10136_v49 = vld [vmem:[#allocation26] ss:$0 sm:$0xff] }
0x2561   :  { %v12108_v9 = vpop.eup %12107 }
0x2562   :  { %v9028_v54 = vmul.f32 %v12108_v9, %v9016_v46 }
0x2564   :  { %v9036_v2 = vmul.f32 %v10126_v37, %v9028_v54 }
0x2566   :  { %v9044_v10 = vadd.f32 %v10127_v22, %v9036_v2  ;;  %v9198_v22 = vld [vmem:[%s14686_s27] sm:$0x3] }
0x2567   :  { %v12066_v2 = vld [vmem:[%s12946_s3] sm:$0xff]  }
0x2568   :  { %v9045_v23 = vmax.f32 %v9044_v10, 0.0 }
0x256a   :  { %v9054_v29 = vpack.c.bf16 %v9045_v23, %v9045_v23 }
0x256c   :  { %11751 = vmatmul.mubr.msk.bf16.vlgmr.msra.gmra.mxu0 %vm5015_vm8, %v9054_v29 }
0x256d   :  { %11767 = vmatprep.mubr.msk.bf16.mxu0 %vm12569_vm5, %v12568_v8  ;;  %11760 = vmatpush3.bf16.msra.mxu0 %v12063_v61  ;;  %v10139_v61 = vld [vmem:[#allocation2] ss:$0 sm:$0xff] }
0x256e   :  { %11761 = vmatprep.subr.bf16.mxu0 %v12568_v8 }
0x2571   :  { %11762 = vmatpush3.bf16.msra.mxu0 %v12064_v58 }
0x2572   :  { %11763 = vmatprep.subr.bf16.mxu0 %v12568_v8 }
0x2575   :  { %11764 = vmatpush3.bf16.msra.mxu0 %v12065_v50 }
0x2576   :  { %11765 = vmatprep.subr.bf16.mxu0 %v12568_v8 }
0x2579   :  { %11766 = vmatpush3.bf16.msra.mxu0 %v12066_v2 }
0x262c   :  { %v9116_v7 = vpop.f32.mrf.mxu0 }
0x262d   :  { %v9122_v31 = vsel %vm4942_vm7, %v9116_v7, 0.0 }
0x262e   :  { %v9123_v35 = vrot.slane %v9122_v31, 4  ;;  %v11752_v51 = vpop.f32.mrf.mxu0 }
0x2630   :  { %v9124_v48 = vadd.f32 %v9123_v35, %v9122_v31  ;;  %v9119_v45 = vpop.f32.mrf.mxu0 }
0x2632   :  { %v9125_v39 = vrot.slane %v9124_v48, 2  ;;  %v11753_v44 = vpop.f32.mrf.mxu0 }
0x2634   :  { %v9126_v11 = vadd.f32 %v9125_v39, %v9124_v48 }
0x2636   :  { %v9127_v36 = vrot.slane %v9126_v11, 1 }
0x2638   :  { %v9128_v19 = vadd.f32 %v9127_v36, %v9126_v11 }
0x263a   :  { %v9129_v15 = vmul.f32 0.5, %v9128_v19 }
0x263c   :  { %v9130_v27 = vsub.f32 %v9116_v7, %v9129_v15 }
0x263e   :  { %v9131_v0 = vmul.f32 %v9130_v27, %v9130_v27 }
0x2640   :  { %v9132_v43 = vsel %vm4942_vm7, %v9131_v0, 0.0 }
0x2641   :  { %v9133_v57 = vrot.slane %v9132_v43, 4 }
0x2643   :  { %v9134_v1 = vadd.f32 %v9133_v57, %v9132_v43 }
0x2645   :  { %v9135_v32 = vrot.slane %v9134_v1, 2 }
0x2647   :  { %v9136_v60 = vadd.f32 %v9135_v32, %v9134_v1 }
0x2649   :  { %v9137_v63 = vrot.slane %v9136_v60, 1 }
0x264b   :  { %v9138_v8 = vadd.f32 %v9137_v63, %v9136_v60 }
0x264d   :  { %v9139_v53 = vmul.f32 0.5, %v9138_v8 }
0x264f   :  { %v9140_v42 = vadd.f32 1e-05, %v9139_v53 }
0x2651   :  { %12109 = vrsqrt.f32 %v9140_v42 }
0x265e   :  { %v12110_v28 = vpop.eup %12109 }
0x265f   :  { %v9142_v12 = vmul.f32 %v12110_v28, %v9130_v27 }
0x2661   :  { %v9150_v62 = vmul.f32 %v10133_v55, %v9142_v12 }
0x2663   :  { %v9158_v30 = vadd.f32 %v10134_v41, %v9150_v62 }
0x2665   :  { %v9159_v14 = vadd.f32 %v9158_v30, %v14362_v33 }
0x2667   :  { %v9160_v52 = vsel %vm4942_vm7, %v9159_v14, 0.0 }
0x2668   :  { %v9161_v25 = vrot.slane %v9160_v52, 4 }
0x266a   :  { %v9162_v17 = vadd.f32 %v9161_v25, %v9160_v52 }
0x266c   :  { %v9163_v59 = vrot.slane %v9162_v17, 2 }
0x266e   :  { %v9164_v5 = vadd.f32 %v9163_v59, %v9162_v17 }
0x2670   :  { %v9165_v16 = vrot.slane %v9164_v5, 1 }
0x2672   :  { %v9166_v24 = vadd.f32 %v9165_v16, %v9164_v5 }
0x2674   :  { %v9167_v3 = vmul.f32 0.5, %v9166_v24 }
0x2676   :  { %v9168_v6 = vsub.f32 %v9159_v14, %v9167_v3 }
0x2678   :  { %v9169_v40 = vmul.f32 %v9168_v6, %v9168_v6 }
0x267a   :  { %v9170_v56 = vsel %vm4942_vm7, %v9169_v40, 0.0 }
0x267b   :  { %v9171_v46 = vrot.slane %v9170_v56, 4 }
0x267d   :  { %v9172_v47 = vadd.f32 %v9171_v46, %v9170_v56 }
0x267f   :  { %v9173_v38 = vrot.slane %v9172_v47, 2 }
0x2681   :  { %v9174_v4 = vadd.f32 %v9173_v38, %v9172_v47 }
0x2683   :  { %v9175_v13 = vrot.slane %v9174_v4, 1 }
0x2685   :  { %v9176_v33 = vadd.f32 %v9175_v13, %v9174_v4 }
0x2687   :  { %v9177_v18 = vmul.f32 0.5, %v9176_v33 }
0x2689   :  { %v9178_v26 = vadd.f32 1e-05, %v9177_v18 }
0x268b   :  { %12111 = vrsqrt.f32 %v9178_v26 }
0x2698   :  { %v12112_v34 = vpop.eup %12111 }
0x2699   :  { %v9180_v21 = vmul.f32 %v12112_v34, %v9168_v6 }
0x269b   :  { %v9188_v9 = vmul.f32 %v10135_v20, %v9180_v21 }
0x269d   :  { %v9196_v37 = vadd.f32 %v10136_v49, %v9188_v9 }
0x269f   :  { %v9197_v54 = vmax.f32 %v9196_v37, 0.0 }
0x26a1   :  { %11755 = vmatpush3.msk.msra.mxu1 %vm9202_vm10, %v9197_v54 }
0x26a2   :  { %11757 = vmatmul.mubr.msk.f32.vlgmr.msra.gmra.mxu1 %vm5308_vm9, %v9198_v22 }
0x2762   :  { %v9272_v10 = vpop.f32.mrf.mxu1 }
0x2763   :  { %v9284_v23 = vpack.c.bf16 %v9272_v10, %v9272_v10 }
0x2764   :  { %v11758_v29 = vpop.f32.mrf.mxu1 }
0x2765   :  { %11768 = vmatmul.mubr.msk.bf16.vlgmr.msra.gmra.mxu0 %vm5015_vm8, %v9284_v23 }
0x2825   :  { %v9353_v58 = vpop.f32.mrf.mxu0 }
0x2826   :  { %v9354_v50 = vadd.f32 %v10139_v61, %v9353_v58 }
0x2827   :  { %v11769_v7 = vpop.f32.mrf.mxu0 }
0x2828   :  { %v10145_v31 = vmul.f32 -1.442695, %v9354_v50 }
0x2829   :  { %v9356_v35 = vpop.f32.mrf.mxu0 }
0x282a   :  { %12113 = vpow2.f32 %v10145_v31 }
0x282b   :  { %v11770_v51 = vpop.f32.mrf.mxu0 }
0x2837   :  { %v12114_v48 = vpop.eup %12113 }
0x2838   :  { %v9362_v45 = vadd.f32 1.0, %v12114_v48 }
0x283a   :  { %12115 = vrcp.f32 %v9362_v45 }
0x2847   :  { %v12116_v39 = vpop.eup %12115 }
0x2848   :  { %9366 = vst.msk [vmem:[%s12951_s28] sm:$0x3] %vm9365_vm11, %v12116_v39 }
0x2849   :  { %9371 = vsyncpa [#allocation4], 1 }
0x284a   :  { %9372 = vsyncpa [#allocation6], 1 }
0x284b   :  { %9373 = vsyncpa [#allocation9], 1 }
0x284c   :  { %9374 = vsyncpa [#allocation12], 1 }
0x284d   :  { %9375 = vsyncpa [#allocation15], 1 }
0x284e   :  { %9376 = vsyncpa [#allocation18], 1 }
0x284f   :  { %9377 = vsyncpa [#allocation21], 1 }
0x2850   :  { %9378 = vsyncpa [#allocation24], 1 }
0x2851   :  { %9379 = vsyncpa [#allocation27], 1 }

</bundles_post_ra>
